<compile_context>
chip_gen: v7x
topology: tpu7x:2x2x1
jax: 0.10.0
libtpu: 0.0.40
codegen_flags: <defaults>
</compile_context>

<pallas_src>
import functools
import math

import numpy as np
import jax
import jax.numpy as jnp
from jax.experimental import pallas as pl
from jax.experimental.pallas import tpu as pltpu

GATE_PAD = 128  # per-gate lane padding for the GRU (r|z|n each own a 128 group)


# -----------------------------------------------------------------------------
# small helpers
# -----------------------------------------------------------------------------
def _sigmoid(x):
    return 1.0 / (1.0 + jnp.exp(-x))


def _modified_sigmoid(x):
    # 2 * sigmoid(x) ** log(10) + 1e-7   (Decoder.modified_sigmoid)
    s = _sigmoid(x)
    return 2.0 * jnp.exp(2.302585092994046 * jnp.log(s)) + 1e-7


def _layer_norm_relu(y, g, beta):
    mu = jnp.mean(y, axis=-1, keepdims=True)
    var = jnp.mean((y - mu) ** 2, axis=-1, keepdims=True)
    y = (y - mu) * jax.lax.rsqrt(var + 1e-5)
    return jnp.maximum(y * g + beta, 0.0)


def _mlp_tail(y0, wr_ref, b_ref, g_ref, be_ref, n_layers):
    """DDSP MLP given the first-layer pre-activation y0 (bias not yet added)."""
    y = _layer_norm_relu(y0 + b_ref[0], g_ref[0], be_ref[0])
    for i in range(n_layers - 1):
        w = wr_ref[i]
        y = jnp.dot(y.astype(w.dtype), w, preferred_element_type=jnp.float32) + b_ref[i + 1]
        y = _layer_norm_relu(y, g_ref[i + 1], be_ref[i + 1])
    return y


def _const_spec(shape):
    nd = len(shape)
    return pl.BlockSpec(tuple(shape), lambda *_: (0,) * nd)


def _row_spec(shape, rb):
    nd = len(shape)
    return pl.BlockSpec((rb,) + tuple(shape[1:]), lambda i: (i,) + (0,) * (nd - 1))


def _row_block(n):
    """Largest row-block (multiple of 8, <=256) dividing n while keeping >=2 grid steps."""
    if n <= 8 or n % 8 != 0:
        return n
    rb = 8
    while rb * 2 <= 256 and n % (rb * 2) == 0 and (n // (rb * 2)) >= 2:
        rb *= 2
    return rb


def _pcall(kernel, args, out_shape):
    """Single-block pallas_call (used only for the inherently-sequential GRU and
    the tiny harmonic-oscillator kernel)."""
    return pl.pallas_call(
        kernel,
        grid=(1,),
        in_specs=[_const_spec(a.shape) for a in args],
        out_specs=_const_spec(out_shape.shape),
        out_shape=out_shape,
    )(*args)


# -----------------------------------------------------------------------------
# Pallas kernels
# -----------------------------------------------------------------------------
def _encoder_kernel(frames_ref, win_ref, gram_ref, f0_ref,
                    f0_w1, f0_wr, f0_b, f0_g, f0_be,
                    ld_w1, ld_wr, ld_b, ld_g, ld_be,
                    wihf0_ref, wihld_ref, bih_ref,
                    o_ref, *, scale, n_layers):
    """Fused: A-weighted loudness + mlp_f0 + mlp_loudness + GRU input projection.

    Loudness uses the precomputed Gram matrix M = C*diag(aw)*C^T + S*diag(aw)*S^T,
    so the full weighted DFT power reduces to one matmul + a row-sum.
    Output is a lane-dense slab [lf0 | lld | pad->128 | xg_r | xg_z | xg_n].
    """
    fw = frames_ref[...] * win_ref[...]
    p = jnp.sum(fw * jnp.dot(fw, gram_ref[...], preferred_element_type=jnp.float32),
                axis=-1, keepdims=True)
    loud = jnp.sqrt(jnp.maximum(p, 0.0)) * scale                       # (RB, 1)

    lf0 = _mlp_tail(f0_ref[...] * f0_w1[...], f0_wr, f0_b, f0_g, f0_be, n_layers)
    lld = _mlp_tail(loud * ld_w1[...], ld_wr, ld_b, ld_g, ld_be, n_layers)

    wf0 = wihf0_ref[...]
    wld = wihld_ref[...]
    xg = (jnp.dot(lf0.astype(wf0.dtype), wf0, preferred_element_type=jnp.float32)
          + jnp.dot(lld.astype(wld.dtype), wld, preferred_element_type=jnp.float32)
          + bih_ref[...])                                              # (RB, 3*128)

    rb = lf0.shape[0]
    pad_w = o_ref.shape[-1] - xg.shape[-1] - lf0.shape[-1] - lld.shape[-1]
    parts = [lf0, lld]
    if pad_w > 0:
        parts.append(jnp.zeros((rb, pad_w), jnp.float32))
    parts.append(xg)
    o_ref[...] = jnp.concatenate(parts, axis=-1)


def _gru_kernel(xg_ref, whh_ref, bhh_ref, o_ref, *, hp, n_steps, unroll):
    """Single-launch GRU. xg already holds x@W_ih^T + b_ih with gates packed
    into 128-lane groups; hidden state is 128-lane padded (pad lanes stay 0)."""
    whh = whh_ref[...]
    bhh = bhh_ref[...]
    batch = xg_ref.shape[1]

    def step(t, h):
        xt = xg_ref[t]                                                 # (B, 3*hp)
        hg = jnp.dot(h.astype(whh.dtype), whh,
                     preferred_element_type=jnp.float32) + bhh
        r = _sigmoid(xt[:, 0:hp] + hg[:, 0:hp])
        z = _sigmoid(xt[:, hp:2 * hp] + hg[:, hp:2 * hp])
        n = jnp.tanh(xt[:, 2 * hp:3 * hp] + r * hg[:, 2 * hp:3 * hp])
        h_new = (1.0 - z) * n + z * h
        o_ref[t] = h_new
        return h_new

    h0 = jnp.zeros((batch, hp), jnp.float32)
    jax.lax.fori_loop(0, n_steps, step, h0, unroll=unroll)


def _decoder_head_kernel(gru_ref, lat_ref, w1g_ref, w1l_ref,
                         g_wr, g_b, g_g, g_be, wh_ref, bh_ref, o_ref,
                         *, n_layers, n_harm, n_freq):
    """Fused mlp_gru + dense_harmonic + dense_filter, packed lane-dense output slab.

    The first mlp layer is split (gru@W_g + lat@W_l) to avoid a lane concat."""
    w1g = w1g_ref[...]
    w1l = w1l_ref[...]
    y0 = (jnp.dot(gru_ref[...].astype(w1g.dtype), w1g, preferred_element_type=jnp.float32)
          + jnp.dot(lat_ref[...].astype(w1l.dtype), w1l, preferred_element_type=jnp.float32))
    y = _mlp_tail(y0, g_wr, g_b, g_g, g_be, n_layers)                  # (RB, U)
    wh = wh_ref[...]
    heads = jnp.dot(y.astype(wh.dtype), wh,
                    preferred_element_type=jnp.float32) + bh_ref[...]  # (RB, P)
    a = _modified_sigmoid(heads[:, 0:1])
    logits = heads[:, 1:1 + n_harm]
    m = jnp.max(logits, axis=-1, keepdims=True)
    e = jnp.exp(logits - m)
    c = e / jnp.sum(e, axis=-1, keepdims=True)
    hf = _modified_sigmoid(heads[:, 1 + n_harm:1 + n_harm + n_freq])
    pad_w = o_ref.shape[-1] - 1 - n_harm - n_freq
    parts = [a, c, hf]
    if pad_w > 0:
        parts.append(jnp.zeros((heads.shape[0], pad_w), jnp.float32))
    o_ref[...] = jnp.concatenate(parts, axis=-1)                       # (RB, 128k)


def _harmonic_kernel(f0b_ref, cb_ref, a_ref, um_ref, uc_ref, sel_ref, o_ref,
                     *, sr, gain):
    """Additive synthesis with upsample + phase-cumsum folded into matmuls.

    phase = cumsum(upsample(f0_bank)/sr) == f0_bank @ cumsum(Umat) / sr (linearity);
    the per-batch harmonic reduction is one block-diagonal selector matmul."""
    phase = jnp.dot(f0b_ref[...], uc_ref[...],
                    preferred_element_type=jnp.float32) * (1.0 / sr)   # (B*K, n)
    c_up = jnp.dot(cb_ref[...], um_ref[...], preferred_element_type=jnp.float32)
    a_up = jnp.dot(a_ref[...], um_ref[...], preferred_element_type=jnp.float32)
    sig = jnp.sin((2.0 * math.pi) * phase) * c_up                      # (B*K, n)
    harm = jnp.dot(sel_ref[...], sig, preferred_element_type=jnp.float32)  # (B, n)
    o_ref[...] = harm * a_up * gain


def _filtered_noise_kernel(h_ref, c2s_ref, noise_ref, o_ref, *, frame_len):
    """Per-frame FIR filtering of white noise.

    c2s[l] bakes IRDFT(H, imag=0) + causal roll + hann window + attenuate gain,
    shifted by l samples and zero-padded to a 128 multiple, so the linear
    convolution is  sum_l (noise[:, l] * H) @ c2s[l]  -- MXU matmuls, no rolls."""
    h = h_ref[...]                                                     # (RB, F)
    noise = noise_ref[...]                                             # (RB, frame_len)
    acc = jnp.dot(noise[:, 0:1] * h, c2s_ref[0], preferred_element_type=jnp.float32)
    for l in range(1, frame_len):
        acc = acc + jnp.dot(noise[:, l:l + 1] * h, c2s_ref[l],
                            preferred_element_type=jnp.float32)
    o_ref[...] = acc                                                   # (RB, W)


def _matmul_tile_kernel(a_ref, b_ref, o_ref):
    o_ref[...] = jnp.dot(a_ref[...], b_ref[...], preferred_element_type=jnp.float32)


# -----------------------------------------------------------------------------
# parameter / constant construction (deterministic)
# -----------------------------------------------------------------------------
def init_params(key, cfg):
    U = cfg["mlp_units"]; H = cfg["gru_units"]; K = cfg["n_harmonics"]; F = cfg["n_freq"]
    L = cfg["mlp_layers"]; sr = cfg["sample_rate"]; hop = cfg["hop"]; n_fft = cfg["n_fft"]
    T = cfg["n_frames"]; R = cfg["reverb_length"]
    Hp = GATE_PAD
    keys = jax.random.split(key, 8)

    def uni(k, shape, bound):
        return jax.random.uniform(k, shape, jnp.float32, -bound, bound)

    def mlp_params(k, din):
        ks = jax.random.split(k, 2 * L)
        w1 = uni(ks[0], (din, U), 1.0 / math.sqrt(din))
        wr = jnp.stack([uni(ks[1 + i], (U, U), 1.0 / math.sqrt(U)) for i in range(L - 1)])
        b = jnp.stack([uni(ks[L + i], (1, U), 1.0 / math.sqrt(din if i == 0 else U))
                       for i in range(L)])
        return dict(w1=w1, wr=wr.astype(jnp.bfloat16), b=b,
                    g=jnp.ones((L, 1, U), jnp.float32),
                    beta=jnp.zeros((L, 1, U), jnp.float32))

    params = {}
    params["mlp_f0"] = mlp_params(keys[0], 1)
    params["mlp_loudness"] = mlp_params(keys[1], 1)

    # decoder mlp_gru: split first layer rows -> (GRU hidden, padded to Hp) + (latent)
    pg = mlp_params(keys[3], H + 2 * U)
    w1 = pg.pop("w1")
    pg["w1g"] = jnp.zeros((Hp, U), jnp.float32).at[:H].set(w1[:H]).astype(jnp.bfloat16)
    pg["w1l"] = w1[H:].astype(jnp.bfloat16)
    params["mlp_gru"] = pg

    # GRU weights with gates [r|z|n] each packed into its own 128-lane group
    gb = 1.0 / math.sqrt(H)
    gk = jax.random.split(keys[2], 4)
    wih = uni(gk[0], (2 * U, 3 * H), gb)
    bih = uni(gk[1], (1, 3 * H), gb)
    whh = uni(gk[2], (H, 3 * H), gb)
    bhh = uni(gk[3], (1, 3 * H), gb)

    def pack_gates(w, rows_pad=None):
        rows = w.shape[0]
        out = jnp.zeros((rows if rows_pad is None else rows_pad, 3 * Hp), jnp.float32)
        for g in range(3):
            out = out.at[:rows, g * Hp:g * Hp + H].set(w[:, g * H:(g + 1) * H])
        return out

    wih_p = pack_gates(wih)
    params["gru"] = dict(
        wih_f0=wih_p[:U].astype(jnp.bfloat16),
        wih_ld=wih_p[U:].astype(jnp.bfloat16),
        bih=pack_gates(bih),
        whh=pack_gates(whh, rows_pad=Hp).astype(jnp.bfloat16),
        bhh=pack_gates(bhh),
    )

    # output heads packed [amp | harmonic dist | noise filter | zero-pad] -> 128 multiple
    hb = 1.0 / math.sqrt(U)
    hk = jax.random.split(keys[4], 4)
    n_head = 1 + K + F
    P = ((n_head + 127) // 128) * 128
    wh = uni(hk[0], (U, 1 + K), hb)
    bh = uni(hk[1], (1, 1 + K), hb)
    wf = uni(hk[2], (U, F), hb)
    bf = uni(hk[3], (1, F), hb)
    whead = (jnp.zeros((U, P), jnp.float32)
             .at[:, :1 + K].set(wh).at[:, 1 + K:n_head].set(wf))
    bhead = (jnp.zeros((1, P), jnp.float32)
             .at[:, :1 + K].set(bh).at[:, 1 + K:n_head].set(bf))
    params["heads"] = (whead.astype(jnp.bfloat16), bhead)

    params["reverb"] = (
        jax.random.uniform(keys[6], (R,), jnp.float32) * 2.0 - 1.0,   # fir
        jnp.float32(-1.0),                                            # drywet
        jnp.float32(2.0),                                             # decay
    )

    # ---- fixed constants ----
    consts = {}
    # loudness extractor: hann window + A-weighted-power Gram matrix
    n = np.arange(n_fft)
    window = (0.5 - 0.5 * np.cos(2.0 * np.pi * n / n_fft)).astype(np.float32)[None, :]
    ang = 2.0 * np.pi * np.outer(n, n) / n_fft
    cos_m = np.cos(ang)
    sin_m = np.sin(ang)
    freq = (sr / n_fft * n) % (sr / 2.0)
    c0, c1, c2_, c3 = np.array([12200.0, 20.6, 107.7, 737.9]) ** 2
    f2 = freq ** 2
    with np.errstate(divide="ignore"):
        db = 2.0 + 20.0 * (np.log10(c0) + 4.0 * np.log10(freq)
                           - np.log10(f2 + c0) - np.log10(f2 + c1)
                           - 0.5 * np.log10(f2 + c2_) - 0.5 * np.log10(f2 + c3))
    db = np.maximum(db, -45.0)
    aw = np.power(10.0, db / 10.0)
    gram = (cos_m * aw[None, :]) @ cos_m.T + (sin_m * aw[None, :]) @ sin_m.T
    consts["win"] = jnp.asarray(window)
    consts["aweight_gram"] = jnp.asarray(gram.astype(np.float32))

    # harmonic oscillator: frame->audio linear-interp upsample matrix + its cumsum
    # (== torch.nn.Upsample(scale_factor=hop, mode="linear", align_corners=False);
    #  cumsum(Umat) folds the phase cumsum into the same matmul).
    # TODO(synk): at production sizes generate Umat tiles in-kernel instead of
    #             materializing the full (T, T*hop) matrix.
    Umat = np.zeros((T, T * hop), dtype=np.float32)
    for j in range(T * hop):
        src = max((j + 0.5) / hop - 0.5, 0.0)
        i0 = min(int(np.floor(src)), T - 1)
        w = src - i0
        i1 = min(i0 + 1, T - 1)
        Umat[i0, j] += 1.0 - w
        Umat[i1, j] += w
    consts["upsample"] = jnp.asarray(Umat)
    consts["upsample_cum"] = jnp.asarray(np.cumsum(Umat, axis=1).astype(np.float32))

    # filtered noise: IRDFT(real spectrum) -> roll(F-1) -> hann -> gain, then a
    # shift-stacked basis (hop, F, W) so the frame conv is a sum of matmuls.
    n_ir = 2 * F - 1
    m_out = n_ir + hop - 1
    Wn = ((m_out + 127) // 128) * 128
    kk = np.arange(F)[:, None]
    nn = np.arange(n_ir)[None, :]
    C = np.cos(2.0 * np.pi * kk * nn / n_ir) * (2.0 / n_ir)
    C[0, :] = 1.0 / n_ir
    C = np.roll(C, F - 1, axis=1)                      # zero-phase -> causal linear-phase
    hann = 0.5 - 0.5 * np.cos(2.0 * np.pi * np.arange(n_ir) / n_ir)
    base = np.zeros((F, Wn), dtype=np.float32)
    base[:, :n_ir] = (C * hann[None, :] * 1e-2).astype(np.float32)
    stack = np.stack([np.roll(base, l, axis=1) for l in range(hop)])   # (hop, F, Wn)
    consts["noise_irdft"] = jnp.asarray(stack)

    params["consts"] = consts
    return params


# -----------------------------------------------------------------------------
# forward pass
# -----------------------------------------------------------------------------
def autoencoder_forward(params, cfg, batch, noise_key, add_reverb=True):
    f0 = batch["f0"].astype(jnp.float32)            # (B, T)
    audio = batch["audio"].astype(jnp.float32)      # (B, (T-1)*hop)
    B, T = f0.shape
    U = cfg["mlp_units"]; K = cfg["n_harmonics"]; F = cfg["n_freq"]
    L = cfg["mlp_layers"]; hop = cfg["hop"]; sr = float(cfg["sample_rate"])
    n_fft = cfg["n_fft"]
    Hp = GATE_PAD
    N = B * T
    n_audio = T * hop
    consts = params["consts"]
    RB = _row_block(N)
    lat_pad = ((2 * U + 127) // 128) * 128
    slab_w = lat_pad + 3 * Hp
    par = pltpu.CompilerParams(dimension_semantics=("parallel",))

    # ---------------- framing for the loudness extractor ----------------
    # TODO(synk): replace this XLA gather (n_fft/hop x duplication of the audio in
    #             HBM) with in-kernel hop-strided pl.ds framing of the padded audio.
    padw = n_fft // 2
    padded = jnp.pad(audio, ((0, 0), (padw, padw)))
    idx = hop * np.arange(T)[:, None] + np.arange(n_fft)[None, :]
    frames = padded[:, idx].reshape(N, n_fft)

    # ------- kernel A: loudness + mlp_f0 + mlp_loudness + GRU input projection -------
    pf0 = params["mlp_f0"]
    pld = params["mlp_loudness"]
    gru_p = params["gru"]
    enc_args = (frames, consts["win"], consts["aweight_gram"], f0.reshape(N, 1),
                pf0["w1"], pf0["wr"], pf0["b"], pf0["g"], pf0["beta"],
                pld["w1"], pld["wr"], pld["b"], pld["g"], pld["beta"],
                gru_p["wih_f0"], gru_p["wih_ld"], gru_p["bih"])
    row_args = {0, 3}
    slab_enc = pl.pallas_call(
        functools.partial(_encoder_kernel, scale=2.0 / float(n_fft), n_layers=L),
        grid=(N // RB,),
        in_specs=[(_row_spec(a.shape, RB) if i in row_args else _const_spec(a.shape))
                  for i, a in enumerate(enc_args)],
        out_specs=_row_spec((N, slab_w), RB),
        out_shape=jax.ShapeDtypeStruct((N, slab_w), jnp.float32),
        compiler_params=par,
    )(*enc_args)
    lat = slab_enc[:, :2 * U]                                       # (N, 2U)
    xg = slab_enc[:, lat_pad:]                                      # (N, 3*128)

    # ---------------- kernel B: GRU (single launch, in-kernel time loop) --------------
    # TODO(synk): fold this transpose into the encoder store / a time-axis BlockSpec.
    xg_t = xg.reshape(B, T, 3 * Hp).transpose(1, 0, 2)              # (T, B, 3*128)
    gru_out = _pcall(
        functools.partial(_gru_kernel, hp=Hp, n_steps=T, unroll=min(8, T)),
        (xg_t, gru_p["whh"], gru_p["bhh"]),
        jax.ShapeDtypeStruct((T, B, Hp), jnp.float32),
    )
    gru_flat = gru_out.transpose(1, 0, 2).reshape(N, Hp)            # (B*T, 128)

    # ---------------- kernel C: mlp_gru + output heads (lane-dense slab) -------------
    pg = params["mlp_gru"]
    whead, bhead = params["heads"]
    P = whead.shape[1]
    head_args = (gru_flat, lat, pg["w1g"], pg["w1l"], pg["wr"], pg["b"], pg["g"],
                 pg["beta"], whead, bhead)
    slab = pl.pallas_call(
        functools.partial(_decoder_head_kernel, n_layers=L, n_harm=K, n_freq=F),
        grid=(N // RB,),
        in_specs=[(_row_spec(a.shape, RB) if i in (0, 1) else _const_spec(a.shape))
                  for i, a in enumerate(head_args)],
        out_specs=_row_spec((N, P), RB),
        out_shape=jax.ShapeDtypeStruct((N, P), jnp.float32),
        compiler_params=par,
    )(*head_args)
    a = slab[:, 0].reshape(B, T)
    c = jnp.transpose(slab[:, 1:1 + K].reshape(B, T, K), (0, 2, 1))   # (B, K, T)
    h_filter = slab[:, 1 + K:1 + K + F]                               # (B*T, F)

    # ---------------- kernel D: harmonic oscillator -----------------------------------
    mult = jnp.arange(1, K + 1, dtype=jnp.float32)
    f0_bank3 = f0[:, None, :] * mult[None, :, None]                   # (B, K, T)
    c_bank3 = c * (f0_bank3 < sr / 2.0).astype(jnp.float32)           # anti-aliasing
    sel = jnp.asarray(np.repeat(np.eye(B, dtype=np.float32), K, axis=1))  # (B, B*K)
    harmonic = _pcall(
        functools.partial(_harmonic_kernel, sr=sr, gain=0.02),
        (f0_bank3.reshape(B * K, T), c_bank3.reshape(B * K, T), a,
         consts["upsample"], consts["upsample_cum"], sel),
        jax.ShapeDtypeStruct((B, n_audio), jnp.float32),
    )

    # ---------------- kernel E: filtered noise + overlap-add --------------------------
    frame_len = hop
    n_ir = 2 * F - 1
    m_out = n_ir + frame_len - 1
    c2s = consts["noise_irdft"]                                       # (hop, F, W)
    Wn = c2s.shape[-1]
    noise = jax.random.uniform(noise_key, (N, frame_len), jnp.float32) * 2.0 - 1.0
    filt = pl.pallas_call(
        functools.partial(_filtered_noise_kernel, frame_len=frame_len),
        grid=(N // RB,),
        in_specs=[_row_spec((N, F), RB), _const_spec(c2s.shape), _row_spec((N, frame_len), RB)],
        out_specs=_row_spec((N, Wn), RB),
        out_shape=jax.ShapeDtypeStruct((N, Wn), jnp.float32),
        compiler_params=par,
    )(h_filter, c2s, noise)
    filt3 = filt[:, :m_out].reshape(B, T, m_out)

    # overlap-add (conv_transpose1d) via the reshape trick: ceil(m_out/hop) shifted adds
    s_chunks = -(-m_out // frame_len)
    l_pad = (T - 1 + s_chunks) * frame_len
    noise_len = (T - 1) * frame_len + m_out
    ola = jnp.zeros((B, l_pad), jnp.float32)
    for s in range(s_chunks):
        w = min(frame_len, m_out - s * frame_len)
        chunk = filt3[:, :, s * frame_len:s * frame_len + w]
        if w < frame_len:
            chunk = jnp.pad(chunk, ((0, 0), (0, 0), (0, frame_len - w)))
        flat = chunk.reshape(B, T * frame_len)
        ola = ola + jnp.pad(flat, ((0, 0), (s * frame_len, l_pad - (s + T) * frame_len)))
    noise_sig = ola[:, :noise_len]

    audio_synth = harmonic + noise_sig[:, :n_audio]
    out = dict(harmonic=harmonic, noise=noise_sig, audio_synth=audio_synth, a=a, c=c)

    # ---------------- kernel F: trainable FIR reverb (tiled Toeplitz matmul) ----------
    if cfg["use_reverb"] and add_reverb:
        fir, drywet, decay = params["reverb"]
        R = fir.shape[-1]
        Ns = n_audio
        Nout = Ns + R - 1
        decay_env = jnp.exp(-(jnp.exp(decay) + 2.0) * jnp.linspace(0.0, 1.0, R))
        dw = jax.nn.sigmoid(drywet)
        final_fir = (dw * (fir * decay_env)
                     + (1.0 - dw) * jnp.zeros((R,), jnp.float32).at[0].set(1.0))
        TN = 1024 if Nout > 1024 else ((Nout + 127) // 128) * 128     # column tile
        n_tiles = -(-Nout // TN)
        nout_pad = n_tiles * TN
        d = (jnp.arange(nout_pad, dtype=jnp.int32)[None, :]
             - jnp.arange(Ns, dtype=jnp.int32)[:, None])
        toep = jnp.where((d >= 0) & (d < R),
                         final_fir[jnp.clip(d, 0, R - 1)], 0.0).astype(jnp.float32)
        # TODO(synk): at production DDSP sizes (sr=16k, reverb_length=48k) do not
        #             materialize the Toeplitz; switch to block-convolution / FFT
        #             (also keeps v7x's 64 MiB VMEM budget with contraction tiling).
        rev = pl.pallas_call(
            _matmul_tile_kernel,
            grid=(n_tiles,),
            in_specs=[pl.BlockSpec((B, Ns), lambda j: (0, 0)),
                      pl.BlockSpec((Ns, TN), lambda j: (0, j))],
            out_specs=pl.BlockSpec((B, TN), lambda j: (0, j)),
            out_shape=jax.ShapeDtypeStruct((B, nout_pad), jnp.float32),
            compiler_params=pltpu.CompilerParams(
                dimension_semantics=("parallel",),
                vmem_limit_bytes=32 * 1024 * 1024),
        )(audio_synth, toep)
        out["audio_reverb"] = rev[:, :Nout]
    return out


# -----------------------------------------------------------------------------
# main
# -----------------------------------------------------------------------------
if __name__ == "__main__":
    sample_rate = 1600
    frame_resolution = 0.01
    hop = int(sample_rate * frame_resolution)           # 16
    B, T = 2, 8
    cfg = dict(
        sample_rate=sample_rate, frame_resolution=frame_resolution, hop=hop,
        n_fft=hop * 5, n_frames=T, mlp_units=32, mlp_layers=3, gru_units=32,
        n_harmonics=7, n_freq=17, use_z=False, use_reverb=True,
        reverb_length=sample_rate * 3,
    )

    root = jax.random.PRNGKey(0)
    k_f0, k_audio, k_noise, k_params = jax.random.split(root, 4)
    f0 = jax.random.uniform(k_f0, (B, T), jnp.float32, 80.0, 400.0)
    audio = 0.1 * jax.random.normal(k_audio, (B, (T - 1) * hop), jnp.float32)

    params = init_params(k_params, cfg)

    fwd = jax.jit(lambda p, f, au, nk: autoencoder_forward(
        p, cfg, dict(f0=f, audio=au), nk))
    out = fwd(params, f0, audio, k_noise)
    jax.block_until_ready(out)

    assert out["harmonic"].shape == (B, T * hop)
    assert out["audio_synth"].shape == (B, T * hop)
    assert out["a"].shape == (B, T)
    assert out["c"].shape == (B, cfg["n_harmonics"], T)
    assert out["noise"].shape[-1] == (T - 1) * hop + (2 * cfg["n_freq"] - 1 + hop - 1)
    assert out["audio_reverb"].shape == (B, T * hop + cfg["reverb_length"] - 1)
    print("KERNEL_OK")
</pallas_src>

<mosaic_0001>
module attributes {stable_mosaic.version = 11 : i64} {
  func.func @_encoder_kernel(%arg0: i32, %arg1: memref<8x80xf32, #tpu.memory_space<vmem>>, %arg2: memref<1x80xf32, #tpu.memory_space<vmem>>, %arg3: memref<80x80xf32, #tpu.memory_space<vmem>>, %arg4: memref<8x1xf32, #tpu.memory_space<vmem>>, %arg5: memref<1x32xf32, #tpu.memory_space<vmem>>, %arg6: memref<2x32x32xbf16, #tpu.memory_space<vmem>>, %arg7: memref<3x1x32xf32, #tpu.memory_space<vmem>>, %arg8: memref<3x1x32xf32, #tpu.memory_space<vmem>>, %arg9: memref<3x1x32xf32, #tpu.memory_space<vmem>>, %arg10: memref<1x32xf32, #tpu.memory_space<vmem>>, %arg11: memref<2x32x32xbf16, #tpu.memory_space<vmem>>, %arg12: memref<3x1x32xf32, #tpu.memory_space<vmem>>, %arg13: memref<3x1x32xf32, #tpu.memory_space<vmem>>, %arg14: memref<3x1x32xf32, #tpu.memory_space<vmem>>, %arg15: memref<32x384xbf16, #tpu.memory_space<vmem>>, %arg16: memref<32x384xbf16, #tpu.memory_space<vmem>>, %arg17: memref<1x384xf32, #tpu.memory_space<vmem>>, %arg18: memref<8x512xf32, #tpu.memory_space<vmem>>) attributes {dimension_semantics = [#tpu.dimension_semantics<parallel>], iteration_bounds = array<i64: 2>, scalar_prefetch = 0 : i64, scratch_operands = 0 : i64, tpu.core_type = #tpu.core_type<tc>, window_params = [{transform_indices = @transform_0, window_bounds = array<i64: 8, 80>}, {pipeline_mode = #tpu.pipeline_mode<synchronous>, transform_indices = @transform_1, window_bounds = array<i64: 1, 80>}, {pipeline_mode = #tpu.pipeline_mode<synchronous>, transform_indices = @transform_2, window_bounds = array<i64: 80, 80>}, {transform_indices = @transform_3, window_bounds = array<i64: 8, 1>}, {pipeline_mode = #tpu.pipeline_mode<synchronous>, transform_indices = @transform_4, window_bounds = array<i64: 1, 32>}, {pipeline_mode = #tpu.pipeline_mode<synchronous>, transform_indices = @transform_5, window_bounds = array<i64: 2, 32, 32>}, {pipeline_mode = #tpu.pipeline_mode<synchronous>, transform_indices = @transform_6, window_bounds = array<i64: 3, 1, 32>}, {pipeline_mode = #tpu.pipeline_mode<synchronous>, transform_indices = @transform_7, window_bounds = array<i64: 3, 1, 32>}, {pipeline_mode = #tpu.pipeline_mode<synchronous>, transform_indices = @transform_8, window_bounds = array<i64: 3, 1, 32>}, {pipeline_mode = #tpu.pipeline_mode<synchronous>, transform_indices = @transform_9, window_bounds = array<i64: 1, 32>}, {pipeline_mode = #tpu.pipeline_mode<synchronous>, transform_indices = @transform_10, window_bounds = array<i64: 2, 32, 32>}, {pipeline_mode = #tpu.pipeline_mode<synchronous>, transform_indices = @transform_11, window_bounds = array<i64: 3, 1, 32>}, {pipeline_mode = #tpu.pipeline_mode<synchronous>, transform_indices = @transform_12, window_bounds = array<i64: 3, 1, 32>}, {pipeline_mode = #tpu.pipeline_mode<synchronous>, transform_indices = @transform_13, window_bounds = array<i64: 3, 1, 32>}, {pipeline_mode = #tpu.pipeline_mode<synchronous>, transform_indices = @transform_14, window_bounds = array<i64: 32, 384>}, {pipeline_mode = #tpu.pipeline_mode<synchronous>, transform_indices = @transform_15, window_bounds = array<i64: 32, 384>}, {pipeline_mode = #tpu.pipeline_mode<synchronous>, transform_indices = @transform_16, window_bounds = array<i64: 1, 384>}, {transform_indices = @transform_17, window_bounds = array<i64: 8, 512>}]} {
    %c0 = arith.constant 0 : index
    %c0_0 = arith.constant 0 : index
    %0 = vector.load %arg1[%c0, %c0_0] : memref<8x80xf32, #tpu.memory_space<vmem>>, vector<8x80xf32>
    %c0_1 = arith.constant 0 : index
    %c0_2 = arith.constant 0 : index
    %1 = vector.load %arg2[%c0_1, %c0_2] : memref<1x80xf32, #tpu.memory_space<vmem>>, vector<1x80xf32>
    %2 = vector.broadcast %1 : vector<1x80xf32> to vector<8x80xf32>
    %3 = arith.mulf %0, %2 : vector<8x80xf32>
    %c0_3 = arith.constant 0 : index
    %c0_4 = arith.constant 0 : index
    %4 = vector.load %arg3[%c0_3, %c0_4] : memref<80x80xf32, #tpu.memory_space<vmem>>, vector<80x80xf32>
    %cst = arith.constant dense<0.000000e+00> : vector<8x80xf32>
    %5 = tpu.matmul %3, %4, %cst {dimension_numbers = #tpu.dot_dimension_numbers<[1], [0], [0], [1], [0, 0, 1, 1], [], []>} : vector<8x80xf32>, vector<80x80xf32>, vector<8x80xf32> -> vector<8x80xf32>
    %6 = arith.mulf %3, %5 : vector<8x80xf32>
    %cst_5 = arith.constant dense<0.000000e+00> : vector<8xf32>
    %7 = vector.multi_reduction <add>, %6, %cst_5 [1] : vector<8x80xf32> to vector<8xf32>
    %8 = vector.shape_cast %7 : vector<8xf32> to vector<8x1xf32>
    %cst_6 = arith.constant 0.000000e+00 : f32
    %9 = vector.broadcast %cst_6 : f32 to vector<8x1xf32>
    %10 = arith.maximumf %8, %9 : vector<8x1xf32>
    %11 = math.sqrt %10 : vector<8x1xf32>
    %cst_7 = arith.constant 2.500000e-02 : f32
    %12 = vector.broadcast %cst_7 : f32 to vector<8x1xf32>
    %13 = arith.mulf %11, %12 : vector<8x1xf32>
    %c0_8 = arith.constant 0 : index
    %c0_9 = arith.constant 0 : index
    %14 = vector.load %arg4[%c0_8, %c0_9] : memref<8x1xf32, #tpu.memory_space<vmem>>, vector<8x1xf32>
    %c0_10 = arith.constant 0 : index
    %c0_11 = arith.constant 0 : index
    %15 = vector.load %arg5[%c0_10, %c0_11] : memref<1x32xf32, #tpu.memory_space<vmem>>, vector<1x32xf32>
    %16 = vector.broadcast %14 : vector<8x1xf32> to vector<8x32xf32>
    %17 = vector.broadcast %15 : vector<1x32xf32> to vector<8x32xf32>
    %18 = arith.mulf %16, %17 : vector<8x32xf32>
    %c0_12 = arith.constant 0 : index
    %c0_13 = arith.constant 0 : index
    %c0_14 = arith.constant 0 : index
    %19 = vector.load %arg7[%c0_12, %c0_13, %c0_14] : memref<3x1x32xf32, #tpu.memory_space<vmem>>, vector<1x1x32xf32>
    %20 = vector.shape_cast %19 : vector<1x1x32xf32> to vector<1x32xf32>
    %21 = vector.broadcast %20 : vector<1x32xf32> to vector<8x32xf32>
    %22 = arith.addf %18, %21 : vector<8x32xf32>
    %c0_15 = arith.constant 0 : index
    %c0_16 = arith.constant 0 : index
    %c0_17 = arith.constant 0 : index
    %23 = vector.load %arg8[%c0_15, %c0_16, %c0_17] : memref<3x1x32xf32, #tpu.memory_space<vmem>>, vector<1x1x32xf32>
    %24 = vector.shape_cast %23 : vector<1x1x32xf32> to vector<1x32xf32>
    %c0_18 = arith.constant 0 : index
    %c0_19 = arith.constant 0 : index
    %c0_20 = arith.constant 0 : index
    %25 = vector.load %arg9[%c0_18, %c0_19, %c0_20] : memref<3x1x32xf32, #tpu.memory_space<vmem>>, vector<1x1x32xf32>
    %26 = vector.shape_cast %25 : vector<1x1x32xf32> to vector<1x32xf32>
    %cst_21 = arith.constant dense<0.000000e+00> : vector<8xf32>
    %27 = vector.multi_reduction <add>, %22, %cst_21 [1] : vector<8x32xf32> to vector<8xf32>
    %28 = vector.shape_cast %27 : vector<8xf32> to vector<8x1xf32>
    %cst_22 = arith.constant 3.200000e+01 : f32
    %29 = vector.broadcast %cst_22 : f32 to vector<8x1xf32>
    %30 = arith.divf %28, %29 : vector<8x1xf32>
    %31 = vector.broadcast %30 : vector<8x1xf32> to vector<8x32xf32>
    %32 = arith.subf %22, %31 : vector<8x32xf32>
    %33 = arith.mulf %32, %32 : vector<8x32xf32>
    %cst_23 = arith.constant dense<0.000000e+00> : vector<8xf32>
    %34 = vector.multi_reduction <add>, %33, %cst_23 [1] : vector<8x32xf32> to vector<8xf32>
    %35 = vector.shape_cast %34 : vector<8xf32> to vector<8x1xf32>
    %cst_24 = arith.constant 3.200000e+01 : f32
    %36 = vector.broadcast %cst_24 : f32 to vector<8x1xf32>
    %37 = arith.divf %35, %36 : vector<8x1xf32>
    %38 = vector.broadcast %30 : vector<8x1xf32> to vector<8x32xf32>
    %39 = arith.subf %22, %38 : vector<8x32xf32>
    %cst_25 = arith.constant 9.99999974E-6 : f32
    %40 = vector.broadcast %cst_25 : f32 to vector<8x1xf32>
    %41 = arith.addf %37, %40 : vector<8x1xf32>
    %42 = math.rsqrt %41 : vector<8x1xf32>
    %43 = vector.broadcast %42 : vector<8x1xf32> to vector<8x32xf32>
    %44 = arith.mulf %39, %43 : vector<8x32xf32>
    %45 = vector.broadcast %24 : vector<1x32xf32> to vector<8x32xf32>
    %46 = arith.mulf %44, %45 : vector<8x32xf32>
    %47 = vector.broadcast %26 : vector<1x32xf32> to vector<8x32xf32>
    %48 = arith.addf %46, %47 : vector<8x32xf32>
    %cst_26 = arith.constant 0.000000e+00 : f32
    %49 = vector.broadcast %cst_26 : f32 to vector<8x32xf32>
    %50 = arith.maximumf %48, %49 : vector<8x32xf32>
    %c0_27 = arith.constant 0 : index
    %c0_28 = arith.constant 0 : index
    %c0_29 = arith.constant 0 : index
    %51 = vector.load %arg6[%c0_27, %c0_28, %c0_29] : memref<2x32x32xbf16, #tpu.memory_space<vmem>>, vector<1x32x32xbf16>
    %52 = vector.shape_cast %51 : vector<1x32x32xbf16> to vector<32x32xbf16>
    %53 = arith.truncf %50 : vector<8x32xf32> to vector<8x32xbf16>
    %cst_30 = arith.constant dense<0.000000e+00> : vector<8x32xf32>
    %54 = tpu.matmul %53, %52, %cst_30 {dimension_numbers = #tpu.dot_dimension_numbers<[1], [0], [0], [1], [0, 0, 1, 1], [], []>} : vector<8x32xbf16>, vector<32x32xbf16>, vector<8x32xf32> -> vector<8x32xf32>
    %c1 = arith.constant 1 : index
    %c0_31 = arith.constant 0 : index
    %c0_32 = arith.constant 0 : index
    %55 = vector.load %arg7[%c1, %c0_31, %c0_32] : memref<3x1x32xf32, #tpu.memory_space<vmem>>, vector<1x1x32xf32>
    %56 = vector.shape_cast %55 : vector<1x1x32xf32> to vector<1x32xf32>
    %57 = vector.broadcast %56 : vector<1x32xf32> to vector<8x32xf32>
    %58 = arith.addf %54, %57 : vector<8x32xf32>
    %c1_33 = arith.constant 1 : index
    %c0_34 = arith.constant 0 : index
    %c0_35 = arith.constant 0 : index
    %59 = vector.load %arg8[%c1_33, %c0_34, %c0_35] : memref<3x1x32xf32, #tpu.memory_space<vmem>>, vector<1x1x32xf32>
    %60 = vector.shape_cast %59 : vector<1x1x32xf32> to vector<1x32xf32>
    %c1_36 = arith.constant 1 : index
    %c0_37 = arith.constant 0 : index
    %c0_38 = arith.constant 0 : index
    %61 = vector.load %arg9[%c1_36, %c0_37, %c0_38] : memref<3x1x32xf32, #tpu.memory_space<vmem>>, vector<1x1x32xf32>
    %62 = vector.shape_cast %61 : vector<1x1x32xf32> to vector<1x32xf32>
    %cst_39 = arith.constant dense<0.000000e+00> : vector<8xf32>
    %63 = vector.multi_reduction <add>, %58, %cst_39 [1] : vector<8x32xf32> to vector<8xf32>
    %64 = vector.shape_cast %63 : vector<8xf32> to vector<8x1xf32>
    %cst_40 = arith.constant 3.200000e+01 : f32
    %65 = vector.broadcast %cst_40 : f32 to vector<8x1xf32>
    %66 = arith.divf %64, %65 : vector<8x1xf32>
    %67 = vector.broadcast %66 : vector<8x1xf32> to vector<8x32xf32>
    %68 = arith.subf %58, %67 : vector<8x32xf32>
    %69 = arith.mulf %68, %68 : vector<8x32xf32>
    %cst_41 = arith.constant dense<0.000000e+00> : vector<8xf32>
    %70 = vector.multi_reduction <add>, %69, %cst_41 [1] : vector<8x32xf32> to vector<8xf32>
    %71 = vector.shape_cast %70 : vector<8xf32> to vector<8x1xf32>
    %cst_42 = arith.constant 3.200000e+01 : f32
    %72 = vector.broadcast %cst_42 : f32 to vector<8x1xf32>
    %73 = arith.divf %71, %72 : vector<8x1xf32>
    %74 = vector.broadcast %66 : vector<8x1xf32> to vector<8x32xf32>
    %75 = arith.subf %58, %74 : vector<8x32xf32>
    %cst_43 = arith.constant 9.99999974E-6 : f32
    %76 = vector.broadcast %cst_43 : f32 to vector<8x1xf32>
    %77 = arith.addf %73, %76 : vector<8x1xf32>
    %78 = math.rsqrt %77 : vector<8x1xf32>
    %79 = vector.broadcast %78 : vector<8x1xf32> to vector<8x32xf32>
    %80 = arith.mulf %75, %79 : vector<8x32xf32>
    %81 = vector.broadcast %60 : vector<1x32xf32> to vector<8x32xf32>
    %82 = arith.mulf %80, %81 : vector<8x32xf32>
    %83 = vector.broadcast %62 : vector<1x32xf32> to vector<8x32xf32>
    %84 = arith.addf %82, %83 : vector<8x32xf32>
    %cst_44 = arith.constant 0.000000e+00 : f32
    %85 = vector.broadcast %cst_44 : f32 to vector<8x32xf32>
    %86 = arith.maximumf %84, %85 : vector<8x32xf32>
    %c1_45 = arith.constant 1 : index
    %c0_46 = arith.constant 0 : index
    %c0_47 = arith.constant 0 : index
    %87 = vector.load %arg6[%c1_45, %c0_46, %c0_47] : memref<2x32x32xbf16, #tpu.memory_space<vmem>>, vector<1x32x32xbf16>
    %88 = vector.shape_cast %87 : vector<1x32x32xbf16> to vector<32x32xbf16>
    %89 = arith.truncf %86 : vector<8x32xf32> to vector<8x32xbf16>
    %cst_48 = arith.constant dense<0.000000e+00> : vector<8x32xf32>
    %90 = tpu.matmul %89, %88, %cst_48 {dimension_numbers = #tpu.dot_dimension_numbers<[1], [0], [0], [1], [0, 0, 1, 1], [], []>} : vector<8x32xbf16>, vector<32x32xbf16>, vector<8x32xf32> -> vector<8x32xf32>
    %c2 = arith.constant 2 : index
    %c0_49 = arith.constant 0 : index
    %c0_50 = arith.constant 0 : index
    %91 = vector.load %arg7[%c2, %c0_49, %c0_50] : memref<3x1x32xf32, #tpu.memory_space<vmem>>, vector<1x1x32xf32>
    %92 = vector.shape_cast %91 : vector<1x1x32xf32> to vector<1x32xf32>
    %93 = vector.broadcast %92 : vector<1x32xf32> to vector<8x32xf32>
    %94 = arith.addf %90, %93 : vector<8x32xf32>
    %c2_51 = arith.constant 2 : index
    %c0_52 = arith.constant 0 : index
    %c0_53 = arith.constant 0 : index
    %95 = vector.load %arg8[%c2_51, %c0_52, %c0_53] : memref<3x1x32xf32, #tpu.memory_space<vmem>>, vector<1x1x32xf32>
    %96 = vector.shape_cast %95 : vector<1x1x32xf32> to vector<1x32xf32>
    %c2_54 = arith.constant 2 : index
    %c0_55 = arith.constant 0 : index
    %c0_56 = arith.constant 0 : index
    %97 = vector.load %arg9[%c2_54, %c0_55, %c0_56] : memref<3x1x32xf32, #tpu.memory_space<vmem>>, vector<1x1x32xf32>
    %98 = vector.shape_cast %97 : vector<1x1x32xf32> to vector<1x32xf32>
    %cst_57 = arith.constant dense<0.000000e+00> : vector<8xf32>
    %99 = vector.multi_reduction <add>, %94, %cst_57 [1] : vector<8x32xf32> to vector<8xf32>
    %100 = vector.shape_cast %99 : vector<8xf32> to vector<8x1xf32>
    %cst_58 = arith.constant 3.200000e+01 : f32
    %101 = vector.broadcast %cst_58 : f32 to vector<8x1xf32>
    %102 = arith.divf %100, %101 : vector<8x1xf32>
    %103 = vector.broadcast %102 : vector<8x1xf32> to vector<8x32xf32>
    %104 = arith.subf %94, %103 : vector<8x32xf32>
    %105 = arith.mulf %104, %104 : vector<8x32xf32>
    %cst_59 = arith.constant dense<0.000000e+00> : vector<8xf32>
    %106 = vector.multi_reduction <add>, %105, %cst_59 [1] : vector<8x32xf32> to vector<8xf32>
    %107 = vector.shape_cast %106 : vector<8xf32> to vector<8x1xf32>
    %cst_60 = arith.constant 3.200000e+01 : f32
    %108 = vector.broadcast %cst_60 : f32 to vector<8x1xf32>
    %109 = arith.divf %107, %108 : vector<8x1xf32>
    %110 = vector.broadcast %102 : vector<8x1xf32> to vector<8x32xf32>
    %111 = arith.subf %94, %110 : vector<8x32xf32>
    %cst_61 = arith.constant 9.99999974E-6 : f32
    %112 = vector.broadcast %cst_61 : f32 to vector<8x1xf32>
    %113 = arith.addf %109, %112 : vector<8x1xf32>
    %114 = math.rsqrt %113 : vector<8x1xf32>
    %115 = vector.broadcast %114 : vector<8x1xf32> to vector<8x32xf32>
    %116 = arith.mulf %111, %115 : vector<8x32xf32>
    %117 = vector.broadcast %96 : vector<1x32xf32> to vector<8x32xf32>
    %118 = arith.mulf %116, %117 : vector<8x32xf32>
    %119 = vector.broadcast %98 : vector<1x32xf32> to vector<8x32xf32>
    %120 = arith.addf %118, %119 : vector<8x32xf32>
    %cst_62 = arith.constant 0.000000e+00 : f32
    %121 = vector.broadcast %cst_62 : f32 to vector<8x32xf32>
    %122 = arith.maximumf %120, %121 : vector<8x32xf32>
    %c0_63 = arith.constant 0 : index
    %c0_64 = arith.constant 0 : index
    %123 = vector.load %arg10[%c0_63, %c0_64] : memref<1x32xf32, #tpu.memory_space<vmem>>, vector<1x32xf32>
    %124 = vector.broadcast %13 : vector<8x1xf32> to vector<8x32xf32>
    %125 = vector.broadcast %123 : vector<1x32xf32> to vector<8x32xf32>
    %126 = arith.mulf %124, %125 : vector<8x32xf32>
    %c0_65 = arith.constant 0 : index
    %c0_66 = arith.constant 0 : index
    %c0_67 = arith.constant 0 : index
    %127 = vector.load %arg12[%c0_65, %c0_66, %c0_67] : memref<3x1x32xf32, #tpu.memory_space<vmem>>, vector<1x1x32xf32>
    %128 = vector.shape_cast %127 : vector<1x1x32xf32> to vector<1x32xf32>
    %129 = vector.broadcast %128 : vector<1x32xf32> to vector<8x32xf32>
    %130 = arith.addf %126, %129 : vector<8x32xf32>
    %c0_68 = arith.constant 0 : index
    %c0_69 = arith.constant 0 : index
    %c0_70 = arith.constant 0 : index
    %131 = vector.load %arg13[%c0_68, %c0_69, %c0_70] : memref<3x1x32xf32, #tpu.memory_space<vmem>>, vector<1x1x32xf32>
    %132 = vector.shape_cast %131 : vector<1x1x32xf32> to vector<1x32xf32>
    %c0_71 = arith.constant 0 : index
    %c0_72 = arith.constant 0 : index
    %c0_73 = arith.constant 0 : index
    %133 = vector.load %arg14[%c0_71, %c0_72, %c0_73] : memref<3x1x32xf32, #tpu.memory_space<vmem>>, vector<1x1x32xf32>
    %134 = vector.shape_cast %133 : vector<1x1x32xf32> to vector<1x32xf32>
    %cst_74 = arith.constant dense<0.000000e+00> : vector<8xf32>
    %135 = vector.multi_reduction <add>, %130, %cst_74 [1] : vector<8x32xf32> to vector<8xf32>
    %136 = vector.shape_cast %135 : vector<8xf32> to vector<8x1xf32>
    %cst_75 = arith.constant 3.200000e+01 : f32
    %137 = vector.broadcast %cst_75 : f32 to vector<8x1xf32>
    %138 = arith.divf %136, %137 : vector<8x1xf32>
    %139 = vector.broadcast %138 : vector<8x1xf32> to vector<8x32xf32>
    %140 = arith.subf %130, %139 : vector<8x32xf32>
    %141 = arith.mulf %140, %140 : vector<8x32xf32>
    %cst_76 = arith.constant dense<0.000000e+00> : vector<8xf32>
    %142 = vector.multi_reduction <add>, %141, %cst_76 [1] : vector<8x32xf32> to vector<8xf32>
    %143 = vector.shape_cast %142 : vector<8xf32> to vector<8x1xf32>
    %cst_77 = arith.constant 3.200000e+01 : f32
    %144 = vector.broadcast %cst_77 : f32 to vector<8x1xf32>
    %145 = arith.divf %143, %144 : vector<8x1xf32>
    %146 = vector.broadcast %138 : vector<8x1xf32> to vector<8x32xf32>
    %147 = arith.subf %130, %146 : vector<8x32xf32>
    %cst_78 = arith.constant 9.99999974E-6 : f32
    %148 = vector.broadcast %cst_78 : f32 to vector<8x1xf32>
    %149 = arith.addf %145, %148 : vector<8x1xf32>
    %150 = math.rsqrt %149 : vector<8x1xf32>
    %151 = vector.broadcast %150 : vector<8x1xf32> to vector<8x32xf32>
    %152 = arith.mulf %147, %151 : vector<8x32xf32>
    %153 = vector.broadcast %132 : vector<1x32xf32> to vector<8x32xf32>
    %154 = arith.mulf %152, %153 : vector<8x32xf32>
    %155 = vector.broadcast %134 : vector<1x32xf32> to vector<8x32xf32>
    %156 = arith.addf %154, %155 : vector<8x32xf32>
    %cst_79 = arith.constant 0.000000e+00 : f32
    %157 = vector.broadcast %cst_79 : f32 to vector<8x32xf32>
    %158 = arith.maximumf %156, %157 : vector<8x32xf32>
    %c0_80 = arith.constant 0 : index
    %c0_81 = arith.constant 0 : index
    %c0_82 = arith.constant 0 : index
    %159 = vector.load %arg11[%c0_80, %c0_81, %c0_82] : memref<2x32x32xbf16, #tpu.memory_space<vmem>>, vector<1x32x32xbf16>
    %160 = vector.shape_cast %159 : vector<1x32x32xbf16> to vector<32x32xbf16>
    %161 = arith.truncf %158 : vector<8x32xf32> to vector<8x32xbf16>
    %cst_83 = arith.constant dense<0.000000e+00> : vector<8x32xf32>
    %162 = tpu.matmul %161, %160, %cst_83 {dimension_numbers = #tpu.dot_dimension_numbers<[1], [0], [0], [1], [0, 0, 1, 1], [], []>} : vector<8x32xbf16>, vector<32x32xbf16>, vector<8x32xf32> -> vector<8x32xf32>
    %c1_84 = arith.constant 1 : index
    %c0_85 = arith.constant 0 : index
    %c0_86 = arith.constant 0 : index
    %163 = vector.load %arg12[%c1_84, %c0_85, %c0_86] : memref<3x1x32xf32, #tpu.memory_space<vmem>>, vector<1x1x32xf32>
    %164 = vector.shape_cast %163 : vector<1x1x32xf32> to vector<1x32xf32>
    %165 = vector.broadcast %164 : vector<1x32xf32> to vector<8x32xf32>
    %166 = arith.addf %162, %165 : vector<8x32xf32>
    %c1_87 = arith.constant 1 : index
    %c0_88 = arith.constant 0 : index
    %c0_89 = arith.constant 0 : index
    %167 = vector.load %arg13[%c1_87, %c0_88, %c0_89] : memref<3x1x32xf32, #tpu.memory_space<vmem>>, vector<1x1x32xf32>
    %168 = vector.shape_cast %167 : vector<1x1x32xf32> to vector<1x32xf32>
    %c1_90 = arith.constant 1 : index
    %c0_91 = arith.constant 0 : index
    %c0_92 = arith.constant 0 : index
    %169 = vector.load %arg14[%c1_90, %c0_91, %c0_92] : memref<3x1x32xf32, #tpu.memory_space<vmem>>, vector<1x1x32xf32>
    %170 = vector.shape_cast %169 : vector<1x1x32xf32> to vector<1x32xf32>
    %cst_93 = arith.constant dense<0.000000e+00> : vector<8xf32>
    %171 = vector.multi_reduction <add>, %166, %cst_93 [1] : vector<8x32xf32> to vector<8xf32>
    %172 = vector.shape_cast %171 : vector<8xf32> to vector<8x1xf32>
    %cst_94 = arith.constant 3.200000e+01 : f32
    %173 = vector.broadcast %cst_94 : f32 to vector<8x1xf32>
    %174 = arith.divf %172, %173 : vector<8x1xf32>
    %175 = vector.broadcast %174 : vector<8x1xf32> to vector<8x32xf32>
    %176 = arith.subf %166, %175 : vector<8x32xf32>
    %177 = arith.mulf %176, %176 : vector<8x32xf32>
    %cst_95 = arith.constant dense<0.000000e+00> : vector<8xf32>
    %178 = vector.multi_reduction <add>, %177, %cst_95 [1] : vector<8x32xf32> to vector<8xf32>
    %179 = vector.shape_cast %178 : vector<8xf32> to vector<8x1xf32>
    %cst_96 = arith.constant 3.200000e+01 : f32
    %180 = vector.broadcast %cst_96 : f32 to vector<8x1xf32>
    %181 = arith.divf %179, %180 : vector<8x1xf32>
    %182 = vector.broadcast %174 : vector<8x1xf32> to vector<8x32xf32>
    %183 = arith.subf %166, %182 : vector<8x32xf32>
    %cst_97 = arith.constant 9.99999974E-6 : f32
    %184 = vector.broadcast %cst_97 : f32 to vector<8x1xf32>
    %185 = arith.addf %181, %184 : vector<8x1xf32>
    %186 = math.rsqrt %185 : vector<8x1xf32>
    %187 = vector.broadcast %186 : vector<8x1xf32> to vector<8x32xf32>
    %188 = arith.mulf %183, %187 : vector<8x32xf32>
    %189 = vector.broadcast %168 : vector<1x32xf32> to vector<8x32xf32>
    %190 = arith.mulf %188, %189 : vector<8x32xf32>
    %191 = vector.broadcast %170 : vector<1x32xf32> to vector<8x32xf32>
    %192 = arith.addf %190, %191 : vector<8x32xf32>
    %cst_98 = arith.constant 0.000000e+00 : f32
    %193 = vector.broadcast %cst_98 : f32 to vector<8x32xf32>
    %194 = arith.maximumf %192, %193 : vector<8x32xf32>
    %c1_99 = arith.constant 1 : index
    %c0_100 = arith.constant 0 : index
    %c0_101 = arith.constant 0 : index
    %195 = vector.load %arg11[%c1_99, %c0_100, %c0_101] : memref<2x32x32xbf16, #tpu.memory_space<vmem>>, vector<1x32x32xbf16>
    %196 = vector.shape_cast %195 : vector<1x32x32xbf16> to vector<32x32xbf16>
    %197 = arith.truncf %194 : vector<8x32xf32> to vector<8x32xbf16>
    %cst_102 = arith.constant dense<0.000000e+00> : vector<8x32xf32>
    %198 = tpu.matmul %197, %196, %cst_102 {dimension_numbers = #tpu.dot_dimension_numbers<[1], [0], [0], [1], [0, 0, 1, 1], [], []>} : vector<8x32xbf16>, vector<32x32xbf16>, vector<8x32xf32> -> vector<8x32xf32>
    %c2_103 = arith.constant 2 : index
    %c0_104 = arith.constant 0 : index
    %c0_105 = arith.constant 0 : index
    %199 = vector.load %arg12[%c2_103, %c0_104, %c0_105] : memref<3x1x32xf32, #tpu.memory_space<vmem>>, vector<1x1x32xf32>
    %200 = vector.shape_cast %199 : vector<1x1x32xf32> to vector<1x32xf32>
    %201 = vector.broadcast %200 : vector<1x32xf32> to vector<8x32xf32>
    %202 = arith.addf %198, %201 : vector<8x32xf32>
    %c2_106 = arith.constant 2 : index
    %c0_107 = arith.constant 0 : index
    %c0_108 = arith.constant 0 : index
    %203 = vector.load %arg13[%c2_106, %c0_107, %c0_108] : memref<3x1x32xf32, #tpu.memory_space<vmem>>, vector<1x1x32xf32>
    %204 = vector.shape_cast %203 : vector<1x1x32xf32> to vector<1x32xf32>
    %c2_109 = arith.constant 2 : index
    %c0_110 = arith.constant 0 : index
    %c0_111 = arith.constant 0 : index
    %205 = vector.load %arg14[%c2_109, %c0_110, %c0_111] : memref<3x1x32xf32, #tpu.memory_space<vmem>>, vector<1x1x32xf32>
    %206 = vector.shape_cast %205 : vector<1x1x32xf32> to vector<1x32xf32>
    %cst_112 = arith.constant dense<0.000000e+00> : vector<8xf32>
    %207 = vector.multi_reduction <add>, %202, %cst_112 [1] : vector<8x32xf32> to vector<8xf32>
    %208 = vector.shape_cast %207 : vector<8xf32> to vector<8x1xf32>
    %cst_113 = arith.constant 3.200000e+01 : f32
    %209 = vector.broadcast %cst_113 : f32 to vector<8x1xf32>
    %210 = arith.divf %208, %209 : vector<8x1xf32>
    %211 = vector.broadcast %210 : vector<8x1xf32> to vector<8x32xf32>
    %212 = arith.subf %202, %211 : vector<8x32xf32>
    %213 = arith.mulf %212, %212 : vector<8x32xf32>
    %cst_114 = arith.constant dense<0.000000e+00> : vector<8xf32>
    %214 = vector.multi_reduction <add>, %213, %cst_114 [1] : vector<8x32xf32> to vector<8xf32>
    %215 = vector.shape_cast %214 : vector<8xf32> to vector<8x1xf32>
    %cst_115 = arith.constant 3.200000e+01 : f32
    %216 = vector.broadcast %cst_115 : f32 to vector<8x1xf32>
    %217 = arith.divf %215, %216 : vector<8x1xf32>
    %218 = vector.broadcast %210 : vector<8x1xf32> to vector<8x32xf32>
    %219 = arith.subf %202, %218 : vector<8x32xf32>
    %cst_116 = arith.constant 9.99999974E-6 : f32
    %220 = vector.broadcast %cst_116 : f32 to vector<8x1xf32>
    %221 = arith.addf %217, %220 : vector<8x1xf32>
    %222 = math.rsqrt %221 : vector<8x1xf32>
    %223 = vector.broadcast %222 : vector<8x1xf32> to vector<8x32xf32>
    %224 = arith.mulf %219, %223 : vector<8x32xf32>
    %225 = vector.broadcast %204 : vector<1x32xf32> to vector<8x32xf32>
    %226 = arith.mulf %224, %225 : vector<8x32xf32>
    %227 = vector.broadcast %206 : vector<1x32xf32> to vector<8x32xf32>
    %228 = arith.addf %226, %227 : vector<8x32xf32>
    %cst_117 = arith.constant 0.000000e+00 : f32
    %229 = vector.broadcast %cst_117 : f32 to vector<8x32xf32>
    %230 = arith.maximumf %228, %229 : vector<8x32xf32>
    %c0_118 = arith.constant 0 : index
    %c0_119 = arith.constant 0 : index
    %231 = vector.load %arg15[%c0_118, %c0_119] : memref<32x384xbf16, #tpu.memory_space<vmem>>, vector<32x384xbf16>
    %c0_120 = arith.constant 0 : index
    %c0_121 = arith.constant 0 : index
    %232 = vector.load %arg16[%c0_120, %c0_121] : memref<32x384xbf16, #tpu.memory_space<vmem>>, vector<32x384xbf16>
    %233 = arith.truncf %122 : vector<8x32xf32> to vector<8x32xbf16>
    %cst_122 = arith.constant dense<0.000000e+00> : vector<8x384xf32>
    %234 = tpu.matmul %233, %231, %cst_122 {dimension_numbers = #tpu.dot_dimension_numbers<[1], [0], [0], [1], [0, 0, 1, 1], [], []>} : vector<8x32xbf16>, vector<32x384xbf16>, vector<8x384xf32> -> vector<8x384xf32>
    %235 = arith.truncf %230 : vector<8x32xf32> to vector<8x32xbf16>
    %cst_123 = arith.constant dense<0.000000e+00> : vector<8x384xf32>
    %236 = tpu.matmul %235, %232, %cst_123 {dimension_numbers = #tpu.dot_dimension_numbers<[1], [0], [0], [1], [0, 0, 1, 1], [], []>} : vector<8x32xbf16>, vector<32x384xbf16>, vector<8x384xf32> -> vector<8x384xf32>
    %237 = arith.addf %234, %236 : vector<8x384xf32>
    %c0_124 = arith.constant 0 : index
    %c0_125 = arith.constant 0 : index
    %238 = vector.load %arg17[%c0_124, %c0_125] : memref<1x384xf32, #tpu.memory_space<vmem>>, vector<1x384xf32>
    %239 = vector.broadcast %238 : vector<1x384xf32> to vector<8x384xf32>
    %240 = arith.addf %237, %239 : vector<8x384xf32>
    %cst_126 = arith.constant 0.000000e+00 : f32
    %241 = vector.broadcast %cst_126 : f32 to vector<8x64xf32>
    %242 = tpu.concatenate %122, %230, %241, %240 in 1 : vector<8x32xf32>, vector<8x32xf32>, vector<8x64xf32>, vector<8x384xf32> -> vector<8x512xf32>
    %c0_127 = arith.constant 0 : index
    %c0_128 = arith.constant 0 : index
    %243 = vector.load %arg18[%c0_127, %c0_128] : memref<8x512xf32, #tpu.memory_space<vmem>>, vector<8x512xf32>
    tpu.vector_store %arg18[%c0_127, %c0_128], %242 {strides = array<i32>} : memref<8x512xf32, #tpu.memory_space<vmem>>, vector<8x512xf32>,
    return
  }
  func.func @transform_0(%arg0: i32) -> (i32, i32) {
    %c0_i32 = arith.constant 0 : i32
    %c0_i32_0 = arith.constant 0 : i32
    return %arg0, %c0_i32 : i32, i32
  }
  func.func @transform_1(%arg0: i32) -> (i32, i32) {
    %c0_i32 = arith.constant 0 : i32
    %c0_i32_0 = arith.constant 0 : i32
    %c0_i32_1 = arith.constant 0 : i32
    return %c0_i32, %c0_i32_0 : i32, i32
  }
  func.func @transform_2(%arg0: i32) -> (i32, i32) {
    %c0_i32 = arith.constant 0 : i32
    %c0_i32_0 = arith.constant 0 : i32
    %c0_i32_1 = arith.constant 0 : i32
    return %c0_i32, %c0_i32_0 : i32, i32
  }
  func.func @transform_3(%arg0: i32) -> (i32, i32) {
    %c0_i32 = arith.constant 0 : i32
    %c0_i32_0 = arith.constant 0 : i32
    return %arg0, %c0_i32 : i32, i32
  }
  func.func @transform_4(%arg0: i32) -> (i32, i32) {
    %c0_i32 = arith.constant 0 : i32
    %c0_i32_0 = arith.constant 0 : i32
    %c0_i32_1 = arith.constant 0 : i32
    return %c0_i32, %c0_i32_0 : i32, i32
  }
  func.func @transform_5(%arg0: i32) -> (i32, i32, i32) {
    %c0_i32 = arith.constant 0 : i32
    %c0_i32_0 = arith.constant 0 : i32
    %c0_i32_1 = arith.constant 0 : i32
    %c0_i32_2 = arith.constant 0 : i32
    return %c0_i32, %c0_i32_0, %c0_i32_1 : i32, i32, i32
  }
  func.func @transform_6(%arg0: i32) -> (i32, i32, i32) {
    %c0_i32 = arith.constant 0 : i32
    %c0_i32_0 = arith.constant 0 : i32
    %c0_i32_1 = arith.constant 0 : i32
    %c0_i32_2 = arith.constant 0 : i32
    return %c0_i32, %c0_i32_0, %c0_i32_1 : i32, i32, i32
  }
  func.func @transform_7(%arg0: i32) -> (i32, i32, i32) {
    %c0_i32 = arith.constant 0 : i32
    %c0_i32_0 = arith.constant 0 : i32
    %c0_i32_1 = arith.constant 0 : i32
    %c0_i32_2 = arith.constant 0 : i32
    return %c0_i32, %c0_i32_0, %c0_i32_1 : i32, i32, i32
  }
  func.func @transform_8(%arg0: i32) -> (i32, i32, i32) {
    %c0_i32 = arith.constant 0 : i32
    %c0_i32_0 = arith.constant 0 : i32
    %c0_i32_1 = arith.constant 0 : i32
    %c0_i32_2 = arith.constant 0 : i32
    return %c0_i32, %c0_i32_0, %c0_i32_1 : i32, i32, i32
  }
  func.func @transform_9(%arg0: i32) -> (i32, i32) {
    %c0_i32 = arith.constant 0 : i32
    %c0_i32_0 = arith.constant 0 : i32
    %c0_i32_1 = arith.constant 0 : i32
    return %c0_i32, %c0_i32_0 : i32, i32
  }
  func.func @transform_10(%arg0: i32) -> (i32, i32, i32) {
    %c0_i32 = arith.constant 0 : i32
    %c0_i32_0 = arith.constant 0 : i32
    %c0_i32_1 = arith.constant 0 : i32
    %c0_i32_2 = arith.constant 0 : i32
    return %c0_i32, %c0_i32_0, %c0_i32_1 : i32, i32, i32
  }
  func.func @transform_11(%arg0: i32) -> (i32, i32, i32) {
    %c0_i32 = arith.constant 0 : i32
    %c0_i32_0 = arith.constant 0 : i32
    %c0_i32_1 = arith.constant 0 : i32
    %c0_i32_2 = arith.constant 0 : i32
    return %c0_i32, %c0_i32_0, %c0_i32_1 : i32, i32, i32
  }
  func.func @transform_12(%arg0: i32) -> (i32, i32, i32) {
    %c0_i32 = arith.constant 0 : i32
    %c0_i32_0 = arith.constant 0 : i32
    %c0_i32_1 = arith.constant 0 : i32
    %c0_i32_2 = arith.constant 0 : i32
    return %c0_i32, %c0_i32_0, %c0_i32_1 : i32, i32, i32
  }
  func.func @transform_13(%arg0: i32) -> (i32, i32, i32) {
    %c0_i32 = arith.constant 0 : i32
    %c0_i32_0 = arith.constant 0 : i32
    %c0_i32_1 = arith.constant 0 : i32
    %c0_i32_2 = arith.constant 0 : i32
    return %c0_i32, %c0_i32_0, %c0_i32_1 : i32, i32, i32
  }
  func.func @transform_14(%arg0: i32) -> (i32, i32) {
    %c0_i32 = arith.constant 0 : i32
    %c0_i32_0 = arith.constant 0 : i32
    %c0_i32_1 = arith.constant 0 : i32
    return %c0_i32, %c0_i32_0 : i32, i32
  }
  func.func @transform_15(%arg0: i32) -> (i32, i32) {
    %c0_i32 = arith.constant 0 : i32
    %c0_i32_0 = arith.constant 0 : i32
    %c0_i32_1 = arith.constant 0 : i32
    return %c0_i32, %c0_i32_0 : i32, i32
  }
  func.func @transform_16(%arg0: i32) -> (i32, i32) {
    %c0_i32 = arith.constant 0 : i32
    %c0_i32_0 = arith.constant 0 : i32
    %c0_i32_1 = arith.constant 0 : i32
    return %c0_i32, %c0_i32_0 : i32, i32
  }
  func.func @transform_17(%arg0: i32) -> (i32, i32) {
    %c0_i32 = arith.constant 0 : i32
    %c0_i32_0 = arith.constant 0 : i32
    return %arg0, %c0_i32 : i32, i32
  }
}

module attributes {stable_mosaic.version = 11 : i64} {
  func.func @_decoder_head_kernel(%arg0: i32, %arg1: memref<8x128xf32, #tpu.memory_space<vmem>>, %arg2: memref<8x64xf32, #tpu.memory_space<vmem>>, %arg3: memref<128x32xbf16, #tpu.memory_space<vmem>>, %arg4: memref<64x32xbf16, #tpu.memory_space<vmem>>, %arg5: memref<2x32x32xbf16, #tpu.memory_space<vmem>>, %arg6: memref<3x1x32xf32, #tpu.memory_space<vmem>>, %arg7: memref<3x1x32xf32, #tpu.memory_space<vmem>>, %arg8: memref<3x1x32xf32, #tpu.memory_space<vmem>>, %arg9: memref<32x128xbf16, #tpu.memory_space<vmem>>, %arg10: memref<1x128xf32, #tpu.memory_space<vmem>>, %arg11: memref<8x128xf32, #tpu.memory_space<vmem>>) attributes {dimension_semantics = [#tpu.dimension_semantics<parallel>], iteration_bounds = array<i64: 2>, scalar_prefetch = 0 : i64, scratch_operands = 0 : i64, tpu.core_type = #tpu.core_type<tc>, window_params = [{transform_indices = @transform_0, window_bounds = array<i64: 8, 128>}, {transform_indices = @transform_1, window_bounds = array<i64: 8, 64>}, {pipeline_mode = #tpu.pipeline_mode<synchronous>, transform_indices = @transform_2, window_bounds = array<i64: 128, 32>}, {pipeline_mode = #tpu.pipeline_mode<synchronous>, transform_indices = @transform_3, window_bounds = array<i64: 64, 32>}, {pipeline_mode = #tpu.pipeline_mode<synchronous>, transform_indices = @transform_4, window_bounds = array<i64: 2, 32, 32>}, {pipeline_mode = #tpu.pipeline_mode<synchronous>, transform_indices = @transform_5, window_bounds = array<i64: 3, 1, 32>}, {pipeline_mode = #tpu.pipeline_mode<synchronous>, transform_indices = @transform_6, window_bounds = array<i64: 3, 1, 32>}, {pipeline_mode = #tpu.pipeline_mode<synchronous>, transform_indices = @transform_7, window_bounds = array<i64: 3, 1, 32>}, {pipeline_mode = #tpu.pipeline_mode<synchronous>, transform_indices = @transform_8, window_bounds = array<i64: 32, 128>}, {pipeline_mode = #tpu.pipeline_mode<synchronous>, transform_indices = @transform_9, window_bounds = array<i64: 1, 128>}, {transform_indices = @transform_10, window_bounds = array<i64: 8, 128>}]} {
    %c0 = arith.constant 0 : index
    %c0_0 = arith.constant 0 : index
    %0 = vector.load %arg3[%c0, %c0_0] : memref<128x32xbf16, #tpu.memory_space<vmem>>, vector<128x32xbf16>
    %c0_1 = arith.constant 0 : index
    %c0_2 = arith.constant 0 : index
    %1 = vector.load %arg4[%c0_1, %c0_2] : memref<64x32xbf16, #tpu.memory_space<vmem>>, vector<64x32xbf16>
    %c0_3 = arith.constant 0 : index
    %c0_4 = arith.constant 0 : index
    %2 = vector.load %arg1[%c0_3, %c0_4] : memref<8x128xf32, #tpu.memory_space<vmem>>, vector<8x128xf32>
    %3 = arith.truncf %2 : vector<8x128xf32> to vector<8x128xbf16>
    %cst = arith.constant dense<0.000000e+00> : vector<8x32xf32>
    %4 = tpu.matmul %3, %0, %cst {dimension_numbers = #tpu.dot_dimension_numbers<[1], [0], [0], [1], [0, 0, 1, 1], [], []>} : vector<8x128xbf16>, vector<128x32xbf16>, vector<8x32xf32> -> vector<8x32xf32>
    %c0_5 = arith.constant 0 : index
    %c0_6 = arith.constant 0 : index
    %5 = vector.load %arg2[%c0_5, %c0_6] : memref<8x64xf32, #tpu.memory_space<vmem>>, vector<8x64xf32>
    %6 = arith.truncf %5 : vector<8x64xf32> to vector<8x64xbf16>
    %cst_7 = arith.constant dense<0.000000e+00> : vector<8x32xf32>
    %7 = tpu.matmul %6, %1, %cst_7 {dimension_numbers = #tpu.dot_dimension_numbers<[1], [0], [0], [1], [0, 0, 1, 1], [], []>} : vector<8x64xbf16>, vector<64x32xbf16>, vector<8x32xf32> -> vector<8x32xf32>
    %8 = arith.addf %4, %7 : vector<8x32xf32>
    %c0_8 = arith.constant 0 : index
    %c0_9 = arith.constant 0 : index
    %c0_10 = arith.constant 0 : index
    %9 = vector.load %arg6[%c0_8, %c0_9, %c0_10] : memref<3x1x32xf32, #tpu.memory_space<vmem>>, vector<1x1x32xf32>
    %10 = vector.shape_cast %9 : vector<1x1x32xf32> to vector<1x32xf32>
    %11 = vector.broadcast %10 : vector<1x32xf32> to vector<8x32xf32>
    %12 = arith.addf %8, %11 : vector<8x32xf32>
    %c0_11 = arith.constant 0 : index
    %c0_12 = arith.constant 0 : index
    %c0_13 = arith.constant 0 : index
    %13 = vector.load %arg7[%c0_11, %c0_12, %c0_13] : memref<3x1x32xf32, #tpu.memory_space<vmem>>, vector<1x1x32xf32>
    %14 = vector.shape_cast %13 : vector<1x1x32xf32> to vector<1x32xf32>
    %c0_14 = arith.constant 0 : index
    %c0_15 = arith.constant 0 : index
    %c0_16 = arith.constant 0 : index
    %15 = vector.load %arg8[%c0_14, %c0_15, %c0_16] : memref<3x1x32xf32, #tpu.memory_space<vmem>>, vector<1x1x32xf32>
    %16 = vector.shape_cast %15 : vector<1x1x32xf32> to vector<1x32xf32>
    %cst_17 = arith.constant dense<0.000000e+00> : vector<8xf32>
    %17 = vector.multi_reduction <add>, %12, %cst_17 [1] : vector<8x32xf32> to vector<8xf32>
    %18 = vector.shape_cast %17 : vector<8xf32> to vector<8x1xf32>
    %cst_18 = arith.constant 3.200000e+01 : f32
    %19 = vector.broadcast %cst_18 : f32 to vector<8x1xf32>
    %20 = arith.divf %18, %19 : vector<8x1xf32>
    %21 = vector.broadcast %20 : vector<8x1xf32> to vector<8x32xf32>
    %22 = arith.subf %12, %21 : vector<8x32xf32>
    %23 = arith.mulf %22, %22 : vector<8x32xf32>
    %cst_19 = arith.constant dense<0.000000e+00> : vector<8xf32>
    %24 = vector.multi_reduction <add>, %23, %cst_19 [1] : vector<8x32xf32> to vector<8xf32>
    %25 = vector.shape_cast %24 : vector<8xf32> to vector<8x1xf32>
    %cst_20 = arith.constant 3.200000e+01 : f32
    %26 = vector.broadcast %cst_20 : f32 to vector<8x1xf32>
    %27 = arith.divf %25, %26 : vector<8x1xf32>
    %28 = vector.broadcast %20 : vector<8x1xf32> to vector<8x32xf32>
    %29 = arith.subf %12, %28 : vector<8x32xf32>
    %cst_21 = arith.constant 9.99999974E-6 : f32
    %30 = vector.broadcast %cst_21 : f32 to vector<8x1xf32>
    %31 = arith.addf %27, %30 : vector<8x1xf32>
    %32 = math.rsqrt %31 : vector<8x1xf32>
    %33 = vector.broadcast %32 : vector<8x1xf32> to vector<8x32xf32>
    %34 = arith.mulf %29, %33 : vector<8x32xf32>
    %35 = vector.broadcast %14 : vector<1x32xf32> to vector<8x32xf32>
    %36 = arith.mulf %34, %35 : vector<8x32xf32>
    %37 = vector.broadcast %16 : vector<1x32xf32> to vector<8x32xf32>
    %38 = arith.addf %36, %37 : vector<8x32xf32>
    %cst_22 = arith.constant 0.000000e+00 : f32
    %39 = vector.broadcast %cst_22 : f32 to vector<8x32xf32>
    %40 = arith.maximumf %38, %39 : vector<8x32xf32>
    %c0_23 = arith.constant 0 : index
    %c0_24 = arith.constant 0 : index
    %c0_25 = arith.constant 0 : index
    %41 = vector.load %arg5[%c0_23, %c0_24, %c0_25] : memref<2x32x32xbf16, #tpu.memory_space<vmem>>, vector<1x32x32xbf16>
    %42 = vector.shape_cast %41 : vector<1x32x32xbf16> to vector<32x32xbf16>
    %43 = arith.truncf %40 : vector<8x32xf32> to vector<8x32xbf16>
    %cst_26 = arith.constant dense<0.000000e+00> : vector<8x32xf32>
    %44 = tpu.matmul %43, %42, %cst_26 {dimension_numbers = #tpu.dot_dimension_numbers<[1], [0], [0], [1], [0, 0, 1, 1], [], []>} : vector<8x32xbf16>, vector<32x32xbf16>, vector<8x32xf32> -> vector<8x32xf32>
    %c1 = arith.constant 1 : index
    %c0_27 = arith.constant 0 : index
    %c0_28 = arith.constant 0 : index
    %45 = vector.load %arg6[%c1, %c0_27, %c0_28] : memref<3x1x32xf32, #tpu.memory_space<vmem>>, vector<1x1x32xf32>
    %46 = vector.shape_cast %45 : vector<1x1x32xf32> to vector<1x32xf32>
    %47 = vector.broadcast %46 : vector<1x32xf32> to vector<8x32xf32>
    %48 = arith.addf %44, %47 : vector<8x32xf32>
    %c1_29 = arith.constant 1 : index
    %c0_30 = arith.constant 0 : index
    %c0_31 = arith.constant 0 : index
    %49 = vector.load %arg7[%c1_29, %c0_30, %c0_31] : memref<3x1x32xf32, #tpu.memory_space<vmem>>, vector<1x1x32xf32>
    %50 = vector.shape_cast %49 : vector<1x1x32xf32> to vector<1x32xf32>
    %c1_32 = arith.constant 1 : index
    %c0_33 = arith.constant 0 : index
    %c0_34 = arith.constant 0 : index
    %51 = vector.load %arg8[%c1_32, %c0_33, %c0_34] : memref<3x1x32xf32, #tpu.memory_space<vmem>>, vector<1x1x32xf32>
    %52 = vector.shape_cast %51 : vector<1x1x32xf32> to vector<1x32xf32>
    %cst_35 = arith.constant dense<0.000000e+00> : vector<8xf32>
    %53 = vector.multi_reduction <add>, %48, %cst_35 [1] : vector<8x32xf32> to vector<8xf32>
    %54 = vector.shape_cast %53 : vector<8xf32> to vector<8x1xf32>
    %cst_36 = arith.constant 3.200000e+01 : f32
    %55 = vector.broadcast %cst_36 : f32 to vector<8x1xf32>
    %56 = arith.divf %54, %55 : vector<8x1xf32>
    %57 = vector.broadcast %56 : vector<8x1xf32> to vector<8x32xf32>
    %58 = arith.subf %48, %57 : vector<8x32xf32>
    %59 = arith.mulf %58, %58 : vector<8x32xf32>
    %cst_37 = arith.constant dense<0.000000e+00> : vector<8xf32>
    %60 = vector.multi_reduction <add>, %59, %cst_37 [1] : vector<8x32xf32> to vector<8xf32>
    %61 = vector.shape_cast %60 : vector<8xf32> to vector<8x1xf32>
    %cst_38 = arith.constant 3.200000e+01 : f32
    %62 = vector.broadcast %cst_38 : f32 to vector<8x1xf32>
    %63 = arith.divf %61, %62 : vector<8x1xf32>
    %64 = vector.broadcast %56 : vector<8x1xf32> to vector<8x32xf32>
    %65 = arith.subf %48, %64 : vector<8x32xf32>
    %cst_39 = arith.constant 9.99999974E-6 : f32
    %66 = vector.broadcast %cst_39 : f32 to vector<8x1xf32>
    %67 = arith.addf %63, %66 : vector<8x1xf32>
    %68 = math.rsqrt %67 : vector<8x1xf32>
    %69 = vector.broadcast %68 : vector<8x1xf32> to vector<8x32xf32>
    %70 = arith.mulf %65, %69 : vector<8x32xf32>
    %71 = vector.broadcast %50 : vector<1x32xf32> to vector<8x32xf32>
    %72 = arith.mulf %70, %71 : vector<8x32xf32>
    %73 = vector.broadcast %52 : vector<1x32xf32> to vector<8x32xf32>
    %74 = arith.addf %72, %73 : vector<8x32xf32>
    %cst_40 = arith.constant 0.000000e+00 : f32
    %75 = vector.broadcast %cst_40 : f32 to vector<8x32xf32>
    %76 = arith.maximumf %74, %75 : vector<8x32xf32>
    %c1_41 = arith.constant 1 : index
    %c0_42 = arith.constant 0 : index
    %c0_43 = arith.constant 0 : index
    %77 = vector.load %arg5[%c1_41, %c0_42, %c0_43] : memref<2x32x32xbf16, #tpu.memory_space<vmem>>, vector<1x32x32xbf16>
    %78 = vector.shape_cast %77 : vector<1x32x32xbf16> to vector<32x32xbf16>
    %79 = arith.truncf %76 : vector<8x32xf32> to vector<8x32xbf16>
    %cst_44 = arith.constant dense<0.000000e+00> : vector<8x32xf32>
    %80 = tpu.matmul %79, %78, %cst_44 {dimension_numbers = #tpu.dot_dimension_numbers<[1], [0], [0], [1], [0, 0, 1, 1], [], []>} : vector<8x32xbf16>, vector<32x32xbf16>, vector<8x32xf32> -> vector<8x32xf32>
    %c2 = arith.constant 2 : index
    %c0_45 = arith.constant 0 : index
    %c0_46 = arith.constant 0 : index
    %81 = vector.load %arg6[%c2, %c0_45, %c0_46] : memref<3x1x32xf32, #tpu.memory_space<vmem>>, vector<1x1x32xf32>
    %82 = vector.shape_cast %81 : vector<1x1x32xf32> to vector<1x32xf32>
    %83 = vector.broadcast %82 : vector<1x32xf32> to vector<8x32xf32>
    %84 = arith.addf %80, %83 : vector<8x32xf32>
    %c2_47 = arith.constant 2 : index
    %c0_48 = arith.constant 0 : index
    %c0_49 = arith.constant 0 : index
    %85 = vector.load %arg7[%c2_47, %c0_48, %c0_49] : memref<3x1x32xf32, #tpu.memory_space<vmem>>, vector<1x1x32xf32>
    %86 = vector.shape_cast %85 : vector<1x1x32xf32> to vector<1x32xf32>
    %c2_50 = arith.constant 2 : index
    %c0_51 = arith.constant 0 : index
    %c0_52 = arith.constant 0 : index
    %87 = vector.load %arg8[%c2_50, %c0_51, %c0_52] : memref<3x1x32xf32, #tpu.memory_space<vmem>>, vector<1x1x32xf32>
    %88 = vector.shape_cast %87 : vector<1x1x32xf32> to vector<1x32xf32>
    %cst_53 = arith.constant dense<0.000000e+00> : vector<8xf32>
    %89 = vector.multi_reduction <add>, %84, %cst_53 [1] : vector<8x32xf32> to vector<8xf32>
    %90 = vector.shape_cast %89 : vector<8xf32> to vector<8x1xf32>
    %cst_54 = arith.constant 3.200000e+01 : f32
    %91 = vector.broadcast %cst_54 : f32 to vector<8x1xf32>
    %92 = arith.divf %90, %91 : vector<8x1xf32>
    %93 = vector.broadcast %92 : vector<8x1xf32> to vector<8x32xf32>
    %94 = arith.subf %84, %93 : vector<8x32xf32>
    %95 = arith.mulf %94, %94 : vector<8x32xf32>
    %cst_55 = arith.constant dense<0.000000e+00> : vector<8xf32>
    %96 = vector.multi_reduction <add>, %95, %cst_55 [1] : vector<8x32xf32> to vector<8xf32>
    %97 = vector.shape_cast %96 : vector<8xf32> to vector<8x1xf32>
    %cst_56 = arith.constant 3.200000e+01 : f32
    %98 = vector.broadcast %cst_56 : f32 to vector<8x1xf32>
    %99 = arith.divf %97, %98 : vector<8x1xf32>
    %100 = vector.broadcast %92 : vector<8x1xf32> to vector<8x32xf32>
    %101 = arith.subf %84, %100 : vector<8x32xf32>
    %cst_57 = arith.constant 9.99999974E-6 : f32
    %102 = vector.broadcast %cst_57 : f32 to vector<8x1xf32>
    %103 = arith.addf %99, %102 : vector<8x1xf32>
    %104 = math.rsqrt %103 : vector<8x1xf32>
    %105 = vector.broadcast %104 : vector<8x1xf32> to vector<8x32xf32>
    %106 = arith.mulf %101, %105 : vector<8x32xf32>
    %107 = vector.broadcast %86 : vector<1x32xf32> to vector<8x32xf32>
    %108 = arith.mulf %106, %107 : vector<8x32xf32>
    %109 = vector.broadcast %88 : vector<1x32xf32> to vector<8x32xf32>
    %110 = arith.addf %108, %109 : vector<8x32xf32>
    %cst_58 = arith.constant 0.000000e+00 : f32
    %111 = vector.broadcast %cst_58 : f32 to vector<8x32xf32>
    %112 = arith.maximumf %110, %111 : vector<8x32xf32>
    %c0_59 = arith.constant 0 : index
    %c0_60 = arith.constant 0 : index
    %113 = vector.load %arg9[%c0_59, %c0_60] : memref<32x128xbf16, #tpu.memory_space<vmem>>, vector<32x128xbf16>
    %114 = arith.truncf %112 : vector<8x32xf32> to vector<8x32xbf16>
    %cst_61 = arith.constant dense<0.000000e+00> : vector<8x128xf32>
    %115 = tpu.matmul %114, %113, %cst_61 {dimension_numbers = #tpu.dot_dimension_numbers<[1], [0], [0], [1], [0, 0, 1, 1], [], []>} : vector<8x32xbf16>, vector<32x128xbf16>, vector<8x128xf32> -> vector<8x128xf32>
    %c0_62 = arith.constant 0 : index
    %c0_63 = arith.constant 0 : index
    %116 = vector.load %arg10[%c0_62, %c0_63] : memref<1x128xf32, #tpu.memory_space<vmem>>, vector<1x128xf32>
    %117 = vector.broadcast %116 : vector<1x128xf32> to vector<8x128xf32>
    %118 = arith.addf %115, %117 : vector<8x128xf32>
    %119 = vector.extract_strided_slice %118 {offsets = [0, 0], sizes = [8, 1], strides = [1, 1]} : vector<8x128xf32> to vector<8x1xf32>
    %cst_64 = arith.constant 0.000000e+00 : f32
    %120 = vector.broadcast %cst_64 : f32 to vector<8x1xf32>
    %121 = arith.subf %120, %119 : vector<8x1xf32>
    %122 = math.exp %121 : vector<8x1xf32>
    %cst_65 = arith.constant 1.000000e+00 : f32
    %123 = vector.broadcast %cst_65 : f32 to vector<8x1xf32>
    %124 = arith.addf %123, %122 : vector<8x1xf32>
    %cst_66 = arith.constant 1.000000e+00 : f32
    %125 = vector.broadcast %cst_66 : f32 to vector<8x1xf32>
    %126 = arith.divf %125, %124 : vector<8x1xf32>
    %127 = math.log %126 : vector<8x1xf32>
    %cst_67 = arith.constant 2.30258512 : f32
    %128 = vector.broadcast %cst_67 : f32 to vector<8x1xf32>
    %129 = arith.mulf %128, %127 : vector<8x1xf32>
    %130 = math.exp %129 : vector<8x1xf32>
    %cst_68 = arith.constant 2.000000e+00 : f32
    %131 = vector.broadcast %cst_68 : f32 to vector<8x1xf32>
    %132 = arith.mulf %131, %130 : vector<8x1xf32>
    %cst_69 = arith.constant 1.000000e-07 : f32
    %133 = vector.broadcast %cst_69 : f32 to vector<8x1xf32>
    %134 = arith.addf %132, %133 : vector<8x1xf32>
    %135 = vector.extract_strided_slice %118 {offsets = [0, 1], sizes = [8, 7], strides = [1, 1]} : vector<8x128xf32> to vector<8x7xf32>
    %cst_70 = arith.constant dense<0xFF800000> : vector<8xf32>
    %136 = vector.multi_reduction <maximumf>, %135, %cst_70 [1] : vector<8x7xf32> to vector<8xf32>
    %137 = vector.shape_cast %136 : vector<8xf32> to vector<8x1xf32>
    %138 = vector.broadcast %137 : vector<8x1xf32> to vector<8x7xf32>
    %139 = arith.subf %135, %138 : vector<8x7xf32>
    %140 = math.exp %139 : vector<8x7xf32>
    %cst_71 = arith.constant dense<0.000000e+00> : vector<8xf32>
    %141 = vector.multi_reduction <add>, %140, %cst_71 [1] : vector<8x7xf32> to vector<8xf32>
    %142 = vector.shape_cast %141 : vector<8xf32> to vector<8x1xf32>
    %143 = vector.broadcast %142 : vector<8x1xf32> to vector<8x7xf32>
    %144 = arith.divf %140, %143 : vector<8x7xf32>
    %145 = vector.extract_strided_slice %118 {offsets = [0, 8], sizes = [8, 17], strides = [1, 1]} : vector<8x128xf32> to vector<8x17xf32>
    %cst_72 = arith.constant 0.000000e+00 : f32
    %146 = vector.broadcast %cst_72 : f32 to vector<8x17xf32>
    %147 = arith.subf %146, %145 : vector<8x17xf32>
    %148 = math.exp %147 : vector<8x17xf32>
    %cst_73 = arith.constant 1.000000e+00 : f32
    %149 = vector.broadcast %cst_73 : f32 to vector<8x17xf32>
    %150 = arith.addf %149, %148 : vector<8x17xf32>
    %cst_74 = arith.constant 1.000000e+00 : f32
    %151 = vector.broadcast %cst_74 : f32 to vector<8x17xf32>
    %152 = arith.divf %151, %150 : vector<8x17xf32>
    %153 = math.log %152 : vector<8x17xf32>
    %cst_75 = arith.constant 2.30258512 : f32
    %154 = vector.broadcast %cst_75 : f32 to vector<8x17xf32>
    %155 = arith.mulf %154, %153 : vector<8x17xf32>
    %156 = math.exp %155 : vector<8x17xf32>
    %cst_76 = arith.constant 2.000000e+00 : f32
    %157 = vector.broadcast %cst_76 : f32 to vector<8x17xf32>
    %158 = arith.mulf %157, %156 : vector<8x17xf32>
    %cst_77 = arith.constant 1.000000e-07 : f32
    %159 = vector.broadcast %cst_77 : f32 to vector<8x17xf32>
    %160 = arith.addf %158, %159 : vector<8x17xf32>
    %cst_78 = arith.constant 0.000000e+00 : f32
    %161 = vector.broadcast %cst_78 : f32 to vector<8x103xf32>
    %162 = tpu.concatenate %134, %144, %160, %161 in 1 : vector<8x1xf32>, vector<8x7xf32>, vector<8x17xf32>, vector<8x103xf32> -> vector<8x128xf32>
    %c0_79 = arith.constant 0 : index
    %c0_80 = arith.constant 0 : index
    %163 = vector.load %arg11[%c0_79, %c0_80] : memref<8x128xf32, #tpu.memory_space<vmem>>, vector<8x128xf32>
    tpu.vector_store %arg11[%c0_79, %c0_80], %162 {strides = array<i32>} : memref<8x128xf32, #tpu.memory_space<vmem>>, vector<8x128xf32>,
    return
  }
  func.func @transform_0(%arg0: i32) -> (i32, i32) {
    %c0_i32 = arith.constant 0 : i32
    %c0_i32_0 = arith.constant 0 : i32
    return %arg0, %c0_i32 : i32, i32
  }
  func.func @transform_1(%arg0: i32) -> (i32, i32) {
    %c0_i32 = arith.constant 0 : i32
    %c0_i32_0 = arith.constant 0 : i32
    return %arg0, %c0_i32 : i32, i32
  }
  func.func @transform_2(%arg0: i32) -> (i32, i32) {
    %c0_i32 = arith.constant 0 : i32
    %c0_i32_0 = arith.constant 0 : i32
    %c0_i32_1 = arith.constant 0 : i32
    return %c0_i32, %c0_i32_0 : i32, i32
  }
  func.func @transform_3(%arg0: i32) -> (i32, i32) {
    %c0_i32 = arith.constant 0 : i32
    %c0_i32_0 = arith.constant 0 : i32
    %c0_i32_1 = arith.constant 0 : i32
    return %c0_i32, %c0_i32_0 : i32, i32
  }
  func.func @transform_4(%arg0: i32) -> (i32, i32, i32) {
    %c0_i32 = arith.constant 0 : i32
    %c0_i32_0 = arith.constant 0 : i32
    %c0_i32_1 = arith.constant 0 : i32
    %c0_i32_2 = arith.constant 0 : i32
    return %c0_i32, %c0_i32_0, %c0_i32_1 : i32, i32, i32
  }
  func.func @transform_5(%arg0: i32) -> (i32, i32, i32) {
    %c0_i32 = arith.constant 0 : i32
    %c0_i32_0 = arith.constant 0 : i32
    %c0_i32_1 = arith.constant 0 : i32
    %c0_i32_2 = arith.constant 0 : i32
    return %c0_i32, %c0_i32_0, %c0_i32_1 : i32, i32, i32
  }
  func.func @transform_6(%arg0: i32) -> (i32, i32, i32) {
    %c0_i32 = arith.constant 0 : i32
    %c0_i32_0 = arith.constant 0 : i32
    %c0_i32_1 = arith.constant 0 : i32
    %c0_i32_2 = arith.constant 0 : i32
    return %c0_i32, %c0_i32_0, %c0_i32_1 : i32, i32, i32
  }
  func.func @transform_7(%arg0: i32) -> (i32, i32, i32) {
    %c0_i32 = arith.constant 0 : i32
    %c0_i32_0 = arith.constant 0 : i32
    %c0_i32_1 = arith.constant 0 : i32
    %c0_i32_2 = arith.constant 0 : i32
    return %c0_i32, %c0_i32_0, %c0_i32_1 : i32, i32, i32
  }
  func.func @transform_8(%arg0: i32) -> (i32, i32) {
    %c0_i32 = arith.constant 0 : i32
    %c0_i32_0 = arith.constant 0 : i32
    %c0_i32_1 = arith.constant 0 : i32
    return %c0_i32, %c0_i32_0 : i32, i32
  }
  func.func @transform_9(%arg0: i32) -> (i32, i32) {
    %c0_i32 = arith.constant 0 : i32
    %c0_i32_0 = arith.constant 0 : i32
    %c0_i32_1 = arith.constant 0 : i32
    return %c0_i32, %c0_i32_0 : i32, i32
  }
  func.func @transform_10(%arg0: i32) -> (i32, i32) {
    %c0_i32 = arith.constant 0 : i32
    %c0_i32_0 = arith.constant 0 : i32
    return %arg0, %c0_i32 : i32, i32
  }
}

module attributes {stable_mosaic.version = 11 : i64} {
  func.func @_gru_kernel(%arg0: i32, %arg1: memref<8x2x384xf32, #tpu.memory_space<vmem>>, %arg2: memref<128x384xbf16, #tpu.memory_space<vmem>>, %arg3: memref<1x384xf32, #tpu.memory_space<vmem>>, %arg4: memref<8x2x128xf32, #tpu.memory_space<vmem>>) attributes {dimension_semantics = [#tpu.dimension_semantics<arbitrary>], iteration_bounds = array<i64: 1>, scalar_prefetch = 0 : i64, scratch_operands = 0 : i64, tpu.core_type = #tpu.core_type<tc>, window_params = [{pipeline_mode = #tpu.pipeline_mode<synchronous>, transform_indices = @transform_0, window_bounds = array<i64: 8, 2, 384>}, {pipeline_mode = #tpu.pipeline_mode<synchronous>, transform_indices = @transform_1, window_bounds = array<i64: 128, 384>}, {pipeline_mode = #tpu.pipeline_mode<synchronous>, transform_indices = @transform_2, window_bounds = array<i64: 1, 384>}, {pipeline_mode = #tpu.pipeline_mode<synchronous>, transform_indices = @transform_3, window_bounds = array<i64: 8, 2, 128>}]} {
    %c0 = arith.constant 0 : index
    %c0_0 = arith.constant 0 : index
    %0 = vector.load %arg2[%c0, %c0_0] : memref<128x384xbf16, #tpu.memory_space<vmem>>, vector<128x384xbf16>
    %c0_1 = arith.constant 0 : index
    %c0_2 = arith.constant 0 : index
    %1 = vector.load %arg3[%c0_1, %c0_2] : memref<1x384xf32, #tpu.memory_space<vmem>>, vector<1x384xf32>
    %cst = arith.constant 0.000000e+00 : f32
    %2 = vector.broadcast %cst : f32 to vector<2x128xf32>
    %c0_i32 = arith.constant 0 : i32
    %3 = arith.index_cast %c0_i32 : i32 to index
    %c0_3 = arith.constant 0 : index
    %c0_4 = arith.constant 0 : index
    %4 = vector.load %arg1[%3, %c0_3, %c0_4] : memref<8x2x384xf32, #tpu.memory_space<vmem>>, vector<1x2x384xf32>
    %5 = vector.shape_cast %4 : vector<1x2x384xf32> to vector<2x384xf32>
    %6 = arith.truncf %2 : vector<2x128xf32> to vector<2x128xbf16>
    %cst_5 = arith.constant dense<0.000000e+00> : vector<2x384xf32>
    %7 = tpu.matmul %6, %0, %cst_5 {dimension_numbers = #tpu.dot_dimension_numbers<[1], [0], [0], [1], [0, 0, 1, 1], [], []>} : vector<2x128xbf16>, vector<128x384xbf16>, vector<2x384xf32> -> vector<2x384xf32>
    %8 = vector.broadcast %1 : vector<1x384xf32> to vector<2x384xf32>
    %9 = arith.addf %7, %8 : vector<2x384xf32>
    %10 = vector.extract_strided_slice %5 {offsets = [0, 0], sizes = [2, 128], strides = [1, 1]} : vector<2x384xf32> to vector<2x128xf32>
    %11 = vector.extract_strided_slice %9 {offsets = [0, 0], sizes = [2, 128], strides = [1, 1]} : vector<2x384xf32> to vector<2x128xf32>
    %12 = arith.addf %10, %11 : vector<2x128xf32>
    %cst_6 = arith.constant 0.000000e+00 : f32
    %13 = vector.broadcast %cst_6 : f32 to vector<2x128xf32>
    %14 = arith.subf %13, %12 : vector<2x128xf32>
    %15 = math.exp %14 : vector<2x128xf32>
    %cst_7 = arith.constant 1.000000e+00 : f32
    %16 = vector.broadcast %cst_7 : f32 to vector<2x128xf32>
    %17 = arith.addf %16, %15 : vector<2x128xf32>
    %cst_8 = arith.constant 1.000000e+00 : f32
    %18 = vector.broadcast %cst_8 : f32 to vector<2x128xf32>
    %19 = arith.divf %18, %17 : vector<2x128xf32>
    %20 = vector.extract_strided_slice %5 {offsets = [0, 128], sizes = [2, 128], strides = [1, 1]} : vector<2x384xf32> to vector<2x128xf32>
    %21 = vector.extract_strided_slice %9 {offsets = [0, 128], sizes = [2, 128], strides = [1, 1]} : vector<2x384xf32> to vector<2x128xf32>
    %22 = arith.addf %20, %21 : vector<2x128xf32>
    %cst_9 = arith.constant 0.000000e+00 : f32
    %23 = vector.broadcast %cst_9 : f32 to vector<2x128xf32>
    %24 = arith.subf %23, %22 : vector<2x128xf32>
    %25 = math.exp %24 : vector<2x128xf32>
    %cst_10 = arith.constant 1.000000e+00 : f32
    %26 = vector.broadcast %cst_10 : f32 to vector<2x128xf32>
    %27 = arith.addf %26, %25 : vector<2x128xf32>
    %cst_11 = arith.constant 1.000000e+00 : f32
    %28 = vector.broadcast %cst_11 : f32 to vector<2x128xf32>
    %29 = arith.divf %28, %27 : vector<2x128xf32>
    %30 = vector.extract_strided_slice %5 {offsets = [0, 256], sizes = [2, 128], strides = [1, 1]} : vector<2x384xf32> to vector<2x128xf32>
    %31 = vector.extract_strided_slice %9 {offsets = [0, 256], sizes = [2, 128], strides = [1, 1]} : vector<2x384xf32> to vector<2x128xf32>
    %32 = arith.mulf %19, %31 : vector<2x128xf32>
    %33 = arith.addf %30, %32 : vector<2x128xf32>
    %34 = math.tanh %33 : vector<2x128xf32>
    %cst_12 = arith.constant 1.000000e+00 : f32
    %35 = vector.broadcast %cst_12 : f32 to vector<2x128xf32>
    %36 = arith.subf %35, %29 : vector<2x128xf32>
    %37 = arith.mulf %36, %34 : vector<2x128xf32>
    %38 = arith.mulf %29, %2 : vector<2x128xf32>
    %39 = arith.addf %37, %38 : vector<2x128xf32>
    %40 = arith.index_cast %c0_i32 : i32 to index
    %c0_13 = arith.constant 0 : index
    %c0_14 = arith.constant 0 : index
    %41 = vector.load %arg4[%40, %c0_13, %c0_14] : memref<8x2x128xf32, #tpu.memory_space<vmem>>, vector<1x2x128xf32>
    %42 = vector.shape_cast %41 : vector<1x2x128xf32> to vector<2x128xf32>
    %43 = vector.shape_cast %39 : vector<2x128xf32> to vector<1x2x128xf32>
    tpu.vector_store %arg4[%40, %c0_13, %c0_14], %43 {strides = array<i32>} : memref<8x2x128xf32, #tpu.memory_space<vmem>>, vector<1x2x128xf32>,
    %c1_i32 = arith.constant 1 : i32
    %44 = arith.index_cast %c1_i32 : i32 to index
    %c0_15 = arith.constant 0 : index
    %c0_16 = arith.constant 0 : index
    %45 = vector.load %arg1[%44, %c0_15, %c0_16] : memref<8x2x384xf32, #tpu.memory_space<vmem>>, vector<1x2x384xf32>
    %46 = vector.shape_cast %45 : vector<1x2x384xf32> to vector<2x384xf32>
    %47 = arith.truncf %39 : vector<2x128xf32> to vector<2x128xbf16>
    %cst_17 = arith.constant dense<0.000000e+00> : vector<2x384xf32>
    %48 = tpu.matmul %47, %0, %cst_17 {dimension_numbers = #tpu.dot_dimension_numbers<[1], [0], [0], [1], [0, 0, 1, 1], [], []>} : vector<2x128xbf16>, vector<128x384xbf16>, vector<2x384xf32> -> vector<2x384xf32>
    %49 = vector.broadcast %1 : vector<1x384xf32> to vector<2x384xf32>
    %50 = arith.addf %48, %49 : vector<2x384xf32>
    %51 = vector.extract_strided_slice %46 {offsets = [0, 0], sizes = [2, 128], strides = [1, 1]} : vector<2x384xf32> to vector<2x128xf32>
    %52 = vector.extract_strided_slice %50 {offsets = [0, 0], sizes = [2, 128], strides = [1, 1]} : vector<2x384xf32> to vector<2x128xf32>
    %53 = arith.addf %51, %52 : vector<2x128xf32>
    %cst_18 = arith.constant 0.000000e+00 : f32
    %54 = vector.broadcast %cst_18 : f32 to vector<2x128xf32>
    %55 = arith.subf %54, %53 : vector<2x128xf32>
    %56 = math.exp %55 : vector<2x128xf32>
    %cst_19 = arith.constant 1.000000e+00 : f32
    %57 = vector.broadcast %cst_19 : f32 to vector<2x128xf32>
    %58 = arith.addf %57, %56 : vector<2x128xf32>
    %cst_20 = arith.constant 1.000000e+00 : f32
    %59 = vector.broadcast %cst_20 : f32 to vector<2x128xf32>
    %60 = arith.divf %59, %58 : vector<2x128xf32>
    %61 = vector.extract_strided_slice %46 {offsets = [0, 128], sizes = [2, 128], strides = [1, 1]} : vector<2x384xf32> to vector<2x128xf32>
    %62 = vector.extract_strided_slice %50 {offsets = [0, 128], sizes = [2, 128], strides = [1, 1]} : vector<2x384xf32> to vector<2x128xf32>
    %63 = arith.addf %61, %62 : vector<2x128xf32>
    %cst_21 = arith.constant 0.000000e+00 : f32
    %64 = vector.broadcast %cst_21 : f32 to vector<2x128xf32>
    %65 = arith.subf %64, %63 : vector<2x128xf32>
    %66 = math.exp %65 : vector<2x128xf32>
    %cst_22 = arith.constant 1.000000e+00 : f32
    %67 = vector.broadcast %cst_22 : f32 to vector<2x128xf32>
    %68 = arith.addf %67, %66 : vector<2x128xf32>
    %cst_23 = arith.constant 1.000000e+00 : f32
    %69 = vector.broadcast %cst_23 : f32 to vector<2x128xf32>
    %70 = arith.divf %69, %68 : vector<2x128xf32>
    %71 = vector.extract_strided_slice %46 {offsets = [0, 256], sizes = [2, 128], strides = [1, 1]} : vector<2x384xf32> to vector<2x128xf32>
    %72 = vector.extract_strided_slice %50 {offsets = [0, 256], sizes = [2, 128], strides = [1, 1]} : vector<2x384xf32> to vector<2x128xf32>
    %73 = arith.mulf %60, %72 : vector<2x128xf32>
    %74 = arith.addf %71, %73 : vector<2x128xf32>
    %75 = math.tanh %74 : vector<2x128xf32>
    %cst_24 = arith.constant 1.000000e+00 : f32
    %76 = vector.broadcast %cst_24 : f32 to vector<2x128xf32>
    %77 = arith.subf %76, %70 : vector<2x128xf32>
    %78 = arith.mulf %77, %75 : vector<2x128xf32>
    %79 = arith.mulf %70, %39 : vector<2x128xf32>
    %80 = arith.addf %78, %79 : vector<2x128xf32>
    %81 = arith.index_cast %c1_i32 : i32 to index
    %c0_25 = arith.constant 0 : index
    %c0_26 = arith.constant 0 : index
    %82 = vector.load %arg4[%81, %c0_25, %c0_26] : memref<8x2x128xf32, #tpu.memory_space<vmem>>, vector<1x2x128xf32>
    %83 = vector.shape_cast %82 : vector<1x2x128xf32> to vector<2x128xf32>
    %84 = vector.shape_cast %80 : vector<2x128xf32> to vector<1x2x128xf32>
    tpu.vector_store %arg4[%81, %c0_25, %c0_26], %84 {strides = array<i32>} : memref<8x2x128xf32, #tpu.memory_space<vmem>>, vector<1x2x128xf32>,
    %c2_i32 = arith.constant 2 : i32
    %85 = arith.index_cast %c2_i32 : i32 to index
    %c0_27 = arith.constant 0 : index
    %c0_28 = arith.constant 0 : index
    %86 = vector.load %arg1[%85, %c0_27, %c0_28] : memref<8x2x384xf32, #tpu.memory_space<vmem>>, vector<1x2x384xf32>
    %87 = vector.shape_cast %86 : vector<1x2x384xf32> to vector<2x384xf32>
    %88 = arith.truncf %80 : vector<2x128xf32> to vector<2x128xbf16>
    %cst_29 = arith.constant dense<0.000000e+00> : vector<2x384xf32>
    %89 = tpu.matmul %88, %0, %cst_29 {dimension_numbers = #tpu.dot_dimension_numbers<[1], [0], [0], [1], [0, 0, 1, 1], [], []>} : vector<2x128xbf16>, vector<128x384xbf16>, vector<2x384xf32> -> vector<2x384xf32>
    %90 = vector.broadcast %1 : vector<1x384xf32> to vector<2x384xf32>
    %91 = arith.addf %89, %90 : vector<2x384xf32>
    %92 = vector.extract_strided_slice %87 {offsets = [0, 0], sizes = [2, 128], strides = [1, 1]} : vector<2x384xf32> to vector<2x128xf32>
    %93 = vector.extract_strided_slice %91 {offsets = [0, 0], sizes = [2, 128], strides = [1, 1]} : vector<2x384xf32> to vector<2x128xf32>
    %94 = arith.addf %92, %93 : vector<2x128xf32>
    %cst_30 = arith.constant 0.000000e+00 : f32
    %95 = vector.broadcast %cst_30 : f32 to vector<2x128xf32>
    %96 = arith.subf %95, %94 : vector<2x128xf32>
    %97 = math.exp %96 : vector<2x128xf32>
    %cst_31 = arith.constant 1.000000e+00 : f32
    %98 = vector.broadcast %cst_31 : f32 to vector<2x128xf32>
    %99 = arith.addf %98, %97 : vector<2x128xf32>
    %cst_32 = arith.constant 1.000000e+00 : f32
    %100 = vector.broadcast %cst_32 : f32 to vector<2x128xf32>
    %101 = arith.divf %100, %99 : vector<2x128xf32>
    %102 = vector.extract_strided_slice %87 {offsets = [0, 128], sizes = [2, 128], strides = [1, 1]} : vector<2x384xf32> to vector<2x128xf32>
    %103 = vector.extract_strided_slice %91 {offsets = [0, 128], sizes = [2, 128], strides = [1, 1]} : vector<2x384xf32> to vector<2x128xf32>
    %104 = arith.addf %102, %103 : vector<2x128xf32>
    %cst_33 = arith.constant 0.000000e+00 : f32
    %105 = vector.broadcast %cst_33 : f32 to vector<2x128xf32>
    %106 = arith.subf %105, %104 : vector<2x128xf32>
    %107 = math.exp %106 : vector<2x128xf32>
    %cst_34 = arith.constant 1.000000e+00 : f32
    %108 = vector.broadcast %cst_34 : f32 to vector<2x128xf32>
    %109 = arith.addf %108, %107 : vector<2x128xf32>
    %cst_35 = arith.constant 1.000000e+00 : f32
    %110 = vector.broadcast %cst_35 : f32 to vector<2x128xf32>
    %111 = arith.divf %110, %109 : vector<2x128xf32>
    %112 = vector.extract_strided_slice %87 {offsets = [0, 256], sizes = [2, 128], strides = [1, 1]} : vector<2x384xf32> to vector<2x128xf32>
    %113 = vector.extract_strided_slice %91 {offsets = [0, 256], sizes = [2, 128], strides = [1, 1]} : vector<2x384xf32> to vector<2x128xf32>
    %114 = arith.mulf %101, %113 : vector<2x128xf32>
    %115 = arith.addf %112, %114 : vector<2x128xf32>
    %116 = math.tanh %115 : vector<2x128xf32>
    %cst_36 = arith.constant 1.000000e+00 : f32
    %117 = vector.broadcast %cst_36 : f32 to vector<2x128xf32>
    %118 = arith.subf %117, %111 : vector<2x128xf32>
    %119 = arith.mulf %118, %116 : vector<2x128xf32>
    %120 = arith.mulf %111, %80 : vector<2x128xf32>
    %121 = arith.addf %119, %120 : vector<2x128xf32>
    %122 = arith.index_cast %c2_i32 : i32 to index
    %c0_37 = arith.constant 0 : index
    %c0_38 = arith.constant 0 : index
    %123 = vector.load %arg4[%122, %c0_37, %c0_38] : memref<8x2x128xf32, #tpu.memory_space<vmem>>, vector<1x2x128xf32>
    %124 = vector.shape_cast %123 : vector<1x2x128xf32> to vector<2x128xf32>
    %125 = vector.shape_cast %121 : vector<2x128xf32> to vector<1x2x128xf32>
    tpu.vector_store %arg4[%122, %c0_37, %c0_38], %125 {strides = array<i32>} : memref<8x2x128xf32, #tpu.memory_space<vmem>>, vector<1x2x128xf32>,
    %c3_i32 = arith.constant 3 : i32
    %126 = arith.index_cast %c3_i32 : i32 to index
    %c0_39 = arith.constant 0 : index
    %c0_40 = arith.constant 0 : index
    %127 = vector.load %arg1[%126, %c0_39, %c0_40] : memref<8x2x384xf32, #tpu.memory_space<vmem>>, vector<1x2x384xf32>
    %128 = vector.shape_cast %127 : vector<1x2x384xf32> to vector<2x384xf32>
    %129 = arith.truncf %121 : vector<2x128xf32> to vector<2x128xbf16>
    %cst_41 = arith.constant dense<0.000000e+00> : vector<2x384xf32>
    %130 = tpu.matmul %129, %0, %cst_41 {dimension_numbers = #tpu.dot_dimension_numbers<[1], [0], [0], [1], [0, 0, 1, 1], [], []>} : vector<2x128xbf16>, vector<128x384xbf16>, vector<2x384xf32> -> vector<2x384xf32>
    %131 = vector.broadcast %1 : vector<1x384xf32> to vector<2x384xf32>
    %132 = arith.addf %130, %131 : vector<2x384xf32>
    %133 = vector.extract_strided_slice %128 {offsets = [0, 0], sizes = [2, 128], strides = [1, 1]} : vector<2x384xf32> to vector<2x128xf32>
    %134 = vector.extract_strided_slice %132 {offsets = [0, 0], sizes = [2, 128], strides = [1, 1]} : vector<2x384xf32> to vector<2x128xf32>
    %135 = arith.addf %133, %134 : vector<2x128xf32>
    %cst_42 = arith.constant 0.000000e+00 : f32
    %136 = vector.broadcast %cst_42 : f32 to vector<2x128xf32>
    %137 = arith.subf %136, %135 : vector<2x128xf32>
    %138 = math.exp %137 : vector<2x128xf32>
    %cst_43 = arith.constant 1.000000e+00 : f32
    %139 = vector.broadcast %cst_43 : f32 to vector<2x128xf32>
    %140 = arith.addf %139, %138 : vector<2x128xf32>
    %cst_44 = arith.constant 1.000000e+00 : f32
    %141 = vector.broadcast %cst_44 : f32 to vector<2x128xf32>
    %142 = arith.divf %141, %140 : vector<2x128xf32>
    %143 = vector.extract_strided_slice %128 {offsets = [0, 128], sizes = [2, 128], strides = [1, 1]} : vector<2x384xf32> to vector<2x128xf32>
    %144 = vector.extract_strided_slice %132 {offsets = [0, 128], sizes = [2, 128], strides = [1, 1]} : vector<2x384xf32> to vector<2x128xf32>
    %145 = arith.addf %143, %144 : vector<2x128xf32>
    %cst_45 = arith.constant 0.000000e+00 : f32
    %146 = vector.broadcast %cst_45 : f32 to vector<2x128xf32>
    %147 = arith.subf %146, %145 : vector<2x128xf32>
    %148 = math.exp %147 : vector<2x128xf32>
    %cst_46 = arith.constant 1.000000e+00 : f32
    %149 = vector.broadcast %cst_46 : f32 to vector<2x128xf32>
    %150 = arith.addf %149, %148 : vector<2x128xf32>
    %cst_47 = arith.constant 1.000000e+00 : f32
    %151 = vector.broadcast %cst_47 : f32 to vector<2x128xf32>
    %152 = arith.divf %151, %150 : vector<2x128xf32>
    %153 = vector.extract_strided_slice %128 {offsets = [0, 256], sizes = [2, 128], strides = [1, 1]} : vector<2x384xf32> to vector<2x128xf32>
    %154 = vector.extract_strided_slice %132 {offsets = [0, 256], sizes = [2, 128], strides = [1, 1]} : vector<2x384xf32> to vector<2x128xf32>
    %155 = arith.mulf %142, %154 : vector<2x128xf32>
    %156 = arith.addf %153, %155 : vector<2x128xf32>
    %157 = math.tanh %156 : vector<2x128xf32>
    %cst_48 = arith.constant 1.000000e+00 : f32
    %158 = vector.broadcast %cst_48 : f32 to vector<2x128xf32>
    %159 = arith.subf %158, %152 : vector<2x128xf32>
    %160 = arith.mulf %159, %157 : vector<2x128xf32>
    %161 = arith.mulf %152, %121 : vector<2x128xf32>
    %162 = arith.addf %160, %161 : vector<2x128xf32>
    %163 = arith.index_cast %c3_i32 : i32 to index
    %c0_49 = arith.constant 0 : index
    %c0_50 = arith.constant 0 : index
    %164 = vector.load %arg4[%163, %c0_49, %c0_50] : memref<8x2x128xf32, #tpu.memory_space<vmem>>, vector<1x2x128xf32>
    %165 = vector.shape_cast %164 : vector<1x2x128xf32> to vector<2x128xf32>
    %166 = vector.shape_cast %162 : vector<2x128xf32> to vector<1x2x128xf32>
    tpu.vector_store %arg4[%163, %c0_49, %c0_50], %166 {strides = array<i32>} : memref<8x2x128xf32, #tpu.memory_space<vmem>>, vector<1x2x128xf32>,
    %c4_i32 = arith.constant 4 : i32
    %167 = arith.index_cast %c4_i32 : i32 to index
    %c0_51 = arith.constant 0 : index
    %c0_52 = arith.constant 0 : index
    %168 = vector.load %arg1[%167, %c0_51, %c0_52] : memref<8x2x384xf32, #tpu.memory_space<vmem>>, vector<1x2x384xf32>
    %169 = vector.shape_cast %168 : vector<1x2x384xf32> to vector<2x384xf32>
    %170 = arith.truncf %162 : vector<2x128xf32> to vector<2x128xbf16>
    %cst_53 = arith.constant dense<0.000000e+00> : vector<2x384xf32>
    %171 = tpu.matmul %170, %0, %cst_53 {dimension_numbers = #tpu.dot_dimension_numbers<[1], [0], [0], [1], [0, 0, 1, 1], [], []>} : vector<2x128xbf16>, vector<128x384xbf16>, vector<2x384xf32> -> vector<2x384xf32>
    %172 = vector.broadcast %1 : vector<1x384xf32> to vector<2x384xf32>
    %173 = arith.addf %171, %172 : vector<2x384xf32>
    %174 = vector.extract_strided_slice %169 {offsets = [0, 0], sizes = [2, 128], strides = [1, 1]} : vector<2x384xf32> to vector<2x128xf32>
    %175 = vector.extract_strided_slice %173 {offsets = [0, 0], sizes = [2, 128], strides = [1, 1]} : vector<2x384xf32> to vector<2x128xf32>
    %176 = arith.addf %174, %175 : vector<2x128xf32>
    %cst_54 = arith.constant 0.000000e+00 : f32
    %177 = vector.broadcast %cst_54 : f32 to vector<2x128xf32>
    %178 = arith.subf %177, %176 : vector<2x128xf32>
    %179 = math.exp %178 : vector<2x128xf32>
    %cst_55 = arith.constant 1.000000e+00 : f32
    %180 = vector.broadcast %cst_55 : f32 to vector<2x128xf32>
    %181 = arith.addf %180, %179 : vector<2x128xf32>
    %cst_56 = arith.constant 1.000000e+00 : f32
    %182 = vector.broadcast %cst_56 : f32 to vector<2x128xf32>
    %183 = arith.divf %182, %181 : vector<2x128xf32>
    %184 = vector.extract_strided_slice %169 {offsets = [0, 128], sizes = [2, 128], strides = [1, 1]} : vector<2x384xf32> to vector<2x128xf32>
    %185 = vector.extract_strided_slice %173 {offsets = [0, 128], sizes = [2, 128], strides = [1, 1]} : vector<2x384xf32> to vector<2x128xf32>
    %186 = arith.addf %184, %185 : vector<2x128xf32>
    %cst_57 = arith.constant 0.000000e+00 : f32
    %187 = vector.broadcast %cst_57 : f32 to vector<2x128xf32>
    %188 = arith.subf %187, %186 : vector<2x128xf32>
    %189 = math.exp %188 : vector<2x128xf32>
    %cst_58 = arith.constant 1.000000e+00 : f32
    %190 = vector.broadcast %cst_58 : f32 to vector<2x128xf32>
    %191 = arith.addf %190, %189 : vector<2x128xf32>
    %cst_59 = arith.constant 1.000000e+00 : f32
    %192 = vector.broadcast %cst_59 : f32 to vector<2x128xf32>
    %193 = arith.divf %192, %191 : vector<2x128xf32>
    %194 = vector.extract_strided_slice %169 {offsets = [0, 256], sizes = [2, 128], strides = [1, 1]} : vector<2x384xf32> to vector<2x128xf32>
    %195 = vector.extract_strided_slice %173 {offsets = [0, 256], sizes = [2, 128], strides = [1, 1]} : vector<2x384xf32> to vector<2x128xf32>
    %196 = arith.mulf %183, %195 : vector<2x128xf32>
    %197 = arith.addf %194, %196 : vector<2x128xf32>
    %198 = math.tanh %197 : vector<2x128xf32>
    %cst_60 = arith.constant 1.000000e+00 : f32
    %199 = vector.broadcast %cst_60 : f32 to vector<2x128xf32>
    %200 = arith.subf %199, %193 : vector<2x128xf32>
    %201 = arith.mulf %200, %198 : vector<2x128xf32>
    %202 = arith.mulf %193, %162 : vector<2x128xf32>
    %203 = arith.addf %201, %202 : vector<2x128xf32>
    %204 = arith.index_cast %c4_i32 : i32 to index
    %c0_61 = arith.constant 0 : index
    %c0_62 = arith.constant 0 : index
    %205 = vector.load %arg4[%204, %c0_61, %c0_62] : memref<8x2x128xf32, #tpu.memory_space<vmem>>, vector<1x2x128xf32>
    %206 = vector.shape_cast %205 : vector<1x2x128xf32> to vector<2x128xf32>
    %207 = vector.shape_cast %203 : vector<2x128xf32> to vector<1x2x128xf32>
    tpu.vector_store %arg4[%204, %c0_61, %c0_62], %207 {strides = array<i32>} : memref<8x2x128xf32, #tpu.memory_space<vmem>>, vector<1x2x128xf32>,
    %c5_i32 = arith.constant 5 : i32
    %208 = arith.index_cast %c5_i32 : i32 to index
    %c0_63 = arith.constant 0 : index
    %c0_64 = arith.constant 0 : index
    %209 = vector.load %arg1[%208, %c0_63, %c0_64] : memref<8x2x384xf32, #tpu.memory_space<vmem>>, vector<1x2x384xf32>
    %210 = vector.shape_cast %209 : vector<1x2x384xf32> to vector<2x384xf32>
    %211 = arith.truncf %203 : vector<2x128xf32> to vector<2x128xbf16>
    %cst_65 = arith.constant dense<0.000000e+00> : vector<2x384xf32>
    %212 = tpu.matmul %211, %0, %cst_65 {dimension_numbers = #tpu.dot_dimension_numbers<[1], [0], [0], [1], [0, 0, 1, 1], [], []>} : vector<2x128xbf16>, vector<128x384xbf16>, vector<2x384xf32> -> vector<2x384xf32>
    %213 = vector.broadcast %1 : vector<1x384xf32> to vector<2x384xf32>
    %214 = arith.addf %212, %213 : vector<2x384xf32>
    %215 = vector.extract_strided_slice %210 {offsets = [0, 0], sizes = [2, 128], strides = [1, 1]} : vector<2x384xf32> to vector<2x128xf32>
    %216 = vector.extract_strided_slice %214 {offsets = [0, 0], sizes = [2, 128], strides = [1, 1]} : vector<2x384xf32> to vector<2x128xf32>
    %217 = arith.addf %215, %216 : vector<2x128xf32>
    %cst_66 = arith.constant 0.000000e+00 : f32
    %218 = vector.broadcast %cst_66 : f32 to vector<2x128xf32>
    %219 = arith.subf %218, %217 : vector<2x128xf32>
    %220 = math.exp %219 : vector<2x128xf32>
    %cst_67 = arith.constant 1.000000e+00 : f32
    %221 = vector.broadcast %cst_67 : f32 to vector<2x128xf32>
    %222 = arith.addf %221, %220 : vector<2x128xf32>
    %cst_68 = arith.constant 1.000000e+00 : f32
    %223 = vector.broadcast %cst_68 : f32 to vector<2x128xf32>
    %224 = arith.divf %223, %222 : vector<2x128xf32>
    %225 = vector.extract_strided_slice %210 {offsets = [0, 128], sizes = [2, 128], strides = [1, 1]} : vector<2x384xf32> to vector<2x128xf32>
    %226 = vector.extract_strided_slice %214 {offsets = [0, 128], sizes = [2, 128], strides = [1, 1]} : vector<2x384xf32> to vector<2x128xf32>
    %227 = arith.addf %225, %226 : vector<2x128xf32>
    %cst_69 = arith.constant 0.000000e+00 : f32
    %228 = vector.broadcast %cst_69 : f32 to vector<2x128xf32>
    %229 = arith.subf %228, %227 : vector<2x128xf32>
    %230 = math.exp %229 : vector<2x128xf32>
    %cst_70 = arith.constant 1.000000e+00 : f32
    %231 = vector.broadcast %cst_70 : f32 to vector<2x128xf32>
    %232 = arith.addf %231, %230 : vector<2x128xf32>
    %cst_71 = arith.constant 1.000000e+00 : f32
    %233 = vector.broadcast %cst_71 : f32 to vector<2x128xf32>
    %234 = arith.divf %233, %232 : vector<2x128xf32>
    %235 = vector.extract_strided_slice %210 {offsets = [0, 256], sizes = [2, 128], strides = [1, 1]} : vector<2x384xf32> to vector<2x128xf32>
    %236 = vector.extract_strided_slice %214 {offsets = [0, 256], sizes = [2, 128], strides = [1, 1]} : vector<2x384xf32> to vector<2x128xf32>
    %237 = arith.mulf %224, %236 : vector<2x128xf32>
    %238 = arith.addf %235, %237 : vector<2x128xf32>
    %239 = math.tanh %238 : vector<2x128xf32>
    %cst_72 = arith.constant 1.000000e+00 : f32
    %240 = vector.broadcast %cst_72 : f32 to vector<2x128xf32>
    %241 = arith.subf %240, %234 : vector<2x128xf32>
    %242 = arith.mulf %241, %239 : vector<2x128xf32>
    %243 = arith.mulf %234, %203 : vector<2x128xf32>
    %244 = arith.addf %242, %243 : vector<2x128xf32>
    %245 = arith.index_cast %c5_i32 : i32 to index
    %c0_73 = arith.constant 0 : index
    %c0_74 = arith.constant 0 : index
    %246 = vector.load %arg4[%245, %c0_73, %c0_74] : memref<8x2x128xf32, #tpu.memory_space<vmem>>, vector<1x2x128xf32>
    %247 = vector.shape_cast %246 : vector<1x2x128xf32> to vector<2x128xf32>
    %248 = vector.shape_cast %244 : vector<2x128xf32> to vector<1x2x128xf32>
    tpu.vector_store %arg4[%245, %c0_73, %c0_74], %248 {strides = array<i32>} : memref<8x2x128xf32, #tpu.memory_space<vmem>>, vector<1x2x128xf32>,
    %c6_i32 = arith.constant 6 : i32
    %249 = arith.index_cast %c6_i32 : i32 to index
    %c0_75 = arith.constant 0 : index
    %c0_76 = arith.constant 0 : index
    %250 = vector.load %arg1[%249, %c0_75, %c0_76] : memref<8x2x384xf32, #tpu.memory_space<vmem>>, vector<1x2x384xf32>
    %251 = vector.shape_cast %250 : vector<1x2x384xf32> to vector<2x384xf32>
    %252 = arith.truncf %244 : vector<2x128xf32> to vector<2x128xbf16>
    %cst_77 = arith.constant dense<0.000000e+00> : vector<2x384xf32>
    %253 = tpu.matmul %252, %0, %cst_77 {dimension_numbers = #tpu.dot_dimension_numbers<[1], [0], [0], [1], [0, 0, 1, 1], [], []>} : vector<2x128xbf16>, vector<128x384xbf16>, vector<2x384xf32> -> vector<2x384xf32>
    %254 = vector.broadcast %1 : vector<1x384xf32> to vector<2x384xf32>
    %255 = arith.addf %253, %254 : vector<2x384xf32>
    %256 = vector.extract_strided_slice %251 {offsets = [0, 0], sizes = [2, 128], strides = [1, 1]} : vector<2x384xf32> to vector<2x128xf32>
    %257 = vector.extract_strided_slice %255 {offsets = [0, 0], sizes = [2, 128], strides = [1, 1]} : vector<2x384xf32> to vector<2x128xf32>
    %258 = arith.addf %256, %257 : vector<2x128xf32>
    %cst_78 = arith.constant 0.000000e+00 : f32
    %259 = vector.broadcast %cst_78 : f32 to vector<2x128xf32>
    %260 = arith.subf %259, %258 : vector<2x128xf32>
    %261 = math.exp %260 : vector<2x128xf32>
    %cst_79 = arith.constant 1.000000e+00 : f32
    %262 = vector.broadcast %cst_79 : f32 to vector<2x128xf32>
    %263 = arith.addf %262, %261 : vector<2x128xf32>
    %cst_80 = arith.constant 1.000000e+00 : f32
    %264 = vector.broadcast %cst_80 : f32 to vector<2x128xf32>
    %265 = arith.divf %264, %263 : vector<2x128xf32>
    %266 = vector.extract_strided_slice %251 {offsets = [0, 128], sizes = [2, 128], strides = [1, 1]} : vector<2x384xf32> to vector<2x128xf32>
    %267 = vector.extract_strided_slice %255 {offsets = [0, 128], sizes = [2, 128], strides = [1, 1]} : vector<2x384xf32> to vector<2x128xf32>
    %268 = arith.addf %266, %267 : vector<2x128xf32>
    %cst_81 = arith.constant 0.000000e+00 : f32
    %269 = vector.broadcast %cst_81 : f32 to vector<2x128xf32>
    %270 = arith.subf %269, %268 : vector<2x128xf32>
    %271 = math.exp %270 : vector<2x128xf32>
    %cst_82 = arith.constant 1.000000e+00 : f32
    %272 = vector.broadcast %cst_82 : f32 to vector<2x128xf32>
    %273 = arith.addf %272, %271 : vector<2x128xf32>
    %cst_83 = arith.constant 1.000000e+00 : f32
    %274 = vector.broadcast %cst_83 : f32 to vector<2x128xf32>
    %275 = arith.divf %274, %273 : vector<2x128xf32>
    %276 = vector.extract_strided_slice %251 {offsets = [0, 256], sizes = [2, 128], strides = [1, 1]} : vector<2x384xf32> to vector<2x128xf32>
    %277 = vector.extract_strided_slice %255 {offsets = [0, 256], sizes = [2, 128], strides = [1, 1]} : vector<2x384xf32> to vector<2x128xf32>
    %278 = arith.mulf %265, %277 : vector<2x128xf32>
    %279 = arith.addf %276, %278 : vector<2x128xf32>
    %280 = math.tanh %279 : vector<2x128xf32>
    %cst_84 = arith.constant 1.000000e+00 : f32
    %281 = vector.broadcast %cst_84 : f32 to vector<2x128xf32>
    %282 = arith.subf %281, %275 : vector<2x128xf32>
    %283 = arith.mulf %282, %280 : vector<2x128xf32>
    %284 = arith.mulf %275, %244 : vector<2x128xf32>
    %285 = arith.addf %283, %284 : vector<2x128xf32>
    %286 = arith.index_cast %c6_i32 : i32 to index
    %c0_85 = arith.constant 0 : index
    %c0_86 = arith.constant 0 : index
    %287 = vector.load %arg4[%286, %c0_85, %c0_86] : memref<8x2x128xf32, #tpu.memory_space<vmem>>, vector<1x2x128xf32>
    %288 = vector.shape_cast %287 : vector<1x2x128xf32> to vector<2x128xf32>
    %289 = vector.shape_cast %285 : vector<2x128xf32> to vector<1x2x128xf32>
    tpu.vector_store %arg4[%286, %c0_85, %c0_86], %289 {strides = array<i32>} : memref<8x2x128xf32, #tpu.memory_space<vmem>>, vector<1x2x128xf32>,
    %c7_i32 = arith.constant 7 : i32
    %290 = arith.index_cast %c7_i32 : i32 to index
    %c0_87 = arith.constant 0 : index
    %c0_88 = arith.constant 0 : index
    %291 = vector.load %arg1[%290, %c0_87, %c0_88] : memref<8x2x384xf32, #tpu.memory_space<vmem>>, vector<1x2x384xf32>
    %292 = vector.shape_cast %291 : vector<1x2x384xf32> to vector<2x384xf32>
    %293 = arith.truncf %285 : vector<2x128xf32> to vector<2x128xbf16>
    %cst_89 = arith.constant dense<0.000000e+00> : vector<2x384xf32>
    %294 = tpu.matmul %293, %0, %cst_89 {dimension_numbers = #tpu.dot_dimension_numbers<[1], [0], [0], [1], [0, 0, 1, 1], [], []>} : vector<2x128xbf16>, vector<128x384xbf16>, vector<2x384xf32> -> vector<2x384xf32>
    %295 = vector.broadcast %1 : vector<1x384xf32> to vector<2x384xf32>
    %296 = arith.addf %294, %295 : vector<2x384xf32>
    %297 = vector.extract_strided_slice %292 {offsets = [0, 0], sizes = [2, 128], strides = [1, 1]} : vector<2x384xf32> to vector<2x128xf32>
    %298 = vector.extract_strided_slice %296 {offsets = [0, 0], sizes = [2, 128], strides = [1, 1]} : vector<2x384xf32> to vector<2x128xf32>
    %299 = arith.addf %297, %298 : vector<2x128xf32>
    %cst_90 = arith.constant 0.000000e+00 : f32
    %300 = vector.broadcast %cst_90 : f32 to vector<2x128xf32>
    %301 = arith.subf %300, %299 : vector<2x128xf32>
    %302 = math.exp %301 : vector<2x128xf32>
    %cst_91 = arith.constant 1.000000e+00 : f32
    %303 = vector.broadcast %cst_91 : f32 to vector<2x128xf32>
    %304 = arith.addf %303, %302 : vector<2x128xf32>
    %cst_92 = arith.constant 1.000000e+00 : f32
    %305 = vector.broadcast %cst_92 : f32 to vector<2x128xf32>
    %306 = arith.divf %305, %304 : vector<2x128xf32>
    %307 = vector.extract_strided_slice %292 {offsets = [0, 128], sizes = [2, 128], strides = [1, 1]} : vector<2x384xf32> to vector<2x128xf32>
    %308 = vector.extract_strided_slice %296 {offsets = [0, 128], sizes = [2, 128], strides = [1, 1]} : vector<2x384xf32> to vector<2x128xf32>
    %309 = arith.addf %307, %308 : vector<2x128xf32>
    %cst_93 = arith.constant 0.000000e+00 : f32
    %310 = vector.broadcast %cst_93 : f32 to vector<2x128xf32>
    %311 = arith.subf %310, %309 : vector<2x128xf32>
    %312 = math.exp %311 : vector<2x128xf32>
    %cst_94 = arith.constant 1.000000e+00 : f32
    %313 = vector.broadcast %cst_94 : f32 to vector<2x128xf32>
    %314 = arith.addf %313, %312 : vector<2x128xf32>
    %cst_95 = arith.constant 1.000000e+00 : f32
    %315 = vector.broadcast %cst_95 : f32 to vector<2x128xf32>
    %316 = arith.divf %315, %314 : vector<2x128xf32>
    %317 = vector.extract_strided_slice %292 {offsets = [0, 256], sizes = [2, 128], strides = [1, 1]} : vector<2x384xf32> to vector<2x128xf32>
    %318 = vector.extract_strided_slice %296 {offsets = [0, 256], sizes = [2, 128], strides = [1, 1]} : vector<2x384xf32> to vector<2x128xf32>
    %319 = arith.mulf %306, %318 : vector<2x128xf32>
    %320 = arith.addf %317, %319 : vector<2x128xf32>
    %321 = math.tanh %320 : vector<2x128xf32>
    %cst_96 = arith.constant 1.000000e+00 : f32
    %322 = vector.broadcast %cst_96 : f32 to vector<2x128xf32>
    %323 = arith.subf %322, %316 : vector<2x128xf32>
    %324 = arith.mulf %323, %321 : vector<2x128xf32>
    %325 = arith.mulf %316, %285 : vector<2x128xf32>
    %326 = arith.addf %324, %325 : vector<2x128xf32>
    %327 = arith.index_cast %c7_i32 : i32 to index
    %c0_97 = arith.constant 0 : index
    %c0_98 = arith.constant 0 : index
    %328 = vector.load %arg4[%327, %c0_97, %c0_98] : memref<8x2x128xf32, #tpu.memory_space<vmem>>, vector<1x2x128xf32>
    %329 = vector.shape_cast %328 : vector<1x2x128xf32> to vector<2x128xf32>
    %330 = vector.shape_cast %326 : vector<2x128xf32> to vector<1x2x128xf32>
    tpu.vector_store %arg4[%327, %c0_97, %c0_98], %330 {strides = array<i32>} : memref<8x2x128xf32, #tpu.memory_space<vmem>>, vector<1x2x128xf32>,
    %c8_i32 = arith.constant 8 : i32
    return
  }
  func.func @transform_0(%arg0: i32) -> (i32, i32, i32) {
    %c0_i32 = arith.constant 0 : i32
    %c0_i32_0 = arith.constant 0 : i32
    %c0_i32_1 = arith.constant 0 : i32
    %c0_i32_2 = arith.constant 0 : i32
    return %c0_i32, %c0_i32_0, %c0_i32_1 : i32, i32, i32
  }
  func.func @transform_1(%arg0: i32) -> (i32, i32) {
    %c0_i32 = arith.constant 0 : i32
    %c0_i32_0 = arith.constant 0 : i32
    %c0_i32_1 = arith.constant 0 : i32
    return %c0_i32, %c0_i32_0 : i32, i32
  }
  func.func @transform_2(%arg0: i32) -> (i32, i32) {
    %c0_i32 = arith.constant 0 : i32
    %c0_i32_0 = arith.constant 0 : i32
    %c0_i32_1 = arith.constant 0 : i32
    return %c0_i32, %c0_i32_0 : i32, i32
  }
  func.func @transform_3(%arg0: i32) -> (i32, i32, i32) {
    %c0_i32 = arith.constant 0 : i32
    %c0_i32_0 = arith.constant 0 : i32
    %c0_i32_1 = arith.constant 0 : i32
    %c0_i32_2 = arith.constant 0 : i32
    return %c0_i32, %c0_i32_0, %c0_i32_1 : i32, i32, i32
  }
}

module attributes {stable_mosaic.version = 11 : i64} {
  func.func @_filtered_noise_kernel(%arg0: i32, %arg1: memref<8x17xf32, #tpu.memory_space<vmem>>, %arg2: memref<16x17x128xf32, #tpu.memory_space<vmem>>, %arg3: memref<8x16xf32, #tpu.memory_space<vmem>>, %arg4: memref<8x128xf32, #tpu.memory_space<vmem>>) attributes {dimension_semantics = [#tpu.dimension_semantics<parallel>], iteration_bounds = array<i64: 2>, scalar_prefetch = 0 : i64, scratch_operands = 0 : i64, tpu.core_type = #tpu.core_type<tc>, window_params = [{transform_indices = @transform_0, window_bounds = array<i64: 8, 17>}, {pipeline_mode = #tpu.pipeline_mode<synchronous>, transform_indices = @transform_1, window_bounds = array<i64: 16, 17, 128>}, {transform_indices = @transform_2, window_bounds = array<i64: 8, 16>}, {transform_indices = @transform_3, window_bounds = array<i64: 8, 128>}]} {
    %c0 = arith.constant 0 : index
    %c0_0 = arith.constant 0 : index
    %0 = vector.load %arg1[%c0, %c0_0] : memref<8x17xf32, #tpu.memory_space<vmem>>, vector<8x17xf32>
    %c0_1 = arith.constant 0 : index
    %c0_2 = arith.constant 0 : index
    %1 = vector.load %arg3[%c0_1, %c0_2] : memref<8x16xf32, #tpu.memory_space<vmem>>, vector<8x16xf32>
    %2 = vector.extract_strided_slice %1 {offsets = [0, 0], sizes = [8, 1], strides = [1, 1]} : vector<8x16xf32> to vector<8x1xf32>
    %3 = vector.broadcast %2 : vector<8x1xf32> to vector<8x17xf32>
    %4 = arith.mulf %3, %0 : vector<8x17xf32>
    %c0_3 = arith.constant 0 : index
    %c0_4 = arith.constant 0 : index
    %c0_5 = arith.constant 0 : index
    %5 = vector.load %arg2[%c0_3, %c0_4, %c0_5] : memref<16x17x128xf32, #tpu.memory_space<vmem>>, vector<1x17x128xf32>
    %6 = vector.shape_cast %5 : vector<1x17x128xf32> to vector<17x128xf32>
    %cst = arith.constant dense<0.000000e+00> : vector<8x128xf32>
    %7 = tpu.matmul %4, %6, %cst {dimension_numbers = #tpu.dot_dimension_numbers<[1], [0], [0], [1], [0, 0, 1, 1], [], []>} : vector<8x17xf32>, vector<17x128xf32>, vector<8x128xf32> -> vector<8x128xf32>
    %8 = vector.extract_strided_slice %1 {offsets = [0, 1], sizes = [8, 1], strides = [1, 1]} : vector<8x16xf32> to vector<8x1xf32>
    %9 = vector.broadcast %8 : vector<8x1xf32> to vector<8x17xf32>
    %10 = arith.mulf %9, %0 : vector<8x17xf32>
    %c1 = arith.constant 1 : index
    %c0_6 = arith.constant 0 : index
    %c0_7 = arith.constant 0 : index
    %11 = vector.load %arg2[%c1, %c0_6, %c0_7] : memref<16x17x128xf32, #tpu.memory_space<vmem>>, vector<1x17x128xf32>
    %12 = vector.shape_cast %11 : vector<1x17x128xf32> to vector<17x128xf32>
    %cst_8 = arith.constant dense<0.000000e+00> : vector<8x128xf32>
    %13 = tpu.matmul %10, %12, %cst_8 {dimension_numbers = #tpu.dot_dimension_numbers<[1], [0], [0], [1], [0, 0, 1, 1], [], []>} : vector<8x17xf32>, vector<17x128xf32>, vector<8x128xf32> -> vector<8x128xf32>
    %14 = arith.addf %7, %13 : vector<8x128xf32>
    %15 = vector.extract_strided_slice %1 {offsets = [0, 2], sizes = [8, 1], strides = [1, 1]} : vector<8x16xf32> to vector<8x1xf32>
    %16 = vector.broadcast %15 : vector<8x1xf32> to vector<8x17xf32>
    %17 = arith.mulf %16, %0 : vector<8x17xf32>
    %c2 = arith.constant 2 : index
    %c0_9 = arith.constant 0 : index
    %c0_10 = arith.constant 0 : index
    %18 = vector.load %arg2[%c2, %c0_9, %c0_10] : memref<16x17x128xf32, #tpu.memory_space<vmem>>, vector<1x17x128xf32>
    %19 = vector.shape_cast %18 : vector<1x17x128xf32> to vector<17x128xf32>
    %cst_11 = arith.constant dense<0.000000e+00> : vector<8x128xf32>
    %20 = tpu.matmul %17, %19, %cst_11 {dimension_numbers = #tpu.dot_dimension_numbers<[1], [0], [0], [1], [0, 0, 1, 1], [], []>} : vector<8x17xf32>, vector<17x128xf32>, vector<8x128xf32> -> vector<8x128xf32>
    %21 = arith.addf %14, %20 : vector<8x128xf32>
    %22 = vector.extract_strided_slice %1 {offsets = [0, 3], sizes = [8, 1], strides = [1, 1]} : vector<8x16xf32> to vector<8x1xf32>
    %23 = vector.broadcast %22 : vector<8x1xf32> to vector<8x17xf32>
    %24 = arith.mulf %23, %0 : vector<8x17xf32>
    %c3 = arith.constant 3 : index
    %c0_12 = arith.constant 0 : index
    %c0_13 = arith.constant 0 : index
    %25 = vector.load %arg2[%c3, %c0_12, %c0_13] : memref<16x17x128xf32, #tpu.memory_space<vmem>>, vector<1x17x128xf32>
    %26 = vector.shape_cast %25 : vector<1x17x128xf32> to vector<17x128xf32>
    %cst_14 = arith.constant dense<0.000000e+00> : vector<8x128xf32>
    %27 = tpu.matmul %24, %26, %cst_14 {dimension_numbers = #tpu.dot_dimension_numbers<[1], [0], [0], [1], [0, 0, 1, 1], [], []>} : vector<8x17xf32>, vector<17x128xf32>, vector<8x128xf32> -> vector<8x128xf32>
    %28 = arith.addf %21, %27 : vector<8x128xf32>
    %29 = vector.extract_strided_slice %1 {offsets = [0, 4], sizes = [8, 1], strides = [1, 1]} : vector<8x16xf32> to vector<8x1xf32>
    %30 = vector.broadcast %29 : vector<8x1xf32> to vector<8x17xf32>
    %31 = arith.mulf %30, %0 : vector<8x17xf32>
    %c4 = arith.constant 4 : index
    %c0_15 = arith.constant 0 : index
    %c0_16 = arith.constant 0 : index
    %32 = vector.load %arg2[%c4, %c0_15, %c0_16] : memref<16x17x128xf32, #tpu.memory_space<vmem>>, vector<1x17x128xf32>
    %33 = vector.shape_cast %32 : vector<1x17x128xf32> to vector<17x128xf32>
    %cst_17 = arith.constant dense<0.000000e+00> : vector<8x128xf32>
    %34 = tpu.matmul %31, %33, %cst_17 {dimension_numbers = #tpu.dot_dimension_numbers<[1], [0], [0], [1], [0, 0, 1, 1], [], []>} : vector<8x17xf32>, vector<17x128xf32>, vector<8x128xf32> -> vector<8x128xf32>
    %35 = arith.addf %28, %34 : vector<8x128xf32>
    %36 = vector.extract_strided_slice %1 {offsets = [0, 5], sizes = [8, 1], strides = [1, 1]} : vector<8x16xf32> to vector<8x1xf32>
    %37 = vector.broadcast %36 : vector<8x1xf32> to vector<8x17xf32>
    %38 = arith.mulf %37, %0 : vector<8x17xf32>
    %c5 = arith.constant 5 : index
    %c0_18 = arith.constant 0 : index
    %c0_19 = arith.constant 0 : index
    %39 = vector.load %arg2[%c5, %c0_18, %c0_19] : memref<16x17x128xf32, #tpu.memory_space<vmem>>, vector<1x17x128xf32>
    %40 = vector.shape_cast %39 : vector<1x17x128xf32> to vector<17x128xf32>
    %cst_20 = arith.constant dense<0.000000e+00> : vector<8x128xf32>
    %41 = tpu.matmul %38, %40, %cst_20 {dimension_numbers = #tpu.dot_dimension_numbers<[1], [0], [0], [1], [0, 0, 1, 1], [], []>} : vector<8x17xf32>, vector<17x128xf32>, vector<8x128xf32> -> vector<8x128xf32>
    %42 = arith.addf %35, %41 : vector<8x128xf32>
    %43 = vector.extract_strided_slice %1 {offsets = [0, 6], sizes = [8, 1], strides = [1, 1]} : vector<8x16xf32> to vector<8x1xf32>
    %44 = vector.broadcast %43 : vector<8x1xf32> to vector<8x17xf32>
    %45 = arith.mulf %44, %0 : vector<8x17xf32>
    %c6 = arith.constant 6 : index
    %c0_21 = arith.constant 0 : index
    %c0_22 = arith.constant 0 : index
    %46 = vector.load %arg2[%c6, %c0_21, %c0_22] : memref<16x17x128xf32, #tpu.memory_space<vmem>>, vector<1x17x128xf32>
    %47 = vector.shape_cast %46 : vector<1x17x128xf32> to vector<17x128xf32>
    %cst_23 = arith.constant dense<0.000000e+00> : vector<8x128xf32>
    %48 = tpu.matmul %45, %47, %cst_23 {dimension_numbers = #tpu.dot_dimension_numbers<[1], [0], [0], [1], [0, 0, 1, 1], [], []>} : vector<8x17xf32>, vector<17x128xf32>, vector<8x128xf32> -> vector<8x128xf32>
    %49 = arith.addf %42, %48 : vector<8x128xf32>
    %50 = vector.extract_strided_slice %1 {offsets = [0, 7], sizes = [8, 1], strides = [1, 1]} : vector<8x16xf32> to vector<8x1xf32>
    %51 = vector.broadcast %50 : vector<8x1xf32> to vector<8x17xf32>
    %52 = arith.mulf %51, %0 : vector<8x17xf32>
    %c7 = arith.constant 7 : index
    %c0_24 = arith.constant 0 : index
    %c0_25 = arith.constant 0 : index
    %53 = vector.load %arg2[%c7, %c0_24, %c0_25] : memref<16x17x128xf32, #tpu.memory_space<vmem>>, vector<1x17x128xf32>
    %54 = vector.shape_cast %53 : vector<1x17x128xf32> to vector<17x128xf32>
    %cst_26 = arith.constant dense<0.000000e+00> : vector<8x128xf32>
    %55 = tpu.matmul %52, %54, %cst_26 {dimension_numbers = #tpu.dot_dimension_numbers<[1], [0], [0], [1], [0, 0, 1, 1], [], []>} : vector<8x17xf32>, vector<17x128xf32>, vector<8x128xf32> -> vector<8x128xf32>
    %56 = arith.addf %49, %55 : vector<8x128xf32>
    %57 = vector.extract_strided_slice %1 {offsets = [0, 8], sizes = [8, 1], strides = [1, 1]} : vector<8x16xf32> to vector<8x1xf32>
    %58 = vector.broadcast %57 : vector<8x1xf32> to vector<8x17xf32>
    %59 = arith.mulf %58, %0 : vector<8x17xf32>
    %c8 = arith.constant 8 : index
    %c0_27 = arith.constant 0 : index
    %c0_28 = arith.constant 0 : index
    %60 = vector.load %arg2[%c8, %c0_27, %c0_28] : memref<16x17x128xf32, #tpu.memory_space<vmem>>, vector<1x17x128xf32>
    %61 = vector.shape_cast %60 : vector<1x17x128xf32> to vector<17x128xf32>
    %cst_29 = arith.constant dense<0.000000e+00> : vector<8x128xf32>
    %62 = tpu.matmul %59, %61, %cst_29 {dimension_numbers = #tpu.dot_dimension_numbers<[1], [0], [0], [1], [0, 0, 1, 1], [], []>} : vector<8x17xf32>, vector<17x128xf32>, vector<8x128xf32> -> vector<8x128xf32>
    %63 = arith.addf %56, %62 : vector<8x128xf32>
    %64 = vector.extract_strided_slice %1 {offsets = [0, 9], sizes = [8, 1], strides = [1, 1]} : vector<8x16xf32> to vector<8x1xf32>
    %65 = vector.broadcast %64 : vector<8x1xf32> to vector<8x17xf32>
    %66 = arith.mulf %65, %0 : vector<8x17xf32>
    %c9 = arith.constant 9 : index
    %c0_30 = arith.constant 0 : index
    %c0_31 = arith.constant 0 : index
    %67 = vector.load %arg2[%c9, %c0_30, %c0_31] : memref<16x17x128xf32, #tpu.memory_space<vmem>>, vector<1x17x128xf32>
    %68 = vector.shape_cast %67 : vector<1x17x128xf32> to vector<17x128xf32>
    %cst_32 = arith.constant dense<0.000000e+00> : vector<8x128xf32>
    %69 = tpu.matmul %66, %68, %cst_32 {dimension_numbers = #tpu.dot_dimension_numbers<[1], [0], [0], [1], [0, 0, 1, 1], [], []>} : vector<8x17xf32>, vector<17x128xf32>, vector<8x128xf32> -> vector<8x128xf32>
    %70 = arith.addf %63, %69 : vector<8x128xf32>
    %71 = vector.extract_strided_slice %1 {offsets = [0, 10], sizes = [8, 1], strides = [1, 1]} : vector<8x16xf32> to vector<8x1xf32>
    %72 = vector.broadcast %71 : vector<8x1xf32> to vector<8x17xf32>
    %73 = arith.mulf %72, %0 : vector<8x17xf32>
    %c10 = arith.constant 10 : index
    %c0_33 = arith.constant 0 : index
    %c0_34 = arith.constant 0 : index
    %74 = vector.load %arg2[%c10, %c0_33, %c0_34] : memref<16x17x128xf32, #tpu.memory_space<vmem>>, vector<1x17x128xf32>
    %75 = vector.shape_cast %74 : vector<1x17x128xf32> to vector<17x128xf32>
    %cst_35 = arith.constant dense<0.000000e+00> : vector<8x128xf32>
    %76 = tpu.matmul %73, %75, %cst_35 {dimension_numbers = #tpu.dot_dimension_numbers<[1], [0], [0], [1], [0, 0, 1, 1], [], []>} : vector<8x17xf32>, vector<17x128xf32>, vector<8x128xf32> -> vector<8x128xf32>
    %77 = arith.addf %70, %76 : vector<8x128xf32>
    %78 = vector.extract_strided_slice %1 {offsets = [0, 11], sizes = [8, 1], strides = [1, 1]} : vector<8x16xf32> to vector<8x1xf32>
    %79 = vector.broadcast %78 : vector<8x1xf32> to vector<8x17xf32>
    %80 = arith.mulf %79, %0 : vector<8x17xf32>
    %c11 = arith.constant 11 : index
    %c0_36 = arith.constant 0 : index
    %c0_37 = arith.constant 0 : index
    %81 = vector.load %arg2[%c11, %c0_36, %c0_37] : memref<16x17x128xf32, #tpu.memory_space<vmem>>, vector<1x17x128xf32>
    %82 = vector.shape_cast %81 : vector<1x17x128xf32> to vector<17x128xf32>
    %cst_38 = arith.constant dense<0.000000e+00> : vector<8x128xf32>
    %83 = tpu.matmul %80, %82, %cst_38 {dimension_numbers = #tpu.dot_dimension_numbers<[1], [0], [0], [1], [0, 0, 1, 1], [], []>} : vector<8x17xf32>, vector<17x128xf32>, vector<8x128xf32> -> vector<8x128xf32>
    %84 = arith.addf %77, %83 : vector<8x128xf32>
    %85 = vector.extract_strided_slice %1 {offsets = [0, 12], sizes = [8, 1], strides = [1, 1]} : vector<8x16xf32> to vector<8x1xf32>
    %86 = vector.broadcast %85 : vector<8x1xf32> to vector<8x17xf32>
    %87 = arith.mulf %86, %0 : vector<8x17xf32>
    %c12 = arith.constant 12 : index
    %c0_39 = arith.constant 0 : index
    %c0_40 = arith.constant 0 : index
    %88 = vector.load %arg2[%c12, %c0_39, %c0_40] : memref<16x17x128xf32, #tpu.memory_space<vmem>>, vector<1x17x128xf32>
    %89 = vector.shape_cast %88 : vector<1x17x128xf32> to vector<17x128xf32>
    %cst_41 = arith.constant dense<0.000000e+00> : vector<8x128xf32>
    %90 = tpu.matmul %87, %89, %cst_41 {dimension_numbers = #tpu.dot_dimension_numbers<[1], [0], [0], [1], [0, 0, 1, 1], [], []>} : vector<8x17xf32>, vector<17x128xf32>, vector<8x128xf32> -> vector<8x128xf32>
    %91 = arith.addf %84, %90 : vector<8x128xf32>
    %92 = vector.extract_strided_slice %1 {offsets = [0, 13], sizes = [8, 1], strides = [1, 1]} : vector<8x16xf32> to vector<8x1xf32>
    %93 = vector.broadcast %92 : vector<8x1xf32> to vector<8x17xf32>
    %94 = arith.mulf %93, %0 : vector<8x17xf32>
    %c13 = arith.constant 13 : index
    %c0_42 = arith.constant 0 : index
    %c0_43 = arith.constant 0 : index
    %95 = vector.load %arg2[%c13, %c0_42, %c0_43] : memref<16x17x128xf32, #tpu.memory_space<vmem>>, vector<1x17x128xf32>
    %96 = vector.shape_cast %95 : vector<1x17x128xf32> to vector<17x128xf32>
    %cst_44 = arith.constant dense<0.000000e+00> : vector<8x128xf32>
    %97 = tpu.matmul %94, %96, %cst_44 {dimension_numbers = #tpu.dot_dimension_numbers<[1], [0], [0], [1], [0, 0, 1, 1], [], []>} : vector<8x17xf32>, vector<17x128xf32>, vector<8x128xf32> -> vector<8x128xf32>
    %98 = arith.addf %91, %97 : vector<8x128xf32>
    %99 = vector.extract_strided_slice %1 {offsets = [0, 14], sizes = [8, 1], strides = [1, 1]} : vector<8x16xf32> to vector<8x1xf32>
    %100 = vector.broadcast %99 : vector<8x1xf32> to vector<8x17xf32>
    %101 = arith.mulf %100, %0 : vector<8x17xf32>
    %c14 = arith.constant 14 : index
    %c0_45 = arith.constant 0 : index
    %c0_46 = arith.constant 0 : index
    %102 = vector.load %arg2[%c14, %c0_45, %c0_46] : memref<16x17x128xf32, #tpu.memory_space<vmem>>, vector<1x17x128xf32>
    %103 = vector.shape_cast %102 : vector<1x17x128xf32> to vector<17x128xf32>
    %cst_47 = arith.constant dense<0.000000e+00> : vector<8x128xf32>
    %104 = tpu.matmul %101, %103, %cst_47 {dimension_numbers = #tpu.dot_dimension_numbers<[1], [0], [0], [1], [0, 0, 1, 1], [], []>} : vector<8x17xf32>, vector<17x128xf32>, vector<8x128xf32> -> vector<8x128xf32>
    %105 = arith.addf %98, %104 : vector<8x128xf32>
    %106 = vector.extract_strided_slice %1 {offsets = [0, 15], sizes = [8, 1], strides = [1, 1]} : vector<8x16xf32> to vector<8x1xf32>
    %107 = vector.broadcast %106 : vector<8x1xf32> to vector<8x17xf32>
    %108 = arith.mulf %107, %0 : vector<8x17xf32>
    %c15 = arith.constant 15 : index
    %c0_48 = arith.constant 0 : index
    %c0_49 = arith.constant 0 : index
    %109 = vector.load %arg2[%c15, %c0_48, %c0_49] : memref<16x17x128xf32, #tpu.memory_space<vmem>>, vector<1x17x128xf32>
    %110 = vector.shape_cast %109 : vector<1x17x128xf32> to vector<17x128xf32>
    %cst_50 = arith.constant dense<0.000000e+00> : vector<8x128xf32>
    %111 = tpu.matmul %108, %110, %cst_50 {dimension_numbers = #tpu.dot_dimension_numbers<[1], [0], [0], [1], [0, 0, 1, 1], [], []>} : vector<8x17xf32>, vector<17x128xf32>, vector<8x128xf32> -> vector<8x128xf32>
    %112 = arith.addf %105, %111 : vector<8x128xf32>
    %c0_51 = arith.constant 0 : index
    %c0_52 = arith.constant 0 : index
    %113 = vector.load %arg4[%c0_51, %c0_52] : memref<8x128xf32, #tpu.memory_space<vmem>>, vector<8x128xf32>
    tpu.vector_store %arg4[%c0_51, %c0_52], %112 {strides = array<i32>} : memref<8x128xf32, #tpu.memory_space<vmem>>, vector<8x128xf32>,
    return
  }
  func.func @transform_0(%arg0: i32) -> (i32, i32) {
    %c0_i32 = arith.constant 0 : i32
    %c0_i32_0 = arith.constant 0 : i32
    return %arg0, %c0_i32 : i32, i32
  }
  func.func @transform_1(%arg0: i32) -> (i32, i32, i32) {
    %c0_i32 = arith.constant 0 : i32
    %c0_i32_0 = arith.constant 0 : i32
    %c0_i32_1 = arith.constant 0 : i32
    %c0_i32_2 = arith.constant 0 : i32
    return %c0_i32, %c0_i32_0, %c0_i32_1 : i32, i32, i32
  }
  func.func @transform_2(%arg0: i32) -> (i32, i32) {
    %c0_i32 = arith.constant 0 : i32
    %c0_i32_0 = arith.constant 0 : i32
    return %arg0, %c0_i32 : i32, i32
  }
  func.func @transform_3(%arg0: i32) -> (i32, i32) {
    %c0_i32 = arith.constant 0 : i32
    %c0_i32_0 = arith.constant 0 : i32
    return %arg0, %c0_i32 : i32, i32
  }
}

module attributes {stable_mosaic.version = 11 : i64} {
  func.func @_harmonic_kernel(%arg0: i32, %arg1: memref<14x8xf32, #tpu.memory_space<vmem>>, %arg2: memref<14x8xf32, #tpu.memory_space<vmem>>, %arg3: memref<2x8xf32, #tpu.memory_space<vmem>>, %arg4: memref<8x128xf32, #tpu.memory_space<vmem>>, %arg5: memref<8x128xf32, #tpu.memory_space<vmem>>, %arg6: memref<2x14xf32, #tpu.memory_space<vmem>>, %arg7: memref<2x128xf32, #tpu.memory_space<vmem>>) attributes {dimension_semantics = [#tpu.dimension_semantics<arbitrary>], iteration_bounds = array<i64: 1>, scalar_prefetch = 0 : i64, scratch_operands = 0 : i64, tpu.core_type = #tpu.core_type<tc>, window_params = [{pipeline_mode = #tpu.pipeline_mode<synchronous>, transform_indices = @transform_0, window_bounds = array<i64: 14, 8>}, {pipeline_mode = #tpu.pipeline_mode<synchronous>, transform_indices = @transform_1, window_bounds = array<i64: 14, 8>}, {pipeline_mode = #tpu.pipeline_mode<synchronous>, transform_indices = @transform_2, window_bounds = array<i64: 2, 8>}, {pipeline_mode = #tpu.pipeline_mode<synchronous>, transform_indices = @transform_3, window_bounds = array<i64: 8, 128>}, {pipeline_mode = #tpu.pipeline_mode<synchronous>, transform_indices = @transform_4, window_bounds = array<i64: 8, 128>}, {pipeline_mode = #tpu.pipeline_mode<synchronous>, transform_indices = @transform_5, window_bounds = array<i64: 2, 14>}, {pipeline_mode = #tpu.pipeline_mode<synchronous>, transform_indices = @transform_6, window_bounds = array<i64: 2, 128>}]} {
    %c0 = arith.constant 0 : index
    %c0_0 = arith.constant 0 : index
    %0 = vector.load %arg1[%c0, %c0_0] : memref<14x8xf32, #tpu.memory_space<vmem>>, vector<14x8xf32>
    %c0_1 = arith.constant 0 : index
    %c0_2 = arith.constant 0 : index
    %1 = vector.load %arg5[%c0_1, %c0_2] : memref<8x128xf32, #tpu.memory_space<vmem>>, vector<8x128xf32>
    %cst = arith.constant dense<0.000000e+00> : vector<14x128xf32>
    %2 = tpu.matmul %0, %1, %cst {dimension_numbers = #tpu.dot_dimension_numbers<[1], [0], [0], [1], [0, 0, 1, 1], [], []>} : vector<14x8xf32>, vector<8x128xf32>, vector<14x128xf32> -> vector<14x128xf32>
    %cst_3 = arith.constant 6.250000e-04 : f32
    %3 = vector.broadcast %cst_3 : f32 to vector<14x128xf32>
    %4 = arith.mulf %2, %3 : vector<14x128xf32>
    %c0_4 = arith.constant 0 : index
    %c0_5 = arith.constant 0 : index
    %5 = vector.load %arg2[%c0_4, %c0_5] : memref<14x8xf32, #tpu.memory_space<vmem>>, vector<14x8xf32>
    %c0_6 = arith.constant 0 : index
    %c0_7 = arith.constant 0 : index
    %6 = vector.load %arg4[%c0_6, %c0_7] : memref<8x128xf32, #tpu.memory_space<vmem>>, vector<8x128xf32>
    %cst_8 = arith.constant dense<0.000000e+00> : vector<14x128xf32>
    %7 = tpu.matmul %5, %6, %cst_8 {dimension_numbers = #tpu.dot_dimension_numbers<[1], [0], [0], [1], [0, 0, 1, 1], [], []>} : vector<14x8xf32>, vector<8x128xf32>, vector<14x128xf32> -> vector<14x128xf32>
    %c0_9 = arith.constant 0 : index
    %c0_10 = arith.constant 0 : index
    %8 = vector.load %arg3[%c0_9, %c0_10] : memref<2x8xf32, #tpu.memory_space<vmem>>, vector<2x8xf32>
    %c0_11 = arith.constant 0 : index
    %c0_12 = arith.constant 0 : index
    %9 = vector.load %arg4[%c0_11, %c0_12] : memref<8x128xf32, #tpu.memory_space<vmem>>, vector<8x128xf32>
    %cst_13 = arith.constant dense<0.000000e+00> : vector<2x128xf32>
    %10 = tpu.matmul %8, %9, %cst_13 {dimension_numbers = #tpu.dot_dimension_numbers<[1], [0], [0], [1], [0, 0, 1, 1], [], []>} : vector<2x8xf32>, vector<8x128xf32>, vector<2x128xf32> -> vector<2x128xf32>
    %cst_14 = arith.constant 6.28318548 : f32
    %11 = vector.broadcast %cst_14 : f32 to vector<14x128xf32>
    %12 = arith.mulf %11, %4 : vector<14x128xf32>
    %13 = math.sin %12 : vector<14x128xf32>
    %14 = arith.mulf %13, %7 : vector<14x128xf32>
    %c0_15 = arith.constant 0 : index
    %c0_16 = arith.constant 0 : index
    %15 = vector.load %arg6[%c0_15, %c0_16] : memref<2x14xf32, #tpu.memory_space<vmem>>, vector<2x14xf32>
    %cst_17 = arith.constant dense<0.000000e+00> : vector<2x128xf32>
    %16 = tpu.matmul %15, %14, %cst_17 {dimension_numbers = #tpu.dot_dimension_numbers<[1], [0], [0], [1], [0, 0, 1, 1], [], []>} : vector<2x14xf32>, vector<14x128xf32>, vector<2x128xf32> -> vector<2x128xf32>
    %17 = arith.mulf %16, %10 : vector<2x128xf32>
    %cst_18 = arith.constant 2.000000e-02 : f32
    %18 = vector.broadcast %cst_18 : f32 to vector<2x128xf32>
    %19 = arith.mulf %17, %18 : vector<2x128xf32>
    %c0_19 = arith.constant 0 : index
    %c0_20 = arith.constant 0 : index
    %20 = vector.load %arg7[%c0_19, %c0_20] : memref<2x128xf32, #tpu.memory_space<vmem>>, vector<2x128xf32>
    tpu.vector_store %arg7[%c0_19, %c0_20], %19 {strides = array<i32>} : memref<2x128xf32, #tpu.memory_space<vmem>>, vector<2x128xf32>,
    return
  }
  func.func @transform_0(%arg0: i32) -> (i32, i32) {
    %c0_i32 = arith.constant 0 : i32
    %c0_i32_0 = arith.constant 0 : i32
    %c0_i32_1 = arith.constant 0 : i32
    return %c0_i32, %c0_i32_0 : i32, i32
  }
  func.func @transform_1(%arg0: i32) -> (i32, i32) {
    %c0_i32 = arith.constant 0 : i32
    %c0_i32_0 = arith.constant 0 : i32
    %c0_i32_1 = arith.constant 0 : i32
    return %c0_i32, %c0_i32_0 : i32, i32
  }
  func.func @transform_2(%arg0: i32) -> (i32, i32) {
    %c0_i32 = arith.constant 0 : i32
    %c0_i32_0 = arith.constant 0 : i32
    %c0_i32_1 = arith.constant 0 : i32
    return %c0_i32, %c0_i32_0 : i32, i32
  }
  func.func @transform_3(%arg0: i32) -> (i32, i32) {
    %c0_i32 = arith.constant 0 : i32
    %c0_i32_0 = arith.constant 0 : i32
    %c0_i32_1 = arith.constant 0 : i32
    return %c0_i32, %c0_i32_0 : i32, i32
  }
  func.func @transform_4(%arg0: i32) -> (i32, i32) {
    %c0_i32 = arith.constant 0 : i32
    %c0_i32_0 = arith.constant 0 : i32
    %c0_i32_1 = arith.constant 0 : i32
    return %c0_i32, %c0_i32_0 : i32, i32
  }
  func.func @transform_5(%arg0: i32) -> (i32, i32) {
    %c0_i32 = arith.constant 0 : i32
    %c0_i32_0 = arith.constant 0 : i32
    %c0_i32_1 = arith.constant 0 : i32
    return %c0_i32, %c0_i32_0 : i32, i32
  }
  func.func @transform_6(%arg0: i32) -> (i32, i32) {
    %c0_i32 = arith.constant 0 : i32
    %c0_i32_0 = arith.constant 0 : i32
    %c0_i32_1 = arith.constant 0 : i32
    return %c0_i32, %c0_i32_0 : i32, i32
  }
}

module attributes {stable_mosaic.version = 11 : i64} {
  func.func @_matmul_tile_kernel(%arg0: i32, %arg1: memref<2x128xf32, #tpu.memory_space<vmem>>, %arg2: memref<128x1024xf32, #tpu.memory_space<vmem>>, %arg3: memref<2x1024xf32, #tpu.memory_space<vmem>>) attributes {dimension_semantics = [#tpu.dimension_semantics<parallel>], iteration_bounds = array<i64: 5>, scalar_prefetch = 0 : i64, scratch_operands = 0 : i64, tpu.core_type = #tpu.core_type<tc>, window_params = [{pipeline_mode = #tpu.pipeline_mode<synchronous>, transform_indices = @transform_0, window_bounds = array<i64: 2, 128>}, {transform_indices = @transform_1, window_bounds = array<i64: 128, 1024>}, {transform_indices = @transform_2, window_bounds = array<i64: 2, 1024>}]} {
    %c0 = arith.constant 0 : index
    %c0_0 = arith.constant 0 : index
    %0 = vector.load %arg1[%c0, %c0_0] : memref<2x128xf32, #tpu.memory_space<vmem>>, vector<2x128xf32>
    %c0_1 = arith.constant 0 : index
    %c0_2 = arith.constant 0 : index
    %1 = vector.load %arg2[%c0_1, %c0_2] : memref<128x1024xf32, #tpu.memory_space<vmem>>, vector<128x1024xf32>
    %cst = arith.constant dense<0.000000e+00> : vector<2x1024xf32>
    %2 = tpu.matmul %0, %1, %cst {dimension_numbers = #tpu.dot_dimension_numbers<[1], [0], [0], [1], [0, 0, 1, 1], [], []>} : vector<2x128xf32>, vector<128x1024xf32>, vector<2x1024xf32> -> vector<2x1024xf32>
    %c0_3 = arith.constant 0 : index
    %c0_4 = arith.constant 0 : index
    %3 = vector.load %arg3[%c0_3, %c0_4] : memref<2x1024xf32, #tpu.memory_space<vmem>>, vector<2x1024xf32>
    tpu.vector_store %arg3[%c0_3, %c0_4], %2 {strides = array<i32>} : memref<2x1024xf32, #tpu.memory_space<vmem>>, vector<2x1024xf32>,
    return
  }
  func.func @transform_0(%arg0: i32) -> (i32, i32) {
    %c0_i32 = arith.constant 0 : i32
    %c0_i32_0 = arith.constant 0 : i32
    %c0_i32_1 = arith.constant 0 : i32
    return %c0_i32, %c0_i32_0 : i32, i32
  }
  func.func @transform_1(%arg0: i32) -> (i32, i32) {
    %c0_i32 = arith.constant 0 : i32
    %c0_i32_0 = arith.constant 0 : i32
    return %c0_i32, %arg0 : i32, i32
  }
  func.func @transform_2(%arg0: i32) -> (i32, i32) {
    %c0_i32 = arith.constant 0 : i32
    %c0_i32_0 = arith.constant 0 : i32
    return %c0_i32, %arg0 : i32, i32
  }
}

</mosaic_0001>

<bundles_post_ra>
// kernel: squeeze.5
= control target key start
LH: loop header
LB: loop body
LE: loop exit
PB: predicated region body
PF: predicated region fallthrough
CT: control target
= control target key end

     0   :  { %vm7_vm0 = vcmask 64512   ;;  %s39_s0 = inlined_call_operand.vmem [shape: f32[16], index: 0, kind: input, shape index: {}]   ;;  %s40_s1 = inlined_call_operand.vmem [shape: f32[2,8], index: 1, kind: output, shape index: {}]  }
   0x1   :  { %v4_v0 = vld [vmem:[%s39_s0] sm:$0x1]  ;;  %s22_s0 = smov 120  }
   0x2   :  { %5 = vst [vmem:[#allocation1] sm:$0x1] %v4_v0 }
   0x9   :  { %v9_v1 = vld [vmem:[#allocation1] sm:$0x1]  }
   0xa   :  { %v6_v2 = vld [vmem:[#allocation1] sm:$0x1]   ;;  %10 = vrot.lane.b32.xlu0 %v9_v1, %s22_s0 }
   0xb   :  { %8 = vst.msk [vmem:[#allocation0] sm:$0x1] %vm7_vm0, %v6_v2  }
  0x7c   :  { %v11_v3 = vpop.permute.xlu0 %10  }
  0x7d   :  { %14 = vst.msk [vmem:[#allocation0 + $0x1] sm:$0x1] %vm7_vm0, %v11_v3  }
  0x84   :  { %v18_v4 = vld [vmem:[#allocation0] sm:$0x3] }
  0x85   :  { %20 = vst [vmem:[%s40_s1] sm:$0x3] %v18_v4 }

// kernel: _lambda_.8
= control target key start
LH: loop header
LB: loop body
LE: loop exit
PB: predicated region body
PF: predicated region fallthrough
CT: control target
= control target key end

     0   :  { %15 = vsyncpa [#allocation3], 0  ;;  %s1910_s0 = inlined_call_operand.vmem [shape: f32[16,128], index: 0, kind: input, shape index: {}]   ;;  %s1911_s1 = inlined_call_operand.vmem [shape: f32[16,64], index: 1, kind: input, shape index: {}]   ;;  %s1912_s2 = inlined_call_operand.vmem [shape: bf16[128,32], index: 2, kind: input, shape index: {}]   ;;  %s1913_s3 = inlined_call_operand.vmem [shape: bf16[64,32], index: 3, kind: input, shape index: {}]   ;;  %s1914_s4 = inlined_call_operand.hbm [shape: bf16[2,32,32], index: 4, kind: input, shape index: {}]   ;;  %s1915_s5 = inlined_call_operand.hbm [shape: f32[3,1,32], index: 5, kind: input, shape index: {}]   ;;  %s1916_s6 = inlined_call_operand.hbm [shape: f32[3,1,32], index: 6, kind: input, shape index: {}]   ;;  %s1917_s7 = inlined_call_operand.hbm [shape: f32[3,1,32], index: 7, kind: input, shape index: {}]   ;;  %s1918_s8 = inlined_call_operand.hbm [shape: bf16[32,128], index: 8, kind: input, shape index: {}]   ;;  %s1919_s9 = inlined_call_operand.hbm [shape: f32[1,128], index: 9, kind: input, shape index: {}]   ;;  %s1920_s10 = inlined_call_operand.vmem [shape: f32[16,128], index: 10, kind: output, shape index: {}]  }
   0x1   :  { %16 = vsyncpa [#allocation5], 0 }
   0x2   :  { %17 = vsyncpa [#allocation8], 0 }
   0x3   :  { %18 = vsyncpa [#allocation11], 0  ;;  %s1618_s13 = smov 0  }
   0x4 LB: > { %s1550_s14 = smov [#allocation4]   ;;  %s1624_s16 = sadd.s32 4294967295, %s1548_s13   ;;  %s1548_s13 = sphi %s1618_s13, %s24_s13  }
   0x5   : > { %s306_s15 = sshll.u32 %s1550_s14, 4  ;;  %p1115_p0 = scmp.ge.s32.totalorder %s1548_s13, 1  ;;  %s1629_s15 = int_to_ptr.vmem [resolvable:$true] %s306_s15 }
   0x6   : > { %p275_p1 = scmp.lt.s32.totalorder %s1548_s13, 3  ;;  %p1922_p2 = scmp.eq.s32.totalorder %s1624_s16, 0 }
   0x7   : > { %s1551_s18 = smov [#allocation7]   ;;  %s1552_s21 = smov [#allocation2]  }
   0x8   : > { %p1631_p3 = pnand %p1115_p0, %p275_p1  ;;  %s332_s19 = sshll.u32 %s1551_s18, 4  ;;  %s1637_s19 = int_to_ptr.vmem [resolvable:$true] %s332_s19 }
   0x9   : > { %s293_s22 = sshll.u32 %s1552_s21, 4  ;;  %s1358_s25 = scalar_lea.hbm %s1915_s5, 48  ;;  %s1645_s22 = int_to_ptr.vmem [resolvable:$true] %s293_s22 }
   0xa   : > { %s1924_s17 = scalar_select %p1631_p3, 1, 0 }
   0xb   : > { %p1270_p4 = pneg %p1631_p3  ;;  %p1359_p6 = scmp.ne.s32.totalorder %s1915_s5, %s1358_s25 }
   0xc   : > { %p1365_p10 = scmp.lt.u32.totalorder %s1358_s25, %s1915_s5 }
   0xd   : > { %p1641_p5 = pnand %p1922_p2, %p1270_p4 }
   0xf   : > { %p1655_p7 = pneg %p1641_p5 }
  0x11   : > { %p1361_p8 = pnand %p1655_p7, %p1359_p6 }
  0x13   : > { %p1362_p9 = pneg %p1361_p8 }
  0x15   : > { %p1367_p11 = pnand %p1365_p10, %p1362_p9 }
  0x17   : > { %1370 = shalt.err (!%p1367_p11)
}
  0x18   : > { %s1371_s11 = scalar_lea.vmem %s1629_s15, 48  ;;  %s1378_s12 = scalar_lea.vmem %s1629_s15, 64 }
  0x19   : > { %p1372_p12 = scmp.ne.s32.totalorder %s1629_s15, %s1371_s11  ;;  %p1379_p1 = scmp.lt.s32.totalorder %s1629_s15, %s1629_s15 }
  0x1a   : > { %p1380_p4 = scmp.lt.s32.totalorder %s1378_s12, %s1371_s11 }
  0x1b   : > { %p1374_p13 = pnand %p1372_p12, %p1655_p7 }
  0x1c   : > { %p1381_p6 = por %p1380_p4, %p1379_p1 }
  0x1d   : > { %p1375_p0 = pneg %p1374_p13 }
  0x1f   : > { %p1382_p8 = pnand %p1381_p6, %p1375_p0 }
  0x21   : > { %1385 = shalt.err (!%p1382_p8)
}
  0x22   : > { %s1921_s14 = smov 16   ;;  %s1554_s18 = smov 1  }
  0x23   : > { %1276 = dma.hbm_to_vmem [thread:$0]  (!%p1641_p5), %s1915_s5, 48, %s1629_s15, [#allocation5], %s1921_s14, %s1921_s14, %s1554_s18  }
  0x24   : > { %s1386_s26 = scalar_lea.hbm %s1917_s7, 48 }
  0x25   : > { %p1387_p9 = scmp.ne.s32.totalorder %s1917_s7, %s1386_s26  ;;  %p1393_p12 = scmp.lt.u32.totalorder %s1386_s26, %s1917_s7 }
  0x27   : > { %p1389_p10 = pnand %p1387_p9, %p1655_p7 }
  0x29   : > { %p1390_p11 = pneg %p1389_p10 }
  0x2b   : > { %p1395_p13 = pnand %p1393_p12, %p1390_p11 }
  0x2d   : > { %1398 = shalt.err (!%p1395_p13)
}
  0x2e   : > { %s1399_s15 = scalar_lea.vmem %s1637_s19, 48  ;;  %s1406_s12 = scalar_lea.vmem %s1637_s19, 64 }
  0x2f   : > { %p1400_p0 = scmp.ne.s32.totalorder %s1637_s19, %s1399_s15  ;;  %p1407_p6 = scmp.lt.s32.totalorder %s1637_s19, %s1637_s19 }
  0x30   : > { %p1408_p8 = scmp.lt.s32.totalorder %s1406_s12, %s1399_s15 }
  0x31   : > { %p1402_p1 = pnand %p1400_p0, %p1655_p7 }
  0x32   : > { %p1409_p9 = por %p1408_p8, %p1407_p6 }
  0x33   : > { %p1403_p4 = pneg %p1402_p1 }
  0x35   : > { %p1410_p10 = pnand %p1409_p9, %p1403_p4 }
  0x37   : > { %1413 = shalt.err (!%p1410_p10)
}
  0x38   : > { %1282 = dma.hbm_to_vmem [thread:$0]  (!%p1641_p5), %s1917_s7, 48, %s1637_s19, [#allocation8], %s1921_s14, %s1921_s14, %s1554_s18  }
  0x39   : > { %s1414_s26 = scalar_lea.hbm %s1914_s4, 512 }
  0x3a   : > { %p1415_p11 = scmp.ne.s32.totalorder %s1914_s4, %s1414_s26  ;;  %p1421_p0 = scmp.lt.u32.totalorder %s1414_s26, %s1914_s4 }
  0x3c   : > { %p1417_p12 = pnand %p1415_p11, %p1655_p7 }
  0x3e   : > { %p1418_p13 = pneg %p1417_p12 }
  0x40   : > { %p1423_p1 = pnand %p1421_p0, %p1418_p13 }
  0x42   : > { %1426 = shalt.err (!%p1423_p1)
}
  0x43   : > { %s1427_s19 = scalar_lea.vmem %s1645_s22, 512  ;;  %p1435_p9 = scmp.lt.s32.totalorder %s1645_s22, %s1645_s22 }
  0x44   : > { %p1428_p4 = scmp.ne.s32.totalorder %s1645_s22, %s1427_s19  ;;  %p1436_p10 = scmp.lt.s32.totalorder %s1427_s19, %s1427_s19 }
  0x46   : > { %p1430_p6 = pnand %p1428_p4, %p1655_p7  ;;  %p1437_p11 = por %p1436_p10, %p1435_p9 }
  0x48   : > { %p1431_p8 = pneg %p1430_p6 }
  0x4a   : > { %p1438_p12 = pnand %p1437_p11, %p1431_p8 }
  0x4c   : > { %1441 = shalt.err (!%p1438_p12)
}
  0x4d   : > { %s1555_s15 = smov 64   ;;  %s1556_s12 = smov 4  }
  0x4e   : > { %1273 = dma.hbm_to_vmem [thread:$0]  (!%p1641_p5), %s1914_s4, 512, %s1645_s22, [#allocation3], %s1555_s15, %s1555_s15, %s1556_s12  }
  0x4f   : > { %s1557_s24 = smov [#allocation6]   ;;  %s1558_s26 = smov [#allocation9]  }
  0x50   : > { %s319_s25 = sshll.u32 %s1557_s24, 4  ;;  %s345_s27 = sshll.u32 %s1558_s26, 4  ;;  %s320_s25 = int_to_ptr.vmem [resolvable:$true] %s319_s25  ;;  %s1733_s27 = int_to_ptr.vmem [resolvable:$true] %s345_s27 }
  0x51   : > { %s1442_s11 = scalar_lea.hbm %s1916_s6, 48 }
  0x52   : > { %p1443_p13 = scmp.ne.s32.totalorder %s1916_s6, %s1442_s11  ;;  %p1449_p4 = scmp.lt.u32.totalorder %s1442_s11, %s1916_s6 }
  0x54   : > { %p1445_p0 = pnand %p1443_p13, %p1655_p7 }
  0x56   : > { %p1446_p1 = pneg %p1445_p0 }
  0x58   : > { %p1451_p6 = pnand %p1449_p4, %p1446_p1 }
  0x5a   : > { %1454 = shalt.err (!%p1451_p6)
}
  0x5b   : > { %s1455_s23 = scalar_lea.vmem %s320_s25, 48  ;;  %s1462_s24 = scalar_lea.vmem %s320_s25, 64 }
  0x5c   : > { %p1456_p8 = scmp.ne.s32.totalorder %s320_s25, %s1455_s23  ;;  %p1463_p11 = scmp.lt.s32.totalorder %s320_s25, %s320_s25 }
  0x5d   : > { %p1464_p12 = scmp.lt.s32.totalorder %s1462_s24, %s1455_s23 }
  0x5e   : > { %p1458_p9 = pnand %p1456_p8, %p1655_p7 }
  0x5f   : > { %p1465_p2 = por %p1464_p12, %p1463_p11 }
  0x60   : > { %p1459_p10 = pneg %p1458_p9 }
  0x62   : > { %p1466_p3 = pnand %p1465_p2, %p1459_p10 }
  0x64   : > { %1469 = shalt.err (!%p1466_p3)
}
  0x65   : > { %s1927_s14 = smov 16   ;;  %s1470_s19 = scalar_lea.hbm %s1918_s8, 256 }
  0x66   : > { %1279 = dma.hbm_to_vmem [thread:$0]  (!%p1641_p5), %s1916_s6, 48, %s320_s25, [#allocation5], %s1927_s14, %s1927_s14, %s1554_s18  }
  0x67   : > { %p1471_p13 = scmp.ne.s32.totalorder %s1918_s8, %s1470_s19  ;;  %p1477_p0 = scmp.lt.u32.totalorder %s1470_s19, %s1918_s8 }
  0x69   : > { %p1473_p2 = pnand %p1471_p13, %p1655_p7 }
  0x6b   : > { %p1474_p3 = pneg %p1473_p2 }
  0x6d   : > { %p1479_p1 = pnand %p1477_p0, %p1474_p3 }
  0x6f   : > { %1482 = shalt.err (!%p1479_p1)
}
  0x70   : > { %s1483_s18 = scalar_lea.vmem %s1733_s27, 256  ;;  %p1491_p9 = scmp.lt.s32.totalorder %s1733_s27, %s1733_s27 }
  0x71   : > { %p1484_p4 = scmp.ne.s32.totalorder %s1733_s27, %s1483_s18  ;;  %p1492_p10 = scmp.lt.s32.totalorder %s1483_s18, %s1483_s18 }
  0x73   : > { %p1486_p6 = pnand %p1484_p4, %p1655_p7  ;;  %p1493_p11 = por %p1492_p10, %p1491_p9 }
  0x75   : > { %p1487_p8 = pneg %p1486_p6 }
  0x77   : > { %p1494_p12 = pnand %p1493_p11, %p1487_p8 }
  0x79   : > { %1497 = shalt.err (!%p1494_p12)
}
  0x7a   : > { %1285 = dma.hbm_to_vmem [thread:$0]  (!%p1641_p5), %s1918_s8, 256, %s1733_s27, [#allocation8], %s1555_s15, %s1555_s15, %s1556_s12  }
  0x7b   : > { %s1559_s26 = smov [#allocation10]   ;;  %s1498_s19 = scalar_lea.hbm %s1919_s9, 16 }
  0x7c   : > { %s359_s29 = sshll.u32 %s1559_s26, 4  ;;  %p1499_p13 = scmp.ne.s32.totalorder %s1919_s9, %s1498_s19  ;;  %s360_s29 = int_to_ptr.vmem [resolvable:$true] %s359_s29 }
  0x7d   : > { %p1505_p0 = scmp.lt.u32.totalorder %s1498_s19, %s1919_s9 }
  0x7e   : > { %p1501_p2 = pnand %p1499_p13, %p1655_p7 }
  0x80   : > { %p1502_p3 = pneg %p1501_p2 }
  0x82   : > { %p1507_p1 = pnand %p1505_p0, %p1502_p3 }
  0x84   : > { %1510 = shalt.err (!%p1507_p1)
}
  0x85   : > { %s1511_s15 = scalar_lea.vmem %s360_s29, 16  ;;  %s1518_s12 = scalar_lea.vmem %s360_s29, 32 }
  0x86   : > { %p1512_p4 = scmp.ne.s32.totalorder %s360_s29, %s1511_s15  ;;  %p1519_p9 = scmp.lt.s32.totalorder %s360_s29, %s360_s29 }
  0x87   : > { %p1520_p10 = scmp.lt.s32.totalorder %s1518_s12, %s1511_s15 }
  0x88   : > { %p1514_p6 = pnand %p1512_p4, %p1655_p7 }
  0x89   : > { %p1521_p11 = por %p1520_p10, %p1519_p9 }
  0x8a   : > { %p1515_p8 = pneg %p1514_p6 }
  0x8c   : > { %p1522_p12 = pnand %p1521_p11, %p1515_p8 }
  0x8e   : > { %1525 = shalt.err (!%p1522_p12)
}
  0x8f   : > { %1288 = dma.hbm_to_vmem [thread:$0]  (!%p1641_p5), %s1919_s9, 16, %s360_s29, [#allocation11]  }
  0x90   : > { %p1928_p13 = scmp.ne.s32.totalorder %s1924_s17, 0 }
  0x91   : > { %p1929_p2 = scmp.eq.s32.totalorder (!%p1928_p13), %s1624_s16, 0 }
  0x92   : > { %386 = sbr.rel (%p1928_p13) target bundleno = 2440 (0x988), region = 60 }
  0x99   : > { %1531 = dma.done.wait (%p1929_p2), [#allocation3], 512   ;;  %p1930_p7 = pmov %p1929_p2 }
  0x9a   : > { %p1931_p3 = pmov %p1929_p2 }
  0x9b   : > { %1533 = vsyncadd (%p1930_p7), [#allocation3], 4294966784 }
  0x9c   : > { %1535 = dma.done.wait (%p1931_p3), [#allocation5], 96   ;;  %p1932_p0 = pmov %p1929_p2 }
  0x9e   : > { %1537 = vsyncadd (%p1932_p0), [#allocation5], 4294967200  ;;  %p1933_p1 = pmov %p1932_p0 }
  0x9f   : > { %p1934_p5 = pmov %p1932_p0 }
  0xa0   : > { %1539 = dma.done.wait (%p1933_p1), [#allocation8], 304  }
  0xa1   : > { %1541 = vsyncadd (%p1934_p5), [#allocation8], 4294966992  ;;  %p1935_p4 = pmov %p1932_p0 }
  0xa2   : > { %p1936_p6 = pmov %p1932_p0 }
  0xa3   : > { %1543 = dma.done.wait (%p1935_p4), [#allocation11], 16  }
  0xa4   : > { %1545 = vsyncadd (%p1936_p6), [#allocation11], 4294967280  ;;  %v1560_v0 = vmov 0.0   ;;  %vm1561_vm0 = vmmov 0   ;;  %p446_p8 = scmp.lt.s32.totalorder %s1624_s16, 1  ;;  %v1322_v1 = vld [vmem:[%s1912_s2] sm:$0xff]  }
  0xa5   : > { %1202 = vmatprep.subr.bf16.mxu1 %v1560_v0  ;;  %1190 = vmatprep.subr.bf16.mxu0 %v1560_v0  ;;  %v1323_v2 = vld [vmem:[%s1912_s2 + $0x8] sm:$0xff]   ;;  %v1326_v3 = vld [vmem:[%s1913_s3] sm:$0xff]   ;;  %v1324_v4 = vld [vmem:[%s1912_s2 + $0x10] sm:$0xff]   ;;  %vm511_vm1 = vcmask 523264   ;;  %vm653_vm2 = vcmask 261120   ;;  %vm964_vm3 = vcmask 64520  }
  0xa6   : > { %1198 = vmatprep.mubr.msk.bf16.mxu0 %vm1561_vm0, %v1560_v0  ;;  %1218 = vmatprep.mubr.msk.bf16.mxu1 %vm1561_vm0, %v1560_v0  ;;  %s1938_s16 = smov (!%p446_p8, %s1624_s16), 1  ;;  %v1328_v5 = vld [vmem:[%s1913_s3 + $0x8] sm:$0xff]   ;;  %v1325_v6 = vld [vmem:[%s1912_s2 + $0x18] sm:$0xff]   ;;  %v1330_v7 = vld [vmem:[%s1913_s3 + $0x10] sm:$0xff]   ;;  %s1562_s24 = smov 127   ;;  %vm975_vm4 = vcmask 56320  }
  0xa7   : > { %1203 = vmatpush3.bf16.msra.mxu1 %v1322_v1  ;;  %1191 = vmatpush3.bf16.msra.mxu0 %v1326_v3  ;;  %s1842_s21 = sshll.u32 %s1938_s16, 3  ;;  %v1327_v8 = vld [vmem:[%s1912_s2 + $0x20] sm:$0xff]   ;;  %v1332_v9 = vld [vmem:[%s1913_s3 + $0x18] sm:$0xff]   ;;  %v1329_v12 = vld [vmem:[%s1912_s2 + $0x28] sm:$0xff]   ;;  %vm981_vm5 = vcmask 7168   ;;  %vm983_vm6 = vcmask 64512  }
  0xa8   : > { %1204 = vmatprep.subr.bf16.mxu1 %v1560_v0  ;;  %1192 = vmatprep.subr.bf16.mxu0 %v1560_v0  ;;  %s453_s12 = scalar_lea.vmem %s1911_s1, %s1842_s21  ;;  %v1331_v13 = vld [vmem:[%s1912_s2 + $0x30] sm:$0xff]   ;;  %s449_s19 = scalar_lea.vmem %s1910_s0, %s1842_s21  ;;  %v1333_v14 = vld [vmem:[%s1912_s2 + $0x38] sm:$0xff]   ;;  %v1146_v22 = vld [vmem:[#allocation4] ss:$0 sm:$0xff]  ;;  %vm985_vm7 = vcmask 203776  }
  0xa9   : > { %v485_v10 = vld [vmem:[%s453_s12] sm:$0xff]  ;;  %v1335_v35 = vld [vmem:[#allocation2 + $0x8] sm:$0xff]   ;;  %v1336_v59 = vld [vmem:[#allocation2 + $0x10] sm:$0xff]   ;;  %s457_s27 = scalar_lea.vmem %s1920_s10, %s1842_s21 }
  0xaa   : > { %v486_v11 = vpack.c.bf16 %v485_v10, %v485_v10  ;;  %v483_v15 = vld [vmem:[%s449_s19] sm:$0xff]  ;;  %v1148_v42 = vld [vmem:[#allocation7] ss:$0 sm:$0xff]  ;;  %v1337_v60 = vld [vmem:[#allocation2 + $0x18] sm:$0xff]  }
  0xab   : > { %1205 = vmatpush3.bf16.msra.mxu1 %v1323_v2  ;;  %1193 = vmatpush3.bf16.msra.mxu0 %v1328_v5  ;;  %v484_v16 = vpack.c.bf16 %v483_v15, %v483_v15  ;;  %v1334_v34 = vld [vmem:[#allocation2] sm:$0xff]  }
  0xac   : > { %1206 = vmatprep.subr.bf16.mxu1 %v1560_v0  ;;  %1194 = vmatprep.subr.bf16.mxu0 %v1560_v0  ;;  %v1147_v40 = vld [vmem:[#allocation6] ss:$0 sm:$0xff]  ;;  %v1149_v47 = vld [vmem:[#allocation4 + $0x1] ss:$0 sm:$0xff]  ;;  %v1153_v2 = vld [vmem:[#allocation6 + $0x1] ss:$0 sm:$0xff] }
  0xaf   : > { %1207 = vmatpush3.bf16.msra.mxu1 %v1324_v4  ;;  %1195 = vmatpush3.bf16.msra.mxu0 %v1330_v7  ;;  %v1154_v4 = vld [vmem:[#allocation7 + $0x1] ss:$0 sm:$0xff] }
  0xb0   : > { %1208 = vmatprep.subr.bf16.mxu1 %v1560_v0  ;;  %1196 = vmatprep.subr.bf16.mxu0 %v1560_v0 }
  0xb3   : > { %1209 = vmatpush3.bf16.msra.mxu1 %v1325_v6  ;;  %1197 = vmatpush3.bf16.msra.mxu0 %v1332_v9  ;;  %v1155_v9 = vld [vmem:[#allocation4 + $0x2] ss:$0 sm:$0xff] }
  0xb4   : > { %1210 = vmatprep.subr.bf16.mxu1 %v1560_v0  ;;  %1222 = vmatprep.subr.bf16.mxu0 %v1560_v0 }
  0xb6   : > { %1199 = vmatmul.mubr.msk.bf16.vlgmr.msra.gmra.mrb[0].mxu0 %vm511_vm1, %v486_v11 }
  0xb7   : > { %1211 = vmatpush3.bf16.msra.mxu1 %v1327_v8  ;;  %1226 = vmatprep.mubr.msk.bf16.mxu0 %vm1561_vm0, %v1560_v0 }
  0xb8   : > { %1212 = vmatprep.subr.bf16.mxu1 %v1560_v0  ;;  %1223 = vmatpush3.bf16.msra.mxu0 %v1334_v34  ;;  %v1161_v34 = vld [vmem:[#allocation10] ss:$0 sm:$0xff] }
  0xb9   : > { %1224 = vmatprep.subr.bf16.mxu0 %v1560_v0 }
  0xbb   : > { %1213 = vmatpush3.bf16.msra.mxu1 %v1329_v12 }
  0xbc   : > { %1214 = vmatprep.subr.bf16.mxu1 %v1560_v0  ;;  %1225 = vmatpush3.bf16.msra.mxu0 %v1335_v35 }
  0xbd   : > { %1230 = vmatprep.subr.bf16.mxu0 %v1560_v0 }
  0xbf   : > { %1215 = vmatpush3.bf16.msra.mxu1 %v1331_v13 }
  0xc0   : > { %1216 = vmatprep.subr.bf16.mxu1 %v1560_v0 }
  0xc3   : > { %1217 = vmatpush3.bf16.msra.mxu1 %v1333_v14 }
  0xc6   : > { %1219 = vmatmul.mubr.bf16.vlgmr.msra.gmra.mrb[0].mxu1 %v484_v16 }
 0x189   : > { %v549_v17 = vpop.f32.mrb[0].mxu0 }
 0x18a   : > { %v1200_v18 = vpop.f32.mrb[1].mxu0 }
 0x18b   : > { %v552_v19 = vpop.f32.mrb[2].mxu0 }
 0x18c   : > { %v1201_v20 = vpop.f32.mrb[3].mxu0 }
 0x199   : > { %v637_v21 = vpop.f32.mrb[0].mxu1 }
 0x19a   : > { %v638_v23 = vadd.f32 %v637_v21, %v549_v17  ;;  %v1220_v24 = vpop.f32.mrb[1].mxu1  ;;  %v1338_v21 = vld [vmem:[#allocation9] sm:$0xff]  }
 0x19b   : > { %v640_v25 = vpop.f32.mrb[2].mxu1 }
 0x19c   : > { %v1221_v26 = vpop.f32.mrb[3].mxu1  ;;  %v650_v27 = vadd.f32 %v1146_v22, %v638_v23  ;;  %v1339_v22 = vld [vmem:[#allocation9 + $0x8] sm:$0xff]  }
 0x19e   : > { %v654_v28 = vsel %vm653_vm2, %v650_v27, 0.0 }
 0x19f   : > { %655 = vadd.xlane.f32.xlu0 %v654_v28 }
 0x22c   : > { %v656_v29 = vpop.xlane.xlu0 %655 }
 0x22d   : > { %v658_v30 = vmul.f32 0.03125, %v656_v29  ;;  %v1160_v29 = vld [vmem:[#allocation7 + $0x2] ss:$0 sm:$0xff] }
 0x22f   : > { %v659_v31 = vsub.f32 %v650_v27, %v658_v30  ;;  %v1159_v27 = vld [vmem:[#allocation6 + $0x2] ss:$0 sm:$0xff] }
 0x231   : > { %v660_v32 = vmul.f32 %v659_v31, %v659_v31 }
 0x233   : > { %v661_v33 = vsel %vm653_vm2, %v660_v32, 0.0 }
 0x234   : > { %662 = vadd.xlane.f32.xlu0 %v661_v33 }
 0x2c1   : > { %v663_v36 = vpop.xlane.xlu0 %662 }
 0x2c2   : > { %v664_v37 = vmul.f32 0.03125, %v663_v36 }
 0x2c4   : > { %v665_v38 = vadd.f32 1e-05, %v664_v37 }
 0x2c6   : > { %1340 = vrsqrt.f32 %v665_v38 }
 0x2d0   : > { %v1341_v39 = vpop.eup %1340 }
 0x2d1   : > { %v667_v41 = vmul.f32 %v1341_v39, %v659_v31 }
 0x2d3   : > { %v674_v43 = vmul.f32 %v1147_v40, %v667_v41 }
 0x2d5   : > { %v681_v44 = vadd.f32 %v1148_v42, %v674_v43 }
 0x2d7   : > { %v682_v45 = vmax.f32 %v681_v44, 0.0 }
 0x2d9   : > { %v687_v46 = vpack.c.bf16 %v682_v45, %v682_v45 }
 0x2db   : > { %1227 = vmatmul.mubr.msk.bf16.vlgmr.msra.gmra.mrb[4].mxu0 %vm653_vm2, %v687_v46 }
 0x2dc   : > { %1234 = vmatprep.mubr.msk.bf16.mxu0 %vm1561_vm0, %v1560_v0  ;;  %1231 = vmatpush3.bf16.msra.mxu0 %v1336_v59 }
 0x2dd   : > { %1232 = vmatprep.subr.bf16.mxu0 %v1560_v0 }
 0x2e0   : > { %1233 = vmatpush3.bf16.msra.mxu0 %v1337_v60 }
 0x2e1   : > { %1238 = vmatprep.subr.bf16.mxu0 %v1560_v0 }
 0x3ae   : > { %v745_v48 = vpop.f32.mrb[4].mxu0 }
 0x3af   : > { %v746_v49 = vadd.f32 %v1149_v47, %v745_v48  ;;  %v1228_v50 = vpop.f32.mrb[5].mxu0 }
 0x3b0   : > { %v748_v51 = vpop.f32.mrb[6].mxu0 }
 0x3b1   : > { %v1229_v52 = vpop.f32.mrb[7].mxu0  ;;  %v755_v53 = vsel %vm653_vm2, %v746_v49, 0.0 }
 0x3b2   : > { %756 = vadd.xlane.f32.xlu1 %v755_v53 }
 0x43f   : > { %v757_v54 = vpop.xlane.xlu1 %756 }
 0x440   : > { %v758_v55 = vmul.f32 0.03125, %v757_v54 }
 0x442   : > { %v759_v56 = vsub.f32 %v746_v49, %v758_v55 }
 0x444   : > { %v760_v57 = vmul.f32 %v759_v56, %v759_v56 }
 0x446   : > { %v761_v58 = vsel %vm653_vm2, %v760_v57, 0.0 }
 0x447   : > { %762 = vadd.xlane.f32.xlu1 %v761_v58 }
 0x4d4   : > { %v763_v61 = vpop.xlane.xlu1 %762 }
 0x4d5   : > { %v764_v62 = vmul.f32 0.03125, %v763_v61 }
 0x4d7   : > { %v765_v63 = vadd.f32 1e-05, %v764_v62 }
 0x4d9   : > { %1342 = vrsqrt.f32 %v765_v63 }
 0x4e3   : > { %v1343_v1 = vpop.eup %1342 }
 0x4e4   : > { %v767_v3 = vmul.f32 %v1343_v1, %v759_v56 }
 0x4e6   : > { %v774_v5 = vmul.f32 %v1153_v2, %v767_v3 }
 0x4e8   : > { %v781_v6 = vadd.f32 %v1154_v4, %v774_v5 }
 0x4ea   : > { %v782_v7 = vmax.f32 %v781_v6, 0.0 }
 0x4ec   : > { %v788_v8 = vpack.c.bf16 %v782_v7, %v782_v7 }
 0x4ee   : > { %1235 = vmatmul.mubr.msk.bf16.vlgmr.msra.gmra.mrb[8].mxu0 %vm653_vm2, %v788_v8 }
 0x4ef   : > { %1242 = vmatprep.mubr.msk.bf16.mxu0 %vm1561_vm0, %v1560_v0  ;;  %1239 = vmatpush3.bf16.msra.mxu0 %v1338_v21 }
 0x4f0   : > { %1240 = vmatprep.subr.bf16.mxu0 %v1560_v0 }
 0x4f3   : > { %1241 = vmatpush3.bf16.msra.mxu0 %v1339_v22 }
 0x5c1   : > { %v846_v10 = vpop.f32.mrb[8].mxu0 }
 0x5c2   : > { %v847_v11 = vadd.f32 %v1155_v9, %v846_v10  ;;  %v1236_v12 = vpop.f32.mrb[9].mxu0 }
 0x5c3   : > { %v849_v13 = vpop.f32.mrb[10].mxu0 }
 0x5c4   : > { %v1237_v14 = vpop.f32.mrb[11].mxu0  ;;  %v856_v15 = vsel %vm653_vm2, %v847_v11, 0.0 }
 0x5c5   : > { %857 = vadd.xlane.f32.xlu0 %v856_v15 }
 0x652   : > { %v858_v16 = vpop.xlane.xlu0 %857 }
 0x653   : > { %v859_v17 = vmul.f32 0.03125, %v858_v16 }
 0x655   : > { %v860_v18 = vsub.f32 %v847_v11, %v859_v17 }
 0x657   : > { %v861_v19 = vmul.f32 %v860_v18, %v860_v18 }
 0x659   : > { %v862_v20 = vsel %vm653_vm2, %v861_v19, 0.0 }
 0x65a   : > { %863 = vadd.xlane.f32.xlu1 %v862_v20 }
 0x6e7   : > { %v864_v23 = vpop.xlane.xlu1 %863 }
 0x6e8   : > { %v865_v24 = vmul.f32 0.03125, %v864_v23 }
 0x6ea   : > { %v866_v25 = vadd.f32 1e-05, %v865_v24 }
 0x6ec   : > { %1344 = vrsqrt.f32 %v866_v25 }
 0x6f6   : > { %v1345_v26 = vpop.eup %1344 }
 0x6f7   : > { %v868_v28 = vmul.f32 %v1345_v26, %v860_v18 }
 0x6f9   : > { %v875_v30 = vmul.f32 %v1159_v27, %v868_v28 }
 0x6fb   : > { %v882_v31 = vadd.f32 %v1160_v29, %v875_v30 }
 0x6fd   : > { %v883_v32 = vmax.f32 %v882_v31, 0.0 }
 0x6ff   : > { %v888_v33 = vpack.c.bf16 %v883_v32, %v883_v32 }
 0x701   : > { %1243 = vmatmul.mubr.msk.bf16.vlgmr.msra.gmra.mrb[12].mxu0 %vm653_vm2, %v888_v33 }
 0x7d4   : > { %v945_v35 = vpop.f32.mrb[12].mxu0 }
 0x7d5   : > { %v946_v36 = vadd.f32 %v1161_v34, %v945_v35  ;;  %v1244_v0 = vpop.f32.mrb[13].mxu0 }
 0x7d6   : > { %v948_v37 = vpop.f32.mrb[14].mxu0 }
 0x7d7   : > { %v1245_v38 = vpop.f32.mrb[15].mxu0  ;;  %v965_v39 = vsel %vm964_vm3, %v946_v36, -inf  ;;  %v951_v46 = vsub.f32 0.0, %v946_v36 }
 0x7d8   : > { %966 = vmax.xlane.f32.xlu0 %v965_v39 }
 0x7d9   : > { %v952_v47 = vmul.f32 1.442695, %v951_v46 }
 0x865   : > { %v967_v40 = vpop.xlane.xlu0 %966 }
 0x866   : > { %v968_v41 = vsub.f32 %v946_v36, %v967_v40 }
 0x868   : > { %v969_v42 = vmul.f32 1.442695, %v968_v41 }
 0x86a   : > { %1346 = vpow2.f32 %v969_v42 }
 0x86b   : > { %1348 = vpow2.f32 %v952_v47 }
 0x874   : > { %v1347_v43 = vpop.eup %1346 }
 0x875   : > { %972 = vrot.lane.b32.xlu1 %v1347_v43, %s1562_s24  ;;  %v1349_v48 = vpop.eup %1348 }
 0x876   : > { %v954_v49 = vadd.f32 1.0, %v1349_v48 }
 0x878   : > { %1350 = vrcp.f32 %v954_v49 }
 0x882   : > { %v1351_v50 = vpop.eup %1350 }
 0x883   : > { %1352 = vlog2.f32 %v1351_v50 }
 0x88d   : > { %v1353_v51 = vpop.eup %1352 }
 0x88e   : > { %v958_v52 = vmul.f32 0.6931472, %v1353_v51 }
 0x890   : > { %v959_v53 = vmul.f32 2.3025851, %v958_v52 }
 0x892   : > { %v960_v54 = vmul.f32 1.442695, %v959_v53 }
 0x894   : > { %1354 = vpow2.f32 %v960_v54 }
 0x89e   : > { %v1355_v56 = vpop.eup %1354 }
 0x89f   : > { %v962_v57 = vmul.f32 2.0, %v1355_v56 }
 0x8a1   : > { %v963_v59 = vadd.f32 1e-07, %v962_v57 }
 0x8e7   : > { %v973_v44 = vpop.permute.xlu1 %972 }
 0x8e8   : > { %v976_v45 = vsel %vm975_vm4, %v973_v44, 0.0 }
 0x8e9   : > { %977 = vadd.xlane.f32.xlu0 %v976_v45 }
 0x976   : > { %v978_v55 = vpop.xlane.xlu0 %977 }
 0x977   : > { %1356 = vrcp.f32 %v978_v55 }
 0x981   : > { %v1357_v58 = vpop.eup %1356 }
 0x982   : > { %v980_v60 = vmul.f32 %v1357_v58, %v1347_v43 }
 0x984   : > { %v982_v61 = vsel %vm981_vm5, %v963_v59, %v980_v60 }
 0x985   : > { %v984_v62 = vsel %vm983_vm6, %v982_v61, %v963_v59 }
 0x986   : > { %v986_v63 = vsel %vm985_vm7, %v984_v62, 0.0 }
 0x987   : > { %987 = vst [vmem:[%s457_s27] sm:$0xff] %v986_v63 }
 0x988 PF: > { %s24_s13 = sadd.s32 1, %s1548_s13  }
 0x989   : > { %p21_p9 = scmp.ge.s32.totalorder %s24_s13, 4  }
 0x98b   :  { %23 = sbr.rel (!%p21_p9) target bundleno = 4 (0x4), region = 125 }
 0x992   :  { %1007 = vsyncpa [#allocation3], 1 }
 0x993   :  { %1009 = vsyncpa [#allocation3 + $0x1], 1 }
 0x994   :  { %1010 = vsyncpa [#allocation5], 1 }
 0x995   :  { %1011 = vsyncpa [#allocation8], 1 }
 0x996   :  { %1012 = vsyncpa [#allocation11], 1 }

// kernel: _lambda_.6
= control target key start
LH: loop header
LB: loop body
LE: loop exit
PB: predicated region body
PF: predicated region fallthrough
CT: control target
= control target key end

     0   :  { %s3333_s0 = inlined_call_operand.vmem [shape: f32[16,80], index: 0, kind: input, shape index: {}]   ;;  %s3334_s1 = inlined_call_operand.hbm [shape: f32[1,80], index: 1, kind: input, shape index: {}]   ;;  %s3335_s2 = inlined_call_operand.hbm [shape: f32[80,80], index: 2, kind: input, shape index: {}]   ;;  %s3336_s3 = inlined_call_operand.vmem [shape: f32[16,1], index: 3, kind: input, shape index: {}]   ;;  %s3337_s4 = inlined_call_operand.hbm [shape: f32[1,32], index: 4, kind: input, shape index: {}]   ;;  %s3338_s5 = inlined_call_operand.hbm [shape: bf16[2,32,32], index: 5, kind: input, shape index: {}]   ;;  %s3339_s6 = inlined_call_operand.hbm [shape: f32[3,1,32], index: 6, kind: input, shape index: {}]   ;;  %s3340_s7 = inlined_call_operand.hbm [shape: f32[3,1,32], index: 7, kind: input, shape index: {}]   ;;  %s3341_s8 = inlined_call_operand.hbm [shape: f32[3,1,32], index: 8, kind: input, shape index: {}]   ;;  %s3342_s9 = inlined_call_operand.hbm [shape: f32[1,32], index: 9, kind: input, shape index: {}]   ;;  %s3343_s10 = inlined_call_operand.hbm [shape: bf16[2,32,32], index: 10, kind: input, shape index: {}]   ;;  %s3344_s11 = inlined_call_operand.hbm [shape: f32[3,1,32], index: 11, kind: input, shape index: {}]   ;;  %s3345_s12 = inlined_call_operand.hbm [shape: f32[3,1,32], index: 12, kind: input, shape index: {}]   ;;  %s3346_s13 = inlined_call_operand.hbm [shape: f32[3,1,32], index: 13, kind: input, shape index: {}]   ;;  %s3347_s14 = inlined_call_operand.hbm [shape: bf16[32,384], index: 14, kind: input, shape index: {}]   ;;  %s3348_s15 = inlined_call_operand.hbm [shape: bf16[32,384], index: 15, kind: input, shape index: {}]   ;;  %s3349_s16 = inlined_call_operand.hbm [shape: f32[1,384], index: 16, kind: input, shape index: {}]   ;;  %s3350_s17 = inlined_call_operand.vmem [shape: f32[16,512], index: 17, kind: output, shape index: {}]  }
   0x1   :  { %3364 = sst [smem:[#allocation36_spill]] %s3333_s0 }
   0x2   :  { %3365 = sst [smem:[#allocation37_spill]] %s3334_s1 }
   0x3   :  { %3366 = sst [smem:[#allocation38_spill]] %s3335_s2 }
   0x4   :  { %3367 = sst [smem:[#allocation39_spill]] %s3336_s3 }
   0x5   :  { %3368 = sst [smem:[#allocation40_spill]] %s3350_s17 }
   0x6   :  { %22 = vsyncpa [#allocation3], 0 }
   0x7   :  { %23 = vsyncpa [#allocation5], 0 }
   0x8   :  { %24 = vsyncpa [#allocation8], 0 }
   0x9   :  { %25 = vsyncpa [#allocation11], 0 }
   0xa   :  { %26 = vsyncpa [#allocation14], 0 }
   0xb   :  { %27 = vsyncpa [#allocation17], 0 }
   0xc   :  { %28 = vsyncpa [#allocation20], 0 }
   0xd   :  { %29 = vsyncpa [#allocation23], 0  ;;  %s2871_s24 = smov 0  }
   0xe LB: > { %3369 = sst [smem:[#allocation33_spill]] %s2751_s24  ;;  %s2753_s25 = smov [#allocation4]   ;;  %s2751_s24 = sphi %s2871_s24, %s35_s24  }
   0xf   : > { %s456_s26 = sshll.u32 %s2753_s25, 4  ;;  %s2877_s27 = sadd.s32 4294967295, %s2751_s24   ;;  %s2882_s26 = int_to_ptr.vmem [resolvable:$true] %s456_s26 }
  0x10   : > { %3370 = sst [smem:[#allocation34_spill]] %s2877_s27  ;;  %p1877_p0 = scmp.ge.s32.totalorder %s2751_s24, 1 }
  0x11   : > { %p433_p1 = scmp.lt.s32.totalorder %s2751_s24, 3  ;;  %p3356_p2 = scmp.eq.s32.totalorder %s2877_s27, 0 }
  0x12   : > { %s2754_s29 = smov [#allocation7]   ;;  %s3374_s2 = sld [smem:[#allocation38_spill]] }
  0x13   : > { %p2884_p3 = pnand %p1877_p0, %p433_p1  ;;  %s480_s0 = sshll.u32 %s2754_s29, 4  ;;  %s2890_s0 = int_to_ptr.vmem [resolvable:$true] %s480_s0 }
  0x15   : > { %s3371_s28 = scalar_select %p2884_p3, 1, 0 }
  0x16   : > { %p2142_p4 = pneg %p2884_p3 }
  0x17   : > { %3372 = sst [smem:[#allocation35_spill]] %s3371_s28 }
  0x18   : > { %p2894_p5 = pnand %p3356_p2, %p2142_p4  ;;  %s2293_s1 = scalar_lea.hbm %s3374_s2, 1280 }
  0x19   : > { %p2294_p6 = scmp.ne.s32.totalorder %s3374_s2, %s2293_s1  ;;  %p2300_p10 = scmp.lt.u32.totalorder %s2293_s1, %s3374_s2 }
  0x1a   : > { %p2906_p7 = pneg %p2894_p5 }
  0x1c   : > { %p2296_p8 = pnand %p2906_p7, %p2294_p6 }
  0x1e   : > { %p2297_p9 = pneg %p2296_p8 }
  0x20   : > { %p2302_p11 = pnand %p2300_p10, %p2297_p9 }
  0x22   : > { %2305 = shalt.err (!%p2302_p11)
}
  0x23   : > { %s2306_s29 = scalar_lea.vmem %s2882_s26, 1280  ;;  %p2314_p1 = scmp.lt.s32.totalorder %s2882_s26, %s2882_s26 }
  0x24   : > { %p2307_p12 = scmp.ne.s32.totalorder %s2882_s26, %s2306_s29  ;;  %p2315_p4 = scmp.lt.s32.totalorder %s2306_s29, %s2306_s29 }
  0x26   : > { %p2309_p13 = pnand %p2307_p12, %p2906_p7  ;;  %p2316_p6 = por %p2315_p4, %p2314_p1 }
  0x28   : > { %p2310_p0 = pneg %p2309_p13 }
  0x2a   : > { %p2317_p8 = pnand %p2316_p6, %p2310_p0 }
  0x2c   : > { %2320 = shalt.err (!%p2317_p8)
}
  0x2d   : > { %s2755_s18 = smov 128   ;;  %s2756_s19 = smov 8  }
  0x2e   : > { %2148 = dma.hbm_to_vmem [thread:$0]  (!%p2894_p5), %s3374_s2, 1280, %s2882_s26, [#allocation5], %s2755_s18, %s2755_s18, %s2756_s19  }
  0x2f   : > { %s2321_s25 = scalar_lea.hbm %s3338_s5, 512 }
  0x30   : > { %p2322_p9 = scmp.ne.s32.totalorder %s3338_s5, %s2321_s25  ;;  %p2328_p12 = scmp.lt.u32.totalorder %s2321_s25, %s3338_s5 }
  0x32   : > { %p2324_p10 = pnand %p2322_p9, %p2906_p7 }
  0x34   : > { %p2325_p11 = pneg %p2324_p10 }
  0x36   : > { %p2330_p13 = pnand %p2328_p12, %p2325_p11 }
  0x38   : > { %2333 = shalt.err (!%p2330_p13)
}
  0x39   : > { %s2334_s26 = scalar_lea.vmem %s2890_s0, 512  ;;  %p2342_p6 = scmp.lt.s32.totalorder %s2890_s0, %s2890_s0 }
  0x3a   : > { %p2335_p0 = scmp.ne.s32.totalorder %s2890_s0, %s2334_s26  ;;  %p2343_p8 = scmp.lt.s32.totalorder %s2334_s26, %s2334_s26 }
  0x3c   : > { %p2337_p1 = pnand %p2335_p0, %p2906_p7  ;;  %p2344_p9 = por %p2343_p8, %p2342_p6 }
  0x3e   : > { %p2338_p4 = pneg %p2337_p1 }
  0x40   : > { %p2345_p10 = pnand %p2344_p9, %p2338_p4 }
  0x42   : > { %2348 = shalt.err (!%p2345_p10)
}
  0x43   : > { %s3358_s17 = smov 64   ;;  %s3359_s3 = smov 4  }
  0x44   : > { %2154 = dma.hbm_to_vmem [thread:$0]  (!%p2894_p5), %s3338_s5, 512, %s2890_s0, [#allocation8], %s3358_s17, %s3358_s17, %s3359_s3  }
  0x45   : > { %s2759_s19 = smov [#allocation10]   ;;  %s2760_s20 = smov [#allocation13]  }
  0x46   : > { %s506_s1 = sshll.u32 %s2759_s19, 4  ;;  %s533_s21 = sshll.u32 %s2760_s20, 4  ;;  %s507_s1 = int_to_ptr.vmem [resolvable:$true] %s506_s1  ;;  %s534_s21 = int_to_ptr.vmem [resolvable:$true] %s533_s21 }
  0x47   : > { %s2349_s29 = scalar_lea.hbm %s3340_s7, 48 }
  0x48   : > { %p2350_p11 = scmp.ne.s32.totalorder %s3340_s7, %s2349_s29  ;;  %p2356_p0 = scmp.lt.u32.totalorder %s2349_s29, %s3340_s7 }
  0x4a   : > { %p2352_p12 = pnand %p2350_p11, %p2906_p7 }
  0x4c   : > { %p2353_p13 = pneg %p2352_p12 }
  0x4e   : > { %p2358_p1 = pnand %p2356_p0, %p2353_p13 }
  0x50   : > { %2361 = shalt.err (!%p2358_p1)
}
  0x51   : > { %s2362_s0 = scalar_lea.vmem %s507_s1, 48  ;;  %s2369_s24 = scalar_lea.vmem %s507_s1, 64 }
  0x52   : > { %p2363_p4 = scmp.ne.s32.totalorder %s507_s1, %s2362_s0  ;;  %p2370_p9 = scmp.lt.s32.totalorder %s507_s1, %s507_s1 }
  0x53   : > { %p2371_p10 = scmp.lt.s32.totalorder %s2369_s24, %s2362_s0 }
  0x54   : > { %p2365_p6 = pnand %p2363_p4, %p2906_p7 }
  0x55   : > { %p2372_p2 = por %p2371_p10, %p2370_p9 }
  0x56   : > { %p2366_p8 = pneg %p2365_p6 }
  0x58   : > { %p2373_p3 = pnand %p2372_p2, %p2366_p8 }
  0x5a   : > { %2376 = shalt.err (!%p2373_p3)
}
  0x5b   : > { %s3362_s2 = smov 16   ;;  %s3363_s18 = smov 1  }
  0x5c   : > { %2160 = dma.hbm_to_vmem [thread:$0]  (!%p2894_p5), %s3340_s7, 48, %s507_s1, [#allocation11], %s3362_s2, %s3362_s2, %s3363_s18  }
  0x5d   : > { %s2377_s23 = scalar_lea.hbm %s3342_s9, 16 }
  0x5e   : > { %p2378_p2 = scmp.ne.s32.totalorder %s3342_s9, %s2377_s23  ;;  %p2384_p12 = scmp.lt.u32.totalorder %s2377_s23, %s3342_s9 }
  0x60   : > { %p2380_p3 = pnand %p2378_p2, %p2906_p7 }
  0x62   : > { %p2381_p11 = pneg %p2380_p3 }
  0x64   : > { %p2386_p13 = pnand %p2384_p12, %p2381_p11 }
  0x66   : > { %2389 = shalt.err (!%p2386_p13)
}
  0x67   : > { %s2390_s24 = scalar_lea.vmem %s534_s21, 16  ;;  %s2397_s1 = scalar_lea.vmem %s534_s21, 32 }
  0x68   : > { %p2391_p0 = scmp.ne.s32.totalorder %s534_s21, %s2390_s24  ;;  %p2398_p6 = scmp.lt.s32.totalorder %s534_s21, %s534_s21 }
  0x69   : > { %p2399_p8 = scmp.lt.s32.totalorder %s2397_s1, %s2390_s24 }
  0x6a   : > { %p2393_p1 = pnand %p2391_p0, %p2906_p7 }
  0x6b   : > { %p2400_p9 = por %p2399_p8, %p2398_p6 }
  0x6c   : > { %p2394_p4 = pneg %p2393_p1 }
  0x6e   : > { %p2401_p10 = pnand %p2400_p9, %p2394_p4 }
  0x70   : > { %2404 = shalt.err (!%p2401_p10)
}
  0x71   : > { %2166 = dma.hbm_to_vmem [thread:$0]  (!%p2894_p5), %s3342_s9, 16, %s534_s21, [#allocation14]  }
  0x72   : > { %s2763_s19 = smov [#allocation16]   ;;  %s2764_s23 = smov [#allocation19]  }
  0x73   : > { %s556_s20 = sshll.u32 %s2763_s19, 4  ;;  %s582_s25 = sshll.u32 %s2764_s23, 4  ;;  %s557_s20 = int_to_ptr.vmem [resolvable:$true] %s556_s20  ;;  %s583_s25 = int_to_ptr.vmem [resolvable:$true] %s582_s25 }
  0x74   : > { %s2405_s0 = scalar_lea.hbm %s3344_s11, 48 }
  0x75   : > { %p2406_p2 = scmp.ne.s32.totalorder %s3344_s11, %s2405_s0  ;;  %p2412_p12 = scmp.lt.u32.totalorder %s2405_s0, %s3344_s11 }
  0x77   : > { %p2408_p3 = pnand %p2406_p2, %p2906_p7 }
  0x79   : > { %p2409_p11 = pneg %p2408_p3 }
  0x7b   : > { %p2414_p13 = pnand %p2412_p12, %p2409_p11 }
  0x7d   : > { %2417 = shalt.err (!%p2414_p13)
}
  0x7e   : > { %s2418_s21 = scalar_lea.vmem %s557_s20, 48  ;;  %s2425_s28 = scalar_lea.vmem %s557_s20, 64 }
  0x7f   : > { %p2419_p0 = scmp.ne.s32.totalorder %s557_s20, %s2418_s21  ;;  %p2426_p6 = scmp.lt.s32.totalorder %s557_s20, %s557_s20 }
  0x80   : > { %p2427_p8 = scmp.lt.s32.totalorder %s2425_s28, %s2418_s21 }
  0x81   : > { %p2421_p1 = pnand %p2419_p0, %p2906_p7 }
  0x82   : > { %p2428_p9 = por %p2427_p8, %p2426_p6 }
  0x83   : > { %p2422_p4 = pneg %p2421_p1 }
  0x85   : > { %p2429_p10 = pnand %p2428_p9, %p2422_p4 }
  0x87   : > { %2432 = shalt.err (!%p2429_p10)
}
  0x88   : > { %2172 = dma.hbm_to_vmem [thread:$0]  (!%p2894_p5), %s3344_s11, 48, %s557_s20, [#allocation17], %s3362_s2, %s3362_s2, %s3363_s18  }
  0x89   : > { %s2433_s26 = scalar_lea.hbm %s3346_s13, 48 }
  0x8a   : > { %p2434_p2 = scmp.ne.s32.totalorder %s3346_s13, %s2433_s26  ;;  %p2440_p12 = scmp.lt.u32.totalorder %s2433_s26, %s3346_s13 }
  0x8c   : > { %p2436_p3 = pnand %p2434_p2, %p2906_p7 }
  0x8e   : > { %p2437_p11 = pneg %p2436_p3 }
  0x90   : > { %p2442_p13 = pnand %p2440_p12, %p2437_p11 }
  0x92   : > { %2445 = shalt.err (!%p2442_p13)
}
  0x93   : > { %s2446_s21 = scalar_lea.vmem %s583_s25, 48  ;;  %s2453_s20 = scalar_lea.vmem %s583_s25, 64 }
  0x94   : > { %p2447_p0 = scmp.ne.s32.totalorder %s583_s25, %s2446_s21  ;;  %p2454_p6 = scmp.lt.s32.totalorder %s583_s25, %s583_s25 }
  0x95   : > { %p2455_p8 = scmp.lt.s32.totalorder %s2453_s20, %s2446_s21 }
  0x96   : > { %p2449_p1 = pnand %p2447_p0, %p2906_p7 }
  0x97   : > { %p2456_p9 = por %p2455_p8, %p2454_p6 }
  0x98   : > { %p2450_p4 = pneg %p2449_p1 }
  0x9a   : > { %p2457_p10 = pnand %p2456_p9, %p2450_p4 }
  0x9c   : > { %2460 = shalt.err (!%p2457_p10)
}
  0x9d   : > { %2178 = dma.hbm_to_vmem [thread:$0]  (!%p2894_p5), %s3346_s13, 48, %s583_s25, [#allocation20], %s3362_s2, %s3362_s2, %s3363_s18  }
  0x9e   : > { %s2765_s19 = smov [#allocation22]   ;;  %s2766_s29 = smov [#allocation2]  }
  0x9f   : > { %s608_s23 = sshll.u32 %s2765_s19, 4  ;;  %s446_s26 = sshll.u32 %s2766_s29, 4  ;;  %s609_s23 = int_to_ptr.vmem [resolvable:$true] %s608_s23  ;;  %s447_s26 = int_to_ptr.vmem [resolvable:$true] %s446_s26 }
  0xa0   : > { %s2461_s1 = scalar_lea.hbm %s3348_s15, 768 }
  0xa1   : > { %p2462_p2 = scmp.ne.s32.totalorder %s3348_s15, %s2461_s1  ;;  %p2468_p12 = scmp.lt.u32.totalorder %s2461_s1, %s3348_s15 }
  0xa3   : > { %p2464_p3 = pnand %p2462_p2, %p2906_p7 }
  0xa5   : > { %p2465_p11 = pneg %p2464_p3 }
  0xa7   : > { %p2470_p13 = pnand %p2468_p12, %p2465_p11 }
  0xa9   : > { %2473 = shalt.err (!%p2470_p13)
}
  0xaa   : > { %s2474_s25 = scalar_lea.vmem %s609_s23, 768  ;;  %p2482_p6 = scmp.lt.s32.totalorder %s609_s23, %s609_s23 }
  0xab   : > { %p2475_p0 = scmp.ne.s32.totalorder %s609_s23, %s2474_s25  ;;  %p2483_p8 = scmp.lt.s32.totalorder %s2474_s25, %s2474_s25 }
  0xad   : > { %p2477_p1 = pnand %p2475_p0, %p2906_p7  ;;  %p2484_p9 = por %p2483_p8, %p2482_p6 }
  0xaf   : > { %p2478_p4 = pneg %p2477_p1 }
  0xb1   : > { %p2485_p10 = pnand %p2484_p9, %p2478_p4 }
  0xb3   : > { %2488 = shalt.err (!%p2485_p10)
}
  0xb4   : > { %s3360_s17 = smov 192   ;;  %s3361_s19 = smov 12  }
  0xb5   : > { %2184 = dma.hbm_to_vmem [thread:$0]  (!%p2894_p5), %s3348_s15, 768, %s609_s23, [#allocation23], %s3360_s17, %s3360_s17, %s3361_s19  }
  0xb6   : > { %s3376_s27 = sld [smem:[#allocation37_spill]] }
  0xbc   : > { %s2489_s21 = scalar_lea.hbm %s3376_s27, 16 }
  0xbd   : > { %p2490_p2 = scmp.ne.s32.totalorder %s3376_s27, %s2489_s21  ;;  %p2496_p12 = scmp.lt.u32.totalorder %s2489_s21, %s3376_s27 }
  0xbf   : > { %p2492_p3 = pnand %p2490_p2, %p2906_p7 }
  0xc1   : > { %p2493_p11 = pneg %p2492_p3 }
  0xc3   : > { %p2498_p13 = pnand %p2496_p12, %p2493_p11 }
  0xc5   : > { %2501 = shalt.err (!%p2498_p13)
}
  0xc6   : > { %s2502_s29 = scalar_lea.vmem %s447_s26, 16  ;;  %s2509_s23 = scalar_lea.vmem %s447_s26, 32 }
  0xc7   : > { %p2503_p0 = scmp.ne.s32.totalorder %s447_s26, %s2502_s29  ;;  %p2510_p6 = scmp.lt.s32.totalorder %s447_s26, %s447_s26 }
  0xc8   : > { %p2511_p8 = scmp.lt.s32.totalorder %s2509_s23, %s2502_s29 }
  0xc9   : > { %p2505_p1 = pnand %p2503_p0, %p2906_p7 }
  0xca   : > { %p2512_p9 = por %p2511_p8, %p2510_p6 }
  0xcb   : > { %p2506_p4 = pneg %p2505_p1 }
  0xcd   : > { %p2513_p10 = pnand %p2512_p9, %p2506_p4 }
  0xcf   : > { %2516 = shalt.err (!%p2513_p10)
}
  0xd0   : > { %2145 = dma.hbm_to_vmem [thread:$0]  (!%p2894_p5), %s3376_s27, 16, %s447_s26, [#allocation3]  }
  0xd1   : > { %s2769_s3 = smov [#allocation6]   ;;  %s2770_s21 = smov [#allocation9]  }
  0xd2   : > { %s470_s1 = sshll.u32 %s2769_s3, 4  ;;  %s493_s20 = sshll.u32 %s2770_s21, 4  ;;  %s471_s1 = int_to_ptr.vmem [resolvable:$true] %s470_s1  ;;  %s494_s20 = int_to_ptr.vmem [resolvable:$true] %s493_s20 }
  0xd3   : > { %s2517_s17 = scalar_lea.hbm %s3337_s4, 16 }
  0xd4   : > { %p2518_p2 = scmp.ne.s32.totalorder %s3337_s4, %s2517_s17  ;;  %p2524_p12 = scmp.lt.u32.totalorder %s2517_s17, %s3337_s4 }
  0xd6   : > { %p2520_p3 = pnand %p2518_p2, %p2906_p7 }
  0xd8   : > { %p2521_p11 = pneg %p2520_p3 }
  0xda   : > { %p2526_p13 = pnand %p2524_p12, %p2521_p11 }
  0xdc   : > { %2529 = shalt.err (!%p2526_p13)
}
  0xdd   : > { %s2530_s26 = scalar_lea.vmem %s471_s1, 16  ;;  %s2537_s24 = scalar_lea.vmem %s471_s1, 32 }
  0xde   : > { %p2531_p0 = scmp.ne.s32.totalorder %s471_s1, %s2530_s26  ;;  %p2538_p6 = scmp.lt.s32.totalorder %s471_s1, %s471_s1 }
  0xdf   : > { %p2539_p8 = scmp.lt.s32.totalorder %s2537_s24, %s2530_s26 }
  0xe0   : > { %p2533_p1 = pnand %p2531_p0, %p2906_p7 }
  0xe1   : > { %p2540_p9 = por %p2539_p8, %p2538_p6 }
  0xe2   : > { %p2534_p4 = pneg %p2533_p1 }
  0xe4   : > { %p2541_p10 = pnand %p2540_p9, %p2534_p4 }
  0xe6   : > { %2544 = shalt.err (!%p2541_p10)
}
  0xe7   : > { %2151 = dma.hbm_to_vmem [thread:$0]  (!%p2894_p5), %s3337_s4, 16, %s471_s1, [#allocation5]  }
  0xe8   : > { %s2545_s28 = scalar_lea.hbm %s3339_s6, 48 }
  0xe9   : > { %p2546_p2 = scmp.ne.s32.totalorder %s3339_s6, %s2545_s28  ;;  %p2552_p12 = scmp.lt.u32.totalorder %s2545_s28, %s3339_s6 }
  0xeb   : > { %p2548_p3 = pnand %p2546_p2, %p2906_p7 }
  0xed   : > { %p2549_p11 = pneg %p2548_p3 }
  0xef   : > { %p2554_p13 = pnand %p2552_p12, %p2549_p11 }
  0xf1   : > { %2557 = shalt.err (!%p2554_p13)
}
  0xf2   : > { %s2558_s26 = scalar_lea.vmem %s494_s20, 48  ;;  %s2565_s1 = scalar_lea.vmem %s494_s20, 64 }
  0xf3   : > { %p2559_p0 = scmp.ne.s32.totalorder %s494_s20, %s2558_s26  ;;  %p2566_p6 = scmp.lt.s32.totalorder %s494_s20, %s494_s20 }
  0xf4   : > { %p2567_p8 = scmp.lt.s32.totalorder %s2565_s1, %s2558_s26 }
  0xf5   : > { %p2561_p1 = pnand %p2559_p0, %p2906_p7 }
  0xf6   : > { %p2568_p9 = por %p2567_p8, %p2566_p6 }
  0xf7   : > { %p2562_p4 = pneg %p2561_p1 }
  0xf9   : > { %p2569_p10 = pnand %p2568_p9, %p2562_p4 }
  0xfb   : > { %2572 = shalt.err (!%p2569_p10)
}
  0xfc   : > { %2157 = dma.hbm_to_vmem [thread:$0]  (!%p2894_p5), %s3339_s6, 48, %s494_s20, [#allocation8], %s3362_s2, %s3362_s2, %s3363_s18  }
  0xfd   : > { %s2771_s21 = smov [#allocation12]   ;;  %s2772_s19 = smov [#allocation15]  }
  0xfe   : > { %s519_s17 = sshll.u32 %s2771_s21, 4  ;;  %s543_s28 = sshll.u32 %s2772_s19, 4  ;;  %s520_s17 = int_to_ptr.vmem [resolvable:$true] %s519_s17  ;;  %s544_s28 = int_to_ptr.vmem [resolvable:$true] %s543_s28 }
  0xff   : > { %s2573_s23 = scalar_lea.hbm %s3341_s8, 48 }
 0x100   : > { %p2574_p2 = scmp.ne.s32.totalorder %s3341_s8, %s2573_s23  ;;  %p2580_p12 = scmp.lt.u32.totalorder %s2573_s23, %s3341_s8 }
 0x102   : > { %p2576_p3 = pnand %p2574_p2, %p2906_p7 }
 0x104   : > { %p2577_p11 = pneg %p2576_p3 }
 0x106   : > { %p2582_p13 = pnand %p2580_p12, %p2577_p11 }
 0x108   : > { %2585 = shalt.err (!%p2582_p13)
}
 0x109   : > { %s2586_s20 = scalar_lea.vmem %s520_s17, 48  ;;  %s2593_s3 = scalar_lea.vmem %s520_s17, 64 }
 0x10a   : > { %p2587_p0 = scmp.ne.s32.totalorder %s520_s17, %s2586_s20  ;;  %p2594_p6 = scmp.lt.s32.totalorder %s520_s17, %s520_s17 }
 0x10b   : > { %p2595_p8 = scmp.lt.s32.totalorder %s2593_s3, %s2586_s20 }
 0x10c   : > { %p2589_p1 = pnand %p2587_p0, %p2906_p7 }
 0x10d   : > { %p2596_p9 = por %p2595_p8, %p2594_p6 }
 0x10e   : > { %p2590_p4 = pneg %p2589_p1 }
 0x110   : > { %p2597_p10 = pnand %p2596_p9, %p2590_p4 }
 0x112   : > { %2600 = shalt.err (!%p2597_p10)
}
 0x113   : > { %2163 = dma.hbm_to_vmem [thread:$0]  (!%p2894_p5), %s3341_s8, 48, %s520_s17, [#allocation11], %s3362_s2, %s3362_s2, %s3363_s18  }
 0x114   : > { %s2601_s23 = scalar_lea.hbm %s3343_s10, 512 }
 0x115   : > { %p2602_p2 = scmp.ne.s32.totalorder %s3343_s10, %s2601_s23  ;;  %p2608_p12 = scmp.lt.u32.totalorder %s2601_s23, %s3343_s10 }
 0x117   : > { %p2604_p3 = pnand %p2602_p2, %p2906_p7 }
 0x119   : > { %p2605_p11 = pneg %p2604_p3 }
 0x11b   : > { %p2610_p13 = pnand %p2608_p12, %p2605_p11 }
 0x11d   : > { %2613 = shalt.err (!%p2610_p13)
}
 0x11e   : > { %s2614_s20 = scalar_lea.vmem %s544_s28, 512  ;;  %p2622_p6 = scmp.lt.s32.totalorder %s544_s28, %s544_s28 }
 0x11f   : > { %p2615_p0 = scmp.ne.s32.totalorder %s544_s28, %s2614_s20  ;;  %p2623_p8 = scmp.lt.s32.totalorder %s2614_s20, %s2614_s20 }
 0x121   : > { %p2617_p1 = pnand %p2615_p0, %p2906_p7  ;;  %p2624_p9 = por %p2623_p8, %p2622_p6 }
 0x123   : > { %p2618_p4 = pneg %p2617_p1 }
 0x125   : > { %p2625_p10 = pnand %p2624_p9, %p2618_p4 }
 0x127   : > { %2628 = shalt.err (!%p2625_p10)
}
 0x128   : > { %s3377_s17 = smov 4   ;;  %s3378_s3 = smov 64  }
 0x129   : > { %2169 = dma.hbm_to_vmem [thread:$0]  (!%p2894_p5), %s3343_s10, 512, %s544_s28, [#allocation14], %s3378_s3, %s3378_s3, %s3377_s17  }
 0x12a   : > { %s2773_s25 = smov [#allocation18]   ;;  %s2774_s23 = smov [#allocation21]  }
 0x12b   : > { %s569_s29 = sshll.u32 %s2773_s25, 4  ;;  %s595_s0 = sshll.u32 %s2774_s23, 4  ;;  %s570_s29 = int_to_ptr.vmem [resolvable:$true] %s569_s29  ;;  %s596_s0 = int_to_ptr.vmem [resolvable:$true] %s595_s0 }
 0x12c   : > { %s2629_s24 = scalar_lea.hbm %s3345_s12, 48 }
 0x12d   : > { %p2630_p2 = scmp.ne.s32.totalorder %s3345_s12, %s2629_s24  ;;  %p2636_p12 = scmp.lt.u32.totalorder %s2629_s24, %s3345_s12 }
 0x12f   : > { %p2632_p3 = pnand %p2630_p2, %p2906_p7 }
 0x131   : > { %p2633_p11 = pneg %p2632_p3 }
 0x133   : > { %p2638_p13 = pnand %p2636_p12, %p2633_p11 }
 0x135   : > { %2641 = shalt.err (!%p2638_p13)
}
 0x136   : > { %s2642_s28 = scalar_lea.vmem %s570_s29, 48  ;;  %s2649_s17 = scalar_lea.vmem %s570_s29, 64 }
 0x137   : > { %p2643_p0 = scmp.ne.s32.totalorder %s570_s29, %s2642_s28  ;;  %p2650_p6 = scmp.lt.s32.totalorder %s570_s29, %s570_s29 }
 0x138   : > { %p2651_p8 = scmp.lt.s32.totalorder %s2649_s17, %s2642_s28 }
 0x139   : > { %p2645_p1 = pnand %p2643_p0, %p2906_p7 }
 0x13a   : > { %p2652_p9 = por %p2651_p8, %p2650_p6 }
 0x13b   : > { %p2646_p4 = pneg %p2645_p1 }
 0x13d   : > { %p2653_p10 = pnand %p2652_p9, %p2646_p4 }
 0x13f   : > { %2656 = shalt.err (!%p2653_p10)
}
 0x140   : > { %s3379_s2 = smov 1   ;;  %s3380_s3 = smov 16  }
 0x141   : > { %2175 = dma.hbm_to_vmem [thread:$0]  (!%p2894_p5), %s3345_s12, 48, %s570_s29, [#allocation17], %s3380_s3, %s3380_s3, %s3379_s2  }
 0x142   : > { %s2657_s26 = scalar_lea.hbm %s3347_s14, 768 }
 0x143   : > { %p2658_p2 = scmp.ne.s32.totalorder %s3347_s14, %s2657_s26  ;;  %p2664_p12 = scmp.lt.u32.totalorder %s2657_s26, %s3347_s14 }
 0x145   : > { %p2660_p3 = pnand %p2658_p2, %p2906_p7 }
 0x147   : > { %p2661_p11 = pneg %p2660_p3 }
 0x149   : > { %p2666_p13 = pnand %p2664_p12, %p2661_p11 }
 0x14b   : > { %2669 = shalt.err (!%p2666_p13)
}
 0x14c   : > { %s2670_s28 = scalar_lea.vmem %s596_s0, 768  ;;  %p2678_p6 = scmp.lt.s32.totalorder %s596_s0, %s596_s0 }
 0x14d   : > { %p2671_p0 = scmp.ne.s32.totalorder %s596_s0, %s2670_s28  ;;  %p2679_p8 = scmp.lt.s32.totalorder %s2670_s28, %s2670_s28 }
 0x14f   : > { %p2673_p1 = pnand %p2671_p0, %p2906_p7  ;;  %p2680_p9 = por %p2679_p8, %p2678_p6 }
 0x151   : > { %p2674_p4 = pneg %p2673_p1 }
 0x153   : > { %p2681_p10 = pnand %p2680_p9, %p2674_p4 }
 0x155   : > { %2684 = shalt.err (!%p2681_p10)
}
 0x156   : > { %s3381_s29 = smov 12   ;;  %s3382_s17 = smov 192  }
 0x157   : > { %2181 = dma.hbm_to_vmem [thread:$0]  (!%p2894_p5), %s3347_s14, 768, %s596_s0, [#allocation20], %s3382_s17, %s3382_s17, %s3381_s29  }
 0x158   : > { %s2775_s18 = smov [#allocation24]   ;;  %s2685_s26 = scalar_lea.hbm %s3349_s16, 48 }
 0x159   : > { %s622_s19 = sshll.u32 %s2775_s18, 4  ;;  %p2686_p2 = scmp.ne.s32.totalorder %s3349_s16, %s2685_s26  ;;  %s623_s19 = int_to_ptr.vmem [resolvable:$true] %s622_s19 }
 0x15a   : > { %p2692_p12 = scmp.lt.u32.totalorder %s2685_s26, %s3349_s16 }
 0x15b   : > { %p2688_p3 = pnand %p2686_p2, %p2906_p7 }
 0x15d   : > { %p2689_p11 = pneg %p2688_p3 }
 0x15f   : > { %p2694_p13 = pnand %p2692_p12, %p2689_p11 }
 0x161   : > { %2697 = shalt.err (!%p2694_p13)
}
 0x162   : > { %s2698_s0 = scalar_lea.vmem %s623_s19, 48  ;;  %s2705_s28 = scalar_lea.vmem %s623_s19, 64 }
 0x163   : > { %p2699_p0 = scmp.ne.s32.totalorder %s623_s19, %s2698_s0  ;;  %p2706_p6 = scmp.lt.s32.totalorder %s623_s19, %s623_s19 }
 0x164   : > { %p2707_p8 = scmp.lt.s32.totalorder %s2705_s28, %s2698_s0 }
 0x165   : > { %p2701_p1 = pnand %p2699_p0, %p2906_p7 }
 0x166   : > { %p2708_p9 = por %p2707_p8, %p2706_p6 }
 0x167   : > { %p2702_p4 = pneg %p2701_p1 }
 0x169   : > { %p2709_p10 = pnand %p2708_p9, %p2702_p4 }
 0x16b   : > { %2712 = shalt.err (!%p2709_p10)
}
 0x16c   : > { %2187 = dma.hbm_to_vmem [thread:$0]  (!%p2894_p5), %s3349_s16, 48, %s623_s19, [#allocation23]  }
 0x16d   : > { %s3383_s2 = sld [smem:[#allocation35_spill]] }
 0x173   : > { %p3384_p2 = scmp.ne.s32.totalorder %s3383_s2, 0 }
 0x174   : > { %s3385_s3 = sld [smem:[#allocation34_spill]] (!%p3384_p2) }
 0x175   : > { %649 = sbr.rel (%p3384_p2) target bundleno = 2686 (0xa7e), region = 88 }
 0x17a   : > { %p3386_p3 = scmp.eq.s32.totalorder (!%p3384_p2), %s3385_s3, 0 }
 0x17c   : > { %2718 = dma.done.wait (%p3386_p3), [#allocation3], 16   ;;  %p3387_p7 = pmov %p3386_p3 }
 0x17d   : > { %p3388_p11 = pmov %p3386_p3 }
 0x17e   : > { %2720 = vsyncadd (%p3387_p7), [#allocation3], 4294967280 }
 0x17f   : > { %2722 = dma.done.wait (%p3388_p11), [#allocation5], 1296   ;;  %p3389_p12 = pmov %p3386_p3 }
 0x180   : > { %p3390_p13 = pmov %p3386_p3 }
 0x181   : > { %2724 = vsyncadd (%p3389_p12), [#allocation5], 4294966000 }
 0x182   : > { %2726 = dma.done.wait (%p3390_p13), [#allocation8], 560   ;;  %p3391_p5 = pmov %p3386_p3 }
 0x183   : > { %p3392_p0 = pmov %p3386_p3 }
 0x184   : > { %2728 = vsyncadd (%p3391_p5), [#allocation8], 4294966736 }
 0x185   : > { %2730 = dma.done.wait (%p3392_p0), [#allocation11], 96   ;;  %p3393_p1 = pmov %p3392_p0 }
 0x186   : > { %p3394_p4 = pmov %p3392_p0 }
 0x187   : > { %2732 = vsyncadd (%p3393_p1), [#allocation11], 4294967200 }
 0x188   : > { %2734 = dma.done.wait (%p3394_p4), [#allocation14], 528   ;;  %p3395_p6 = pmov %p3392_p0 }
 0x189   : > { %p3396_p8 = pmov %p3392_p0 }
 0x18a   : > { %2736 = vsyncadd (%p3395_p6), [#allocation14], 4294966768 }
 0x18b   : > { %2738 = dma.done.wait (%p3396_p8), [#allocation17], 96   ;;  %p3397_p9 = pmov %p3392_p0 }
 0x18c   : > { %p3398_p10 = pmov %p3392_p0 }
 0x18d   : > { %2740 = vsyncadd (%p3397_p9), [#allocation17], 4294967200 }
 0x18e   : > { %2742 = dma.done.wait (%p3398_p10), [#allocation20], 816   ;;  %p3399_p2 = pmov %p3392_p0 }
 0x18f   : > { %p3400_p3 = pmov %p3392_p0 }
 0x190   : > { %2744 = vsyncadd (%p3399_p2), [#allocation20], 4294966480 }
 0x191   : > { %2746 = dma.done.wait (%p3400_p3), [#allocation23], 816   ;;  %p3401_p7 = pmov %p3392_p0 }
 0x192   : > { %p760_p11 = scmp.lt.s32.totalorder %s3385_s3, 1  ;;  %v2776_v0 = vmov 0   ;;  %s3402_s19 = sld [smem:[#allocation39_spill]]  ;;  %v783_v2 = vld [vmem:[#allocation4] sm:$0xff]  ;;  %v784_v3 = vld [vmem:[#allocation4 + $0x8] sm:$0xff]  ;;  %v785_v4 = vld [vmem:[#allocation4 + $0x10] sm:$0xff] }
 0x193   : > { %2748 = vsyncadd (%p3401_p7), [#allocation23], 4294966480  ;;  %2254 = vset.pattern.permute.xlu0 %v2776_v0  ;;  %v2777_v5 = vmov 0.0|0.0   ;;  %v2068_v6 = vpack.c.bf16 %v784_v3, %v783_v2  ;;  %v786_v7 = vld [vmem:[#allocation4 + $0x18] sm:$0xff]  ;;  %v787_v8 = vld [vmem:[#allocation4 + $0x20] sm:$0xff]  ;;  %vm904_vm0 = vcmask 261120  }
 0x194   : > { %s3407_s3 = smov (!%p760_p11, %s3385_s3), 1  ;;  %2067 = vmatprep.subr.bf16.mxu0 %v2777_v5  ;;  %v788_v9 = vld [vmem:[#allocation4 + $0x28] sm:$0xff]  ;;  %v2071_v10 = vpack.c.bf16 %v786_v7, %v785_v4  ;;  %v789_v11 = vld [vmem:[#allocation4 + $0x30] sm:$0xff]  ;;  %v790_v12 = vld [vmem:[#allocation4 + $0x38] sm:$0xff]  ;;  %s3403_s1 = sld [smem:[#allocation36_spill]]  ;;  %vm2778_vm1 = vmmov 0  }
 0x195   : > { %s1910_s30 = sshll.u32 %s3407_s3, 3  ;;  %2069 = vmatpush3.bf16.msra.mxu0 %v2068_v6  ;;  %v2074_v13 = vpack.c.bf16 %v788_v9, %v787_v8  ;;  %v2077_v14 = vpack.c.bf16 %v790_v12, %v789_v11  ;;  %v1916_v15 = vld [vmem:[#allocation6] ss:$0 sm:$0xff]  ;;  %v1917_v17 = vld [vmem:[#allocation9] ss:$0 sm:$0xff]  ;;  %v791_v23 = vld [vmem:[#allocation4 + $0x40] sm:$0xff] }
 0x196   : > { %2070 = vmatprep.subr.bf16.mxu0 %v2777_v5  ;;  %v1914_v22 = vld [vmem:[#allocation2] ss:$0 sm:$0xff]  ;;  %v792_v24 = vld [vmem:[#allocation4 + $0x48] sm:$0xff]  ;;  %v2779_v27 = vmov 0.0   ;;  %vm793_vm2 = vcmask 654336   ;;  %v2255_v33 = vld [vmem:[#allocation7] sm:$0xff]  }
 0x197   : > { %v2080_v25 = vpack.c.bf16 %v792_v24, %v791_v23  ;;  %2016 = vmatprep.mubr.msk.f32.mxu0 %vm2778_vm1, %v2779_v27  ;;  %2019 = vmatprep.subr.bf16.mxu1 %v2779_v27  ;;  %v2256_v34 = vld [vmem:[#allocation7 + $0x8] sm:$0xff]   ;;  %v1918_v43 = vld [vmem:[#allocation10] ss:$0 sm:$0xff]  ;;  %v1920_v59 = vld [vmem:[#allocation9 + $0x1] ss:$0 sm:$0xff]  ;;  %s2780_s20 = smov 32  }
 0x198   : > { %s767_s25 = scalar_lea.vmem %s3402_s19, %s1910_s30  ;;  %2023 = vmatprep.mubr.msk.bf16.mxu1 %vm2778_vm1, %v2779_v27  ;;  %2020 = vmatpush3.bf16.msra.mxu1 %v2255_v33  ;;  %v1919_v45 = vld [vmem:[#allocation12] ss:$0 sm:$0xff]  ;;  %v1932_v58 = vld [vmem:[#allocation13] ss:$0 sm:$0xff]  ;;  %v1933_v62 = vld [vmem:[#allocation16] ss:$0 sm:$0xff] }
 0x199   : > { %v880_v1 = vld [vmem:[%s767_s25] sm:$0xff]  ;;  %2072 = vmatpush3.bf16.msra.mxu0 %v2071_v10  ;;  %2021 = vmatprep.subr.bf16.mxu1 %v2779_v27  ;;  %s1966_s21 = sshll.u32 %s3407_s3, 5  ;;  %vm1657_vm5 = vcmask 523264   ;;  %s3404_s29 = sld [smem:[#allocation40_spill]] }
 0x19a   : > { %884 = vperm.xlu0 %2254, %v880_v1   ;;  %2073 = vmatprep.subr.bf16.mxu0 %v2777_v5  ;;  %s763_s24 = scalar_lea.vmem %s3403_s1, %s1910_s30 }
 0x19b   : > { %v774_v21 = vld [vmem:[%s763_s24] sm:$0xff] }
 0x19c   : > { %v782_v26 = vmul.f32 %v1914_v22, %v774_v21  ;;  %2022 = vmatpush3.bf16.msra.mxu1 %v2256_v34 }
 0x19d   : > { %2075 = vmatpush3.bf16.msra.mxu0 %v2074_v13  ;;  %2027 = vmatprep.subr.bf16.mxu1 %v2779_v27 }
 0x19e   : > { %2076 = vmatprep.subr.bf16.mxu0 %v2777_v5 }
 0x19f   : > { %s3323_s17 = scalar_lea.vmem %s3404_s29, %s1966_s21 }
 0x1a1   : > { %2078 = vmatpush3.bf16.msra.mxu0 %v2077_v14 }
 0x1a2   : > { %2079 = vmatprep.subr.bf16.mxu0 %v2777_v5 }
 0x1a5   : > { %2081 = vmatpush3.bf16.msra.mxu0 %v2080_v25 }
 0x1a6   : > { %2043 = vmatprep.subr.bf16.mxu0 %v2779_v27 }
 0x1a8   : > { %2017 = vmatmul.mubr.msk.f32.vlgmr.msra.gmra.mrb[0].mxu0 %vm793_vm2, %v782_v26 }
 0x1a9   : > { %2047 = vmatprep.mubr.msk.bf16.mxu0 %vm2778_vm1, %v2779_v27 }
 0x219   : > { %v885_v16 = vpop.permute.xlu0 %884 }
 0x21a   : > { %v893_v18 = vmul.f32 %v1916_v15, %v885_v16 }
 0x21c   : > { %v901_v19 = vadd.f32 %v1917_v17, %v893_v18  ;;  %v2257_v17 = vld [vmem:[#allocation7 + $0x10] sm:$0xff]   ;;  %v2258_v18 = vld [vmem:[#allocation7 + $0x18] sm:$0xff]  }
 0x21e   : > { %v905_v20 = vsel %vm904_vm0, %v901_v19, 0.0 }
 0x21f   : > { %906 = vadd.xlane.f32.xlu0 %v905_v20 }
 0x27b   : > { %v863_v35 = vpop.f32.mrb[0].mxu0 }
 0x27c   : > { %v867_v36 = vmul.f32 %v863_v35, %v782_v26  ;;  %v2018_v37 = vpop.f32.mrb[1].mxu0  ;;  %v1924_v26 = vld [vmem:[#allocation10 + $0x1] ss:$0 sm:$0xff]  ;;  %v1935_v35 = vld [vmem:[#allocation19] ss:$0 sm:$0xff] }
 0x27e   : > { %v868_v38 = vsel %vm793_vm2, %v867_v36, 0.0 }
 0x2ac   : > { %v907_v28 = vpop.xlane.xlu0 %906 }
 0x2ad   : > { %v909_v29 = vmul.f32 0.03125, %v907_v28 }
 0x2af   : > { %v910_v30 = vsub.f32 %v901_v19, %v909_v29  ;;  %v1925_v29 = vld [vmem:[#allocation12 + $0x1] ss:$0 sm:$0xff] }
 0x2b1   : > { %v911_v31 = vmul.f32 %v910_v30, %v910_v30 }
 0x2b3   : > { %v912_v32 = vsel %vm904_vm0, %v911_v31, 0.0 }
 0x2b4   : > { %913 = vadd.xlane.f32.xlu1 %v912_v32  ;;  %v1934_v32 = vld [vmem:[#allocation18] ss:$0 sm:$0xff] }
 0x2b8   : > { %869 = vadd.xlane.f32.xlu1 %v868_v38  ;;  %v2259_v38 = vld [vmem:[#allocation15] sm:$0xff]  }
 0x341   : > { %v914_v39 = vpop.xlane.xlu1 %913 }
 0x342   : > { %v915_v40 = vmul.f32 0.03125, %v914_v39 }
 0x344   : > { %v916_v41 = vadd.f32 1e-05, %v915_v40 }
 0x345   : > { %v870_v50 = vpop.xlane.xlu1 %869 }
 0x346   : > { %2279 = vrsqrt.f32 %v916_v41  ;;  %v871_v51 = vmax.f32 %v870_v50, 0.0  ;;  %v2260_v41 = vld [vmem:[#allocation15 + $0x8] sm:$0xff]  }
 0x348   : > { %2281 = vrsqrt.f32 %v871_v51  ;;  %vm874_vm3 = vcmp.eq.f32.partialorder %v871_v51, inf  ;;  %v877_v54 = vand.u32 2147483648, %v871_v51  ;;  %vm876_vm4 = vcmp.eq.f32.partialorder %v871_v51, 0.0 }
 0x350   : > { %v2280_v42 = vpop.eup %2279 }
 0x351   : > { %v918_v44 = vmul.f32 %v2280_v42, %v910_v30 }
 0x352   : > { %v2282_v52 = vpop.eup %2281 }
 0x353   : > { %v925_v46 = vmul.f32 %v1918_v43, %v918_v44  ;;  %v873_v53 = vmul.f32 %v2282_v52, %v871_v51  ;;  %v1926_v44 = vld [vmem:[#allocation9 + $0x2] ss:$0 sm:$0xff] }
 0x355   : > { %v932_v47 = vadd.f32 %v1919_v45, %v925_v46  ;;  %v875_v55 = vsel %vm874_vm3, %v871_v51, %v873_v53  ;;  %v1936_v51 = vld [vmem:[#allocation16 + $0x1] ss:$0 sm:$0xff] }
 0x356   : > { %v878_v56 = vsel %vm876_vm4, %v877_v54, %v875_v55 }
 0x357   : > { %v933_v48 = vmax.f32 %v932_v47, 0.0  ;;  %v879_v57 = vmul.f32 0.025, %v878_v56 }
 0x359   : > { %v938_v49 = vpack.c.bf16 %v933_v48, %v933_v48  ;;  %v1142_v60 = vmul.f32 %v1932_v58, %v879_v57 }
 0x35b   : > { %2024 = vmatmul.mubr.msk.bf16.vlgmr.msra.gmra.mrb[0].mxu1 %vm904_vm0, %v938_v49  ;;  %v1150_v5 = vadd.f32 %v1933_v62, %v1142_v60 }
 0x35c   : > { %2031 = vmatprep.mubr.msk.bf16.mxu1 %vm2778_vm1, %v2779_v27  ;;  %2028 = vmatpush3.bf16.msra.mxu1 %v2257_v17 }
 0x35d   : > { %v1153_v6 = vsel %vm904_vm0, %v1150_v5, 0.0  ;;  %2029 = vmatprep.subr.bf16.mxu1 %v2779_v27 }
 0x360   : > { %2030 = vmatpush3.bf16.msra.mxu1 %v2258_v18  ;;  %v1942_v18 = vld [vmem:[#allocation16 + $0x2] ss:$0 sm:$0xff] }
 0x361   : > { %2035 = vmatprep.subr.bf16.mxu1 %v2779_v27 }
 0x42e   : > { %v996_v61 = vpop.f32.mrb[0].mxu1 }
 0x42f   : > { %v997_v63 = vadd.f32 %v1920_v59, %v996_v61  ;;  %v2025_v1 = vpop.f32.mrb[1].mxu1 }
 0x430   : > { %v999_v2 = vpop.f32.mrb[2].mxu1 }
 0x431   : > { %v2026_v3 = vpop.f32.mrb[3].mxu1  ;;  %v1006_v4 = vsel %vm904_vm0, %v997_v63, 0.0 }
 0x432   : > { %1007 = vadd.xlane.f32.xlu1 %v1006_v4 }
 0x436   : > { %1154 = vadd.xlane.f32.xlu1 %v1153_v6  ;;  %v2262_v6 = vld [vmem:[#allocation15 + $0x18] sm:$0xff]  }
 0x4bf   : > { %v1008_v7 = vpop.xlane.xlu1 %1007 }
 0x4c0   : > { %v1009_v8 = vmul.f32 0.03125, %v1008_v7 }
 0x4c2   : > { %v1010_v9 = vsub.f32 %v997_v63, %v1009_v8 }
 0x4c3   : > { %v1155_v10 = vpop.xlane.xlu1 %1154 }
 0x4c4   : > { %v1156_v11 = vmul.f32 0.03125, %v1155_v10  ;;  %v1011_v12 = vmul.f32 %v1010_v9, %v1010_v9 }
 0x4c6   : > { %v1157_v13 = vsub.f32 %v1150_v5, %v1156_v11  ;;  %v1012_v14 = vsel %vm904_vm0, %v1011_v12, 0.0  ;;  %v2261_v5 = vld [vmem:[#allocation15 + $0x10] sm:$0xff]   ;;  %v1940_v11 = vld [vmem:[#allocation18 + $0x1] ss:$0 sm:$0xff] }
 0x4c7   : > { %1013 = vadd.xlane.f32.xlu1 %v1012_v14  ;;  %2044 = vmatpush3.bf16.msra.mxu0 %v2261_v5 }
 0x4c8   : > { %v1158_v15 = vmul.f32 %v1157_v13, %v1157_v13  ;;  %2045 = vmatprep.subr.bf16.mxu0 %v2779_v27 }
 0x4ca   : > { %v1159_v16 = vsel %vm904_vm0, %v1158_v15, 0.0 }
 0x4cb   : > { %1160 = vadd.xlane.f32.xlu1 %v1159_v16  ;;  %2046 = vmatpush3.bf16.msra.mxu0 %v2262_v6 }
 0x4cc   : > { %2051 = vmatprep.subr.bf16.mxu0 %v2779_v27 }
 0x554   : > { %v1014_v19 = vpop.xlane.xlu1 %1013 }
 0x555   : > { %v1015_v20 = vmul.f32 0.03125, %v1014_v19 }
 0x557   : > { %v1016_v21 = vadd.f32 1e-05, %v1015_v20 }
 0x558   : > { %v1161_v22 = vpop.xlane.xlu1 %1160 }
 0x559   : > { %2283 = vrsqrt.f32 %v1016_v21  ;;  %v1162_v23 = vmul.f32 0.03125, %v1161_v22 }
 0x55b   : > { %v1163_v24 = vadd.f32 1e-05, %v1162_v23 }
 0x55d   : > { %2285 = vrsqrt.f32 %v1163_v24 }
 0x563   : > { %v2284_v25 = vpop.eup %2283 }
 0x564   : > { %v1018_v28 = vmul.f32 %v2284_v25, %v1010_v9 }
 0x566   : > { %v1025_v30 = vmul.f32 %v1924_v26, %v1018_v28 }
 0x567   : > { %v2286_v31 = vpop.eup %2285 }
 0x568   : > { %v1165_v33 = vmul.f32 %v2286_v31, %v1157_v13  ;;  %v1032_v34 = vadd.f32 %v1925_v29, %v1025_v30  ;;  %v1941_v13 = vld [vmem:[#allocation19 + $0x1] ss:$0 sm:$0xff] }
 0x569   : > { %v2263_v31 = vld [vmem:[#allocation22] ss:$12 sps:$4 sm:$0xff]  }
 0x56a   : > { %v1172_v36 = vmul.f32 %v1934_v32, %v1165_v33  ;;  %v1033_v37 = vmax.f32 %v1032_v34, 0.0  ;;  %v2265_v32 = vld [vmem:[#allocation22 + $0x4] ss:$12 sps:$4 sm:$0xff]   ;;  %v2266_v33 = vld [vmem:[#allocation22 + $0x8] ss:$12 sps:$4 sm:$0xff]  }
 0x56b   : > { %v2269_v34 = vld [vmem:[#allocation22 + $0x1c] ss:$12 sps:$4 sm:$0xff]  }
 0x56c   : > { %v1039_v39 = vpack.c.bf16 %v1033_v37, %v1033_v37  ;;  %v1179_v40 = vadd.f32 %v1935_v35, %v1172_v36  ;;  %v2270_v35 = vld [vmem:[#allocation22 + $0x20] ss:$12 sps:$4 sm:$0xff]   ;;  %v2267_v36 = vld [vmem:[#allocation22 + $0x18] ss:$12 sps:$4 sm:$0xff]  }
 0x56d   : > { %v2273_v37 = vld [vmem:[#allocation21 + $0x4] ss:$12 sps:$4 sm:$0xff]  }
 0x56e   : > { %2032 = vmatmul.mubr.msk.bf16.vlgmr.msra.gmra.mrb[4].mxu1 %vm904_vm0, %v1039_v39  ;;  %v1180_v42 = vmax.f32 %v1179_v40, 0.0 }
 0x56f   : > { %2036 = vmatpush3.bf16.msra.mxu1 %v2259_v38  ;;  %2039 = vmatprep.mubr.msk.bf16.mxu1 %vm2778_vm1, %v2779_v27 }
 0x570   : > { %2037 = vmatprep.subr.bf16.mxu1 %v2779_v27  ;;  %v1185_v43 = vpack.c.bf16 %v1180_v42, %v1180_v42 }
 0x573   : > { %2038 = vmatpush3.bf16.msra.mxu1 %v2260_v41 }
 0x574   : > { %1435 = vmatprep.subr.bf16.mxu1 %v2265_v32 }
 0x576   : > { %2040 = vmatmul.mubr.msk.bf16.vlgmr.msra.gmra.mrb[8].mxu1 %vm904_vm0, %v1185_v43 }
 0x577   : > { %1467 = vmatprep.mubr.bf16.mxu1 %v2776_v0  ;;  %1436 = vmatpush1.bf16.msra.mxu1 %v2263_v31 }
 0x578   : > { %1437 = vmatprep.subr.bf16.mxu1 %v2269_v34 }
 0x57b   : > { %1438 = vmatpush1.bf16.msra.mxu1 %v2267_v36 }
 0x57c   : > { %1551 = vmatprep.subr.bf16.mxu1 %v2273_v37 }
 0x641   : > { %v1097_v45 = vpop.f32.mrb[4].mxu1 }
 0x642   : > { %v1098_v46 = vadd.f32 %v1926_v44, %v1097_v45  ;;  %v2033_v47 = vpop.f32.mrb[5].mxu1 }
 0x643   : > { %v1100_v48 = vpop.f32.mrb[6].mxu1 }
 0x644   : > { %v2034_v49 = vpop.f32.mrb[7].mxu1  ;;  %v1107_v50 = vsel %vm904_vm0, %v1098_v46, 0.0 }
 0x645   : > { %1108 = vadd.xlane.f32.xlu0 %v1107_v50  ;;  %v1930_v49 = vld [vmem:[#allocation10 + $0x2] ss:$0 sm:$0xff]  ;;  %v1947_v50 = vld [vmem:[#allocation19 + $0x2] ss:$0 sm:$0xff] }
 0x649   : > { %v1243_v52 = vpop.f32.mrb[8].mxu1 }
 0x64a   : > { %v1244_v53 = vadd.f32 %v1936_v51, %v1243_v52  ;;  %v2041_v54 = vpop.f32.mrb[9].mxu1 }
 0x64b   : > { %v1246_v55 = vpop.f32.mrb[10].mxu1  ;;  %v1931_v54 = vld [vmem:[#allocation12 + $0x2] ss:$0 sm:$0xff] }
 0x64c   : > { %v2042_v56 = vpop.f32.mrb[11].mxu1  ;;  %v1253_v57 = vsel %vm904_vm0, %v1244_v53, 0.0 }
 0x64d   : > { %1254 = vadd.xlane.f32.xlu1 %v1253_v57  ;;  %v2271_v56 = vld [vmem:[#allocation21] ss:$12 sps:$4 sm:$0xff]   ;;  %v2274_v57 = vld [vmem:[#allocation21 + $0x8] ss:$12 sps:$4 sm:$0xff]  }
 0x6d2   : > { %v1109_v58 = vpop.xlane.xlu0 %1108 }
 0x6d3   : > { %v1110_v59 = vmul.f32 0.03125, %v1109_v58 }
 0x6d5   : > { %v3295_v60 = vsub.f32 %v1098_v46, %v1110_v59  ;;  %v1946_v46 = vld [vmem:[#allocation18 + $0x2] ss:$0 sm:$0xff]  ;;  %v2277_v59 = vld [vmem:[#allocation21 + $0x1c] ss:$12 sps:$4 sm:$0xff]  }
 0x6d7   : > { %v1112_v61 = vmul.f32 %v3295_v60, %v3295_v60 }
 0x6d9   : > { %v1113_v62 = vsel %vm904_vm0, %v1112_v61, 0.0 }
 0x6da   : > { %1114 = vadd.xlane.f32.xlu0 %v1113_v62  ;;  %v1255_v63 = vpop.xlane.xlu1 %1254  ;;  %v2278_v62 = vld [vmem:[#allocation21 + $0x20] ss:$12 sps:$4 sm:$0xff]  }
 0x6db   : > { %v1256_v1 = vmul.f32 0.03125, %v1255_v63 }
 0x6dd   : > { %v1257_v2 = vsub.f32 %v1244_v53, %v1256_v1 }
 0x6df   : > { %v1258_v3 = vmul.f32 %v1257_v2, %v1257_v2 }
 0x6e1   : > { %v1259_v4 = vsel %vm904_vm0, %v1258_v3, 0.0 }
 0x6e2   : > { %1260 = vadd.xlane.f32.xlu1 %v1259_v4 }
 0x767   : > { %v1115_v38 = vpop.xlane.xlu0 %1114 }
 0x768   : > { %v1116_v39 = vmul.f32 0.03125, %v1115_v38 }
 0x76a   : > { %v1117_v40 = vadd.f32 1e-05, %v1116_v39 }
 0x76f   : > { %v1261_v7 = vpop.xlane.xlu1 %1260 }
 0x770   : > { %v1262_v8 = vmul.f32 0.03125, %v1261_v7 }
 0x772   : > { %v1263_v9 = vadd.f32 1e-05, %v1262_v8 }
 0x774   : > { %2287 = vrsqrt.f32 %v1263_v9 }
 0x775   : > { %2289 = vrsqrt.f32 %v1117_v40 }
 0x77e   : > { %v2288_v10 = vpop.eup %2287 }
 0x77f   : > { %v1265_v12 = vmul.f32 %v2288_v10, %v1257_v2  ;;  %v2290_v44 = vpop.eup %2289 }
 0x780   : > { %v1119_v47 = vmul.f32 %v2290_v44, %v3295_v60  ;;  %v2275_v60 = vld [vmem:[#allocation21 + $0x18] ss:$12 sps:$4 sm:$0xff]  }
 0x781   : > { %v1272_v14 = vmul.f32 %v1940_v11, %v1265_v12 }
 0x782   : > { %v1126_v52 = vmul.f32 %v1930_v49, %v1119_v47 }
 0x783   : > { %v1279_v15 = vadd.f32 %v1941_v13, %v1272_v14 }
 0x784   : > { %v1133_v61 = vadd.f32 %v1931_v54, %v1126_v52 }
 0x785   : > { %v1280_v16 = vmax.f32 %v1279_v15, 0.0  ;;  %v1632_v15 = vld [vmem:[#allocation24] sm:$0x7] }
 0x786   : > { %v1134_v63 = vmax.f32 %v1133_v61, 0.0 }
 0x787   : > { %v1286_v17 = vpack.c.bf16 %v1280_v16, %v1280_v16 }
 0x788   : > { %v1398_v1 = vpack.c.bf16 %v1134_v63, %v1134_v63 }
 0x789   : > { %2048 = vmatmul.mubr.msk.bf16.vlgmr.msra.gmra.mrb[4].mxu0 %vm904_vm0, %v1286_v17 }
 0x78a   : > { %2055 = vmatprep.mubr.msk.bf16.mxu0 %vm2778_vm1, %v2779_v27  ;;  %2052 = vmatpush3.bf16.msra.mxu0 %v2266_v33 }
 0x78b   : > { %2053 = vmatprep.subr.bf16.mxu0 %v2779_v27 }
 0x78e   : > { %2054 = vmatpush3.bf16.msra.mxu0 %v2270_v35 }
 0x78f   : > { %2059 = vmatprep.subr.bf16.mxu0 %v2779_v27 }
 0x85c   : > { %v1344_v19 = vpop.f32.mrb[4].mxu0 }
 0x85d   : > { %v1345_v20 = vadd.f32 %v1942_v18, %v1344_v19  ;;  %v2049_v21 = vpop.f32.mrb[5].mxu0 }
 0x85e   : > { %v1347_v22 = vpop.f32.mrb[6].mxu0 }
 0x85f   : > { %v2050_v23 = vpop.f32.mrb[7].mxu0  ;;  %v1354_v24 = vsel %vm904_vm0, %v1345_v20, 0.0 }
 0x860   : > { %1355 = vadd.xlane.f32.xlu1 %v1354_v24 }
 0x8ed   : > { %v1356_v25 = vpop.xlane.xlu1 %1355 }
 0x8ee   : > { %v1357_v26 = vmul.f32 0.03125, %v1356_v25 }
 0x8f0   : > { %v1358_v28 = vsub.f32 %v1345_v20, %v1357_v26 }
 0x8f2   : > { %v1359_v29 = vmul.f32 %v1358_v28, %v1358_v28 }
 0x8f4   : > { %v1360_v30 = vsel %vm904_vm0, %v1359_v29, 0.0 }
 0x8f5   : > { %1361 = vadd.xlane.f32.xlu1 %v1360_v30 }
 0x982   : > { %v1362_v41 = vpop.xlane.xlu1 %1361 }
 0x983   : > { %v1363_v42 = vmul.f32 0.03125, %v1362_v41 }
 0x985   : > { %v1364_v43 = vadd.f32 1e-05, %v1363_v42 }
 0x987   : > { %2291 = vrsqrt.f32 %v1364_v43 }
 0x991   : > { %v2292_v45 = vpop.eup %2291 }
 0x992   : > { %v1366_v48 = vmul.f32 %v2292_v45, %v1358_v28 }
 0x994   : > { %v1373_v51 = vmul.f32 %v1946_v46, %v1366_v48 }
 0x996   : > { %v1380_v53 = vadd.f32 %v1947_v50, %v1373_v51 }
 0x998   : > { %v1381_v55 = vmax.f32 %v1380_v53, 0.0 }
 0x99a   : > { %1653 = vrot.lane.b32.xlu1 %v1381_v55, %s2780_s20  ;;  %v1399_v58 = vpack.c.bf16 %v1381_v55, %v1381_v55 }
 0x99c   : > { %1954 = vmatmul.mubr.msk.bf16.vlgmr.msra.gmra.mrb[12].mxu1 %vm904_vm0, %v1399_v58  ;;  %2056 = vmatmul.mubr.msk.bf16.vlgmr.msra.gmra.mrb[8].mxu0 %vm904_vm0, %v1399_v58 }
 0x99d   : > { %1552 = vmatpush1.bf16.msra.mxu1 %v2271_v56  ;;  %2060 = vmatpush3.bf16.msra.mxu0 %v2274_v57 }
 0x99e   : > { %1553 = vmatprep.subr.bf16.mxu1 %v2277_v59  ;;  %2061 = vmatprep.subr.bf16.mxu0 %v2779_v27 }
 0x99f   : > { %1583 = vmatprep.mubr.bf16.mxu1 %v2776_v0  ;;  %2063 = vmatprep.mubr.msk.bf16.mxu0 %vm2778_vm1, %v2779_v27  ;;  %v1634_v27 = vlaneseq }
 0x9a1   : > { %1554 = vmatpush1.bf16.msra.mxu1 %v2275_v60  ;;  %2062 = vmatpush3.bf16.msra.mxu0 %v2278_v62  ;;  %v1635_v4 = vshrl.u32 %v1634_v27, 7 }
 0x9a3   : > { %v1636_v13 = vsub.s32 0, %v1635_v4  ;;  %v1644_v14 = vsub.s32 2, %v1635_v4  ;;  %v1640_v16 = vsub.s32 1, %v1635_v4 }
 0x9a4   : > { %1962 = vmatmul.mubr.msk.bf16.vlgmr.msra.gmra.mrb[16].mxu1 %vm904_vm0, %v1398_v1  ;;  %2064 = vmatmul.mubr.msk.bf16.vlgmr.msra.gmra.mrb[12].mxu0 %vm904_vm0, %v1398_v1 }
 0x9a5   : > { %v1637_v17 = vrot.slane %v1632_v15, %v1636_v13  ;;  %v1645_v18 = vrot.slane %v1632_v15, %v1644_v14  ;;  %v1641_v21 = vrot.slane %v1632_v15, %v1640_v16 }
 0xa0c   : > { %v1654_v2 = vpop.permute.xlu1 %1653 }
 0xa0d   : > { %v1656_v0 = vsel %vm904_vm0, %v1134_v63, %v1654_v2 }
 0xa0e   : > { %v1658_v3 = vsel %vm1657_vm5, %v1656_v0, 0.0 }
 0xa0f   : > { %1659 = vst [vmem:[%s3323_s17] sm:$0xff] %v1658_v3 }
 0xa6f   : > { %v1469_v5 = vpop.f32.mrb[12].mxu1  ;;  %v1510_v6 = vpop.f32.mrb[8].mxu0 }
 0xa70   : > { %v1471_v7 = vpop.f32.mrb[13].mxu1  ;;  %v2057_v8 = vpop.f32.mrb[9].mxu0 }
 0xa71   : > { %v1473_v9 = vpop.f32.mrb[14].mxu1  ;;  %v1513_v10 = vpop.f32.mrb[10].mxu0 }
 0xa72   : > { %v1474_v11 = vpop.f32.mrb[15].mxu1  ;;  %v2058_v12 = vpop.f32.mrb[11].mxu0 }
 0xa77   : > { %v1585_v19 = vpop.f32.mrb[16].mxu1  ;;  %v1626_v20 = vpop.f32.mrb[12].mxu0 }
 0xa78   : > { %v1586_v22 = vadd.f32 %v1585_v19, %v1469_v5  ;;  %v1627_v23 = vadd.f32 %v1626_v20, %v1510_v6  ;;  %v1587_v24 = vpop.f32.mrb[17].mxu1  ;;  %v2065_v25 = vpop.f32.mrb[13].mxu0 }
 0xa79   : > { %v1588_v26 = vadd.f32 %v1587_v24, %v1471_v7  ;;  %v1589_v28 = vpop.f32.mrb[18].mxu1  ;;  %v1629_v29 = vpop.f32.mrb[14].mxu0 }
 0xa7a   : > { %v1649_v30 = vadd.f32 %v1637_v17, %v1586_v22  ;;  %v1651_v31 = vadd.f32 %v1645_v18, %v1627_v23  ;;  %v1590_v32 = vpop.f32.mrb[19].mxu1  ;;  %v2066_v33 = vpop.f32.mrb[15].mxu0 }
 0xa7b   : > { %v1650_v34 = vadd.f32 %v1641_v21, %v1588_v26 }
 0xa7c   : > { %1660 = vst [vmem:[%s3323_s17 + $0x8] sm:$0xff] %v1649_v30  ;;  %1662 = vst [vmem:[%s3323_s17 + $0x18] sm:$0xff] %v1651_v31 }
 0xa7d   : > { %1661 = vst [vmem:[%s3323_s17 + $0x10] sm:$0xff] %v1650_v34 }
 0xa7e PF: > { %s3405_s2 = sld [smem:[#allocation33_spill]] }
 0xa84   : > { %s35_s24 = sadd.s32 1, %s3405_s2  }
 0xa85   : > { %p32_p12 = scmp.ge.s32.totalorder %s35_s24, 4  }
 0xa87   :  { %34 = sbr.rel (!%p32_p12) target bundleno = 14 (0xe), region = 196 }
 0xa8e   :  { %1684 = vsyncpa [#allocation3], 1 }
 0xa8f   :  { %1686 = vsyncpa [#allocation3 + $0x1], 1 }
 0xa90   :  { %1687 = vsyncpa [#allocation5], 1 }
 0xa91   :  { %1688 = vsyncpa [#allocation8], 1 }
 0xa92   :  { %1689 = vsyncpa [#allocation11], 1 }
 0xa93   :  { %1690 = vsyncpa [#allocation14], 1 }
 0xa94   :  { %1691 = vsyncpa [#allocation17], 1 }
 0xa95   :  { %1692 = vsyncpa [#allocation20], 1 }
 0xa96   :  { %1693 = vsyncpa [#allocation23], 1 }

// kernel: _lambda_.7
= control target key start
LH: loop header
LB: loop body
LE: loop exit
PB: predicated region body
PF: predicated region fallthrough
CT: control target
= control target key end

     0   :  { %8 = vsyncpa [#allocation3], 0  ;;  %s2049_s0 = inlined_call_operand.vmem [shape: f32[8,2,384], index: 0, kind: input, shape index: {}]   ;;  %s2050_s1 = inlined_call_operand.hbm [shape: bf16[128,384], index: 1, kind: input, shape index: {}]   ;;  %s2051_s2 = inlined_call_operand.hbm [shape: f32[1,384], index: 2, kind: input, shape index: {}]   ;;  %s2052_s3 = inlined_call_operand.vmem [shape: f32[8,2,128], index: 3, kind: output, shape index: {}]  }
   0x1   :  { %9 = vsyncpa [#allocation5], 0  ;;  %s1572_s12 = smov [#allocation2]   ;;  %s1524_s16 = scalar_lea.hbm %s2050_s1, 3072 }
   0x2   :  { %s17_s13 = sshll.u32 %s1572_s12, 4  ;;  %p1525_p0 = scmp.ne.s32.totalorder %s2050_s1, %s1524_s16  ;;  %s18_s13 = int_to_ptr.vmem [resolvable:$true] %s17_s13 }
   0x3   :  { %p1528_p1 = scmp.lt.u32.totalorder %s1524_s16, %s2050_s1 }
   0x5   :  { %p1530_p2 = pnand %p1528_p1, %p1525_p0 }
   0x7   :  { %1533 = shalt.err (!%p1530_p2)
}
   0x8   :  { %s1534_s21 = scalar_lea.vmem %s18_s13, 3072  ;;  %p1539_p4 = scmp.lt.s32.totalorder %s18_s13, %s18_s13 }
   0x9   :  { %p1535_p3 = scmp.ne.s32.totalorder %s18_s13, %s1534_s21  ;;  %p1540_p5 = scmp.lt.s32.totalorder %s1534_s21, %s1534_s21 }
   0xb   :  { %p1541_p6 = por %p1540_p5, %p1539_p4 }
   0xd   :  { %p1542_p7 = pnand %p1541_p6, %p1535_p3 }
   0xf   :  { %1545 = shalt.err (!%p1542_p7)
}
  0x10   :  { %s1573_s22 = smov 192   ;;  %s1574_s23 = smov 12  }
  0x11   :  { %23 = dma.hbm_to_vmem [thread:$0]  %s2050_s1, 3072, %s18_s13, [#allocation3], %s1573_s22, %s1573_s22, %s1574_s23  }
  0x12   :  { %s1575_s26 = smov [#allocation4]   ;;  %s1546_s30 = scalar_lea.hbm %s2051_s2, 48 }
  0x13   :  { %s30_s27 = sshll.u32 %s1575_s26, 4  ;;  %p1547_p8 = scmp.ne.s32.totalorder %s2051_s2, %s1546_s30  ;;  %s31_s27 = int_to_ptr.vmem [resolvable:$true] %s30_s27 }
  0x14   :  { %p1550_p9 = scmp.lt.u32.totalorder %s1546_s30, %s2051_s2 }
  0x16   :  { %p1552_p10 = pnand %p1550_p9, %p1547_p8 }
  0x18   :  { %1555 = shalt.err (!%p1552_p10)
}
  0x19   :  { %s1556_s8 = scalar_lea.vmem %s31_s27, 48  ;;  %s1560_s1 = scalar_lea.vmem %s31_s27, 64 }
  0x1a   :  { %p1557_p11 = scmp.ne.s32.totalorder %s31_s27, %s1556_s8  ;;  %p1561_p12 = scmp.lt.s32.totalorder %s31_s27, %s31_s27 }
  0x1b   :  { %p1562_p13 = scmp.lt.s32.totalorder %s1560_s1, %s1556_s8 }
  0x1d   :  { %p1563_p0 = por %p1562_p13, %p1561_p12 }
  0x1f   :  { %p1564_p1 = pnand %p1563_p0, %p1557_p11 }
  0x21   :  { %1567 = shalt.err (!%p1564_p1)
}
  0x22   :  { %33 = dma.hbm_to_vmem [thread:$0]  %s2051_s2, 48, %s31_s27, [#allocation5]  }
  0x23   :  { %1568 = dma.done.wait [#allocation3], 3072  }
  0x24   :  { %1569 = vsyncadd [#allocation3], 4294964224 }
  0x25   :  { %1570 = dma.done.wait [#allocation5], 48  }
  0x26   :  { %1571 = vsyncadd [#allocation5], 4294967248  ;;  %v1576_v0 = vmov 0.0   ;;  %v1577_v1 = vmov 0   ;;  %vm1578_vm0 = vmmov 0   ;;  %v76_v26 = vlaneseq }
  0x27   :  { %1227 = vmatprep.subr.bf16.mxu1 %v1576_v0  ;;  %251 = vmatprep.mubr.bf16.mxu0 %v1577_v1  ;;  %v1627_v2 = vld [vmem:[#allocation2 + $0x4] ss:$12 sps:$4 sm:$0xff]   ;;  %v1629_v3 = vld [vmem:[#allocation2] ss:$12 sps:$4 sm:$0xff]   ;;  %v1632_v4 = vld [vmem:[#allocation2 + $0x1c] ss:$12 sps:$4 sm:$0xff]  }
  0x28   :  { %1243 = vmatprep.mubr.msk.bf16.mxu1 %vm1578_vm0, %v1576_v0  ;;  %219 = vmatprep.subr.bf16.mxu0 %v1627_v2  ;;  %v1635_v5 = vld [vmem:[#allocation2 + $0x18] ss:$12 sps:$4 sm:$0xff]   ;;  %v1638_v6 = vld [vmem:[#allocation2 + $0x34] ss:$12 sps:$4 sm:$0xff]   ;;  %v1641_v7 = vld [vmem:[#allocation2 + $0x30] ss:$12 sps:$4 sm:$0xff]  }
  0x29   :  { %220 = vmatpush1.bf16.msra.mxu0 %v1629_v3  ;;  %v1644_v8 = vld [vmem:[#allocation2 + $0x4c] ss:$12 sps:$4 sm:$0xff]   ;;  %v1647_v9 = vld [vmem:[#allocation2 + $0x48] ss:$12 sps:$4 sm:$0xff]   ;;  %v1652_v11 = vld [vmem:[#allocation2 + $0x64] ss:$12 sps:$4 sm:$0xff]  }
  0x2a   :  { %221 = vmatprep.subr.bf16.mxu0 %v1632_v4  ;;  %v1649_v10 = vld [vmem:[#allocation2 + $0x8] ss:$12 sps:$4 sm:$0xff]   ;;  %v1655_v12 = vld [vmem:[#allocation2 + $0x20] ss:$12 sps:$4 sm:$0xff]   ;;  %v1665_v15 = vld [vmem:[#allocation2 + $0x38] ss:$12 sps:$4 sm:$0xff]  }
  0x2b   :  { %1228 = vmatpush3.bf16.msra.mxu1 %v1649_v10  ;;  %v1659_v13 = vld [vmem:[#allocation2 + $0x60] ss:$12 sps:$4 sm:$0xff]   ;;  %v1662_v14 = vld [vmem:[#allocation2 + $0x7c] ss:$12 sps:$4 sm:$0xff]   ;;  %v1669_v16 = vld [vmem:[#allocation2 + $0x78] ss:$12 sps:$4 sm:$0xff]  }
  0x2c   :  { %1229 = vmatprep.subr.bf16.mxu1 %v1576_v0  ;;  %v1672_v17 = vld [vmem:[#allocation2 + $0x94] ss:$12 sps:$4 sm:$0xff]   ;;  %v1675_v18 = vld [vmem:[#allocation2 + $0x50] ss:$12 sps:$4 sm:$0xff]   ;;  %v1682_v20 = vld [vmem:[#allocation2 + $0xac] ss:$12 sps:$4 sm:$0xff]  }
  0x2d   :  { %222 = vmatpush1.bf16.msra.mxu0 %v1635_v5  ;;  %v1679_v19 = vld [vmem:[#allocation2 + $0x90] ss:$12 sps:$4 sm:$0xff]   ;;  %v1685_v21 = vld [vmem:[#allocation2 + $0x68] ss:$12 sps:$4 sm:$0xff]   ;;  %v1693_v23 = vld [vmem:[#allocation2 + $0x80] ss:$12 sps:$4 sm:$0xff]  }
  0x2e   :  { %223 = vmatprep.subr.bf16.mxu0 %v1638_v6  ;;  %v1689_v22 = vld [vmem:[#allocation2 + $0xa8] ss:$12 sps:$4 sm:$0xff]   ;;  %v1699_v24 = vld [vmem:[#allocation2 + $0x98] ss:$12 sps:$4 sm:$0xff]   ;;  %v1707_v25 = vld [vmem:[#allocation2 + $0xb0] ss:$12 sps:$4 sm:$0xff]  }
  0x2f   :  { %1230 = vmatpush3.bf16.msra.mxu1 %v1655_v12  ;;  %v77_v27 = vshrl.u32 %v76_v26, 7  ;;  %v73_v29 = vld [vmem:[#allocation4] sm:$0x7] }
  0x30   :  { %1231 = vmatprep.subr.bf16.mxu1 %v1576_v0  ;;  %v74_v31 = vld [vmem:[%s2049_s0] sm:$0x3f] }
  0x31   :  { %224 = vmatpush1.bf16.msra.mxu0 %v1641_v7  ;;  %v78_v28 = vsub.s32 0, %v77_v27  ;;  %v82_v30 = vsub.s32 1, %v77_v27  ;;  %v308_v35 = vrot.slane %v74_v31, 2  ;;  %v86_v53 = vsub.s32 2, %v77_v27 }
  0x32   :  { %225 = vmatprep.subr.bf16.mxu0 %v1644_v8  ;;  %v318_v58 = vrot.slane %v74_v31, 4 }
  0x33   :  { %1232 = vmatpush3.bf16.msra.mxu1 %v1665_v15  ;;  %v1748_v32 = vrot.slane %v73_v29, %v78_v28  ;;  %v1750_v33 = vrot.slane %v73_v29, %v82_v30  ;;  %v1754_v54 = vrot.slane %v73_v29, %v86_v53  ;;  %v1141_v29 = vld [vmem:[%s2049_s0 + $0x6] sm:$0x3f] }
  0x34   :  { %1233 = vmatprep.subr.bf16.mxu1 %v1576_v0 }
  0x35   :  { %226 = vmatpush1.bf16.msra.mxu0 %v1647_v9 }
  0x36   :  { %227 = vmatprep.subr.bf16.mxu0 %v1652_v11 }
  0x37   :  { %1234 = vmatpush3.bf16.msra.mxu1 %v1675_v18 }
  0x38   :  { %1235 = vmatprep.subr.bf16.mxu1 %v1576_v0 }
  0x39   :  { %228 = vmatpush1.bf16.msra.mxu0 %v1659_v13 }
  0x3a   :  { %229 = vmatprep.subr.bf16.mxu0 %v1662_v14 }
  0x3b   :  { %1236 = vmatpush3.bf16.msra.mxu1 %v1685_v21 }
  0x3c   :  { %1237 = vmatprep.subr.bf16.mxu1 %v1576_v0 }
  0x3d   :  { %230 = vmatpush1.bf16.msra.mxu0 %v1669_v16 }
  0x3e   :  { %231 = vmatprep.subr.bf16.mxu0 %v1672_v17 }
  0x3f   :  { %1238 = vmatpush3.bf16.msra.mxu1 %v1693_v23 }
  0x40   :  { %1239 = vmatprep.subr.bf16.mxu1 %v1576_v0 }
  0x41   :  { %232 = vmatpush1.bf16.msra.mxu0 %v1679_v19 }
  0x42   :  { %233 = vmatprep.subr.bf16.mxu0 %v1682_v20 }
  0x43   :  { %1240 = vmatpush3.bf16.msra.mxu1 %v1699_v24 }
  0x44   :  { %1241 = vmatprep.subr.bf16.mxu1 %v1576_v0 }
  0x45   :  { %234 = vmatpush1.bf16.msra.mxu0 %v1689_v22 }
  0x46   :  { %330 = vmatprep.subr.bf16.mxu0 %v1627_v2 }
  0x47   :  { %1242 = vmatpush3.bf16.msra.mxu1 %v1707_v25 }
  0x48   :  { %252 = vmatmul.mubr.bf16.vlgmr.msra.gmra.mrb[0].mxu0 %v1577_v1  ;;  %1247 = vmatprep.subr.bf16.mxu1 %v1576_v0 }
  0x49   :  { %331 = vmatpush1.bf16.msra.mxu0 %v1629_v3  ;;  %362 = vmatprep.mubr.bf16.mxu0 %v1577_v1 }
  0x4a   :  { %332 = vmatprep.subr.bf16.mxu0 %v1632_v4  ;;  %1244 = vmatmul.mubr.bf16.vlgmr.msra.gmra.mrb[0].mxu1 %v1577_v1 }
  0x4b   :  { %1248 = vmatpush3.bf16.msra.mxu1 %v1649_v10  ;;  %1263 = vmatprep.mubr.msk.bf16.mxu1 %vm1578_vm0, %v1576_v0 }
  0x4c   :  { %1249 = vmatprep.subr.bf16.mxu1 %v1576_v0 }
  0x4d   :  { %333 = vmatpush1.bf16.msra.mxu0 %v1635_v5 }
  0x4e   :  { %334 = vmatprep.subr.bf16.mxu0 %v1638_v6 }
  0x4f   :  { %1250 = vmatpush3.bf16.msra.mxu1 %v1655_v12 }
  0x50   :  { %1251 = vmatprep.subr.bf16.mxu1 %v1576_v0 }
  0x51   :  { %335 = vmatpush1.bf16.msra.mxu0 %v1641_v7 }
  0x52   :  { %336 = vmatprep.subr.bf16.mxu0 %v1644_v8 }
  0x53   :  { %1252 = vmatpush3.bf16.msra.mxu1 %v1665_v15 }
  0x54   :  { %1253 = vmatprep.subr.bf16.mxu1 %v1576_v0 }
  0x55   :  { %337 = vmatpush1.bf16.msra.mxu0 %v1647_v9 }
  0x56   :  { %338 = vmatprep.subr.bf16.mxu0 %v1652_v11 }
  0x57   :  { %1254 = vmatpush3.bf16.msra.mxu1 %v1675_v18 }
  0x58   :  { %1255 = vmatprep.subr.bf16.mxu1 %v1576_v0 }
  0x59   :  { %339 = vmatpush1.bf16.msra.mxu0 %v1659_v13 }
  0x5a   :  { %340 = vmatprep.subr.bf16.mxu0 %v1662_v14 }
  0x5b   :  { %1256 = vmatpush3.bf16.msra.mxu1 %v1685_v21 }
  0x5c   :  { %1257 = vmatprep.subr.bf16.mxu1 %v1576_v0 }
  0x5d   :  { %341 = vmatpush1.bf16.msra.mxu0 %v1669_v16 }
  0x5e   :  { %342 = vmatprep.subr.bf16.mxu0 %v1672_v17 }
  0x5f   :  { %1258 = vmatpush3.bf16.msra.mxu1 %v1693_v23 }
  0x60   :  { %1259 = vmatprep.subr.bf16.mxu1 %v1576_v0 }
  0x61   :  { %343 = vmatpush1.bf16.msra.mxu0 %v1679_v19 }
  0x62   :  { %344 = vmatprep.subr.bf16.mxu0 %v1682_v20 }
  0x63   :  { %1260 = vmatpush3.bf16.msra.mxu1 %v1699_v24 }
  0x64   :  { %1261 = vmatprep.subr.bf16.mxu1 %v1576_v0 }
  0x65   :  { %345 = vmatpush1.bf16.msra.mxu0 %v1689_v22 }
  0x66   :  { %442 = vmatprep.subr.bf16.mxu0 %v1627_v2 }
  0x67   :  { %1262 = vmatpush3.bf16.msra.mxu1 %v1707_v25 }
  0x68   :  { %1267 = vmatprep.subr.bf16.mxu1 %v1576_v0 }
 0x11b   :  { %v253_v34 = vpop.f32.mrb[0].mxu0 }
 0x11c   :  { %v254_v36 = vadd.f32 %v253_v34, %v1748_v32  ;;  %v255_v37 = vpop.f32.mrb[1].mxu0 }
 0x11d   :  { %v256_v38 = vadd.f32 %v255_v37, %v1750_v33  ;;  %v257_v39 = vpop.f32.mrb[2].mxu0  ;;  %v294_v46 = vpop.f32.mrb[0].mxu1 }
 0x11e   :  { %v300_v40 = vadd.f32 %v254_v36, %v74_v31  ;;  %v258_v41 = vpop.f32.mrb[3].mxu0  ;;  %v1245_v47 = vpop.f32.mrb[1].mxu1  ;;  %v295_v57 = vadd.f32 %v294_v46, %v1754_v54  ;;  %v419_v36 = vrot.slane %v1141_v29, 2 }
 0x11f   :  { %v310_v42 = vadd.f32 %v308_v35, %v256_v38  ;;  %v297_v49 = vpop.f32.mrb[2].mxu1 }
 0x120   :  { %v301_v43 = vsub.f32 0.0, %v300_v40  ;;  %v1246_v50 = vpop.f32.mrb[3].mxu1 }
 0x121   :  { %v311_v45 = vsub.f32 0.0, %v310_v42 }
 0x122   :  { %v302_v44 = vmul.f32 1.442695, %v301_v43 }
 0x123   :  { %v312_v48 = vmul.f32 1.442695, %v311_v45 }
 0x124   :  { %1426 = vpow2.f32 %v302_v44 }
 0x125   :  { %1428 = vpow2.f32 %v312_v48 }
 0x12e   :  { %v1427_v51 = vpop.eup %1426 }
 0x12f   :  { %v304_v52 = vadd.f32 1.0, %v1427_v51  ;;  %v1429_v55 = vpop.eup %1428 }
 0x130   :  { %v314_v56 = vadd.f32 1.0, %v1429_v55 }
 0x131   :  { %1430 = vrcp.f32 %v304_v52 }
 0x132   :  { %1432 = vrcp.f32 %v314_v56 }
 0x13b   :  { %v1431_v59 = vpop.eup %1430 }
 0x13c   :  { %v317_v60 = vmul.f32 %v1431_v59, %v295_v57  ;;  %v1433_v62 = vpop.eup %1432  ;;  %v429_v57 = vrot.slane %v1141_v29, 4 }
 0x13d   :  { %v322_v63 = vsub.f32 1.0, %v1433_v62  ;;  %v324_v30 = vmul.f32 0.0, %v1433_v62 }
 0x13e   :  { %v320_v61 = vadd.f32 %v318_v58, %v317_v60 }
 0x140   :  { %1434 = vtanh.f32 %v320_v61 }
 0x14a   :  { %v1435_v26 = vpop.eup %1434 }
 0x14b   :  { %v323_v28 = vmul.f32 %v1435_v26, %v322_v63 }
 0x14d   :  { %v1757_v34 = vadd.f32 %v324_v30, %v323_v28 }
 0x14f   :  { %326 = vst [vmem:[%s2052_s3] sm:$0x3] %v1757_v34  ;;  %v329_v27 = vpack.c.bf16 %v1757_v34, %v1757_v34 }
 0x151   :  { %363 = vmatmul.mubr.bf16.vlgmr.msra.gmra.mrb[4].mxu0 %v329_v27  ;;  %1264 = vmatmul.mubr.bf16.vlgmr.msra.gmra.mrb[4].mxu1 %v329_v27 }
 0x152   :  { %443 = vmatpush1.bf16.msra.mxu0 %v1629_v3  ;;  %1268 = vmatpush3.bf16.msra.mxu1 %v1649_v10 }
 0x153   :  { %444 = vmatprep.subr.bf16.mxu0 %v1632_v4  ;;  %1269 = vmatprep.subr.bf16.mxu1 %v1576_v0 }
 0x154   :  { %474 = vmatprep.mubr.bf16.mxu0 %v1577_v1  ;;  %1283 = vmatprep.mubr.msk.bf16.mxu1 %vm1578_vm0, %v1576_v0 }
 0x156   :  { %445 = vmatpush1.bf16.msra.mxu0 %v1635_v5  ;;  %1270 = vmatpush3.bf16.msra.mxu1 %v1655_v12 }
 0x157   :  { %446 = vmatprep.subr.bf16.mxu0 %v1638_v6  ;;  %1271 = vmatprep.subr.bf16.mxu1 %v1576_v0 }
 0x15a   :  { %447 = vmatpush1.bf16.msra.mxu0 %v1641_v7  ;;  %1272 = vmatpush3.bf16.msra.mxu1 %v1665_v15 }
 0x15b   :  { %448 = vmatprep.subr.bf16.mxu0 %v1644_v8  ;;  %1273 = vmatprep.subr.bf16.mxu1 %v1576_v0 }
 0x15e   :  { %449 = vmatpush1.bf16.msra.mxu0 %v1647_v9  ;;  %1274 = vmatpush3.bf16.msra.mxu1 %v1675_v18 }
 0x15f   :  { %450 = vmatprep.subr.bf16.mxu0 %v1652_v11  ;;  %1275 = vmatprep.subr.bf16.mxu1 %v1576_v0 }
 0x162   :  { %451 = vmatpush1.bf16.msra.mxu0 %v1659_v13  ;;  %1276 = vmatpush3.bf16.msra.mxu1 %v1685_v21 }
 0x163   :  { %452 = vmatprep.subr.bf16.mxu0 %v1662_v14  ;;  %1277 = vmatprep.subr.bf16.mxu1 %v1576_v0 }
 0x166   :  { %453 = vmatpush1.bf16.msra.mxu0 %v1669_v16  ;;  %1278 = vmatpush3.bf16.msra.mxu1 %v1693_v23 }
 0x167   :  { %454 = vmatprep.subr.bf16.mxu0 %v1672_v17  ;;  %1279 = vmatprep.subr.bf16.mxu1 %v1576_v0 }
 0x16a   :  { %455 = vmatpush1.bf16.msra.mxu0 %v1679_v19  ;;  %1280 = vmatpush3.bf16.msra.mxu1 %v1699_v24 }
 0x16b   :  { %456 = vmatprep.subr.bf16.mxu0 %v1682_v20  ;;  %1281 = vmatprep.subr.bf16.mxu1 %v1576_v0 }
 0x16e   :  { %457 = vmatpush1.bf16.msra.mxu0 %v1689_v22  ;;  %1282 = vmatpush3.bf16.msra.mxu1 %v1707_v25 }
 0x16f   :  { %554 = vmatprep.subr.bf16.mxu0 %v1627_v2  ;;  %1287 = vmatprep.subr.bf16.mxu1 %v1576_v0 }
 0x224   :  { %v364_v31 = vpop.f32.mrb[4].mxu0  ;;  %v405_v35 = vpop.f32.mrb[4].mxu1 }
 0x225   :  { %v365_v37 = vadd.f32 %v364_v31, %v1748_v32  ;;  %v366_v38 = vpop.f32.mrb[5].mxu0  ;;  %v1265_v39 = vpop.f32.mrb[5].mxu1  ;;  %v406_v56 = vadd.f32 %v405_v35, %v1754_v54 }
 0x226   :  { %v367_v40 = vadd.f32 %v366_v38, %v1750_v33  ;;  %v368_v41 = vpop.f32.mrb[6].mxu0  ;;  %v408_v42 = vpop.f32.mrb[6].mxu1 }
 0x227   :  { %v411_v43 = vadd.f32 %v1141_v29, %v365_v37  ;;  %v369_v44 = vpop.f32.mrb[7].mxu0  ;;  %v1266_v45 = vpop.f32.mrb[7].mxu1 }
 0x228   :  { %v421_v46 = vadd.f32 %v419_v36, %v367_v40 }
 0x229   :  { %v412_v47 = vsub.f32 0.0, %v411_v43 }
 0x22a   :  { %v422_v49 = vsub.f32 0.0, %v421_v46 }
 0x22b   :  { %v413_v48 = vmul.f32 1.442695, %v412_v47 }
 0x22c   :  { %v423_v50 = vmul.f32 1.442695, %v422_v49 }
 0x22d   :  { %1436 = vpow2.f32 %v413_v48 }
 0x22e   :  { %1438 = vpow2.f32 %v423_v50 }
 0x237   :  { %v1437_v51 = vpop.eup %1436 }
 0x238   :  { %v415_v52 = vadd.f32 1.0, %v1437_v51  ;;  %v1439_v53 = vpop.eup %1438 }
 0x239   :  { %v425_v55 = vadd.f32 1.0, %v1439_v53 }
 0x23a   :  { %1440 = vrcp.f32 %v415_v52 }
 0x23b   :  { %1442 = vrcp.f32 %v425_v55 }
 0x244   :  { %v1441_v58 = vpop.eup %1440 }
 0x245   :  { %v428_v59 = vmul.f32 %v1441_v58, %v406_v56  ;;  %v1443_v61 = vpop.eup %1442 }
 0x246   :  { %v433_v62 = vsub.f32 1.0, %v1443_v61  ;;  %v435_v28 = vmul.f32 %v1443_v61, %v1757_v34  ;;  %v1143_v34 = vld [vmem:[%s2049_s0 + $0xc] sm:$0x3f] }
 0x247   :  { %v431_v60 = vadd.f32 %v429_v57, %v428_v59  ;;  %v531_v35 = vrot.slane %v1143_v34, 2  ;;  %v541_v56 = vrot.slane %v1143_v34, 4 }
 0x249   :  { %1444 = vtanh.f32 %v431_v60 }
 0x253   :  { %v1445_v63 = vpop.eup %1444 }
 0x254   :  { %v434_v26 = vmul.f32 %v1445_v63, %v433_v62 }
 0x256   :  { %v1807_v30 = vadd.f32 %v435_v28, %v434_v26 }
 0x258   :  { %1142 = vst [vmem:[%s2052_s3 + $0x2] sm:$0x3] %v1807_v30  ;;  %v441_v27 = vpack.c.bf16 %v1807_v30, %v1807_v30 }
 0x25a   :  { %475 = vmatmul.mubr.bf16.vlgmr.msra.gmra.mrb[8].mxu0 %v441_v27  ;;  %1284 = vmatmul.mubr.bf16.vlgmr.msra.gmra.mrb[8].mxu1 %v441_v27 }
 0x25b   :  { %555 = vmatpush1.bf16.msra.mxu0 %v1629_v3  ;;  %1288 = vmatpush3.bf16.msra.mxu1 %v1649_v10 }
 0x25c   :  { %556 = vmatprep.subr.bf16.mxu0 %v1632_v4  ;;  %1289 = vmatprep.subr.bf16.mxu1 %v1576_v0 }
 0x25d   :  { %586 = vmatprep.mubr.bf16.mxu0 %v1577_v1  ;;  %1303 = vmatprep.mubr.msk.bf16.mxu1 %vm1578_vm0, %v1576_v0 }
 0x25f   :  { %557 = vmatpush1.bf16.msra.mxu0 %v1635_v5  ;;  %1290 = vmatpush3.bf16.msra.mxu1 %v1655_v12 }
 0x260   :  { %558 = vmatprep.subr.bf16.mxu0 %v1638_v6  ;;  %1291 = vmatprep.subr.bf16.mxu1 %v1576_v0 }
 0x263   :  { %559 = vmatpush1.bf16.msra.mxu0 %v1641_v7  ;;  %1292 = vmatpush3.bf16.msra.mxu1 %v1665_v15 }
 0x264   :  { %560 = vmatprep.subr.bf16.mxu0 %v1644_v8  ;;  %1293 = vmatprep.subr.bf16.mxu1 %v1576_v0 }
 0x267   :  { %561 = vmatpush1.bf16.msra.mxu0 %v1647_v9  ;;  %1294 = vmatpush3.bf16.msra.mxu1 %v1675_v18 }
 0x268   :  { %562 = vmatprep.subr.bf16.mxu0 %v1652_v11  ;;  %1295 = vmatprep.subr.bf16.mxu1 %v1576_v0 }
 0x26b   :  { %563 = vmatpush1.bf16.msra.mxu0 %v1659_v13  ;;  %1296 = vmatpush3.bf16.msra.mxu1 %v1685_v21 }
 0x26c   :  { %564 = vmatprep.subr.bf16.mxu0 %v1662_v14  ;;  %1297 = vmatprep.subr.bf16.mxu1 %v1576_v0 }
 0x26f   :  { %565 = vmatpush1.bf16.msra.mxu0 %v1669_v16  ;;  %1298 = vmatpush3.bf16.msra.mxu1 %v1693_v23 }
 0x270   :  { %566 = vmatprep.subr.bf16.mxu0 %v1672_v17  ;;  %1299 = vmatprep.subr.bf16.mxu1 %v1576_v0 }
 0x273   :  { %567 = vmatpush1.bf16.msra.mxu0 %v1679_v19  ;;  %1300 = vmatpush3.bf16.msra.mxu1 %v1699_v24 }
 0x274   :  { %568 = vmatprep.subr.bf16.mxu0 %v1682_v20  ;;  %1301 = vmatprep.subr.bf16.mxu1 %v1576_v0 }
 0x277   :  { %569 = vmatpush1.bf16.msra.mxu0 %v1689_v22  ;;  %1302 = vmatpush3.bf16.msra.mxu1 %v1707_v25 }
 0x278   :  { %666 = vmatprep.subr.bf16.mxu0 %v1627_v2  ;;  %1307 = vmatprep.subr.bf16.mxu1 %v1576_v0 }
 0x32d   :  { %v476_v29 = vpop.f32.mrb[8].mxu0  ;;  %v517_v31 = vpop.f32.mrb[8].mxu1 }
 0x32e   :  { %v477_v36 = vadd.f32 %v476_v29, %v1748_v32  ;;  %v478_v37 = vpop.f32.mrb[9].mxu0  ;;  %v1285_v38 = vpop.f32.mrb[9].mxu1  ;;  %v518_v55 = vadd.f32 %v517_v31, %v1754_v54 }
 0x32f   :  { %v479_v39 = vadd.f32 %v478_v37, %v1750_v33  ;;  %v480_v40 = vpop.f32.mrb[10].mxu0  ;;  %v520_v41 = vpop.f32.mrb[10].mxu1 }
 0x330   :  { %v523_v42 = vadd.f32 %v1143_v34, %v477_v36  ;;  %v481_v43 = vpop.f32.mrb[11].mxu0  ;;  %v1286_v44 = vpop.f32.mrb[11].mxu1 }
 0x331   :  { %v533_v45 = vadd.f32 %v531_v35, %v479_v39 }
 0x332   :  { %v524_v46 = vsub.f32 0.0, %v523_v42 }
 0x333   :  { %v534_v48 = vsub.f32 0.0, %v533_v45 }
 0x334   :  { %v525_v47 = vmul.f32 1.442695, %v524_v46 }
 0x335   :  { %v535_v49 = vmul.f32 1.442695, %v534_v48 }
 0x336   :  { %1446 = vpow2.f32 %v525_v47 }
 0x337   :  { %1448 = vpow2.f32 %v535_v49 }
 0x340   :  { %v1447_v50 = vpop.eup %1446 }
 0x341   :  { %v527_v51 = vadd.f32 1.0, %v1447_v50  ;;  %v1449_v52 = vpop.eup %1448 }
 0x342   :  { %v537_v53 = vadd.f32 1.0, %v1449_v52 }
 0x343   :  { %1450 = vrcp.f32 %v527_v51 }
 0x344   :  { %1452 = vrcp.f32 %v537_v53 }
 0x34d   :  { %v1451_v57 = vpop.eup %1450 }
 0x34e   :  { %v540_v58 = vmul.f32 %v1451_v57, %v518_v55  ;;  %v1453_v60 = vpop.eup %1452 }
 0x34f   :  { %v545_v61 = vsub.f32 1.0, %v1453_v60  ;;  %v547_v26 = vmul.f32 %v1453_v60, %v1807_v30  ;;  %v1145_v30 = vld [vmem:[%s2049_s0 + $0x12] sm:$0x3f] }
 0x350   :  { %v543_v59 = vadd.f32 %v541_v56, %v540_v58  ;;  %v643_v31 = vrot.slane %v1145_v30, 2  ;;  %v653_v55 = vrot.slane %v1145_v30, 4 }
 0x352   :  { %1454 = vtanh.f32 %v543_v59 }
 0x35c   :  { %v1455_v62 = vpop.eup %1454 }
 0x35d   :  { %v546_v63 = vmul.f32 %v1455_v62, %v545_v61 }
 0x35f   :  { %v1857_v28 = vadd.f32 %v547_v26, %v546_v63 }
 0x361   :  { %1144 = vst [vmem:[%s2052_s3 + $0x4] sm:$0x3] %v1857_v28  ;;  %v553_v27 = vpack.c.bf16 %v1857_v28, %v1857_v28 }
 0x363   :  { %587 = vmatmul.mubr.bf16.vlgmr.msra.gmra.mrb[12].mxu0 %v553_v27  ;;  %1304 = vmatmul.mubr.bf16.vlgmr.msra.gmra.mrb[12].mxu1 %v553_v27 }
 0x364   :  { %667 = vmatpush1.bf16.msra.mxu0 %v1629_v3  ;;  %1308 = vmatpush3.bf16.msra.mxu1 %v1649_v10 }
 0x365   :  { %668 = vmatprep.subr.bf16.mxu0 %v1632_v4  ;;  %1309 = vmatprep.subr.bf16.mxu1 %v1576_v0 }
 0x366   :  { %698 = vmatprep.mubr.bf16.mxu0 %v1577_v1  ;;  %1323 = vmatprep.mubr.msk.bf16.mxu1 %vm1578_vm0, %v1576_v0 }
 0x368   :  { %669 = vmatpush1.bf16.msra.mxu0 %v1635_v5  ;;  %1310 = vmatpush3.bf16.msra.mxu1 %v1655_v12 }
 0x369   :  { %670 = vmatprep.subr.bf16.mxu0 %v1638_v6  ;;  %1311 = vmatprep.subr.bf16.mxu1 %v1576_v0 }
 0x36c   :  { %671 = vmatpush1.bf16.msra.mxu0 %v1641_v7  ;;  %1312 = vmatpush3.bf16.msra.mxu1 %v1665_v15 }
 0x36d   :  { %672 = vmatprep.subr.bf16.mxu0 %v1644_v8  ;;  %1313 = vmatprep.subr.bf16.mxu1 %v1576_v0 }
 0x370   :  { %673 = vmatpush1.bf16.msra.mxu0 %v1647_v9  ;;  %1314 = vmatpush3.bf16.msra.mxu1 %v1675_v18 }
 0x371   :  { %674 = vmatprep.subr.bf16.mxu0 %v1652_v11  ;;  %1315 = vmatprep.subr.bf16.mxu1 %v1576_v0 }
 0x374   :  { %675 = vmatpush1.bf16.msra.mxu0 %v1659_v13  ;;  %1316 = vmatpush3.bf16.msra.mxu1 %v1685_v21 }
 0x375   :  { %676 = vmatprep.subr.bf16.mxu0 %v1662_v14  ;;  %1317 = vmatprep.subr.bf16.mxu1 %v1576_v0 }
 0x378   :  { %677 = vmatpush1.bf16.msra.mxu0 %v1669_v16  ;;  %1318 = vmatpush3.bf16.msra.mxu1 %v1693_v23 }
 0x379   :  { %678 = vmatprep.subr.bf16.mxu0 %v1672_v17  ;;  %1319 = vmatprep.subr.bf16.mxu1 %v1576_v0 }
 0x37c   :  { %679 = vmatpush1.bf16.msra.mxu0 %v1679_v19  ;;  %1320 = vmatpush3.bf16.msra.mxu1 %v1699_v24 }
 0x37d   :  { %680 = vmatprep.subr.bf16.mxu0 %v1682_v20  ;;  %1321 = vmatprep.subr.bf16.mxu1 %v1576_v0 }
 0x380   :  { %681 = vmatpush1.bf16.msra.mxu0 %v1689_v22  ;;  %1322 = vmatpush3.bf16.msra.mxu1 %v1707_v25 }
 0x381   :  { %778 = vmatprep.subr.bf16.mxu0 %v1627_v2  ;;  %1327 = vmatprep.subr.bf16.mxu1 %v1576_v0 }
 0x436   :  { %v588_v34 = vpop.f32.mrb[12].mxu0  ;;  %v629_v29 = vpop.f32.mrb[12].mxu1 }
 0x437   :  { %v589_v35 = vadd.f32 %v588_v34, %v1748_v32  ;;  %v590_v36 = vpop.f32.mrb[13].mxu0  ;;  %v1305_v37 = vpop.f32.mrb[13].mxu1  ;;  %v630_v53 = vadd.f32 %v629_v29, %v1754_v54 }
 0x438   :  { %v591_v38 = vadd.f32 %v590_v36, %v1750_v33  ;;  %v592_v39 = vpop.f32.mrb[14].mxu0  ;;  %v632_v40 = vpop.f32.mrb[14].mxu1 }
 0x439   :  { %v635_v41 = vadd.f32 %v1145_v30, %v589_v35  ;;  %v593_v42 = vpop.f32.mrb[15].mxu0  ;;  %v1306_v43 = vpop.f32.mrb[15].mxu1 }
 0x43a   :  { %v645_v44 = vadd.f32 %v643_v31, %v591_v38 }
 0x43b   :  { %v636_v45 = vsub.f32 0.0, %v635_v41 }
 0x43c   :  { %v646_v47 = vsub.f32 0.0, %v645_v44 }
 0x43d   :  { %v637_v46 = vmul.f32 1.442695, %v636_v45 }
 0x43e   :  { %v647_v48 = vmul.f32 1.442695, %v646_v47 }
 0x43f   :  { %1456 = vpow2.f32 %v637_v46 }
 0x440   :  { %1458 = vpow2.f32 %v647_v48 }
 0x449   :  { %v1457_v49 = vpop.eup %1456 }
 0x44a   :  { %v639_v50 = vadd.f32 1.0, %v1457_v49  ;;  %v1459_v51 = vpop.eup %1458 }
 0x44b   :  { %v649_v52 = vadd.f32 1.0, %v1459_v51 }
 0x44c   :  { %1460 = vrcp.f32 %v639_v50 }
 0x44d   :  { %1462 = vrcp.f32 %v649_v52 }
 0x456   :  { %v1461_v56 = vpop.eup %1460 }
 0x457   :  { %v652_v57 = vmul.f32 %v1461_v56, %v630_v53  ;;  %v1463_v59 = vpop.eup %1462 }
 0x458   :  { %v657_v60 = vsub.f32 1.0, %v1463_v59  ;;  %v659_v63 = vmul.f32 %v1463_v59, %v1857_v28  ;;  %v1147_v28 = vld [vmem:[%s2049_s0 + $0x18] sm:$0x3f] }
 0x459   :  { %v655_v58 = vadd.f32 %v653_v55, %v652_v57  ;;  %v755_v29 = vrot.slane %v1147_v28, 2  ;;  %v765_v53 = vrot.slane %v1147_v28, 4 }
 0x45b   :  { %1464 = vtanh.f32 %v655_v58 }
 0x465   :  { %v1465_v61 = vpop.eup %1464 }
 0x466   :  { %v658_v62 = vmul.f32 %v1465_v61, %v657_v60 }
 0x468   :  { %v1907_v26 = vadd.f32 %v659_v63, %v658_v62 }
 0x46a   :  { %1146 = vst [vmem:[%s2052_s3 + $0x6] sm:$0x3] %v1907_v26  ;;  %v665_v27 = vpack.c.bf16 %v1907_v26, %v1907_v26 }
 0x46c   :  { %699 = vmatmul.mubr.bf16.vlgmr.msra.gmra.mrb[16].mxu0 %v665_v27  ;;  %1324 = vmatmul.mubr.bf16.vlgmr.msra.gmra.mrb[16].mxu1 %v665_v27 }
 0x46d   :  { %779 = vmatpush1.bf16.msra.mxu0 %v1629_v3  ;;  %1328 = vmatpush3.bf16.msra.mxu1 %v1649_v10 }
 0x46e   :  { %780 = vmatprep.subr.bf16.mxu0 %v1632_v4  ;;  %1329 = vmatprep.subr.bf16.mxu1 %v1576_v0 }
 0x46f   :  { %810 = vmatprep.mubr.bf16.mxu0 %v1577_v1  ;;  %1343 = vmatprep.mubr.msk.bf16.mxu1 %vm1578_vm0, %v1576_v0 }
 0x471   :  { %781 = vmatpush1.bf16.msra.mxu0 %v1635_v5  ;;  %1330 = vmatpush3.bf16.msra.mxu1 %v1655_v12 }
 0x472   :  { %782 = vmatprep.subr.bf16.mxu0 %v1638_v6  ;;  %1331 = vmatprep.subr.bf16.mxu1 %v1576_v0 }
 0x475   :  { %783 = vmatpush1.bf16.msra.mxu0 %v1641_v7  ;;  %1332 = vmatpush3.bf16.msra.mxu1 %v1665_v15 }
 0x476   :  { %784 = vmatprep.subr.bf16.mxu0 %v1644_v8  ;;  %1333 = vmatprep.subr.bf16.mxu1 %v1576_v0 }
 0x479   :  { %785 = vmatpush1.bf16.msra.mxu0 %v1647_v9  ;;  %1334 = vmatpush3.bf16.msra.mxu1 %v1675_v18 }
 0x47a   :  { %786 = vmatprep.subr.bf16.mxu0 %v1652_v11  ;;  %1335 = vmatprep.subr.bf16.mxu1 %v1576_v0 }
 0x47d   :  { %787 = vmatpush1.bf16.msra.mxu0 %v1659_v13  ;;  %1336 = vmatpush3.bf16.msra.mxu1 %v1685_v21 }
 0x47e   :  { %788 = vmatprep.subr.bf16.mxu0 %v1662_v14  ;;  %1337 = vmatprep.subr.bf16.mxu1 %v1576_v0 }
 0x481   :  { %789 = vmatpush1.bf16.msra.mxu0 %v1669_v16  ;;  %1338 = vmatpush3.bf16.msra.mxu1 %v1693_v23 }
 0x482   :  { %790 = vmatprep.subr.bf16.mxu0 %v1672_v17  ;;  %1339 = vmatprep.subr.bf16.mxu1 %v1576_v0 }
 0x485   :  { %791 = vmatpush1.bf16.msra.mxu0 %v1679_v19  ;;  %1340 = vmatpush3.bf16.msra.mxu1 %v1699_v24 }
 0x486   :  { %792 = vmatprep.subr.bf16.mxu0 %v1682_v20  ;;  %1341 = vmatprep.subr.bf16.mxu1 %v1576_v0 }
 0x489   :  { %793 = vmatpush1.bf16.msra.mxu0 %v1689_v22  ;;  %1342 = vmatpush3.bf16.msra.mxu1 %v1707_v25 }
 0x48a   :  { %890 = vmatprep.subr.bf16.mxu0 %v1627_v2  ;;  %1347 = vmatprep.subr.bf16.mxu1 %v1576_v0 }
 0x53f   :  { %v700_v30 = vpop.f32.mrb[16].mxu0  ;;  %v741_v34 = vpop.f32.mrb[16].mxu1 }
 0x540   :  { %v701_v31 = vadd.f32 %v700_v30, %v1748_v32  ;;  %v702_v35 = vpop.f32.mrb[17].mxu0  ;;  %v1325_v36 = vpop.f32.mrb[17].mxu1  ;;  %v742_v52 = vadd.f32 %v741_v34, %v1754_v54 }
 0x541   :  { %v703_v37 = vadd.f32 %v702_v35, %v1750_v33  ;;  %v704_v38 = vpop.f32.mrb[18].mxu0  ;;  %v744_v39 = vpop.f32.mrb[18].mxu1 }
 0x542   :  { %v747_v40 = vadd.f32 %v1147_v28, %v701_v31  ;;  %v705_v41 = vpop.f32.mrb[19].mxu0  ;;  %v1326_v42 = vpop.f32.mrb[19].mxu1 }
 0x543   :  { %v757_v43 = vadd.f32 %v755_v29, %v703_v37 }
 0x544   :  { %v748_v44 = vsub.f32 0.0, %v747_v40 }
 0x545   :  { %v758_v46 = vsub.f32 0.0, %v757_v43 }
 0x546   :  { %v749_v45 = vmul.f32 1.442695, %v748_v44  ;;  %v1506_v44 = vld [vmem:[#allocation2] ss:$12 sps:$4 sm:$0xff]  }
 0x547   :  { %v759_v47 = vmul.f32 1.442695, %v758_v46  ;;  %v1508_v46 = vld [vmem:[#allocation2 + $0x1c] ss:$12 sps:$4 sm:$0xff]  }
 0x548   :  { %1466 = vpow2.f32 %v749_v45  ;;  %v1507_v45 = vld [vmem:[#allocation2 + $0x8] ss:$12 sps:$4 sm:$0xff]  }
 0x549   :  { %1468 = vpow2.f32 %v759_v47  ;;  %v1509_v47 = vld [vmem:[#allocation2 + $0x18] ss:$12 sps:$4 sm:$0xff]  }
 0x552   :  { %v1467_v48 = vpop.eup %1466 }
 0x553   :  { %v751_v49 = vadd.f32 1.0, %v1467_v48  ;;  %v1469_v50 = vpop.eup %1468  ;;  %v1510_v48 = vld [vmem:[#allocation2 + $0x20] ss:$12 sps:$4 sm:$0xff]  }
 0x554   :  { %v761_v51 = vadd.f32 1.0, %v1469_v50  ;;  %v1512_v50 = vld [vmem:[#allocation2 + $0x30] ss:$12 sps:$4 sm:$0xff]  }
 0x555   :  { %1470 = vrcp.f32 %v751_v49  ;;  %v1511_v49 = vld [vmem:[#allocation2 + $0x34] ss:$12 sps:$4 sm:$0xff]  }
 0x556   :  { %1472 = vrcp.f32 %v761_v51  ;;  %v1513_v51 = vld [vmem:[#allocation2 + $0x38] ss:$12 sps:$4 sm:$0xff]  }
 0x55f   :  { %v1471_v55 = vpop.eup %1470 }
 0x560   :  { %v764_v56 = vmul.f32 %v1471_v55, %v742_v52  ;;  %v1473_v58 = vpop.eup %1472  ;;  %v1514_v52 = vld [vmem:[#allocation2 + $0x4c] ss:$12 sps:$4 sm:$0xff]  }
 0x561   :  { %v769_v59 = vsub.f32 1.0, %v1473_v58  ;;  %v771_v62 = vmul.f32 %v1473_v58, %v1907_v26  ;;  %v1517_v55 = vld [vmem:[#allocation2 + $0x60] ss:$12 sps:$4 sm:$0xff]  }
 0x562   :  { %v767_v57 = vadd.f32 %v765_v53, %v764_v56  ;;  %v1516_v53 = vld [vmem:[#allocation2 + $0x64] ss:$12 sps:$4 sm:$0xff]   ;;  %v1518_v56 = vld [vmem:[#allocation2 + $0x7c] ss:$12 sps:$4 sm:$0xff]   ;;  %v1520_v58 = vld [vmem:[#allocation2 + $0x94] ss:$12 sps:$4 sm:$0xff]  }
 0x564   :  { %1474 = vtanh.f32 %v767_v57  ;;  %v1519_v57 = vld [vmem:[#allocation2 + $0x78] ss:$12 sps:$4 sm:$0xff]  }
 0x56e   :  { %v1475_v60 = vpop.eup %1474 }
 0x56f   :  { %v770_v61 = vmul.f32 %v1475_v60, %v769_v59  ;;  %v1522_v59 = vld [vmem:[#allocation2 + $0xac] ss:$12 sps:$4 sm:$0xff]  }
 0x571   :  { %v1957_v63 = vadd.f32 %v771_v62, %v770_v61 }
 0x573   :  { %1148 = vst [vmem:[%s2052_s3 + $0x8] sm:$0x3] %v1957_v63  ;;  %v777_v27 = vpack.c.bf16 %v1957_v63, %v1957_v63 }
 0x575   :  { %811 = vmatmul.mubr.bf16.vlgmr.msra.gmra.mrb[20].mxu0 %v777_v27  ;;  %1344 = vmatmul.mubr.bf16.vlgmr.msra.gmra.mrb[20].mxu1 %v777_v27 }
 0x576   :  { %891 = vmatpush1.bf16.msra.mxu0 %v1629_v3  ;;  %1348 = vmatpush3.bf16.msra.mxu1 %v1649_v10  ;;  %v1149_v3 = vld [vmem:[%s2049_s0 + $0x1e] sm:$0x3f] }
 0x577   :  { %892 = vmatprep.subr.bf16.mxu0 %v1632_v4  ;;  %1349 = vmatprep.subr.bf16.mxu1 %v1576_v0  ;;  %v877_v29 = vrot.slane %v1149_v3, 4 }
 0x578   :  { %922 = vmatprep.mubr.bf16.mxu0 %v1577_v1  ;;  %1363 = vmatprep.mubr.msk.bf16.mxu1 %vm1578_vm0, %v1576_v0 }
 0x57a   :  { %893 = vmatpush1.bf16.msra.mxu0 %v1635_v5  ;;  %1350 = vmatpush3.bf16.msra.mxu1 %v1655_v12 }
 0x57b   :  { %894 = vmatprep.subr.bf16.mxu0 %v1638_v6  ;;  %1351 = vmatprep.subr.bf16.mxu1 %v1576_v0  ;;  %v867_v6 = vrot.slane %v1149_v3, 2 }
 0x57e   :  { %895 = vmatpush1.bf16.msra.mxu0 %v1641_v7  ;;  %1352 = vmatpush3.bf16.msra.mxu1 %v1665_v15 }
 0x57f   :  { %896 = vmatprep.subr.bf16.mxu0 %v1644_v8  ;;  %1353 = vmatprep.subr.bf16.mxu1 %v1576_v0 }
 0x582   :  { %897 = vmatpush1.bf16.msra.mxu0 %v1647_v9  ;;  %1354 = vmatpush3.bf16.msra.mxu1 %v1675_v18 }
 0x583   :  { %898 = vmatprep.subr.bf16.mxu0 %v1652_v11  ;;  %1355 = vmatprep.subr.bf16.mxu1 %v1576_v0 }
 0x586   :  { %899 = vmatpush1.bf16.msra.mxu0 %v1659_v13  ;;  %1356 = vmatpush3.bf16.msra.mxu1 %v1685_v21 }
 0x587   :  { %900 = vmatprep.subr.bf16.mxu0 %v1662_v14  ;;  %1357 = vmatprep.subr.bf16.mxu1 %v1576_v0 }
 0x58a   :  { %901 = vmatpush1.bf16.msra.mxu0 %v1669_v16  ;;  %1358 = vmatpush3.bf16.msra.mxu1 %v1693_v23 }
 0x58b   :  { %902 = vmatprep.subr.bf16.mxu0 %v1672_v17  ;;  %1359 = vmatprep.subr.bf16.mxu1 %v1576_v0 }
 0x58e   :  { %903 = vmatpush1.bf16.msra.mxu0 %v1679_v19  ;;  %1360 = vmatpush3.bf16.msra.mxu1 %v1699_v24 }
 0x58f   :  { %904 = vmatprep.subr.bf16.mxu0 %v1682_v20  ;;  %1361 = vmatprep.subr.bf16.mxu1 %v1576_v0 }
 0x592   :  { %905 = vmatpush1.bf16.msra.mxu0 %v1689_v22  ;;  %1362 = vmatpush3.bf16.msra.mxu1 %v1707_v25 }
 0x593   :  { %1002 = vmatprep.subr.bf16.mxu0 %v1627_v2  ;;  %1367 = vmatprep.subr.bf16.mxu1 %v1576_v0 }
 0x648   :  { %v812_v4 = vpop.f32.mrb[20].mxu0  ;;  %v853_v5 = vpop.f32.mrb[20].mxu1 }
 0x649   :  { %v813_v7 = vadd.f32 %v812_v4, %v1748_v32  ;;  %v814_v8 = vpop.f32.mrb[21].mxu0  ;;  %v1345_v9 = vpop.f32.mrb[21].mxu1  ;;  %v854_v34 = vadd.f32 %v853_v5, %v1754_v54 }
 0x64a   :  { %v815_v10 = vadd.f32 %v814_v8, %v1750_v33  ;;  %v816_v11 = vpop.f32.mrb[22].mxu0  ;;  %v856_v12 = vpop.f32.mrb[22].mxu1 }
 0x64b   :  { %v859_v13 = vadd.f32 %v1149_v3, %v813_v7  ;;  %v817_v14 = vpop.f32.mrb[23].mxu0  ;;  %v1346_v2 = vpop.f32.mrb[23].mxu1 }
 0x64c   :  { %v869_v15 = vadd.f32 %v867_v6, %v815_v10 }
 0x64d   :  { %v860_v16 = vsub.f32 0.0, %v859_v13 }
 0x64e   :  { %v870_v19 = vsub.f32 0.0, %v869_v15 }
 0x64f   :  { %v861_v17 = vmul.f32 1.442695, %v860_v16 }
 0x650   :  { %v871_v20 = vmul.f32 1.442695, %v870_v19 }
 0x651   :  { %1476 = vpow2.f32 %v861_v17 }
 0x652   :  { %1478 = vpow2.f32 %v871_v20 }
 0x65b   :  { %v1477_v22 = vpop.eup %1476 }
 0x65c   :  { %v863_v26 = vadd.f32 1.0, %v1477_v22  ;;  %v1479_v28 = vpop.eup %1478 }
 0x65d   :  { %v873_v30 = vadd.f32 1.0, %v1479_v28 }
 0x65e   :  { %1480 = vrcp.f32 %v863_v26 }
 0x65f   :  { %1482 = vrcp.f32 %v873_v30 }
 0x668   :  { %v1481_v31 = vpop.eup %1480 }
 0x669   :  { %v876_v35 = vmul.f32 %v1481_v31, %v854_v34  ;;  %v1483_v37 = vpop.eup %1482 }
 0x66a   :  { %v881_v38 = vsub.f32 1.0, %v1483_v37  ;;  %v883_v41 = vmul.f32 %v1483_v37, %v1957_v63 }
 0x66b   :  { %v879_v36 = vadd.f32 %v877_v29, %v876_v35  ;;  %v1153_v35 = vld [vmem:[%s2049_s0 + $0x2a] sm:$0x3f] }
 0x66d   :  { %1484 = vtanh.f32 %v879_v36 }
 0x677   :  { %v1485_v39 = vpop.eup %1484 }
 0x678   :  { %v882_v40 = vmul.f32 %v1485_v39, %v881_v38  ;;  %v1091_v38 = vrot.slane %v1153_v35, 2 }
 0x67a   :  { %v2007_v42 = vadd.f32 %v883_v41, %v882_v40 }
 0x67c   :  { %1150 = vst [vmem:[%s2052_s3 + $0xa] sm:$0x3] %v2007_v42  ;;  %v889_v43 = vpack.c.bf16 %v2007_v42, %v2007_v42 }
 0x67e   :  { %923 = vmatmul.mubr.bf16.vlgmr.msra.gmra.mrb[24].mxu0 %v889_v43  ;;  %1364 = vmatmul.mubr.bf16.vlgmr.msra.gmra.mrb[24].mxu1 %v889_v43 }
 0x67f   :  { %1003 = vmatpush1.bf16.msra.mxu0 %v1506_v44  ;;  %1368 = vmatpush3.bf16.msra.mxu1 %v1507_v45 }
 0x680   :  { %1004 = vmatprep.subr.bf16.mxu0 %v1508_v46  ;;  %1369 = vmatprep.subr.bf16.mxu1 %v1576_v0 }
 0x681   :  { %1034 = vmatprep.mubr.bf16.mxu0 %v1577_v1  ;;  %1383 = vmatprep.mubr.msk.bf16.mxu1 %vm1578_vm0, %v1576_v0  ;;  %v1515_v1 = vld [vmem:[#allocation2 + $0x48] ss:$12 sps:$4 sm:$0xff]  }
 0x683   :  { %1005 = vmatpush1.bf16.msra.mxu0 %v1509_v47  ;;  %1370 = vmatpush3.bf16.msra.mxu1 %v1510_v48 }
 0x684   :  { %1006 = vmatprep.subr.bf16.mxu0 %v1511_v49  ;;  %1371 = vmatprep.subr.bf16.mxu1 %v1576_v0 }
 0x687   :  { %1007 = vmatpush1.bf16.msra.mxu0 %v1512_v50  ;;  %1372 = vmatpush3.bf16.msra.mxu1 %v1513_v51 }
 0x688   :  { %1008 = vmatprep.subr.bf16.mxu0 %v1514_v52  ;;  %1373 = vmatprep.subr.bf16.mxu1 %v1576_v0 }
 0x68b   :  { %1009 = vmatpush1.bf16.msra.mxu0 %v1515_v1  ;;  %1374 = vmatpush3.bf16.msra.mxu1 %v1675_v18  ;;  %v1521_v18 = vld [vmem:[#allocation2 + $0x90] ss:$12 sps:$4 sm:$0xff]  }
 0x68c   :  { %1010 = vmatprep.subr.bf16.mxu0 %v1516_v53  ;;  %1375 = vmatprep.subr.bf16.mxu1 %v1576_v0 }
 0x68f   :  { %1011 = vmatpush1.bf16.msra.mxu0 %v1517_v55  ;;  %1376 = vmatpush3.bf16.msra.mxu1 %v1685_v21  ;;  %v1523_v21 = vld [vmem:[#allocation2 + $0xa8] ss:$12 sps:$4 sm:$0xff]  }
 0x690   :  { %1012 = vmatprep.subr.bf16.mxu0 %v1518_v56  ;;  %1377 = vmatprep.subr.bf16.mxu1 %v1576_v0 }
 0x693   :  { %1013 = vmatpush1.bf16.msra.mxu0 %v1519_v57  ;;  %1378 = vmatpush3.bf16.msra.mxu1 %v1693_v23  ;;  %v1151_v23 = vld [vmem:[%s2049_s0 + $0x24] sm:$0x3f] }
 0x694   :  { %1014 = vmatprep.subr.bf16.mxu0 %v1520_v58  ;;  %1379 = vmatprep.subr.bf16.mxu1 %v1576_v0  ;;  %v979_v62 = vrot.slane %v1151_v23, 2  ;;  %v989_v16 = vrot.slane %v1151_v23, 4 }
 0x697   :  { %1015 = vmatpush1.bf16.msra.mxu0 %v1521_v18  ;;  %1380 = vmatpush3.bf16.msra.mxu1 %v1699_v24 }
 0x698   :  { %1016 = vmatprep.subr.bf16.mxu0 %v1522_v59  ;;  %1381 = vmatprep.subr.bf16.mxu1 %v1576_v0 }
 0x69b   :  { %1017 = vmatpush1.bf16.msra.mxu0 %v1523_v21  ;;  %1382 = vmatpush3.bf16.msra.mxu1 %v1707_v25 }
 0x751   :  { %v924_v60 = vpop.f32.mrb[24].mxu0  ;;  %v965_v61 = vpop.f32.mrb[24].mxu1 }
 0x752   :  { %v925_v63 = vadd.f32 %v924_v60, %v1748_v32  ;;  %v926_v27 = vpop.f32.mrb[25].mxu0  ;;  %v1365_v3 = vpop.f32.mrb[25].mxu1  ;;  %v966_v15 = vadd.f32 %v965_v61, %v1754_v54 }
 0x753   :  { %v927_v24 = vadd.f32 %v926_v27, %v1750_v33  ;;  %v928_v4 = vpop.f32.mrb[26].mxu0  ;;  %v968_v5 = vpop.f32.mrb[26].mxu1 }
 0x754   :  { %v971_v0 = vadd.f32 %v1151_v23, %v925_v63  ;;  %v929_v6 = vpop.f32.mrb[27].mxu0  ;;  %v1366_v7 = vpop.f32.mrb[27].mxu1 }
 0x755   :  { %v981_v8 = vadd.f32 %v979_v62, %v927_v24 }
 0x756   :  { %v972_v25 = vsub.f32 0.0, %v971_v0 }
 0x757   :  { %v982_v10 = vsub.f32 0.0, %v981_v8 }
 0x758   :  { %v973_v9 = vmul.f32 1.442695, %v972_v25 }
 0x759   :  { %v983_v11 = vmul.f32 1.442695, %v982_v10 }
 0x75a   :  { %1486 = vpow2.f32 %v973_v9 }
 0x75b   :  { %1488 = vpow2.f32 %v983_v11 }
 0x764   :  { %v1487_v12 = vpop.eup %1486 }
 0x765   :  { %v975_v13 = vadd.f32 1.0, %v1487_v12  ;;  %v1489_v14 = vpop.eup %1488 }
 0x766   :  { %v985_v2 = vadd.f32 1.0, %v1489_v14 }
 0x767   :  { %1490 = vrcp.f32 %v975_v13 }
 0x768   :  { %1492 = vrcp.f32 %v985_v2 }
 0x771   :  { %v1491_v17 = vpop.eup %1490 }
 0x772   :  { %v988_v19 = vmul.f32 %v1491_v17, %v966_v15  ;;  %v1493_v22 = vpop.eup %1492 }
 0x773   :  { %v993_v26 = vsub.f32 1.0, %v1493_v22  ;;  %v995_v34 = vmul.f32 %v1493_v22, %v2007_v42 }
 0x774   :  { %v991_v20 = vadd.f32 %v989_v16, %v988_v19 }
 0x776   :  { %1494 = vtanh.f32 %v991_v20 }
 0x780   :  { %v1495_v28 = vpop.eup %1494 }
 0x781   :  { %v994_v30 = vmul.f32 %v1495_v28, %v993_v26 }
 0x783   :  { %v996_v29 = vadd.f32 %v995_v34, %v994_v30 }
 0x785   :  { %1152 = vst [vmem:[%s2052_s3 + $0xc] sm:$0x3] %v996_v29  ;;  %v1001_v31 = vpack.c.bf16 %v996_v29, %v996_v29 }
 0x787   :  { %1035 = vmatmul.mubr.bf16.vlgmr.msra.gmra.mrb[28].mxu0 %v1001_v31  ;;  %1384 = vmatmul.mubr.bf16.vlgmr.msra.gmra.mrb[28].mxu1 %v1001_v31 }
 0x85a   :  { %v1036_v36 = vpop.f32.mrb[28].mxu0  ;;  %v1077_v37 = vpop.f32.mrb[28].mxu1 }
 0x85b   :  { %v1037_v39 = vadd.f32 %v1036_v36, %v1748_v32  ;;  %v1038_v40 = vpop.f32.mrb[29].mxu0  ;;  %v1385_v41 = vpop.f32.mrb[29].mxu1  ;;  %v1078_v56 = vadd.f32 %v1077_v37, %v1754_v54 }
 0x85c   :  { %v1039_v42 = vadd.f32 %v1038_v40, %v1750_v33  ;;  %v1040_v43 = vpop.f32.mrb[30].mxu0  ;;  %v1080_v44 = vpop.f32.mrb[30].mxu1  ;;  %v1101_v33 = vrot.slane %v1153_v35, 4 }
 0x85d   :  { %v1083_v45 = vadd.f32 %v1153_v35, %v1037_v39  ;;  %v1041_v46 = vpop.f32.mrb[31].mxu0  ;;  %v1386_v47 = vpop.f32.mrb[31].mxu1 }
 0x85e   :  { %v1093_v48 = vadd.f32 %v1091_v38, %v1039_v42 }
 0x85f   :  { %v1084_v49 = vsub.f32 0.0, %v1083_v45 }
 0x860   :  { %v1094_v51 = vsub.f32 0.0, %v1093_v48 }
 0x861   :  { %v1085_v50 = vmul.f32 1.442695, %v1084_v49 }
 0x862   :  { %v1095_v52 = vmul.f32 1.442695, %v1094_v51 }
 0x863   :  { %1496 = vpow2.f32 %v1085_v50 }
 0x864   :  { %1498 = vpow2.f32 %v1095_v52 }
 0x86d   :  { %v1497_v1 = vpop.eup %1496 }
 0x86e   :  { %v1087_v53 = vadd.f32 1.0, %v1497_v1  ;;  %v1499_v32 = vpop.eup %1498 }
 0x86f   :  { %v1097_v55 = vadd.f32 1.0, %v1499_v32 }
 0x870   :  { %1500 = vrcp.f32 %v1087_v53 }
 0x871   :  { %1502 = vrcp.f32 %v1097_v55 }
 0x87a   :  { %v1501_v57 = vpop.eup %1500 }
 0x87b   :  { %v1100_v58 = vmul.f32 %v1501_v57, %v1078_v56  ;;  %v1503_v59 = vpop.eup %1502 }
 0x87c   :  { %v1105_v21 = vsub.f32 1.0, %v1503_v59  ;;  %v1107_v61 = vmul.f32 %v1503_v59, %v996_v29 }
 0x87d   :  { %v1103_v18 = vadd.f32 %v1101_v33, %v1100_v58 }
 0x87f   :  { %1504 = vtanh.f32 %v1103_v18 }
 0x889   :  { %v1505_v23 = vpop.eup %1504 }
 0x88a   :  { %v1106_v60 = vmul.f32 %v1505_v23, %v1105_v21 }
 0x88c   :  { %v1108_v62 = vadd.f32 %v1107_v61, %v1106_v60 }
 0x88e   :  { %1154 = vst [vmem:[%s2052_s3 + $0xe] sm:$0x3] %v1108_v62 }
 0x88f   :  { %1115 = vsyncpa [#allocation3], 1 }
 0x890   :  { %1116 = vsyncpa [#allocation5], 1 }

// kernel: _lambda_.10
= control target key start
LH: loop header
LB: loop body
LE: loop exit
PB: predicated region body
PF: predicated region fallthrough
CT: control target
= control target key end

     0   :  { %s2090_s12 = smov 0   ;;  %s2373_s0 = inlined_call_operand.vmem [shape: f32[16,17], index: 0, kind: input, shape index: {}]   ;;  %s2374_s1 = inlined_call_operand.vmem [shape: f32[16,17,128], index: 1, kind: input, shape index: {}]   ;;  %s2375_s2 = inlined_call_operand.vmem [shape: f32[16,16], index: 2, kind: input, shape index: {}]   ;;  %s2376_s3 = inlined_call_operand.vmem [shape: f32[16,128], index: 3, kind: output, shape index: {}]  }
   0x1 LB: > { %s1627_s13 = sadd.s32 4294967295, %s2049_s12   ;;  %p1631_p0 = scmp.ge.s32.totalorder %s2049_s12, 1  ;;  %s2049_s12 = sphi %s2090_s12, %s13_s12  }
   0x2   : > { %p145_p1 = scmp.lt.s32.totalorder %s2049_s12, 3 }
   0x4   : > { %p146_p2 = pnand %p1631_p0, %p145_p1 }
   0x5   : > { %p171_p3 = scmp.lt.s32.totalorder (!%p146_p2), %s1627_s13, 1  ;;  %v2051_v0 = vmov (!%p146_p2), 1   ;;  %v2052_v1 = vmov (!%p146_p2), 0   ;;  %v1635_v2 = vld [vmem:[%s2374_s1 + $0x18] sm:$0xff] (!%p146_p2)  ;;  %v1636_v3 = vld [vmem:[%s2374_s1 + $0x20] sm:$0xff] (!%p146_p2)  ;;  %v2053_v5 = vmov (!%p146_p2), 0.0|0.0  }
   0x6   : > { %149 = sbr.rel (%p146_p2) target bundleno = 423 (0x1a7), region = 32  ;;  %2026 = vset.pattern.permute.xlu0 (!%p146_p2), %v2051_v0  ;;  %2028 = vset.pattern.permute.xlu1 (!%p146_p2), %v2052_v1  ;;  %v1923_v4 = vpack.c.bf16 (!%p146_p2), %v1636_v3, %v1635_v2  ;;  %v1672_v7 = vld [vmem:[%s2374_s1 + $0xc0] sm:$0xff] (!%p146_p2)  ;;  %v1637_v8 = vld [vmem:[%s2374_s1 + $0x28] sm:$0x1] (!%p146_p2)  ;;  %vm207_vm0 = vcmask (!%p146_p2), 1040384   ;;  %v2054_v10 = vmov (!%p146_p2), 0.0  }
   0x7   : > { %1922 = vmatprep.subr.bf16.mxu1 (!%p146_p2), %v2053_v5  ;;  %1946 = vmatprep.subr.bf16.mxu0 (!%p146_p2), %v2053_v5  ;;  %v1673_v9 = vld [vmem:[%s2374_s1 + $0xc8] sm:$0xff] (!%p146_p2)  ;;  %vm2055_vm1 = vmmov (!%p146_p2), 0   ;;  %v2056_v12 = vmov (!%p146_p2), 8   ;;  %v2057_v13 = vmov (!%p146_p2), 9   ;;  %v1674_v14 = vld [vmem:[%s2374_s1 + $0xd0] sm:$0x1] (!%p146_p2) }
   0x8   : > { %1924 = vmatpush3.bf16.msra.mxu1 (!%p146_p2), %v1923_v4  ;;  %1784 = vmatprep.mubr.msk.f32.mxu1 (!%p146_p2), %vm2055_vm1, %v2054_v10  ;;  %v1947_v11 = vpack.c.bf16 (!%p146_p2), %v1673_v9, %v1672_v7  ;;  %v2058_v15 = vmov (!%p146_p2), 2   ;;  %v2059_v16 = vmov (!%p146_p2), 10   ;;  %v2060_v17 = vmov (!%p146_p2), 3   ;;  %v191_v27 = vld [vmem:[%s2374_s1] sm:$0xff] (!%p146_p2)  ;;  %v192_v28 = vld [vmem:[%s2374_s1 + $0x8] sm:$0xff] (!%p146_p2)  ;;  %v1677_v34 = vld [vmem:[%s2374_s1 + $0xd8] sm:$0xff] (!%p146_p2) }
   0x9   : > { %1782 = vmatprep.subr.mxu1 (!%p146_p2), %v2054_v10  ;;  %1856 = vmatprep.mubr.msk.f32.mxu0 (!%p146_p2), %vm2055_vm1, %v2054_v10  ;;  %v2061_v18 = vmov (!%p146_p2), 4   ;;  %v2062_v19 = vmov (!%p146_p2), 11   ;;  %v2063_v20 = vmov (!%p146_p2), 13   ;;  %v2064_v21 = vmov (!%p146_p2), 12   ;;  %v1678_v35 = vld [vmem:[%s2374_s1 + $0xe0] sm:$0xff] (!%p146_p2)  ;;  %v1642_v39 = vld [vmem:[%s2374_s1 + $0x30] sm:$0xff] (!%p146_p2) }
   0xa   : > { %1948 = vmatpush3.bf16.msra.mxu0 (!%p146_p2), %v1947_v11  ;;  %v2065_v22 = vmov (!%p146_p2), 7   ;;  %v2066_v23 = vmov (!%p146_p2), 5   ;;  %v2067_v24 = vmov (!%p146_p2), 15   ;;  %v2068_v25 = vmov (!%p146_p2), 6   ;;  %v193_v38 = vld [vmem:[%s2374_s1 + $0x10] sm:$0x1] (!%p146_p2) }
   0xb   : > { %1854 = vmatprep.subr.mxu0 (!%p146_p2), %v2054_v10  ;;  %v2069_v26 = vmov (!%p146_p2), 14   ;;  %vm203_vm2 = vcmask (!%p146_p2), 138240   ;;  %v1926_v31 = vpack.c.bf16 (!%p146_p2), %v192_v28, %v191_v27  ;;  %v1950_v37 = vpack.c.bf16 (!%p146_p2), %v1678_v35, %v1677_v34  ;;  %v1643_v40 = vld [vmem:[%s2374_s1 + $0x38] sm:$0xff] (!%p146_p2)  ;;  %v1679_v45 = vld [vmem:[%s2374_s1 + $0xe8] sm:$0x1] (!%p146_p2)  ;;  %v1682_v46 = vld [vmem:[%s2374_s1 + $0xf0] sm:$0xff] (!%p146_p2) }
   0xc   : > { %1783 = vmatpush3.msk.msra.mxu1 (!%p146_p2), %vm207_vm0, %v1637_v8  ;;  %v1929_v44 = vpack.c.bf16 (!%p146_p2), %v1643_v40, %v1642_v39  ;;  %v1683_v47 = vld [vmem:[%s2374_s1 + $0xf8] sm:$0xff] (!%p146_p2)  ;;  %v1644_v51 = vld [vmem:[%s2374_s1 + $0x40] sm:$0x1] (!%p146_p2)  ;;  %v1647_v52 = vld [vmem:[%s2374_s1 + $0x48] sm:$0xff] (!%p146_p2) }
   0xd   : > { %s2378_s13 = smov (!%p171_p3, %s1627_s13), 1  ;;  %1925 = vmatprep.subr.bf16.mxu1 %v2053_v5  ;;  %v1953_v50 = vpack.c.bf16 %v1683_v47, %v1682_v46  ;;  %v1648_v53 = vld [vmem:[%s2374_s1 + $0x50] sm:$0xff]  ;;  %v1684_v57 = vld [vmem:[%s2374_s1 + $0x100] sm:$0x1]  ;;  %v1687_v58 = vld [vmem:[%s2374_s1 + $0x108] sm:$0xff] }
   0xe   : > { %s2104_s18 = sshll.u32 %s2378_s13, 3  ;;  %1855 = vmatpush3.msk.msra.mxu0 %vm207_vm0, %v1674_v14  ;;  %v1932_v55 = vpack.c.bf16 %v1648_v53, %v1647_v52  ;;  %v1688_v59 = vld [vmem:[%s2374_s1 + $0x110] sm:$0xff]  ;;  %v1649_v63 = vld [vmem:[%s2374_s1 + $0x58] sm:$0x1]  ;;  %v1652_v0 = vld [vmem:[%s2374_s1 + $0x60] sm:$0xff] }
   0xf   : > { %s178_s21 = scalar_lea.vmem %s2375_s2, %s2104_s18  ;;  %1949 = vmatprep.subr.bf16.mxu0 %v2053_v5  ;;  %s174_s5 = scalar_lea.vmem %s2373_s0, %s2104_s18  ;;  %v1956_v62 = vpack.c.bf16 %v1688_v59, %v1687_v58  ;;  %v1653_v1 = vld [vmem:[%s2374_s1 + $0x68] sm:$0xff]  ;;  %v1692_v7 = vld [vmem:[%s2374_s1 + $0x120] sm:$0xff]  ;;  %v1657_v14 = vld [vmem:[%s2374_s1 + $0x78] sm:$0xff] }
  0x10   : > { %v184_v6 = vld [vmem:[%s178_s21] sm:$0xff]  ;;  %v1935_v3 = vpack.c.bf16 %v1653_v1, %v1652_v0  ;;  %v1693_v8 = vld [vmem:[%s2374_s1 + $0x128] sm:$0xff]  ;;  %v1663_v27 = vld [vmem:[%s2374_s1 + $0x98] sm:$0xff]  ;;  %s182_s19 = scalar_lea.vmem %s2376_s3, %s2104_s18 }
  0x11   : > { %195 = vperm.xlu0 %2026, %v184_v6   ;;  %187 = vperm.xlu1 %2028, %v184_v6   ;;  %v2144_v29 = vld [vmem:[%s174_s5] sm:$0xff]  ;;  %v1703_v34 = vld [vmem:[%s2374_s1 + $0x158] sm:$0xff]  ;;  %v1667_v39 = vld [vmem:[%s2374_s1 + $0xa8] sm:$0xff] }
  0x12   : > { %v1668_v40 = vld [vmem:[%s2374_s1 + $0xb0] sm:$0xff]  ;;  %v1709_v53 = vld [vmem:[%s2374_s1 + $0x178] sm:$0x1] }
  0x13   : > { %v1708_v46 = vld [vmem:[%s2374_s1 + $0x170] sm:$0xff] }
  0x15   : > { %2027 = vset.pattern.permute.xlu0 %v2056_v12  ;;  %2029 = vset.pattern.permute.xlu1 %v2057_v13  ;;  %v1959_v12 = vpack.c.bf16 %v1693_v8, %v1692_v7  ;;  %v1654_v13 = vld [vmem:[%s2374_s1 + $0x70] sm:$0x1] }
  0x16   : > { %874 = vperm.xlu0 %2027, %v184_v6   ;;  %960 = vperm.xlu1 %2029, %v184_v6  }
  0x1a   : > { %2030 = vset.pattern.permute.xlu1 %v2058_v15  ;;  %2031 = vset.pattern.permute.xlu0 %v2059_v16  ;;  %v1658_v15 = vld [vmem:[%s2374_s1 + $0x80] sm:$0xff] }
  0x1b   : > { %358 = vperm.xlu1 %2030, %v184_v6   ;;  %1046 = vperm.xlu0 %2031, %v184_v6  }
  0x1f   : > { %2032 = vset.pattern.permute.xlu1 %v2060_v17  ;;  %2034 = vset.pattern.permute.xlu0 %v2061_v18  ;;  %v1938_v18 = vpack.c.bf16 %v1658_v15, %v1657_v14 }
  0x20   : > { %444 = vperm.xlu1 %2032, %v184_v6   ;;  %530 = vperm.xlu0 %2034, %v184_v6  }
  0x24   : > { %2033 = vset.pattern.permute.xlu1 %v2062_v19  ;;  %2037 = vset.pattern.permute.xlu0 %v2063_v20  ;;  %v1694_v19 = vld [vmem:[%s2374_s1 + $0x130] sm:$0x1]  ;;  %v1697_v20 = vld [vmem:[%s2374_s1 + $0x138] sm:$0xff] }
  0x25   : > { %1132 = vperm.xlu1 %2033, %v184_v6   ;;  %1304 = vperm.xlu0 %2037, %v184_v6  }
  0x29   : > { %2035 = vset.pattern.permute.xlu1 %v2064_v21  ;;  %2040 = vset.pattern.permute.xlu0 %v2065_v22  ;;  %v1698_v21 = vld [vmem:[%s2374_s1 + $0x140] sm:$0xff] }
  0x2a   : > { %1218 = vperm.xlu1 %2035, %v184_v6   ;;  %788 = vperm.xlu0 %2040, %v184_v6  }
  0x2e   : > { %2036 = vset.pattern.permute.xlu1 %v2066_v23  ;;  %2042 = vset.pattern.permute.xlu0 %v2067_v24 }
  0x2f   : > { %616 = vperm.xlu1 %2036, %v184_v6  }
  0x33   : > { %2038 = vset.pattern.permute.xlu1 %v2068_v25  ;;  %v1659_v25 = vld [vmem:[%s2374_s1 + $0x88] sm:$0x1] }
  0x34   : > { %702 = vperm.xlu1 %2038, %v184_v6  }
  0x38   : > { %2039 = vset.pattern.permute.xlu1 %v2069_v26  ;;  %v1662_v26 = vld [vmem:[%s2374_s1 + $0x90] sm:$0xff] }
  0x39   : > { %1390 = vperm.xlu1 %2039, %v184_v6  }
  0x3d   : > { %2041 = vset.pattern.permute.xlu1 %v2067_v24  ;;  %v1962_v24 = vpack.c.bf16 %v1698_v21, %v1697_v20 }
  0x3e   : > { %1476 = vperm.xlu1 %2041, %v184_v6   ;;  %v1689_v6 = vld [vmem:[%s2374_s1 + $0x118] sm:$0x1] }
  0x90   : > { %v196_v30 = vpop.permute.xlu0 %195  ;;  %v188_v32 = vpop.permute.xlu1 %187 }
  0x91   : > { %v198_v33 = vmul.f32 %v196_v30, %v2144_v29  ;;  %v190_v43 = vmul.f32 %v188_v32, %v2144_v29  ;;  %v1941_v30 = vpack.c.bf16 %v1663_v27, %v1662_v26  ;;  %v1699_v32 = vld [vmem:[%s2374_s1 + $0x148] sm:$0x1] }
  0x93   : > { %1785 = vmatmul.mubr.msk.f32.vlgmr.msra.gmra.mrb[0].mxu1 %vm203_vm2, %v198_v33  ;;  %v1702_v33 = vld [vmem:[%s2374_s1 + $0x150] sm:$0xff] }
  0x94   : > { %1927 = vmatpush3.bf16.msra.mxu1 %v1926_v31  ;;  %1793 = vmatprep.mubr.msk.f32.mxu1 %vm2055_vm1, %v2054_v10 }
  0x95   : > { %v875_v36 = vpop.permute.xlu0 %874  ;;  %1791 = vmatprep.subr.mxu1 %v2054_v10  ;;  %v961_v42 = vpop.permute.xlu1 %960 }
  0x96   : > { %v877_v41 = vmul.f32 %v875_v36, %v2144_v29  ;;  %v963_v48 = vmul.f32 %v961_v42, %v2144_v29  ;;  %v1944_v42 = vpack.c.bf16 %v1668_v40, %v1667_v39 }
  0x98   : > { %1857 = vmatmul.mubr.msk.f32.vlgmr.msra.gmra.mrb[0].mxu0 %vm203_vm2, %v877_v41  ;;  %1792 = vmatpush3.msk.msra.mxu1 %vm207_vm0, %v193_v38  ;;  %v1664_v38 = vld [vmem:[%s2374_s1 + $0xa0] sm:$0x1] }
  0x99   : > { %1951 = vmatpush3.bf16.msra.mxu0 %v1950_v37  ;;  %1928 = vmatprep.subr.bf16.mxu1 %v2053_v5  ;;  %v1965_v37 = vpack.c.bf16 %v1703_v34, %v1702_v33 }
  0x9a   : > { %1863 = vmatprep.subr.mxu0 %v2054_v10  ;;  %1865 = vmatprep.mubr.msk.f32.mxu0 %vm2055_vm1, %v2054_v10  ;;  %v359_v49 = vpop.permute.xlu1 %358  ;;  %v1047_v56 = vpop.permute.xlu0 %1046 }
  0x9b   : > { %1794 = vmatmul.mubr.msk.f32.vlgmr.msra.gmra.mrb[0].mxu1 %vm203_vm2, %v190_v43  ;;  %v361_v54 = vmul.f32 %v359_v49, %v2144_v29  ;;  %v1049_v61 = vmul.f32 %v1047_v56, %v2144_v29 }
  0x9c   : > { %1930 = vmatpush3.bf16.msra.mxu1 %v1929_v44  ;;  %1802 = vmatprep.mubr.msk.f32.mxu1 %vm2055_vm1, %v2054_v10  ;;  %v1704_v44 = vld [vmem:[%s2374_s1 + $0x160] sm:$0x1] }
  0x9d   : > { %1864 = vmatpush3.msk.msra.mxu0 %vm207_vm0, %v1679_v45  ;;  %1800 = vmatprep.subr.mxu1 %v2054_v10  ;;  %v1707_v45 = vld [vmem:[%s2374_s1 + $0x168] sm:$0xff] }
  0x9e   : > { %1952 = vmatprep.subr.bf16.mxu0 %v2053_v5  ;;  %v1968_v49 = vpack.c.bf16 %v1708_v46, %v1707_v45 }
  0x9f   : > { %v445_v60 = vpop.permute.xlu1 %444  ;;  %v531_v11 = vpop.permute.xlu0 %530 }
  0xa0   : > { %1866 = vmatmul.mubr.msk.f32.vlgmr.msra.gmra.mrb[0].mxu0 %vm203_vm2, %v963_v48  ;;  %1801 = vmatpush3.msk.msra.mxu1 %vm207_vm0, %v1644_v51  ;;  %v447_v2 = vmul.f32 %v445_v60, %v2144_v29  ;;  %v533_v17 = vmul.f32 %v531_v11, %v2144_v29 }
  0xa1   : > { %1954 = vmatpush3.bf16.msra.mxu0 %v1953_v50  ;;  %1931 = vmatprep.subr.bf16.mxu1 %v2053_v5  ;;  %v1669_v50 = vld [vmem:[%s2374_s1 + $0xb8] sm:$0x1] }
  0xa2   : > { %1872 = vmatprep.subr.mxu0 %v2054_v10  ;;  %1874 = vmatprep.mubr.msk.f32.mxu0 %vm2055_vm1, %v2054_v10 }
  0xa3   : > { %1803 = vmatmul.mubr.msk.f32.vlgmr.msra.gmra.mrb[0].mxu1 %vm203_vm2, %v361_v54 }
  0xa4   : > { %1933 = vmatpush3.bf16.msra.mxu1 %v1932_v55  ;;  %1811 = vmatprep.mubr.msk.f32.mxu1 %vm2055_vm1, %v2054_v10  ;;  %v1133_v4 = vpop.permute.xlu1 %1132  ;;  %v1305_v31 = vpop.permute.xlu0 %1304 }
  0xa5   : > { %1873 = vmatpush3.msk.msra.mxu0 %vm207_vm0, %v1684_v57  ;;  %1809 = vmatprep.subr.mxu1 %v2054_v10  ;;  %v1135_v9 = vmul.f32 %v1133_v4, %v2144_v29  ;;  %v1307_v36 = vmul.f32 %v1305_v31, %v2144_v29 }
  0xa6   : > { %1955 = vmatprep.subr.bf16.mxu0 %v2053_v5 }
  0xa8   : > { %1875 = vmatmul.mubr.msk.f32.vlgmr.msra.gmra.mrb[0].mxu0 %vm203_vm2, %v1049_v61  ;;  %1810 = vmatpush3.msk.msra.mxu1 %vm207_vm0, %v1649_v63 }
  0xa9   : > { %1957 = vmatpush3.bf16.msra.mxu0 %v1956_v62  ;;  %1934 = vmatprep.subr.bf16.mxu1 %v2053_v5  ;;  %v1219_v16 = vpop.permute.xlu1 %1218  ;;  %v789_v48 = vpop.permute.xlu0 %788 }
  0xaa   : > { %1881 = vmatprep.subr.mxu0 %v2054_v10  ;;  %1883 = vmatprep.mubr.msk.f32.mxu0 %vm2055_vm1, %v2054_v10  ;;  %v1221_v22 = vmul.f32 %v1219_v16, %v2144_v29  ;;  %v791_v51 = vmul.f32 %v789_v48, %v2144_v29 }
  0xab   : > { %1812 = vmatmul.mubr.msk.f32.vlgmr.msra.gmra.mrb[0].mxu1 %vm203_vm2, %v447_v2 }
  0xac   : > { %1936 = vmatpush3.bf16.msra.mxu1 %v1935_v3  ;;  %1820 = vmatprep.mubr.msk.f32.mxu1 %vm2055_vm1, %v2054_v10 }
  0xad   : > { %1882 = vmatpush3.msk.msra.mxu0 %vm207_vm0, %v1689_v6  ;;  %1818 = vmatprep.subr.mxu1 %v2054_v10 }
  0xae   : > { %1958 = vmatprep.subr.bf16.mxu0 %v2053_v5  ;;  %v617_v23 = vpop.permute.xlu1 %616 }
  0xaf   : > { %v619_v28 = vmul.f32 %v617_v23, %v2144_v29 }
  0xb0   : > { %1884 = vmatmul.mubr.msk.f32.vlgmr.msra.gmra.mrb[0].mxu0 %vm203_vm2, %v1135_v9  ;;  %1819 = vmatpush3.msk.msra.mxu1 %vm207_vm0, %v1654_v13 }
  0xb1   : > { %1960 = vmatpush3.bf16.msra.mxu0 %v1959_v12  ;;  %1937 = vmatprep.subr.bf16.mxu1 %v2053_v5 }
  0xb2   : > { %1890 = vmatprep.subr.mxu0 %v2054_v10  ;;  %1892 = vmatprep.mubr.msk.f32.mxu0 %vm2055_vm1, %v2054_v10 }
  0xb3   : > { %1821 = vmatmul.mubr.msk.f32.vlgmr.msra.gmra.mrb[0].mxu1 %vm203_vm2, %v533_v17  ;;  %v703_v35 = vpop.permute.xlu1 %702 }
  0xb4   : > { %1939 = vmatpush3.bf16.msra.mxu1 %v1938_v18  ;;  %1829 = vmatprep.mubr.msk.f32.mxu1 %vm2055_vm1, %v2054_v10  ;;  %v705_v41 = vmul.f32 %v703_v35, %v2144_v29 }
  0xb5   : > { %1891 = vmatpush3.msk.msra.mxu0 %vm207_vm0, %v1694_v19  ;;  %1827 = vmatprep.subr.mxu1 %v2054_v10 }
  0xb6   : > { %1961 = vmatprep.subr.bf16.mxu0 %v2053_v5 }
  0xb8   : > { %1893 = vmatmul.mubr.msk.f32.vlgmr.msra.gmra.mrb[0].mxu0 %vm203_vm2, %v1221_v22  ;;  %1828 = vmatpush3.msk.msra.mxu1 %vm207_vm0, %v1659_v25  ;;  %v1391_v43 = vpop.permute.xlu1 %1390 }
  0xb9   : > { %1963 = vmatpush3.bf16.msra.mxu0 %v1962_v24  ;;  %1940 = vmatprep.subr.bf16.mxu1 %v2053_v5  ;;  %v1393_v47 = vmul.f32 %v1391_v43, %v2144_v29 }
  0xba   : > { %1899 = vmatprep.subr.mxu0 %v2054_v10  ;;  %1901 = vmatprep.mubr.msk.f32.mxu0 %vm2055_vm1, %v2054_v10 }
  0xbb   : > { %1830 = vmatmul.mubr.msk.f32.vlgmr.msra.gmra.mrb[0].mxu1 %vm203_vm2, %v619_v28 }
  0xbc   : > { %1942 = vmatpush3.bf16.msra.mxu1 %v1941_v30  ;;  %1838 = vmatprep.mubr.msk.f32.mxu1 %vm2055_vm1, %v2054_v10 }
  0xbd   : > { %1900 = vmatpush3.msk.msra.mxu0 %vm207_vm0, %v1699_v32  ;;  %1836 = vmatprep.subr.mxu1 %v2054_v10  ;;  %v1477_v52 = vpop.permute.xlu1 %1476 }
  0xbe   : > { %1964 = vmatprep.subr.bf16.mxu0 %v2053_v5 }
  0xc0   : > { %1902 = vmatmul.mubr.msk.f32.vlgmr.msra.gmra.mrb[0].mxu0 %vm203_vm2, %v1307_v36  ;;  %1837 = vmatpush3.msk.msra.mxu1 %vm207_vm0, %v1664_v38 }
  0xc1   : > { %1966 = vmatpush3.bf16.msra.mxu0 %v1965_v37  ;;  %1943 = vmatprep.subr.bf16.mxu1 %v2053_v5 }
  0xc2   : > { %1908 = vmatprep.subr.mxu0 %v2054_v10  ;;  %1910 = vmatprep.mubr.msk.f32.mxu0 %vm2055_vm1, %v2054_v10 }
  0xc3   : > { %1839 = vmatmul.mubr.msk.f32.vlgmr.msra.gmra.mrb[0].mxu1 %vm203_vm2, %v705_v41 }
  0xc4   : > { %1945 = vmatpush3.bf16.msra.mxu1 %v1944_v42  ;;  %1847 = vmatprep.mubr.msk.f32.mxu1 %vm2055_vm1, %v2054_v10 }
  0xc5   : > { %1909 = vmatpush3.msk.msra.mxu0 %vm207_vm0, %v1704_v44  ;;  %1845 = vmatprep.subr.mxu1 %v2054_v10 }
  0xc6   : > { %1967 = vmatprep.subr.bf16.mxu0 %v2053_v5  ;;  %v1479_v5 = vmul.f32 %v1477_v52, %v2144_v29 }
  0xc8   : > { %1911 = vmatmul.mubr.msk.f32.vlgmr.msra.gmra.mrb[0].mxu0 %vm203_vm2, %v1393_v47  ;;  %1846 = vmatpush3.msk.msra.mxu1 %vm207_vm0, %v1669_v50 }
  0xc9   : > { %1969 = vmatpush3.bf16.msra.mxu0 %v1968_v49  ;;  %1919 = vmatprep.mubr.msk.f32.mxu0 %vm2055_vm1, %v2054_v10 }
  0xca   : > { %1917 = vmatprep.subr.mxu0 %v2054_v10 }
  0xcb   : > { %1848 = vmatmul.mubr.msk.f32.vlgmr.msra.gmra.mrb[0].mxu1 %vm203_vm2, %v791_v51 }
  0xcd   : > { %1918 = vmatpush3.msk.msra.mxu0 %vm207_vm0, %v1709_v53 }
  0xd0   : > { %1920 = vmatmul.mubr.msk.f32.vlgmr.msra.gmra.mrb[0].mxu0 %vm203_vm2, %v1479_v5 }
 0x19e   : > { %v868_v54 = vpop.f32.mrb[0].mxu1 }
 0x19f   : > { %v1849_v55 = vpop.f32.mrb[1].mxu1 }
 0x1a3   : > { %v1556_v56 = vpop.f32.mrb[0].mxu0 }
 0x1a4   : > { %v1970_v10 = vadd.f32 %v1556_v56, %v868_v54  ;;  %v1921_v57 = vpop.f32.mrb[1].mxu0 }
 0x1a6   : > { %1561 = vst [vmem:[%s182_s19] sm:$0xff] %v1970_v10 }
 0x1a7 PF: > { %s13_s12 = sadd.s32 1, %s2049_s12  }
 0x1a8   : > { %p10_p4 = scmp.ge.s32.totalorder %s13_s12, 4  }
 0x1aa   :  { %12 = sbr.rel (!%p10_p4) target bundleno = 1 (0x1), region = 80 }

// kernel: _lambda_.9
= control target key start
LH: loop header
LB: loop body
LE: loop exit
PB: predicated region body
PF: predicated region fallthrough
CT: control target
= control target key end

     0   :  { %11 = vsyncpa [#allocation3], 0  ;;  %s938_s0 = inlined_call_operand.vmem [shape: f32[14,8], index: 0, kind: input, shape index: {}]   ;;  %s939_s1 = inlined_call_operand.vmem [shape: f32[14,8], index: 1, kind: input, shape index: {}]   ;;  %s940_s2 = inlined_call_operand.vmem [shape: f32[2,8], index: 2, kind: input, shape index: {}]   ;;  %s941_s3 = inlined_call_operand.hbm [shape: f32[8,128], index: 3, kind: input, shape index: {}]   ;;  %s942_s4 = inlined_call_operand.hbm [shape: f32[8,128], index: 4, kind: input, shape index: {}]   ;;  %s943_s5 = inlined_call_operand.hbm [shape: f32[2,14], index: 5, kind: input, shape index: {}]   ;;  %s944_s6 = inlined_call_operand.vmem [shape: f32[2,128], index: 6, kind: output, shape index: {}]  }
   0x1   :  { %12 = vsyncpa [#allocation5], 0  ;;  %s754_s21 = smov [#allocation4]   ;;  %s755_s23 = smov [#allocation2]  }
   0x2   :  { %s35_s22 = sshll.u32 %s754_s21, 4  ;;  %s25_s24 = sshll.u32 %s755_s23, 4  ;;  %s36_s22 = int_to_ptr.vmem [resolvable:$true] %s35_s22  ;;  %s26_s24 = int_to_ptr.vmem [resolvable:$true] %s25_s24 }
   0x3   :  { %s684_s27 = scalar_lea.hbm %s942_s4, 128 }
   0x4   :  { %p685_p0 = scmp.ne.s32.totalorder %s942_s4, %s684_s27  ;;  %p688_p1 = scmp.lt.u32.totalorder %s684_s27, %s942_s4 }
   0x6   :  { %p690_p2 = pnand %p688_p1, %p685_p0 }
   0x8   :  { %693 = shalt.err (!%p690_p2)
}
   0x9   :  { %s694_s8 = scalar_lea.vmem %s36_s22, 128  ;;  %p699_p4 = scmp.lt.s32.totalorder %s36_s22, %s36_s22 }
   0xa   :  { %p695_p3 = scmp.ne.s32.totalorder %s36_s22, %s694_s8  ;;  %p700_p5 = scmp.lt.s32.totalorder %s694_s8, %s694_s8 }
   0xc   :  { %p701_p6 = por %p700_p5, %p699_p4 }
   0xe   :  { %p702_p7 = pnand %p701_p6, %p695_p3 }
  0x10   :  { %705 = shalt.err (!%p702_p7)
}
  0x11   :  { %38 = dma.hbm_to_vmem [thread:$0]  %s942_s4, 128, %s36_s22, [#allocation5]  }
  0x12   :  { %s706_s13 = scalar_lea.hbm %s941_s3, 128 }
  0x13   :  { %p707_p8 = scmp.ne.s32.totalorder %s941_s3, %s706_s13  ;;  %p710_p9 = scmp.lt.u32.totalorder %s706_s13, %s941_s3 }
  0x15   :  { %p712_p10 = pnand %p710_p9, %p707_p8 }
  0x17   :  { %715 = shalt.err (!%p712_p10)
}
  0x18   :  { %s716_s18 = scalar_lea.vmem %s26_s24, 128  ;;  %p721_p12 = scmp.lt.s32.totalorder %s26_s24, %s26_s24 }
  0x19   :  { %p717_p11 = scmp.ne.s32.totalorder %s26_s24, %s716_s18  ;;  %p722_p13 = scmp.lt.s32.totalorder %s716_s18, %s716_s18 }
  0x1b   :  { %p723_p0 = por %p722_p13, %p721_p12 }
  0x1d   :  { %p724_p1 = pnand %p723_p0, %p717_p11 }
  0x1f   :  { %727 = shalt.err (!%p724_p1)
}
  0x20   :  { %28 = dma.hbm_to_vmem [thread:$0]  %s941_s3, 128, %s26_s24, [#allocation3]  }
  0x21   :  { %s756_s20 = smov [#allocation6]   ;;  %s728_s25 = scalar_lea.hbm %s943_s5, 32 }
  0x22   :  { %s45_s21 = sshll.u32 %s756_s20, 4  ;;  %p729_p2 = scmp.ne.s32.totalorder %s943_s5, %s728_s25  ;;  %s46_s21 = int_to_ptr.vmem [resolvable:$true] %s45_s21 }
  0x23   :  { %p732_p3 = scmp.lt.u32.totalorder %s728_s25, %s943_s5 }
  0x25   :  { %p734_p4 = pnand %p732_p3, %p729_p2 }
  0x27   :  { %737 = shalt.err (!%p734_p4)
}
  0x28   :  { %s738_s30 = scalar_lea.vmem %s46_s21, 32  ;;  %p743_p6 = scmp.lt.s32.totalorder %s46_s21, %s46_s21 }
  0x29   :  { %p739_p5 = scmp.ne.s32.totalorder %s46_s21, %s738_s30  ;;  %p744_p7 = scmp.lt.s32.totalorder %s738_s30, %s738_s30 }
  0x2b   :  { %p745_p8 = por %p744_p7, %p743_p6 }
  0x2d   :  { %p746_p9 = pnand %p745_p8, %p739_p5 }
  0x2f   :  { %749 = shalt.err (!%p746_p9)
}
  0x30   :  { %48 = dma.hbm_to_vmem [thread:$0]  %s943_s5, 32, %s46_s21, [#allocation5]  }
  0x31   :  { %750 = dma.done.wait [#allocation3], 128  }
  0x32   :  { %751 = vsyncadd [#allocation3], 4294967168 }
  0x33   :  { %752 = dma.done.wait [#allocation5], 160  }
  0x34   :  { %753 = vsyncadd [#allocation5], 4294967136  ;;  %vm61_vm0 = vcmask 64512   ;;  %v60_v0 = vld [vmem:[#allocation4] sm:$0xff]  ;;  %v58_v1 = vld [vmem:[%s938_s0] sm:$0xff]  ;;  %v757_v6 = vmov 0.0  }
  0x35   :  { %v59_v2 = vld [vmem:[%s938_s0 + $0x8] sm:$0x3f]  ;;  %629 = vmatprep.subr.mxu0 %v60_v0  ;;  %631 = vmatprep.mubr.msk.f32.mxu0 %vm61_vm0, %v58_v1  ;;  %v147_v3 = vld [vmem:[#allocation2] sm:$0xff]  ;;  %v758_v7 = vmov 0.0|0.0   ;;  %vm759_vm1 = vmmov 0  }
  0x36   :  { %v145_v4 = vld [vmem:[%s939_s1] sm:$0xff]  ;;  %630 = vmatpush3.msra.mxu0 %v60_v0  ;;  %634 = vmatprep.subr.mxu1 %v147_v3  ;;  %v146_v5 = vld [vmem:[%s939_s1 + $0x8] sm:$0x3f]  ;;  %v760_v39 = vmov 2102212464  }
  0x37   :  { %632 = vmatmul.mubr.msk.f32.vlgmr.msra.gmra.mrb[0].mxu0 %vm61_vm0, %v59_v2  ;;  %635 = vmatpush3.msra.mxu1 %v147_v3  ;;  %v229_v8 = vld [vmem:[%s940_s2] sm:$0x3]  ;;  %v761_v41 = vmov 920167782   ;;  %v762_v45 = vmov 1326507024  }
  0x38   :  { %636 = vmatprep.mubr.msk.f32.mxu1 %vm61_vm0, %v145_v4  ;;  %639 = vmatprep.subr.mxu0 %v757_v6  ;;  %v763_v51 = vmov 683565275   ;;  %v764_v53 = vmov 2475754826   ;;  %v765_v58 = vmov 2131351028  }
  0x39   :  { %637 = vmatmul.mubr.msk.f32.vlgmr.msra.gmra.mrb[0].mxu1 %vm61_vm0, %v146_v5  ;;  %651 = vmatprep.subr.bf16.mxu1 %v758_v7 }
  0x3a   :  { %640 = vmatpush3.msra.mxu0 %v147_v3  ;;  %641 = vmatprep.mubr.msk.f32.mxu0 %vm759_vm1, %v757_v6 }
  0x3b   :  { %648 = vmatprep.mubr.msk.f32.mxu1 %vm759_vm1, %v757_v6  ;;  %642 = vmatmul.mubr.msk.f32.vlgmr.msra.gmra.mrb[2].mxu0 %vm61_vm0, %v229_v8 }
 0x10a   :  { %v633_v9 = vpop.f32.mrb[0].mxu0 }
 0x10b   :  { %v144_v10 = vmul.f32 0.000625, %v633_v9  ;;  %v134_v11 = vpop.f32.mrb[1].mxu0 }
 0x10c   :  { %v143_v12 = vmul.f32 0.000625, %v134_v11  ;;  %v858_v13 = vpop.f32.mrb[0].mxu1 }
 0x10d   :  { %v860_v14 = vmul.f32 6.2831855, %v144_v10  ;;  %v862_v15 = vpop.f32.mrb[1].mxu1 }
 0x10e   :  { %v864_v16 = vmul.f32 6.2831855, %v143_v12 }
 0x10f   :  { %v412_v17 = vand.u32 2139095040, %v860_v14  ;;  %v409_v18 = vand.u32 2147483647, %v860_v14  ;;  %vm411_vm0 = vcmp.lt.s32.totalorder %v860_v14, 0 }
 0x110   :  { %v308_v19 = vand.u32 2139095040, %v864_v16  ;;  %v305_v24 = vand.u32 2147483647, %v864_v16 }
 0x111   :  { %v413_v20 = vshrl.u32 %v412_v17, 23  ;;  %v416_v23 = vand.u32 8388607, %v409_v18  ;;  %vm410_vm1 = vcmp.le.f32.partialorder %v409_v18, 0.7853982 }
 0x112   :  { %v309_v21 = vshrl.u32 %v308_v19, 23  ;;  %v874_v29 = vand.u32 8388607, %v305_v24 }
 0x113   :  { %v612_v22 = vadd.s32 4294967169, %v413_v20  ;;  %v417_v28 = vor.u32 8388608, %v416_v23 }
 0x114   :  { %v608_v25 = vadd.s32 4294967169, %v309_v21  ;;  %v313_v38 = vor.u32 8388608, %v874_v29 }
 0x115   :  { %v419_v26 = vadd.s32 1, %v612_v22  ;;  %v878_v37 = vshll.u32 %v417_v28, 8 }
 0x116   :  { %v315_v27 = vadd.s32 1, %v608_v25 }
 0x117   :  { %vm420_vm2 = vcmp.gt.s32.totalorder %v419_v26, 0 }
 0x118   :  { %v421_v30 = vsel %vm420_vm2, %v419_v26, 0  ;;  %vm316_vm3 = vcmp.gt.s32.totalorder %v315_v27, 0  ;;  %vm307_vm2 = vcmp.lt.s32.totalorder %v864_v16, 0 }
 0x119   :  { %v422_v31 = vshrl.u32 %v421_v30, 5  ;;  %v423_v32 = vand.u32 31, %v421_v30  ;;  %v317_v33 = vsel %vm316_vm3, %v315_v27, 0  ;;  %vm306_vm3 = vcmp.le.f32.partialorder %v305_v24, 0.7853982 }
 0x11a   :  { %v319_v34 = vand.u32 31, %v317_v33  ;;  %v876_v36 = vshrl.u32 %v317_v33, 5 }
 0x11b   :  { %v424_v35 = vsub.s32 32, %v423_v32  ;;  %v435_v40 = vshll.u32 %v760_v39, %v423_v32  ;;  %v438_v42 = vshll.u32 %v761_v41, %v423_v32  ;;  %vm444_vm4 = vcmp.lt.s32.totalorder %v422_v31, 4 }
 0x11c   :  { %v320_v43 = vsub.s32 32, %v319_v34  ;;  %v331_v47 = vshll.u32 %v760_v39, %v319_v34  ;;  %v334_v48 = vshll.u32 %v761_v41, %v319_v34  ;;  %v426_v52 = vshll.u32 %v763_v51, %v423_v32 }
 0x11d   :  { %v436_v44 = vshrl.u32 %v761_v41, %v424_v35  ;;  %v439_v46 = vshrl.u32 %v762_v45, %v424_v35  ;;  %v427_v54 = vshrl.u32 %v764_v53, %v424_v35  ;;  %v429_v57 = vshll.u32 %v764_v53, %v423_v32 }
 0x11e   :  { %v332_v49 = vshrl.u32 %v761_v41, %v320_v43  ;;  %v335_v50 = vshrl.u32 %v762_v45, %v320_v43  ;;  %v430_v59 = vshrl.u32 %v765_v58, %v424_v35  ;;  %vm340_vm5 = vcmp.lt.s32.totalorder %v876_v36, 4 }
 0x11f   :  { %v437_v55 = vor.u32 %v436_v44, %v435_v40  ;;  %v440_v56 = vor.u32 %v439_v46, %v438_v42  ;;  %v428_v60 = vor.u32 %v427_v54, %v426_v52  ;;  %v432_v61 = vshll.u32 %v765_v58, %v423_v32 }
 0x120   :  { %v433_v62 = vshrl.u32 %v760_v39, %v424_v35  ;;  %v425_v1 = vshrl.u32 %v763_v51, %v424_v35  ;;  %v431_v2 = vor.u32 %v430_v59, %v429_v57  ;;  %v333_v3 = vor.u32 %v332_v49, %v331_v47 }
 0x121   :  { %v450_v63 = vsel %vm444_vm4, %v437_v55, 920167782  ;;  %v454_v0 = vsel %vm444_vm4, %v440_v56, 1326507024  ;;  %v336_v4 = vor.u32 %v335_v50, %v334_v48  ;;  %vm441_vm6 = vcmp.lt.s32.totalorder %v422_v31, 1 }
 0x122   :  { %v434_v5 = vor.u32 %v433_v62, %v432_v61  ;;  %vm442_vm7 = vcmp.lt.s32.totalorder %v422_v31, 2  ;;  %vm443_vm8 = vcmp.lt.s32.totalorder %v422_v31, 3  ;;  %v445_v6 = vsel %vm441_vm6, %v425_v1, %v428_v60 }
 0x123   :  { %v449_v7 = vsel %vm441_vm6, %v428_v60, %v431_v2  ;;  %v455_v11 = vsel %vm443_vm8, %v437_v55, %v454_v0  ;;  %v322_v20 = vshll.u32 %v763_v51, %v319_v34  ;;  %v323_v25 = vshrl.u32 %v764_v53, %v320_v43 }
 0x124   :  { %v446_v8 = vsel %vm444_vm4, %v434_v5, 2102212464  ;;  %v451_v9 = vsel %vm443_vm8, %v434_v5, %v450_v63  ;;  %v453_v10 = vsel %vm441_vm6, %v431_v2, %v434_v5  ;;  %v350_v26 = vsel %vm340_vm5, %v336_v4, 1326507024 }
 0x125   :  { %v447_v12 = vsel %vm443_vm8, %v431_v2, %v446_v8  ;;  %v452_v17 = vsel %vm442_vm7, %v449_v7, %v451_v9  ;;  %v456_v19 = vsel %vm442_vm7, %v453_v10, %v455_v11  ;;  %v325_v29 = vshll.u32 %v764_v53, %v319_v34 }
 0x126   :  { %v448_v21 = vsel %vm442_vm7, %v445_v6, %v447_v12  ;;  %v886_v22 = vmul.u32.u64.low %v878_v37, %v456_v19  ;;  %v887_v23 = vmul.u32.u64.high %v878_v37, %v456_v19, %v886_v22  ;;  %v324_v30 = vor.u32 %v323_v25, %v322_v20 }
 0x127   :  { %v892_v27 = vmul.u32.u64.low %v878_v37, %v452_v17  ;;  %v893_v28 = vmul.u32.u64.high %v878_v37, %v452_v17, %v892_v27  ;;  %v326_v31 = vshrl.u32 %v765_v58, %v320_v43  ;;  %v328_v32 = vshll.u32 %v765_v58, %v319_v34 }
 0x128   :  { %v329_v33 = vshrl.u32 %v760_v39, %v320_v43  ;;  %v346_v35 = vsel %vm340_vm5, %v333_v3, 920167782  ;;  %v464_v40 = vmul.u32 %v878_v37, %v448_v21  ;;  %v321_v41 = vshrl.u32 %v763_v51, %v320_v43 }
 0x129   :  { %v353_v42 = vshll.u32 %v313_v38, 8  ;;  %vm466_vm9 = vc.u32 %v887_v23, %v892_v27  ;;  %v327_v44 = vor.u32 %v326_v31, %v325_v29  ;;  %vm339_vm10 = vcmp.lt.s32.totalorder %v876_v36, 3 }
 0x12a   :  { %v330_v45 = vor.u32 %v329_v33, %v328_v32  ;;  %v467_v46 = vadd.s32 1, %v893_v28  ;;  %vm337_vm11 = vcmp.lt.s32.totalorder %v876_v36, 1  ;;  %vm338_vm12 = vcmp.lt.s32.totalorder %v876_v36, 2 }
 0x12b   :  { %v351_v34 = vsel %vm339_vm10, %v333_v3, %v350_v26  ;;  %v345_v47 = vsel %vm337_vm11, %v324_v30, %v327_v44  ;;  %v341_v48 = vsel %vm337_vm11, %v321_v41, %v324_v30  ;;  %v465_v11 = vadd.s32 %v892_v27, %v887_v23 }
 0x12c   :  { %v342_v39 = vsel %vm340_vm5, %v330_v45, 2102212464  ;;  %v347_v37 = vsel %vm339_vm10, %v330_v45, %v346_v35  ;;  %v349_v43 = vsel %vm337_vm11, %v327_v44, %v330_v45  ;;  %v468_v38 = vsel %vm466_vm9, %v467_v46, %v893_v28 }
 0x12d   :  { %v348_v49 = vsel %vm338_vm12, %v345_v47, %v347_v37  ;;  %v352_v50 = vsel %vm338_vm12, %v349_v43, %v351_v34  ;;  %v469_v51 = vadd.s32 %v468_v38, %v464_v40  ;;  %v343_v52 = vsel %vm339_vm10, %v327_v44, %v342_v39 }
 0x12e   :  { %v910_v53 = vmul.u32.u64.low %v353_v42, %v352_v50  ;;  %v911_v54 = vmul.u32.u64.high %v353_v42, %v352_v50, %v910_v53  ;;  %v913_v55 = vmul.u32.u64.low %v353_v42, %v348_v49  ;;  %v914_v56 = vmul.u32.u64.high %v353_v42, %v348_v49, %v913_v55 }
 0x12f   :  { %v470_v57 = vadd.s32 536870912, %v469_v51  ;;  %v344_v58 = vsel %vm338_vm12, %v341_v48, %v343_v52  ;;  %vm501_vm7 = vweird.f32 %v860_v14  ;;  %vm520_vm11 = vcmask 1045504  }
 0x130   :  { %vm362_vm13 = vc.u32 %v911_v54, %v913_v55  ;;  %v363_v60 = vadd.s32 1, %v914_v56  ;;  %v360_v62 = vmul.u32 %v353_v42, %v344_v58  ;;  %v361_v35 = vadd.s32 %v913_v55, %v911_v54 }
 0x131   :  { %v471_v59 = vshrl.u32 %v470_v57, 30  ;;  %vm397_vm12 = vweird.f32 %v864_v16 }
 0x132   :  { %v364_v63 = vsel %vm362_vm13, %v363_v60, %v914_v56  ;;  %vm766_vm13 = vmmov 1  }
 0x133   :  { %v472_v61 = vshll.u32 %v471_v59, 30  ;;  %v365_v1 = vadd.s32 %v364_v63, %v360_v62  ;;  %v495_v46 = vsub.s32 4, %v471_v59 }
 0x135   :  { %v473_v0 = vsub.s32 %v469_v51, %v472_v61  ;;  %v366_v3 = vadd.s32 536870912, %v365_v1  ;;  %v496_v38 = vsel %vm411_vm0, %v495_v46, %v471_v59 }
 0x136   :  { %v498_v50 = vsel %vm410_vm1, 0, %v496_v38 }
 0x137   :  { %v475_v2 = vsub.s32 0, %v473_v0  ;;  %v367_v5 = vshrl.u32 %v366_v3, 30  ;;  %v502_v54 = vadd.s32 3, %v498_v50 }
 0x139   :  { %v613_v4 = vmin.u32 %v475_v2, %v473_v0  ;;  %v368_v7 = vshll.u32 %v367_v5, 30  ;;  %v391_v52 = vsub.s32 4, %v367_v5  ;;  %v503_v58 = vand.u32 3, %v502_v54 }
 0x13b   :  { %v477_v6 = vclz %v613_v4  ;;  %v369_v36 = vsub.s32 %v365_v1, %v368_v7  ;;  %v392_v55 = vsel %vm307_vm2, %v391_v52, %v367_v5  ;;  %vm505_vm4 = vcmp.eq.s32.totalorder %v503_v58, 0 }
 0x13c   :  { %v394_v59 = vsel %vm306_vm3, 0, %v392_v55  ;;  %vm508_vm5 = vcmp.eq.s32.totalorder %v503_v58, 2  ;;  %vm504_vm6 = vcmp.lt.s32.totalorder %v503_v58, 2 }
 0x13d   :  { %v614_v8 = vadd.s32 4294967294, %v477_v6  ;;  %v371_v10 = vsub.s32 0, %v369_v36  ;;  %v398_v63 = vadd.s32 3, %v394_v59 }
 0x13f   :  { %vm615_vm14 = vcmp.lt.s32.totalorder %v614_v8, 0  ;;  %v609_v19 = vmin.u32 %v371_v10, %v369_v36  ;;  %v399_v2 = vand.u32 3, %v398_v63 }
 0x140   :  { %v480_v9 = vsel %vm615_vm14, 0, %v614_v8  ;;  %vm653_vm14 = vmpackc.low %vm520_vm11, %vm766_vm13 }
 0x141   :  { %v481_v12 = vsub.s32 32, %v480_v9  ;;  %v485_v17 = vsub.s32 4294967266, %v480_v9  ;;  %v482_v20 = vshll.u32 %v473_v0, %v480_v9  ;;  %v373_v25 = vclz %v609_v19  ;;  %v299_v19 = vpop.f32.mrb[2].mxu0 }
 0x142   :  { %vm404_vm8 = vcmp.eq.s32.totalorder %v399_v2, 2  ;;  %vm401_vm9 = vcmp.eq.s32.totalorder %v399_v2, 0  ;;  %vm400_vm10 = vcmp.lt.s32.totalorder %v399_v2, 2 }
 0x143   :  { %v483_v21 = vshrl.u32 %v465_v11, %v481_v12  ;;  %v486_v22 = vadd.s32 127, %v485_v17  ;;  %v610_v29 = vadd.s32 4294967294, %v373_v25  ;;  %v515_v17 = vld [vmem:[#allocation6] sm:$0x3] }
 0x145   :  { %v484_v26 = vor.u32 %v483_v21, %v482_v20  ;;  %v487_v28 = vshll.u32 %v486_v22, 23  ;;  %vm611_vm15 = vcmp.lt.s32.totalorder %v610_v29, 0  ;;  %v643_v20 = vpop.f32.mrb[3].mxu0 }
 0x146   :  { %v376_v33 = vsel %vm611_vm15, 0, %v610_v29  ;;  %vm516_vm15 = vcmask 113664  }
 0x147   :  { %v488_v30 = vor.u32 4788187, %v487_v28  ;;  %v491_v32 = vcvt.s32.f32 %v484_v26  ;;  %v377_v40 = vsub.s32 32, %v376_v33  ;;  %v381_v41 = vsub.s32 4294967266, %v376_v33 }
 0x148   :  { %v378_v27 = vshll.u32 %v369_v36, %v376_v33 }
 0x149   :  { %v489_v31 = vand.u32 2147483647, %v488_v30  ;;  %v379_v42 = vshrl.u32 %v361_v35, %v377_v40  ;;  %v382_v44 = vadd.s32 127, %v381_v41 }
 0x14b   :  { %v492_v23 = vmul.f32 %v491_v32, %v489_v31  ;;  %v380_v34 = vor.u32 %v379_v42, %v378_v27  ;;  %v383_v39 = vshll.u32 %v382_v44, 23 }
 0x14d   :  { %v493_v45 = vxor.u32 2147483648, %v492_v23  ;;  %v384_v43 = vor.u32 4788187, %v383_v39  ;;  %v387_v49 = vcvt.s32.f32 %v380_v34 }
 0x14f   :  { %v494_v47 = vsel %vm411_vm0, %v493_v45, %v492_v23  ;;  %v385_v48 = vand.u32 2147483647, %v384_v43 }
 0x150   :  { %v497_v37 = vsel %vm410_vm1, %v860_v14, %v494_v47 }
 0x151   :  { %676 = vcosq.f32 %v497_v37  ;;  %v388_v51 = vmul.f32 %v387_v49, %v385_v48 }
 0x152   :  { %678 = vsinq.f32 %v497_v37 }
 0x153   :  { %v389_v53 = vxor.u32 2147483648, %v388_v51 }
 0x155   :  { %v390_v18 = vsel %vm307_vm2, %v389_v53, %v388_v51 }
 0x156   :  { %v393_v56 = vsel %vm306_vm3, %v864_v16, %v390_v18 }
 0x157   :  { %680 = vcosq.f32 %v393_v56 }
 0x158   :  { %682 = vsinq.f32 %v393_v56 }
 0x15b   :  { %v677_v57 = vpop.eup %676 }
 0x15c   :  { %v679_v60 = vpop.eup %678  ;;  %v509_v61 = vxor.u32 2147483648, %v677_v57 }
 0x15d   :  { %v506_v62 = vxor.u32 2147483648, %v679_v60 }
 0x15e   :  { %v510_v1 = vsel %vm508_vm5, %v509_v61, %v679_v60 }
 0x15f   :  { %v507_v0 = vsel %vm505_vm4, %v677_v57, %v506_v62 }
 0x160   :  { %v511_v24 = vsel %vm504_vm6, %v507_v0, %v510_v1 }
 0x161   :  { %v681_v3 = vpop.eup %680  ;;  %v512_v6 = vsel %vm501_vm7, nan, %v511_v24 }
 0x162   :  { %v683_v4 = vpop.eup %682  ;;  %v405_v5 = vxor.u32 2147483648, %v681_v3  ;;  %v514_v9 = vmul.f32 %v858_v13, %v512_v6 }
 0x163   :  { %v402_v7 = vxor.u32 2147483648, %v683_v4 }
 0x164   :  { %v406_v8 = vsel %vm404_vm8, %v405_v5, %v683_v4 }
 0x165   :  { %v403_v36 = vsel %vm401_vm9, %v681_v3, %v402_v7 }
 0x166   :  { %v407_v10 = vsel %vm400_vm10, %v403_v36, %v406_v8 }
 0x167   :  { %v408_v11 = vsel %vm397_vm12, nan, %v407_v10 }
 0x168   :  { %v513_v12 = vmul.f32 %v408_v11, %v862_v15 }
 0x16a   :  { %v652_v14 = vpack.c.bf16 %v514_v9, %v513_v12 }
 0x16c   :  { %654 = vmatpush3.bf16.msk.msra.mxu1 %vm653_vm14, %v652_v14 }
 0x16f   :  { %649 = vmatmul.mubr.msk.f32.vlgmr.msra.gmra.mrb[2].mxu1 %vm516_vm15, %v515_v17 }
 0x242   :  { %v590_v21 = vpop.f32.mrb[2].mxu1 }
 0x243   :  { %v594_v22 = vmul.f32 %v590_v21, %v299_v19  ;;  %v650_v25 = vpop.f32.mrb[3].mxu1 }
 0x245   :  { %v595_v26 = vmul.f32 0.02, %v594_v22 }
 0x247   :  { %596 = vst [vmem:[%s944_s6] sm:$0x3] %v595_v26 }
 0x248   :  { %601 = vsyncpa [#allocation3], 1 }
 0x249   :  { %602 = vsyncpa [#allocation5], 1 }

// kernel: _lambda_.11
= control target key start
LH: loop header
LB: loop body
LE: loop exit
PB: predicated region body
PF: predicated region fallthrough
CT: control target
= control target key end

     0   :  { %s1150_s9 = smov 0   ;;  %s1152_s10 = smov 0   ;;  %s1605_s0 = inlined_call_operand.vmem [shape: f32[2,128], index: 0, kind: input, shape index: {}]   ;;  %s1606_s1 = inlined_call_operand.vmem [shape: f32[128,5120], index: 1, kind: input, shape index: {}]   ;;  %s1607_s2 = inlined_call_operand.vmem [shape: f32[2,5120], index: 2, kind: output, shape index: {}]  }
   0x1   :  { %s1154_s11 = smov 0  }
   0x2 LB: > { %s941_s12 = sadd.s32 4294967295, %s1131_s11   ;;  %s1167_s13 = sadd.s32 1, %s1131_s11   ;;  %s1131_s11 = sphi %s1154_s11, %s1610_s11   ;;  %s1127_s10 = sphi %s1152_s10, %s1609_s10   ;;  %s1123_s9 = sphi %s1150_s9, %s1608_s9  }
   0x3   : > { %s37_s14 = ssub.s32 %s1131_s11, %s1167_s13  ;;  %s40_s15 = sadd.s32 1, %s1127_s10 }
   0x4   : > { %p38_p0 = scmp.eq.s32.totalorder %s37_s14, 0  ;;  %p47_p1 = scmp.ne.s32.totalorder %s1127_s10, %s1123_s9 }
   0x5   : > { %p48_p2 = scmp.eq.s32.totalorder %s1131_s11, 0  ;;  %p944_p4 = scmp.ge.s32.totalorder %s1131_s11, 5 }
   0x6   : > { %s1176_s16 = scalar_select %p38_p0, %s1127_s10, %s40_s15  }
   0x7   : > { %p49_p3 = por %p48_p2, %p47_p1  ;;  %102 = sbr.rel (%p944_p4) target bundleno = 82 (0x52), region = 20 }
   0xe   : > { %105 = sbr.rel (!%p49_p3) target bundleno = 82 (0x52), region = 24  ;;  %s107_s17 = sand.u32 (%p49_p3), 1, %s1127_s10  }
   0xf   : > { %s954_s18 = sshll.u32 (%p49_p3), %s1131_s11, 6  ;;  %s945_s19 = sshll.u32 (%p49_p3), %s107_s17, 10 }
  0x10   : > { %s1184_s22 = scalar_lea.vmem (%p49_p3), %s1606_s1, %s954_s18  ;;  %s1189_s23 = scalar_lea.vmem (%p49_p3), [#allocation2], %s945_s19 }
  0x11   : > { %v125_v0 = vld [vmem:[%s1184_s22] sm:$0xff] (%p49_p3)  ;;  %v127_v1 = vld [vmem:[%s1184_s22 + $0x8] sm:$0xff] (%p49_p3)  ;;  %v129_v2 = vld [vmem:[%s1184_s22 + $0x10] sm:$0xff] (%p49_p3) }
  0x12   : > { %126 = vst [vmem:[%s1189_s23] sm:$0xff] (%p49_p3), %v125_v0  ;;  %128 = vst [vmem:[%s1189_s23 + $0x8] sm:$0xff] (%p49_p3), %v127_v1  ;;  %v131_v3 = vld [vmem:[%s1184_s22 + $0x18] sm:$0xff] (%p49_p3)  ;;  %v133_v4 = vld [vmem:[%s1184_s22 + $0x20] sm:$0xff] (%p49_p3) }
  0x13   : > { %130 = vst [vmem:[%s1189_s23 + $0x10] sm:$0xff] (%p49_p3), %v129_v2  ;;  %v135_v5 = vld [vmem:[%s1184_s22 + $0x28] sm:$0xff] (%p49_p3)  ;;  %132 = vst [vmem:[%s1189_s23 + $0x18] sm:$0xff] (%p49_p3), %v131_v3  ;;  %v137_v6 = vld [vmem:[%s1184_s22 + $0x30] sm:$0xff] (%p49_p3) }
  0x14   : > { %134 = vst [vmem:[%s1189_s23 + $0x20] sm:$0xff] (%p49_p3), %v133_v4  ;;  %136 = vst [vmem:[%s1189_s23 + $0x28] sm:$0xff] (%p49_p3), %v135_v5  ;;  %v139_v7 = vld [vmem:[%s1184_s22 + $0x38] sm:$0xff] (%p49_p3)  ;;  %v141_v8 = vld [vmem:[%s1184_s22 + $0x140] sm:$0xff] (%p49_p3) }
  0x15   : > { %138 = vst [vmem:[%s1189_s23 + $0x30] sm:$0xff] %v137_v6  ;;  %140 = vst [vmem:[%s1189_s23 + $0x38] sm:$0xff] %v139_v7  ;;  %v143_v9 = vld [vmem:[%s1184_s22 + $0x148] sm:$0xff]  ;;  %v145_v10 = vld [vmem:[%s1184_s22 + $0x150] sm:$0xff] }
  0x16   : > { %142 = vst [vmem:[%s1189_s23 + $0x40] sm:$0xff] %v141_v8  ;;  %v147_v11 = vld [vmem:[%s1184_s22 + $0x158] sm:$0xff]  ;;  %144 = vst [vmem:[%s1189_s23 + $0x48] sm:$0xff] %v143_v9  ;;  %v149_v12 = vld [vmem:[%s1184_s22 + $0x160] sm:$0xff] }
  0x17   : > { %146 = vst [vmem:[%s1189_s23 + $0x50] sm:$0xff] %v145_v10  ;;  %148 = vst [vmem:[%s1189_s23 + $0x58] sm:$0xff] %v147_v11  ;;  %v151_v13 = vld [vmem:[%s1184_s22 + $0x168] sm:$0xff]  ;;  %v153_v14 = vld [vmem:[%s1184_s22 + $0x170] sm:$0xff] }
  0x18   : > { %150 = vst [vmem:[%s1189_s23 + $0x60] sm:$0xff] %v149_v12  ;;  %152 = vst [vmem:[%s1189_s23 + $0x68] sm:$0xff] %v151_v13  ;;  %v155_v15 = vld [vmem:[%s1184_s22 + $0x178] sm:$0xff]  ;;  %v157_v16 = vld [vmem:[%s1184_s22 + $0x280] sm:$0xff] }
  0x19   : > { %154 = vst [vmem:[%s1189_s23 + $0x70] sm:$0xff] %v153_v14  ;;  %v159_v17 = vld [vmem:[%s1184_s22 + $0x288] sm:$0xff]  ;;  %156 = vst [vmem:[%s1189_s23 + $0x78] sm:$0xff] %v155_v15  ;;  %v161_v18 = vld [vmem:[%s1184_s22 + $0x290] sm:$0xff] }
  0x1a   : > { %158 = vst [vmem:[%s1189_s23 + $0x80] sm:$0xff] %v157_v16  ;;  %160 = vst [vmem:[%s1189_s23 + $0x88] sm:$0xff] %v159_v17  ;;  %v163_v19 = vld [vmem:[%s1184_s22 + $0x298] sm:$0xff]  ;;  %v165_v20 = vld [vmem:[%s1184_s22 + $0x2a0] sm:$0xff] }
  0x1b   : > { %162 = vst [vmem:[%s1189_s23 + $0x90] sm:$0xff] %v161_v18  ;;  %164 = vst [vmem:[%s1189_s23 + $0x98] sm:$0xff] %v163_v19  ;;  %v167_v21 = vld [vmem:[%s1184_s22 + $0x2a8] sm:$0xff]  ;;  %v169_v22 = vld [vmem:[%s1184_s22 + $0x2b0] sm:$0xff] }
  0x1c   : > { %166 = vst [vmem:[%s1189_s23 + $0xa0] sm:$0xff] %v165_v20  ;;  %v171_v23 = vld [vmem:[%s1184_s22 + $0x2b8] sm:$0xff]  ;;  %168 = vst [vmem:[%s1189_s23 + $0xa8] sm:$0xff] %v167_v21  ;;  %v173_v24 = vld [vmem:[%s1184_s22 + $0x3c0] sm:$0xff] }
  0x1d   : > { %170 = vst [vmem:[%s1189_s23 + $0xb0] sm:$0xff] %v169_v22  ;;  %172 = vst [vmem:[%s1189_s23 + $0xb8] sm:$0xff] %v171_v23  ;;  %v175_v25 = vld [vmem:[%s1184_s22 + $0x3c8] sm:$0xff]  ;;  %v177_v26 = vld [vmem:[%s1184_s22 + $0x3d0] sm:$0xff] }
  0x1e   : > { %174 = vst [vmem:[%s1189_s23 + $0xc0] sm:$0xff] %v173_v24  ;;  %176 = vst [vmem:[%s1189_s23 + $0xc8] sm:$0xff] %v175_v25  ;;  %v179_v27 = vld [vmem:[%s1184_s22 + $0x3d8] sm:$0xff]  ;;  %v181_v28 = vld [vmem:[%s1184_s22 + $0x3e0] sm:$0xff] }
  0x1f   : > { %178 = vst [vmem:[%s1189_s23 + $0xd0] sm:$0xff] %v177_v26  ;;  %v183_v29 = vld [vmem:[%s1184_s22 + $0x3e8] sm:$0xff]  ;;  %180 = vst [vmem:[%s1189_s23 + $0xd8] sm:$0xff] %v179_v27  ;;  %v185_v30 = vld [vmem:[%s1184_s22 + $0x3f0] sm:$0xff] }
  0x20   : > { %182 = vst [vmem:[%s1189_s23 + $0xe0] sm:$0xff] %v181_v28  ;;  %184 = vst [vmem:[%s1189_s23 + $0xe8] sm:$0xff] %v183_v29  ;;  %v187_v31 = vld [vmem:[%s1184_s22 + $0x3f8] sm:$0xff]  ;;  %v189_v32 = vld [vmem:[%s1184_s22 + $0x500] sm:$0xff] }
  0x21   : > { %186 = vst [vmem:[%s1189_s23 + $0xf0] sm:$0xff] %v185_v30  ;;  %188 = vst [vmem:[%s1189_s23 + $0xf8] sm:$0xff] %v187_v31  ;;  %v191_v33 = vld [vmem:[%s1184_s22 + $0x508] sm:$0xff]  ;;  %v193_v34 = vld [vmem:[%s1184_s22 + $0x510] sm:$0xff] }
  0x22   : > { %190 = vst [vmem:[%s1189_s23 + $0x100] sm:$0xff] %v189_v32  ;;  %v195_v35 = vld [vmem:[%s1184_s22 + $0x518] sm:$0xff]  ;;  %192 = vst [vmem:[%s1189_s23 + $0x108] sm:$0xff] %v191_v33  ;;  %v197_v36 = vld [vmem:[%s1184_s22 + $0x520] sm:$0xff] }
  0x23   : > { %194 = vst [vmem:[%s1189_s23 + $0x110] sm:$0xff] %v193_v34  ;;  %196 = vst [vmem:[%s1189_s23 + $0x118] sm:$0xff] %v195_v35  ;;  %v199_v37 = vld [vmem:[%s1184_s22 + $0x528] sm:$0xff]  ;;  %v201_v38 = vld [vmem:[%s1184_s22 + $0x530] sm:$0xff] }
  0x24   : > { %198 = vst [vmem:[%s1189_s23 + $0x120] sm:$0xff] %v197_v36  ;;  %200 = vst [vmem:[%s1189_s23 + $0x128] sm:$0xff] %v199_v37  ;;  %v203_v39 = vld [vmem:[%s1184_s22 + $0x538] sm:$0xff]  ;;  %v205_v40 = vld [vmem:[%s1184_s22 + $0x640] sm:$0xff] }
  0x25   : > { %202 = vst [vmem:[%s1189_s23 + $0x130] sm:$0xff] %v201_v38  ;;  %v207_v41 = vld [vmem:[%s1184_s22 + $0x648] sm:$0xff]  ;;  %204 = vst [vmem:[%s1189_s23 + $0x138] sm:$0xff] %v203_v39  ;;  %v209_v42 = vld [vmem:[%s1184_s22 + $0x650] sm:$0xff] }
  0x26   : > { %206 = vst [vmem:[%s1189_s23 + $0x140] sm:$0xff] %v205_v40  ;;  %208 = vst [vmem:[%s1189_s23 + $0x148] sm:$0xff] %v207_v41  ;;  %v211_v43 = vld [vmem:[%s1184_s22 + $0x658] sm:$0xff]  ;;  %v213_v44 = vld [vmem:[%s1184_s22 + $0x660] sm:$0xff] }
  0x27   : > { %210 = vst [vmem:[%s1189_s23 + $0x150] sm:$0xff] %v209_v42  ;;  %212 = vst [vmem:[%s1189_s23 + $0x158] sm:$0xff] %v211_v43  ;;  %v215_v45 = vld [vmem:[%s1184_s22 + $0x668] sm:$0xff]  ;;  %v217_v46 = vld [vmem:[%s1184_s22 + $0x670] sm:$0xff] }
  0x28   : > { %214 = vst [vmem:[%s1189_s23 + $0x160] sm:$0xff] %v213_v44  ;;  %v219_v47 = vld [vmem:[%s1184_s22 + $0x678] sm:$0xff]  ;;  %216 = vst [vmem:[%s1189_s23 + $0x168] sm:$0xff] %v215_v45  ;;  %v221_v48 = vld [vmem:[%s1184_s22 + $0x780] sm:$0xff] }
  0x29   : > { %218 = vst [vmem:[%s1189_s23 + $0x170] sm:$0xff] %v217_v46  ;;  %220 = vst [vmem:[%s1189_s23 + $0x178] sm:$0xff] %v219_v47  ;;  %v223_v49 = vld [vmem:[%s1184_s22 + $0x788] sm:$0xff]  ;;  %v225_v50 = vld [vmem:[%s1184_s22 + $0x790] sm:$0xff] }
  0x2a   : > { %222 = vst [vmem:[%s1189_s23 + $0x180] sm:$0xff] %v221_v48  ;;  %224 = vst [vmem:[%s1189_s23 + $0x188] sm:$0xff] %v223_v49  ;;  %v227_v51 = vld [vmem:[%s1184_s22 + $0x798] sm:$0xff]  ;;  %v229_v52 = vld [vmem:[%s1184_s22 + $0x7a0] sm:$0xff] }
  0x2b   : > { %226 = vst [vmem:[%s1189_s23 + $0x190] sm:$0xff] %v225_v50  ;;  %v231_v53 = vld [vmem:[%s1184_s22 + $0x7a8] sm:$0xff]  ;;  %228 = vst [vmem:[%s1189_s23 + $0x198] sm:$0xff] %v227_v51  ;;  %v233_v54 = vld [vmem:[%s1184_s22 + $0x7b0] sm:$0xff] }
  0x2c   : > { %230 = vst [vmem:[%s1189_s23 + $0x1a0] sm:$0xff] %v229_v52  ;;  %232 = vst [vmem:[%s1189_s23 + $0x1a8] sm:$0xff] %v231_v53  ;;  %v235_v55 = vld [vmem:[%s1184_s22 + $0x7b8] sm:$0xff]  ;;  %v237_v56 = vld [vmem:[%s1184_s22 + $0x8c0] sm:$0xff] }
  0x2d   : > { %234 = vst [vmem:[%s1189_s23 + $0x1b0] sm:$0xff] %v233_v54  ;;  %236 = vst [vmem:[%s1189_s23 + $0x1b8] sm:$0xff] %v235_v55  ;;  %v239_v57 = vld [vmem:[%s1184_s22 + $0x8c8] sm:$0xff]  ;;  %v241_v58 = vld [vmem:[%s1184_s22 + $0x8d0] sm:$0xff] }
  0x2e   : > { %238 = vst [vmem:[%s1189_s23 + $0x1c0] sm:$0xff] %v237_v56  ;;  %v243_v59 = vld [vmem:[%s1184_s22 + $0x8d8] sm:$0xff]  ;;  %240 = vst [vmem:[%s1189_s23 + $0x1c8] sm:$0xff] %v239_v57  ;;  %v245_v60 = vld [vmem:[%s1184_s22 + $0x8e0] sm:$0xff] }
  0x2f   : > { %242 = vst [vmem:[%s1189_s23 + $0x1d0] sm:$0xff] %v241_v58  ;;  %244 = vst [vmem:[%s1189_s23 + $0x1d8] sm:$0xff] %v243_v59  ;;  %v247_v61 = vld [vmem:[%s1184_s22 + $0x8e8] sm:$0xff]  ;;  %v249_v62 = vld [vmem:[%s1184_s22 + $0x8f0] sm:$0xff] }
  0x30   : > { %246 = vst [vmem:[%s1189_s23 + $0x1e0] sm:$0xff] %v245_v60  ;;  %248 = vst [vmem:[%s1189_s23 + $0x1e8] sm:$0xff] %v247_v61  ;;  %v251_v63 = vld [vmem:[%s1184_s22 + $0x8f8] sm:$0xff]  ;;  %v253_v0 = vld [vmem:[%s1184_s22 + $0xa00] sm:$0xff] }
  0x31   : > { %250 = vst [vmem:[%s1189_s23 + $0x1f0] sm:$0xff] %v249_v62  ;;  %v255_v1 = vld [vmem:[%s1184_s22 + $0xa08] sm:$0xff]  ;;  %252 = vst [vmem:[%s1189_s23 + $0x1f8] sm:$0xff] %v251_v63  ;;  %v257_v2 = vld [vmem:[%s1184_s22 + $0xa10] sm:$0xff] }
  0x32   : > { %254 = vst [vmem:[%s1189_s23 + $0x200] sm:$0xff] %v253_v0  ;;  %256 = vst [vmem:[%s1189_s23 + $0x208] sm:$0xff] %v255_v1  ;;  %v259_v3 = vld [vmem:[%s1184_s22 + $0xa18] sm:$0xff]  ;;  %v261_v4 = vld [vmem:[%s1184_s22 + $0xa20] sm:$0xff] }
  0x33   : > { %258 = vst [vmem:[%s1189_s23 + $0x210] sm:$0xff] %v257_v2  ;;  %260 = vst [vmem:[%s1189_s23 + $0x218] sm:$0xff] %v259_v3  ;;  %v263_v5 = vld [vmem:[%s1184_s22 + $0xa28] sm:$0xff]  ;;  %v265_v6 = vld [vmem:[%s1184_s22 + $0xa30] sm:$0xff] }
  0x34   : > { %262 = vst [vmem:[%s1189_s23 + $0x220] sm:$0xff] %v261_v4  ;;  %v267_v7 = vld [vmem:[%s1184_s22 + $0xa38] sm:$0xff]  ;;  %264 = vst [vmem:[%s1189_s23 + $0x228] sm:$0xff] %v263_v5  ;;  %v269_v8 = vld [vmem:[%s1184_s22 + $0xb40] sm:$0xff] }
  0x35   : > { %266 = vst [vmem:[%s1189_s23 + $0x230] sm:$0xff] %v265_v6  ;;  %268 = vst [vmem:[%s1189_s23 + $0x238] sm:$0xff] %v267_v7  ;;  %v271_v9 = vld [vmem:[%s1184_s22 + $0xb48] sm:$0xff]  ;;  %v273_v10 = vld [vmem:[%s1184_s22 + $0xb50] sm:$0xff] }
  0x36   : > { %270 = vst [vmem:[%s1189_s23 + $0x240] sm:$0xff] %v269_v8  ;;  %272 = vst [vmem:[%s1189_s23 + $0x248] sm:$0xff] %v271_v9  ;;  %v275_v11 = vld [vmem:[%s1184_s22 + $0xb58] sm:$0xff]  ;;  %v277_v12 = vld [vmem:[%s1184_s22 + $0xb60] sm:$0xff] }
  0x37   : > { %274 = vst [vmem:[%s1189_s23 + $0x250] sm:$0xff] %v273_v10  ;;  %v279_v13 = vld [vmem:[%s1184_s22 + $0xb68] sm:$0xff]  ;;  %276 = vst [vmem:[%s1189_s23 + $0x258] sm:$0xff] %v275_v11  ;;  %v281_v14 = vld [vmem:[%s1184_s22 + $0xb70] sm:$0xff] }
  0x38   : > { %278 = vst [vmem:[%s1189_s23 + $0x260] sm:$0xff] %v277_v12  ;;  %280 = vst [vmem:[%s1189_s23 + $0x268] sm:$0xff] %v279_v13  ;;  %v283_v15 = vld [vmem:[%s1184_s22 + $0xb78] sm:$0xff]  ;;  %v285_v16 = vld [vmem:[%s1184_s22 + $0xc80] sm:$0xff] }
  0x39   : > { %282 = vst [vmem:[%s1189_s23 + $0x270] sm:$0xff] %v281_v14  ;;  %284 = vst [vmem:[%s1189_s23 + $0x278] sm:$0xff] %v283_v15  ;;  %v287_v17 = vld [vmem:[%s1184_s22 + $0xc88] sm:$0xff]  ;;  %v289_v18 = vld [vmem:[%s1184_s22 + $0xc90] sm:$0xff] }
  0x3a   : > { %286 = vst [vmem:[%s1189_s23 + $0x280] sm:$0xff] %v285_v16  ;;  %v291_v19 = vld [vmem:[%s1184_s22 + $0xc98] sm:$0xff]  ;;  %288 = vst [vmem:[%s1189_s23 + $0x288] sm:$0xff] %v287_v17  ;;  %v293_v20 = vld [vmem:[%s1184_s22 + $0xca0] sm:$0xff] }
  0x3b   : > { %290 = vst [vmem:[%s1189_s23 + $0x290] sm:$0xff] %v289_v18  ;;  %292 = vst [vmem:[%s1189_s23 + $0x298] sm:$0xff] %v291_v19  ;;  %v295_v21 = vld [vmem:[%s1184_s22 + $0xca8] sm:$0xff]  ;;  %v297_v22 = vld [vmem:[%s1184_s22 + $0xcb0] sm:$0xff] }
  0x3c   : > { %294 = vst [vmem:[%s1189_s23 + $0x2a0] sm:$0xff] %v293_v20  ;;  %296 = vst [vmem:[%s1189_s23 + $0x2a8] sm:$0xff] %v295_v21  ;;  %v299_v23 = vld [vmem:[%s1184_s22 + $0xcb8] sm:$0xff]  ;;  %v301_v24 = vld [vmem:[%s1184_s22 + $0xdc0] sm:$0xff] }
  0x3d   : > { %298 = vst [vmem:[%s1189_s23 + $0x2b0] sm:$0xff] %v297_v22  ;;  %v303_v25 = vld [vmem:[%s1184_s22 + $0xdc8] sm:$0xff]  ;;  %300 = vst [vmem:[%s1189_s23 + $0x2b8] sm:$0xff] %v299_v23  ;;  %v305_v26 = vld [vmem:[%s1184_s22 + $0xdd0] sm:$0xff] }
  0x3e   : > { %302 = vst [vmem:[%s1189_s23 + $0x2c0] sm:$0xff] %v301_v24  ;;  %304 = vst [vmem:[%s1189_s23 + $0x2c8] sm:$0xff] %v303_v25  ;;  %v307_v27 = vld [vmem:[%s1184_s22 + $0xdd8] sm:$0xff]  ;;  %v309_v28 = vld [vmem:[%s1184_s22 + $0xde0] sm:$0xff] }
  0x3f   : > { %306 = vst [vmem:[%s1189_s23 + $0x2d0] sm:$0xff] %v305_v26  ;;  %308 = vst [vmem:[%s1189_s23 + $0x2d8] sm:$0xff] %v307_v27  ;;  %v311_v29 = vld [vmem:[%s1184_s22 + $0xde8] sm:$0xff]  ;;  %v313_v30 = vld [vmem:[%s1184_s22 + $0xdf0] sm:$0xff] }
  0x40   : > { %310 = vst [vmem:[%s1189_s23 + $0x2e0] sm:$0xff] %v309_v28  ;;  %v315_v31 = vld [vmem:[%s1184_s22 + $0xdf8] sm:$0xff]  ;;  %312 = vst [vmem:[%s1189_s23 + $0x2e8] sm:$0xff] %v311_v29  ;;  %v317_v32 = vld [vmem:[%s1184_s22 + $0xf00] sm:$0xff] }
  0x41   : > { %314 = vst [vmem:[%s1189_s23 + $0x2f0] sm:$0xff] %v313_v30  ;;  %316 = vst [vmem:[%s1189_s23 + $0x2f8] sm:$0xff] %v315_v31  ;;  %v319_v33 = vld [vmem:[%s1184_s22 + $0xf08] sm:$0xff]  ;;  %v321_v34 = vld [vmem:[%s1184_s22 + $0xf10] sm:$0xff] }
  0x42   : > { %318 = vst [vmem:[%s1189_s23 + $0x300] sm:$0xff] %v317_v32  ;;  %320 = vst [vmem:[%s1189_s23 + $0x308] sm:$0xff] %v319_v33  ;;  %v323_v35 = vld [vmem:[%s1184_s22 + $0xf18] sm:$0xff]  ;;  %v325_v36 = vld [vmem:[%s1184_s22 + $0xf20] sm:$0xff] }
  0x43   : > { %322 = vst [vmem:[%s1189_s23 + $0x310] sm:$0xff] %v321_v34  ;;  %v327_v37 = vld [vmem:[%s1184_s22 + $0xf28] sm:$0xff]  ;;  %324 = vst [vmem:[%s1189_s23 + $0x318] sm:$0xff] %v323_v35  ;;  %v329_v38 = vld [vmem:[%s1184_s22 + $0xf30] sm:$0xff] }
  0x44   : > { %326 = vst [vmem:[%s1189_s23 + $0x320] sm:$0xff] %v325_v36  ;;  %328 = vst [vmem:[%s1189_s23 + $0x328] sm:$0xff] %v327_v37  ;;  %v331_v39 = vld [vmem:[%s1184_s22 + $0xf38] sm:$0xff]  ;;  %v333_v40 = vld [vmem:[%s1184_s22 + $0x1040] sm:$0xff] }
  0x45   : > { %330 = vst [vmem:[%s1189_s23 + $0x330] sm:$0xff] %v329_v38  ;;  %332 = vst [vmem:[%s1189_s23 + $0x338] sm:$0xff] %v331_v39  ;;  %v335_v41 = vld [vmem:[%s1184_s22 + $0x1048] sm:$0xff]  ;;  %v337_v42 = vld [vmem:[%s1184_s22 + $0x1050] sm:$0xff] }
  0x46   : > { %334 = vst [vmem:[%s1189_s23 + $0x340] sm:$0xff] %v333_v40  ;;  %v339_v43 = vld [vmem:[%s1184_s22 + $0x1058] sm:$0xff]  ;;  %336 = vst [vmem:[%s1189_s23 + $0x348] sm:$0xff] %v335_v41  ;;  %v341_v44 = vld [vmem:[%s1184_s22 + $0x1060] sm:$0xff] }
  0x47   : > { %338 = vst [vmem:[%s1189_s23 + $0x350] sm:$0xff] %v337_v42  ;;  %340 = vst [vmem:[%s1189_s23 + $0x358] sm:$0xff] %v339_v43  ;;  %v343_v45 = vld [vmem:[%s1184_s22 + $0x1068] sm:$0xff]  ;;  %v345_v46 = vld [vmem:[%s1184_s22 + $0x1070] sm:$0xff] }
  0x48   : > { %342 = vst [vmem:[%s1189_s23 + $0x360] sm:$0xff] %v341_v44  ;;  %344 = vst [vmem:[%s1189_s23 + $0x368] sm:$0xff] %v343_v45  ;;  %v347_v47 = vld [vmem:[%s1184_s22 + $0x1078] sm:$0xff]  ;;  %v349_v48 = vld [vmem:[%s1184_s22 + $0x1180] sm:$0xff] }
  0x49   : > { %346 = vst [vmem:[%s1189_s23 + $0x370] sm:$0xff] %v345_v46  ;;  %v351_v49 = vld [vmem:[%s1184_s22 + $0x1188] sm:$0xff]  ;;  %348 = vst [vmem:[%s1189_s23 + $0x378] sm:$0xff] %v347_v47  ;;  %v353_v50 = vld [vmem:[%s1184_s22 + $0x1190] sm:$0xff] }
  0x4a   : > { %350 = vst [vmem:[%s1189_s23 + $0x380] sm:$0xff] %v349_v48  ;;  %352 = vst [vmem:[%s1189_s23 + $0x388] sm:$0xff] %v351_v49  ;;  %v355_v51 = vld [vmem:[%s1184_s22 + $0x1198] sm:$0xff]  ;;  %v357_v52 = vld [vmem:[%s1184_s22 + $0x11a0] sm:$0xff] }
  0x4b   : > { %354 = vst [vmem:[%s1189_s23 + $0x390] sm:$0xff] %v353_v50  ;;  %356 = vst [vmem:[%s1189_s23 + $0x398] sm:$0xff] %v355_v51  ;;  %v359_v53 = vld [vmem:[%s1184_s22 + $0x11a8] sm:$0xff]  ;;  %v361_v54 = vld [vmem:[%s1184_s22 + $0x11b0] sm:$0xff] }
  0x4c   : > { %358 = vst [vmem:[%s1189_s23 + $0x3a0] sm:$0xff] %v357_v52  ;;  %v363_v55 = vld [vmem:[%s1184_s22 + $0x11b8] sm:$0xff]  ;;  %360 = vst [vmem:[%s1189_s23 + $0x3a8] sm:$0xff] %v359_v53  ;;  %v365_v56 = vld [vmem:[%s1184_s22 + $0x12c0] sm:$0xff] }
  0x4d   : > { %362 = vst [vmem:[%s1189_s23 + $0x3b0] sm:$0xff] %v361_v54  ;;  %364 = vst [vmem:[%s1189_s23 + $0x3b8] sm:$0xff] %v363_v55  ;;  %v367_v57 = vld [vmem:[%s1184_s22 + $0x12c8] sm:$0xff]  ;;  %v369_v58 = vld [vmem:[%s1184_s22 + $0x12d0] sm:$0xff] }
  0x4e   : > { %366 = vst [vmem:[%s1189_s23 + $0x3c0] sm:$0xff] %v365_v56  ;;  %368 = vst [vmem:[%s1189_s23 + $0x3c8] sm:$0xff] %v367_v57  ;;  %v371_v59 = vld [vmem:[%s1184_s22 + $0x12d8] sm:$0xff]  ;;  %v373_v60 = vld [vmem:[%s1184_s22 + $0x12e0] sm:$0xff] }
  0x4f   : > { %370 = vst [vmem:[%s1189_s23 + $0x3d0] sm:$0xff] %v369_v58  ;;  %v375_v61 = vld [vmem:[%s1184_s22 + $0x12e8] sm:$0xff]  ;;  %372 = vst [vmem:[%s1189_s23 + $0x3d8] sm:$0xff] %v371_v59  ;;  %v377_v62 = vld [vmem:[%s1184_s22 + $0x12f0] sm:$0xff] }
  0x50   : > { %374 = vst [vmem:[%s1189_s23 + $0x3e0] sm:$0xff] %v373_v60  ;;  %376 = vst [vmem:[%s1189_s23 + $0x3e8] sm:$0xff] %v375_v61  ;;  %v379_v63 = vld [vmem:[%s1184_s22 + $0x12f8] sm:$0xff] }
  0x51   : > { %378 = vst [vmem:[%s1189_s23 + $0x3f0] sm:$0xff] %v377_v62  ;;  %380 = vst [vmem:[%s1189_s23 + $0x3f8] sm:$0xff] %v379_v63 }
  0x52 PF: > { %p948_p5 = scmp.ge.s32.totalorder %s1131_s11, 1  ;;  %p385_p6 = scmp.lt.s32.totalorder %s1131_s11, 6 }
  0x54   : > { %p386_p7 = pnand %p948_p5, %p385_p6 }
  0x55   : > { %s392_s24 = sand.u32 (!%p386_p7), 1, %s1123_s9   ;;  %v1133_v0 = vmov (!%p386_p7), 0.0   ;;  %s950_s29 = sshll.u32 (!%p386_p7), %s941_s12, 3 }
  0x56   : > { %389 = sbr.rel (%p386_p7) target bundleno = 377 (0x179), region = 47  ;;  %s949_s25 = sshll.u32 (!%p386_p7), %s392_s24, 10  ;;  %613 = vmatprep.mubr.f32.mxu0 (!%p386_p7), %v1133_v0  ;;  %684 = vmatprep.mubr.f32.mxu1 (!%p386_p7), %v1133_v0 }
  0x57   : > { %s1449_s26 = scalar_lea.vmem (!%p386_p7), [#allocation2], %s949_s25  ;;  %p415_p8 = scmp.lt.s32.totalorder (!%p386_p7), %s950_s29, 39 }
  0x58   : > { %v422_v1 = vld [vmem:[%s1449_s26 + $0x8] sm:$0xff] (!%p386_p7)  ;;  %v424_v3 = vld [vmem:[%s1449_s26 + $0x18] sm:$0xff] (!%p386_p7)  ;;  %v421_v6 = vld [vmem:[%s1449_s26] sm:$0xff] (!%p386_p7) }
  0x59   : > { %v430_v2 = vld [vmem:[%s1449_s26 + $0x48] sm:$0xff] (!%p386_p7)  ;;  %v432_v5 = vld [vmem:[%s1449_s26 + $0x58] sm:$0xff] (!%p386_p7)  ;;  %v429_v7 = vld [vmem:[%s1449_s26 + $0x40] sm:$0xff] (!%p386_p7) }
  0x5a   : > { %v955_v4 = vpack.c.bf16 (!%p386_p7), %v430_v2, %v422_v1  ;;  %v987_v8 = vpack.c.bf16 (!%p386_p7), %v432_v5, %v424_v3  ;;  %v957_v9 = vpack.c.bf16 (!%p386_p7), %v429_v7, %v421_v6  ;;  %v423_v10 = vld [vmem:[%s1449_s26 + $0x10] sm:$0xff] (!%p386_p7)  ;;  %v438_v12 = vld [vmem:[%s1449_s26 + $0x88] sm:$0xff] (!%p386_p7)  ;;  %v440_v15 = vld [vmem:[%s1449_s26 + $0x98] sm:$0xff] (!%p386_p7) }
  0x5b   : > { %v431_v11 = vld [vmem:[%s1449_s26 + $0x50] sm:$0xff] (!%p386_p7)  ;;  %v446_v14 = vld [vmem:[%s1449_s26 + $0xc8] sm:$0xff] (!%p386_p7)  ;;  %v448_v16 = vld [vmem:[%s1449_s26 + $0xd8] sm:$0xff] (!%p386_p7) }
  0x5c   : > { %956 = vmatprep.subr.bf16.mxu0 (!%p386_p7), %v955_v4  ;;  %v989_v13 = vpack.c.bf16 (!%p386_p7), %v431_v11, %v423_v10  ;;  %988 = vmatprep.subr.bf16.mxu1 (!%p386_p7), %v987_v8  ;;  %v959_v17 = vpack.c.bf16 (!%p386_p7), %v446_v14, %v438_v12  ;;  %v991_v18 = vpack.c.bf16 (!%p386_p7), %v448_v16, %v440_v15  ;;  %v437_v19 = vld [vmem:[%s1449_s26 + $0x80] sm:$0xff] (!%p386_p7)  ;;  %v439_v21 = vld [vmem:[%s1449_s26 + $0x90] sm:$0xff] (!%p386_p7)  ;;  %v454_v24 = vld [vmem:[%s1449_s26 + $0x108] sm:$0xff] (!%p386_p7) }
  0x5d   : > { %958 = vmatpush1.bf16.msra.mxu0 %v957_v9  ;;  %v445_v20 = vld [vmem:[%s1449_s26 + $0xc0] sm:$0xff]  ;;  %v447_v23 = vld [vmem:[%s1449_s26 + $0xd0] sm:$0xff]  ;;  %v462_v25 = vld [vmem:[%s1449_s26 + $0x148] sm:$0xff]  ;;  %s1612_s29 = smov (!%p415_p8, %s950_s29), 39 }
  0x5e   : > { %990 = vmatpush1.bf16.msra.mxu1 %v989_v13  ;;  %v961_v22 = vpack.c.bf16 %v445_v20, %v437_v19  ;;  %960 = vmatprep.subr.bf16.mxu0 %v959_v17  ;;  %v993_v26 = vpack.c.bf16 %v447_v23, %v439_v21  ;;  %v963_v27 = vpack.c.bf16 %v462_v25, %v454_v24  ;;  %v456_v28 = vld [vmem:[%s1449_s26 + $0x118] sm:$0xff]  ;;  %v453_v30 = vld [vmem:[%s1449_s26 + $0x100] sm:$0xff]  ;;  %v455_v33 = vld [vmem:[%s1449_s26 + $0x110] sm:$0xff]  ;;  %s951_s30 = sshll.u32 %s1612_s29, 1 }
  0x5f   : > { %992 = vmatprep.subr.bf16.mxu1 %v991_v18  ;;  %v464_v29 = vld [vmem:[%s1449_s26 + $0x158] sm:$0xff]  ;;  %v461_v32 = vld [vmem:[%s1449_s26 + $0x140] sm:$0xff]  ;;  %v463_v34 = vld [vmem:[%s1449_s26 + $0x150] sm:$0xff]  ;;  %s418_s5 = scalar_lea.vmem %s1607_s2, %s951_s30 }
  0x60   : > { %v995_v31 = vpack.c.bf16 %v464_v29, %v456_v28  ;;  %v965_v35 = vpack.c.bf16 %v461_v32, %v453_v30  ;;  %v470_v36 = vld [vmem:[%s1449_s26 + $0x188] sm:$0xff]  ;;  %v472_v38 = vld [vmem:[%s1449_s26 + $0x198] sm:$0xff]  ;;  %v997_v39 = vpack.c.bf16 %v463_v34, %v455_v33  ;;  %v469_v42 = vld [vmem:[%s1449_s26 + $0x180] sm:$0xff] }
  0x61   : > { %962 = vmatpush1.bf16.msra.mxu0 %v961_v22  ;;  %v478_v37 = vld [vmem:[%s1449_s26 + $0x1c8] sm:$0xff]  ;;  %v480_v41 = vld [vmem:[%s1449_s26 + $0x1d8] sm:$0xff]  ;;  %v477_v43 = vld [vmem:[%s1449_s26 + $0x1c0] sm:$0xff] }
  0x62   : > { %994 = vmatpush1.bf16.msra.mxu1 %v993_v26  ;;  %964 = vmatprep.subr.bf16.mxu0 %v963_v27  ;;  %v967_v40 = vpack.c.bf16 %v478_v37, %v470_v36  ;;  %v999_v44 = vpack.c.bf16 %v480_v41, %v472_v38  ;;  %v471_v45 = vld [vmem:[%s1449_s26 + $0x190] sm:$0xff]  ;;  %v486_v47 = vld [vmem:[%s1449_s26 + $0x208] sm:$0xff]  ;;  %v488_v49 = vld [vmem:[%s1449_s26 + $0x218] sm:$0xff]  ;;  %v969_v51 = vpack.c.bf16 %v477_v43, %v469_v42 }
  0x63   : > { %996 = vmatprep.subr.bf16.mxu1 %v995_v31  ;;  %v479_v46 = vld [vmem:[%s1449_s26 + $0x1d0] sm:$0xff]  ;;  %v494_v48 = vld [vmem:[%s1449_s26 + $0x248] sm:$0xff]  ;;  %v496_v50 = vld [vmem:[%s1449_s26 + $0x258] sm:$0xff] }
  0x64   : > { %v1001_v52 = vpack.c.bf16 %v479_v46, %v471_v45  ;;  %v971_v53 = vpack.c.bf16 %v494_v48, %v486_v47  ;;  %v485_v54 = vld [vmem:[%s1449_s26 + $0x200] sm:$0xff]  ;;  %v487_v56 = vld [vmem:[%s1449_s26 + $0x210] sm:$0xff]  ;;  %v1003_v57 = vpack.c.bf16 %v496_v50, %v488_v49  ;;  %v502_v59 = vld [vmem:[%s1449_s26 + $0x288] sm:$0xff] }
  0x65   : > { %966 = vmatpush1.bf16.msra.mxu0 %v965_v35  ;;  %v493_v55 = vld [vmem:[%s1449_s26 + $0x240] sm:$0xff]  ;;  %v495_v58 = vld [vmem:[%s1449_s26 + $0x250] sm:$0xff]  ;;  %v510_v60 = vld [vmem:[%s1449_s26 + $0x2c8] sm:$0xff] }
  0x66   : > { %998 = vmatpush1.bf16.msra.mxu1 %v997_v39  ;;  %968 = vmatprep.subr.bf16.mxu0 %v967_v40  ;;  %v504_v61 = vld [vmem:[%s1449_s26 + $0x298] sm:$0xff]  ;;  %v973_v63 = vpack.c.bf16 %v493_v55, %v485_v54  ;;  %v1005_v1 = vpack.c.bf16 %v495_v58, %v487_v56  ;;  %v975_v2 = vpack.c.bf16 %v510_v60, %v502_v59  ;;  %v501_v3 = vld [vmem:[%s1449_s26 + $0x280] sm:$0xff]  ;;  %v503_v5 = vld [vmem:[%s1449_s26 + $0x290] sm:$0xff] }
  0x67   : > { %1000 = vmatprep.subr.bf16.mxu1 %v999_v44  ;;  %v512_v62 = vld [vmem:[%s1449_s26 + $0x2d8] sm:$0xff]  ;;  %v509_v4 = vld [vmem:[%s1449_s26 + $0x2c0] sm:$0xff]  ;;  %v511_v7 = vld [vmem:[%s1449_s26 + $0x2d0] sm:$0xff] }
  0x68   : > { %v1007_v6 = vpack.c.bf16 %v512_v62, %v504_v61  ;;  %v518_v8 = vld [vmem:[%s1449_s26 + $0x308] sm:$0xff]  ;;  %v520_v10 = vld [vmem:[%s1449_s26 + $0x318] sm:$0xff]  ;;  %v977_v12 = vpack.c.bf16 %v509_v4, %v501_v3  ;;  %v1009_v13 = vpack.c.bf16 %v511_v7, %v503_v5  ;;  %v517_v15 = vld [vmem:[%s1449_s26 + $0x300] sm:$0xff] }
  0x69   : > { %970 = vmatpush1.bf16.msra.mxu0 %v969_v51  ;;  %v526_v9 = vld [vmem:[%s1449_s26 + $0x348] sm:$0xff]  ;;  %v528_v11 = vld [vmem:[%s1449_s26 + $0x358] sm:$0xff]  ;;  %v525_v16 = vld [vmem:[%s1449_s26 + $0x340] sm:$0xff] }
  0x6a   : > { %1002 = vmatpush1.bf16.msra.mxu1 %v1001_v52  ;;  %972 = vmatprep.subr.bf16.mxu0 %v971_v53  ;;  %v979_v14 = vpack.c.bf16 %v526_v9, %v518_v8  ;;  %v519_v17 = vld [vmem:[%s1449_s26 + $0x310] sm:$0xff]  ;;  %v1011_v18 = vpack.c.bf16 %v528_v11, %v520_v10  ;;  %v534_v20 = vld [vmem:[%s1449_s26 + $0x388] sm:$0xff]  ;;  %v536_v22 = vld [vmem:[%s1449_s26 + $0x398] sm:$0xff]  ;;  %v981_v24 = vpack.c.bf16 %v525_v16, %v517_v15 }
  0x6b   : > { %1004 = vmatprep.subr.bf16.mxu1 %v1003_v57  ;;  %v527_v19 = vld [vmem:[%s1449_s26 + $0x350] sm:$0xff]  ;;  %v542_v21 = vld [vmem:[%s1449_s26 + $0x3c8] sm:$0xff]  ;;  %v544_v23 = vld [vmem:[%s1449_s26 + $0x3d8] sm:$0xff] }
  0x6c   : > { %v1013_v25 = vpack.c.bf16 %v527_v19, %v519_v17  ;;  %v983_v26 = vpack.c.bf16 %v542_v21, %v534_v20  ;;  %v533_v27 = vld [vmem:[%s1449_s26 + $0x380] sm:$0xff]  ;;  %v535_v29 = vld [vmem:[%s1449_s26 + $0x390] sm:$0xff]  ;;  %v1015_v30 = vpack.c.bf16 %v544_v23, %v536_v22  ;;  %v426_v32 = vld [vmem:[%s1449_s26 + $0x28] sm:$0xff] }
  0x6d   : > { %974 = vmatpush1.bf16.msra.mxu0 %v973_v63  ;;  %v541_v28 = vld [vmem:[%s1449_s26 + $0x3c0] sm:$0xff]  ;;  %v543_v31 = vld [vmem:[%s1449_s26 + $0x3d0] sm:$0xff]  ;;  %v434_v33 = vld [vmem:[%s1449_s26 + $0x68] sm:$0xff] }
  0x6e   : > { %1006 = vmatpush1.bf16.msra.mxu1 %v1005_v1  ;;  %976 = vmatprep.subr.bf16.mxu0 %v975_v2  ;;  %v428_v34 = vld [vmem:[%s1449_s26 + $0x38] sm:$0xff]  ;;  %v985_v36 = vpack.c.bf16 %v541_v28, %v533_v27  ;;  %v1017_v37 = vpack.c.bf16 %v543_v31, %v535_v29  ;;  %v1019_v38 = vpack.c.bf16 %v434_v33, %v426_v32  ;;  %v425_v39 = vld [vmem:[%s1449_s26 + $0x20] sm:$0xff]  ;;  %v427_v41 = vld [vmem:[%s1449_s26 + $0x30] sm:$0xff] }
  0x6f   : > { %1008 = vmatprep.subr.bf16.mxu1 %v1007_v6  ;;  %v436_v35 = vld [vmem:[%s1449_s26 + $0x78] sm:$0xff]  ;;  %v433_v40 = vld [vmem:[%s1449_s26 + $0x60] sm:$0xff]  ;;  %v435_v43 = vld [vmem:[%s1449_s26 + $0x70] sm:$0xff] }
  0x70   : > { %v1051_v42 = vpack.c.bf16 %v436_v35, %v428_v34  ;;  %v442_v44 = vld [vmem:[%s1449_s26 + $0xa8] sm:$0xff]  ;;  %v444_v46 = vld [vmem:[%s1449_s26 + $0xb8] sm:$0xff]  ;;  %v1530_v48 = vld [vmem:[%s1605_s0] sm:$0x3]  ;;  %v1021_v49 = vpack.c.bf16 %v433_v40, %v425_v39  ;;  %v1053_v50 = vpack.c.bf16 %v435_v43, %v427_v41 }
  0x71   : > { %978 = vmatpush1.bf16.msra.mxu0 %v977_v12  ;;  %v450_v45 = vld [vmem:[%s1449_s26 + $0xe8] sm:$0xff]  ;;  %v452_v47 = vld [vmem:[%s1449_s26 + $0xf8] sm:$0xff]  ;;  %v441_v52 = vld [vmem:[%s1449_s26 + $0xa0] sm:$0xff] }
  0x72   : > { %1010 = vmatpush1.bf16.msra.mxu1 %v1009_v13  ;;  %980 = vmatprep.subr.bf16.mxu0 %v979_v14  ;;  %v1023_v51 = vpack.c.bf16 %v450_v45, %v442_v44  ;;  %v449_v53 = vld [vmem:[%s1449_s26 + $0xe0] sm:$0xff]  ;;  %v443_v54 = vld [vmem:[%s1449_s26 + $0xb0] sm:$0xff]  ;;  %v1055_v55 = vpack.c.bf16 %v452_v47, %v444_v46  ;;  %v458_v57 = vld [vmem:[%s1449_s26 + $0x128] sm:$0xff] }
  0x73   : > { %1012 = vmatprep.subr.bf16.mxu1 %v1011_v18  ;;  %v451_v56 = vld [vmem:[%s1449_s26 + $0xf0] sm:$0xff]  ;;  %v466_v58 = vld [vmem:[%s1449_s26 + $0x168] sm:$0xff]  ;;  %v460_v59 = vld [vmem:[%s1449_s26 + $0x138] sm:$0xff]  ;;  %v1025_v61 = vpack.c.bf16 %v449_v53, %v441_v52 }
  0x74   : > { %v468_v60 = vld [vmem:[%s1449_s26 + $0x178] sm:$0xff]  ;;  %v1057_v62 = vpack.c.bf16 %v451_v56, %v443_v54  ;;  %v1027_v63 = vpack.c.bf16 %v466_v58, %v458_v57  ;;  %v457_v1 = vld [vmem:[%s1449_s26 + $0x120] sm:$0xff]  ;;  %v459_v3 = vld [vmem:[%s1449_s26 + $0x130] sm:$0xff] }
  0x75   : > { %982 = vmatpush1.bf16.msra.mxu0 %v981_v24  ;;  %v465_v2 = vld [vmem:[%s1449_s26 + $0x160] sm:$0xff]  ;;  %v1059_v4 = vpack.c.bf16 %v468_v60, %v460_v59  ;;  %v467_v5 = vld [vmem:[%s1449_s26 + $0x170] sm:$0xff]  ;;  %v474_v6 = vld [vmem:[%s1449_s26 + $0x1a8] sm:$0xff] }
  0x76   : > { %1014 = vmatpush1.bf16.msra.mxu1 %v1013_v25  ;;  %984 = vmatprep.subr.bf16.mxu0 %v983_v26  ;;  %v482_v7 = vld [vmem:[%s1449_s26 + $0x1e8] sm:$0xff]  ;;  %v476_v8 = vld [vmem:[%s1449_s26 + $0x1b8] sm:$0xff]  ;;  %v1029_v10 = vpack.c.bf16 %v465_v2, %v457_v1  ;;  %v1061_v11 = vpack.c.bf16 %v467_v5, %v459_v3  ;;  %v473_v13 = vld [vmem:[%s1449_s26 + $0x1a0] sm:$0xff]  ;;  %v1134_v5 = vmov 1983009808  }
  0x77   : > { %1016 = vmatprep.subr.bf16.mxu1 %v1015_v30  ;;  %v484_v9 = vld [vmem:[%s1449_s26 + $0x1f8] sm:$0xff]  ;;  %v1031_v12 = vpack.c.bf16 %v482_v7, %v474_v6  ;;  %v481_v14 = vld [vmem:[%s1449_s26 + $0x1e0] sm:$0xff]  ;;  %v475_v15 = vld [vmem:[%s1449_s26 + $0x1b0] sm:$0xff]  ;;  %v844_v6 = vunpack.c.l.s4 %v1134_v5  ;;  %v846_v7 = vlaneseq }
  0x78   : > { %v1063_v16 = vpack.c.bf16 %v484_v9, %v476_v8  ;;  %v483_v17 = vld [vmem:[%s1449_s26 + $0x1f0] sm:$0xff]  ;;  %v490_v18 = vld [vmem:[%s1449_s26 + $0x228] sm:$0xff]  ;;  %v492_v19 = vld [vmem:[%s1449_s26 + $0x238] sm:$0xff]  ;;  %v1033_v21 = vpack.c.bf16 %v481_v14, %v473_v13 }
  0x79   : > { %986 = vmatpush1.bf16.msra.mxu0 %v985_v36  ;;  %v500_v20 = vld [vmem:[%s1449_s26 + $0x278] sm:$0xff]  ;;  %v1065_v22 = vpack.c.bf16 %v483_v17, %v475_v15  ;;  %v489_v24 = vld [vmem:[%s1449_s26 + $0x220] sm:$0xff]  ;;  %v491_v26 = vld [vmem:[%s1449_s26 + $0x230] sm:$0xff]  ;;  %v845_v8 = vunpack.c.0.s8 %v844_v6  ;;  %v847_v9 = vshrl.u32 %v846_v7, 7 }
  0x7a   : > { %1018 = vmatpush1.bf16.msra.mxu1 %v1017_v37  ;;  %1020 = vmatprep.subr.bf16.mxu0 %v1019_v38  ;;  %v497_v25 = vld [vmem:[%s1449_s26 + $0x260] sm:$0xff]  ;;  %v1067_v27 = vpack.c.bf16 %v500_v20, %v492_v19  ;;  %v499_v28 = vld [vmem:[%s1449_s26 + $0x270] sm:$0xff]  ;;  %v506_v29 = vld [vmem:[%s1449_s26 + $0x2a8] sm:$0xff] }
  0x7b   : > { %1052 = vmatprep.subr.bf16.mxu1 %v1051_v42  ;;  %v514_v30 = vld [vmem:[%s1449_s26 + $0x2e8] sm:$0xff]  ;;  %v508_v31 = vld [vmem:[%s1449_s26 + $0x2b8] sm:$0xff]  ;;  %v1037_v33 = vpack.c.bf16 %v497_v25, %v489_v24  ;;  %v1069_v34 = vpack.c.bf16 %v499_v28, %v491_v26  ;;  %v505_v36 = vld [vmem:[%s1449_s26 + $0x2a0] sm:$0xff] }
  0x7c   : > { %614 = vmatmul.mubr.f32.vlgmr.msra.gmra.mrb[0].mxu0 %v1530_v48  ;;  %v516_v32 = vld [vmem:[%s1449_s26 + $0x2f8] sm:$0xff]  ;;  %v1039_v35 = vpack.c.bf16 %v514_v30, %v506_v29  ;;  %v513_v37 = vld [vmem:[%s1449_s26 + $0x2e0] sm:$0xff]  ;;  %v507_v38 = vld [vmem:[%s1449_s26 + $0x2b0] sm:$0xff] }
  0x7d   : > { %685 = vmatmul.mubr.f32.vlgmr.msra.gmra.mrb[0].mxu1 %v1530_v48  ;;  %1022 = vmatpush1.bf16.msra.mxu0 %v1021_v49  ;;  %v1071_v39 = vpack.c.bf16 %v516_v32, %v508_v31  ;;  %v515_v40 = vld [vmem:[%s1449_s26 + $0x2f0] sm:$0xff]  ;;  %v522_v41 = vld [vmem:[%s1449_s26 + $0x328] sm:$0xff]  ;;  %v524_v43 = vld [vmem:[%s1449_s26 + $0x338] sm:$0xff]  ;;  %v1041_v45 = vpack.c.bf16 %v513_v37, %v505_v36 }
  0x7e   : > { %1054 = vmatpush1.bf16.msra.mxu1 %v1053_v50  ;;  %1024 = vmatprep.subr.bf16.mxu0 %v1023_v51  ;;  %v530_v42 = vld [vmem:[%s1449_s26 + $0x368] sm:$0xff]  ;;  %v532_v44 = vld [vmem:[%s1449_s26 + $0x378] sm:$0xff]  ;;  %v1073_v46 = vpack.c.bf16 %v515_v40, %v507_v38  ;;  %v521_v49 = vld [vmem:[%s1449_s26 + $0x320] sm:$0xff] }
  0x7f   : > { %1056 = vmatprep.subr.bf16.mxu1 %v1055_v55  ;;  %755 = vmatprep.mubr.f32.mxu0 %v1133_v0  ;;  %v1043_v47 = vpack.c.bf16 %v530_v42, %v522_v41  ;;  %v529_v50 = vld [vmem:[%s1449_s26 + $0x360] sm:$0xff]  ;;  %v523_v51 = vld [vmem:[%s1449_s26 + $0x330] sm:$0xff]  ;;  %v1075_v52 = vpack.c.bf16 %v532_v44, %v524_v43  ;;  %v538_v54 = vld [vmem:[%s1449_s26 + $0x3a8] sm:$0xff] }
  0x80   : > { %826 = vmatprep.mubr.f32.mxu1 %v1133_v0  ;;  %v498_v0 = vld [vmem:[%s1449_s26 + $0x268] sm:$0xff]  ;;  %v531_v53 = vld [vmem:[%s1449_s26 + $0x370] sm:$0xff]  ;;  %v540_v56 = vld [vmem:[%s1449_s26 + $0x3b8] sm:$0xff]  ;;  %v1045_v58 = vpack.c.bf16 %v529_v50, %v521_v49 }
  0x81   : > { %1026 = vmatpush1.bf16.msra.mxu0 %v1025_v61  ;;  %v1035_v23 = vpack.c.bf16 %v498_v0, %v490_v18  ;;  %v546_v55 = vld [vmem:[%s1449_s26 + $0x3e8] sm:$0xff]  ;;  %v548_v57 = vld [vmem:[%s1449_s26 + $0x3f8] sm:$0xff]  ;;  %v1077_v59 = vpack.c.bf16 %v531_v53, %v523_v51  ;;  %v537_v61 = vld [vmem:[%s1449_s26 + $0x3a0] sm:$0xff] }
  0x82   : > { %1058 = vmatpush1.bf16.msra.mxu1 %v1057_v62  ;;  %1028 = vmatprep.subr.bf16.mxu0 %v1027_v63  ;;  %v1047_v60 = vpack.c.bf16 %v546_v55, %v538_v54  ;;  %v545_v62 = vld [vmem:[%s1449_s26 + $0x3e0] sm:$0xff]  ;;  %v1079_v63 = vpack.c.bf16 %v548_v57, %v540_v56  ;;  %v539_v1 = vld [vmem:[%s1449_s26 + $0x3b0] sm:$0xff] }
  0x83   : > { %1060 = vmatprep.subr.bf16.mxu1 %v1059_v4  ;;  %v547_v2 = vld [vmem:[%s1449_s26 + $0x3f0] sm:$0xff]  ;;  %v1049_v3 = vpack.c.bf16 %v545_v62, %v537_v61 }
  0x84   : > { %v1081_v4 = vpack.c.bf16 %v547_v2, %v539_v1 }
  0x85   : > { %1030 = vmatpush1.bf16.msra.mxu0 %v1029_v10 }
  0x86   : > { %1062 = vmatpush1.bf16.msra.mxu1 %v1061_v11  ;;  %1032 = vmatprep.subr.bf16.mxu0 %v1031_v12  ;;  %v848_v11 = vsub.s32 %v845_v8, %v847_v9 }
  0x87   : > { %1064 = vmatprep.subr.bf16.mxu1 %v1063_v16 }
  0x89   : > { %1034 = vmatpush1.bf16.msra.mxu0 %v1033_v21 }
  0x8a   : > { %1066 = vmatpush1.bf16.msra.mxu1 %v1065_v22  ;;  %1036 = vmatprep.subr.bf16.mxu0 %v1035_v23 }
  0x8b   : > { %1068 = vmatprep.subr.bf16.mxu1 %v1067_v27 }
  0x8d   : > { %1038 = vmatpush1.bf16.msra.mxu0 %v1037_v33 }
  0x8e   : > { %1070 = vmatpush1.bf16.msra.mxu1 %v1069_v34  ;;  %1040 = vmatprep.subr.bf16.mxu0 %v1039_v35 }
  0x8f   : > { %1072 = vmatprep.subr.bf16.mxu1 %v1071_v39 }
  0x91   : > { %1042 = vmatpush1.bf16.msra.mxu0 %v1041_v45 }
  0x92   : > { %1074 = vmatpush1.bf16.msra.mxu1 %v1073_v46  ;;  %1044 = vmatprep.subr.bf16.mxu0 %v1043_v47 }
  0x93   : > { %1076 = vmatprep.subr.bf16.mxu1 %v1075_v52 }
  0x95   : > { %1046 = vmatpush1.bf16.msra.mxu0 %v1045_v58 }
  0x96   : > { %1078 = vmatpush1.bf16.msra.mxu1 %v1077_v59  ;;  %1048 = vmatprep.subr.bf16.mxu0 %v1047_v60 }
  0x97   : > { %1080 = vmatprep.subr.bf16.mxu1 %v1079_v63 }
  0x99   : > { %1050 = vmatpush1.bf16.msra.mxu0 %v1049_v3 }
  0x9a   : > { %1082 = vmatpush1.bf16.msra.mxu1 %v1081_v4 }
  0x9c   : > { %756 = vmatmul.mubr.f32.vlgmr.msra.gmra.mrb[2].mxu0 %v1530_v48 }
  0x9d   : > { %827 = vmatmul.mubr.f32.vlgmr.msra.gmra.mrb[2].mxu1 %v1530_v48 }
 0x14f   : > { %v615_v10 = vpop.f32.mrb[0].mxu0 }
 0x150   : > { %v686_v12 = vpop.f32.mrb[0].mxu1  ;;  %v617_v13 = vpop.f32.mrb[1].mxu0 }
 0x151   : > { %v841_v14 = vcombine.low %v615_v10, %v617_v13  ;;  %v688_v15 = vpop.f32.mrb[1].mxu1 }
 0x152   : > { %v842_v16 = vcombine.low %v686_v12, %v688_v15 }
 0x153   : > { %v849_v17 = vrot.slane %v841_v14, %v848_v11 }
 0x154   : > { %v856_v18 = vrot.slane %v842_v16, %v848_v11 }
 0x156   : > { %v857_v48 = vcombine.low %v849_v17, %v856_v18 }
 0x158   : > { %877 = vst [vmem:[%s418_s5] sm:$0xff] %v857_v48 }
 0x16f   : > { %v757_v0 = vpop.f32.mrb[2].mxu0 }
 0x170   : > { %v828_v19 = vpop.f32.mrb[2].mxu1  ;;  %v759_v20 = vpop.f32.mrb[3].mxu0 }
 0x171   : > { %v858_v21 = vcombine.low %v757_v0, %v759_v20  ;;  %v830_v22 = vpop.f32.mrb[3].mxu1 }
 0x172   : > { %v859_v23 = vcombine.low %v828_v19, %v830_v22 }
 0x173   : > { %v866_v24 = vrot.slane %v858_v21, %v848_v11 }
 0x174   : > { %v873_v25 = vrot.slane %v859_v23, %v848_v11 }
 0x176   : > { %v874_v26 = vcombine.low %v866_v24, %v873_v25 }
 0x178   : > { %878 = vst [vmem:[%s418_s5 + $0x8] sm:$0xff] %v874_v26 }
 0x179 PF: > { %p9_p9 = scmp.ge.s32.totalorder %s1167_s13, 7   ;;  %s1608_s9 = smov %s1127_s10 }
 0x17a   : > { %s1609_s10 = smov %s1176_s16  ;;  %s1610_s11 = smov %s1167_s13 }
 0x17b   :  { %11 = sbr.rel (!%p9_p9) target bundleno = 2 (0x2), region = 86 }

</bundles_post_ra>
